<compile_context>
chip_gen: v6e
topology: v6e:2x2x1
jax: 0.10.0
libtpu: 0.0.40
codegen_flags: <defaults>
</compile_context>

<pallas_src>
import jax
import jax.numpy as jnp
from jax import lax
from jax.experimental import pallas as pl
from jax.experimental.pallas import tpu as pltpu

# ----- model hyper-params (match the PyTorch globals) -------------------------
N_EMBD = 384
N_HEAD = 6
HEAD_SIZE = N_EMBD // N_HEAD        # 64
BLOCK_SIZE = 256                    # max context (we use T <= BLOCK_SIZE)
LN_EPS = 1e-5
NEG_BIG = -1e30                     # finite mask value (NaN-safe vs. -inf)


def _layernorm_f32(h, gamma, beta):
    mu = jnp.mean(h, axis=-1, keepdims=True)
    cen = h - mu
    var = jnp.mean(cen * cen, axis=-1, keepdims=True)
    return cen * lax.rsqrt(var + LN_EPS) * gamma + beta


def _block_kernel(x_ref,
                  wqkv_ref, wproj_ref, bproj_ref,
                  g1_ref, b1_ref, g2_ref, b2_ref,
                  w1_ref, bb1_ref, w2_ref, bb2_ref,
                  o_ref):
    Bt, T, C = x_ref.shape
    M = Bt * T

    # Flatten the batch tile into one (Bt*T, C) slab for the dense matmuls.
    x = x_ref[...].astype(jnp.float32).reshape(M, C)

    # ---- x = x + sa(ln1(x)) ---------------------------------------------------
    ln1 = _layernorm_f32(x, g1_ref[...], b1_ref[...])            # f32 on VPU
    qkv = jnp.dot(ln1.astype(jnp.bfloat16), wqkv_ref[...],
                  preferred_element_type=jnp.float32)            # (M, 3C) f32

    row = lax.broadcasted_iota(jnp.int32, (T, T), 0)
    col = lax.broadcasted_iota(jnp.int32, (T, T), 1)
    causal = row >= col

    scale = HEAD_SIZE ** (-0.5)
    dn = (((1,), (1,)), ((), ()))        # contract last dims, no batch dims

    sa_rows = []
    for b in range(Bt):                  # attention is per-sequence
        r0 = b * T
        sa_b = jnp.zeros((T, C), jnp.float32)
        for h in range(N_HEAD):
            lo = h * HEAD_SIZE
            # scale folded into q: (T, 64) multiply instead of (T, T)
            qh = (qkv[r0:r0 + T, lo:lo + HEAD_SIZE] * scale).astype(jnp.bfloat16)
            kh = qkv[r0:r0 + T, C + lo:C + lo + HEAD_SIZE].astype(jnp.bfloat16)
            vh = qkv[r0:r0 + T, 2 * C + lo:2 * C + lo + HEAD_SIZE].astype(jnp.bfloat16)

            # scores without materializing a transpose of k
            s = lax.dot_general(qh, kh, dn, preferred_element_type=jnp.float32)
            s = jnp.where(causal, s, NEG_BIG)
            s = s - jnp.max(s, axis=-1, keepdims=True)
            p = jnp.exp(s)                                        # f32 EUP
            p = p * pl.reciprocal(jnp.sum(p, axis=-1, keepdims=True), approx=True)

            oh = jnp.dot(p.astype(jnp.bfloat16), vh,
                         preferred_element_type=jnp.float32)      # (T, 64)
            # accumulate the output projection per head -> no head concat
            sa_b = sa_b + jnp.dot(oh.astype(jnp.bfloat16),
                                  wproj_ref[lo:lo + HEAD_SIZE, :],
                                  preferred_element_type=jnp.float32)
        sa_rows.append(sa_b)
    sa = sa_rows[0] if Bt == 1 else jnp.concatenate(sa_rows, axis=0)  # row concat only

    x2 = x + sa + bproj_ref[...]                                  # residual 1

    # ---- x = x + ffwd(ln2(x)) -------------------------------------------------
    ln2 = _layernorm_f32(x2, g2_ref[...], b2_ref[...])
    h1 = jnp.dot(ln2.astype(jnp.bfloat16), w1_ref[...],
                 preferred_element_type=jnp.float32) + bb1_ref[...]
    h1 = jnp.maximum(h1, 0.0)                                     # ReLU
    ff = jnp.dot(h1.astype(jnp.bfloat16), w2_ref[...],
                 preferred_element_type=jnp.float32) + bb2_ref[...]

    out = x2 + ff                                                 # residual 2
    o_ref[...] = out.reshape(Bt, T, C).astype(o_ref.dtype)


def _pick_batch_tile(B, T):
    """Pack several sequences per grid step so matmul M isn't tiny."""
    if T % 8 != 0:
        return 1
    bt = 1
    for d in range(1, B + 1):
        if B % d == 0 and d * T <= 512:
            bt = d
    return bt


def block_forward(x, params):
    """x: (B, T, C) float32.  params: dict of f32 weights (see init_params)."""
    B, T, C = x.shape
    assert C == N_EMBD and T <= BLOCK_SIZE

    bt = _pick_batch_tile(B, T)
    grid = (B // bt,)

    # Pre-cast matmul weights to bf16 in HBM; fuse q/k/v into one (C, 3C) weight.
    bf16 = jnp.bfloat16
    wqkv = jnp.concatenate([params["wq"], params["wk"], params["wv"]],
                           axis=1).astype(bf16)                  # (C, 3C)
    wproj = params["wproj"].astype(bf16)                          # (C, C)
    w1 = params["w1"].astype(bf16)                                # (C, 4C)
    w2 = params["w2"].astype(bf16)                                # (4C, C)

    full = lambda shape: pl.BlockSpec(shape, lambda i: (0, 0))

    in_specs = [
        pl.BlockSpec((bt, T, C), lambda i: (i, 0, 0)),            # x
        full((C, 3 * C)),                                         # wqkv (bf16)
        full((C, C)),                                             # wproj (bf16)
        full((1, C)),                                             # bproj
        full((1, C)),                                             # ln1 gamma
        full((1, C)),                                             # ln1 beta
        full((1, C)),                                             # ln2 gamma
        full((1, C)),                                             # ln2 beta
        full((C, 4 * C)),                                         # ffn w1 (bf16)
        full((1, 4 * C)),                                         # ffn b1
        full((4 * C, C)),                                         # ffn w2 (bf16)
        full((1, C)),                                             # ffn b2
    ]

    return pl.pallas_call(
        _block_kernel,
        out_shape=jax.ShapeDtypeStruct((B, T, C), x.dtype),
        grid_spec=pltpu.PrefetchScalarGridSpec(
            num_scalar_prefetch=0,
            grid=grid,
            in_specs=in_specs,
            out_specs=pl.BlockSpec((bt, T, C), lambda i: (i, 0, 0)),
        ),
        compiler_params=pltpu.CompilerParams(
            dimension_semantics=("parallel",),
            vmem_limit_bytes=48 * 1024 * 1024,   # fits v7x's 64 MiB VMEM
        ),
    )(x, wqkv, wproj, params["bproj"],
      params["g1"], params["b1"], params["g2"], params["b2"],
      w1, params["bb1"], w2, params["bb2"])


# ---------------------------- pure-JAX f32 reference --------------------------
def block_reference(x, p):
    def ln(h, g, b):
        mu = jnp.mean(h, axis=-1, keepdims=True)
        var = jnp.mean((h - mu) ** 2, axis=-1, keepdims=True)
        return (h - mu) / jnp.sqrt(var + LN_EPS) * g + b

    B, T, C = x.shape
    h = ln(x, p["g1"][0], p["b1"][0])
    q = h @ p["wq"]
    k = h @ p["wk"]
    v = h @ p["wv"]
    q = q.reshape(B, T, N_HEAD, HEAD_SIZE).transpose(0, 2, 1, 3)
    k = k.reshape(B, T, N_HEAD, HEAD_SIZE).transpose(0, 2, 1, 3)
    v = v.reshape(B, T, N_HEAD, HEAD_SIZE).transpose(0, 2, 1, 3)
    wei = jnp.einsum("bhqd,bhkd->bhqk", q, k) * HEAD_SIZE ** (-0.5)
    mask = jnp.tril(jnp.ones((T, T), bool))
    wei = jnp.where(mask, wei, -jnp.inf)
    wei = jax.nn.softmax(wei, axis=-1)
    out = jnp.einsum("bhqk,bhkd->bhqd", wei, v)
    out = out.transpose(0, 2, 1, 3).reshape(B, T, C)
    sa = out @ p["wproj"] + p["bproj"][0]
    x2 = x + sa
    h2 = ln(x2, p["g2"][0], p["b2"][0])
    ff = jnp.maximum(h2 @ p["w1"] + p["bb1"][0], 0.0) @ p["w2"] + p["bb2"][0]
    return x2 + ff


def init_params(key):
    ks = jax.random.split(key, 8)
    C = N_EMBD
    s = 0.02
    return {
        "wq": jax.random.normal(ks[0], (C, C), jnp.float32) * s,
        "wk": jax.random.normal(ks[1], (C, C), jnp.float32) * s,
        "wv": jax.random.normal(ks[2], (C, C), jnp.float32) * s,
        "wproj": jax.random.normal(ks[3], (C, C), jnp.float32) * s,
        "bproj": jax.random.normal(ks[4], (1, C), jnp.float32) * s,
        "g1": jnp.ones((1, C), jnp.float32),
        "b1": jnp.zeros((1, C), jnp.float32),
        "g2": jnp.ones((1, C), jnp.float32),
        "b2": jnp.zeros((1, C), jnp.float32),
        "w1": jax.random.normal(ks[5], (C, 4 * C), jnp.float32) * s,
        "bb1": jax.random.normal(ks[6], (1, 4 * C), jnp.float32) * s,
        "w2": jax.random.normal(ks[7], (4 * C, C), jnp.float32) * s,
        "bb2": jnp.zeros((1, C), jnp.float32),
    }


if __name__ == "__main__":
    key = jax.random.PRNGKey(0)
    kx, kp = jax.random.split(key)

    B, T = 2, 16                       # small batch / seq, C fixed at n_embd
    x = jax.random.normal(kx, (B, T, N_EMBD), jnp.float32)
    params = init_params(kp)

    out = jax.block_until_ready(block_forward(x, params))
    ref = block_reference(x, params)

    assert out.shape == (B, T, N_EMBD)
    # bf16 matmul operands vs. f32 reference -> tolerance loosened accordingly.
    max_err = float(jnp.max(jnp.abs(out - ref)))
    assert max_err < 3e-2, max_err

    print("KERNEL_OK")
</pallas_src>

<mosaic_0001>
module attributes {stable_mosaic.version = 11 : i64} {
  func.func @_block_kernel(%arg0: i32, %arg1: memref<2x16x384xf32, #tpu.memory_space<vmem>>, %arg2: memref<384x1152xbf16, #tpu.memory_space<vmem>>, %arg3: memref<384x384xbf16, #tpu.memory_space<vmem>>, %arg4: memref<1x384xf32, #tpu.memory_space<vmem>>, %arg5: memref<1x384xf32, #tpu.memory_space<vmem>>, %arg6: memref<1x384xf32, #tpu.memory_space<vmem>>, %arg7: memref<1x384xf32, #tpu.memory_space<vmem>>, %arg8: memref<1x384xf32, #tpu.memory_space<vmem>>, %arg9: memref<384x1536xbf16, #tpu.memory_space<vmem>>, %arg10: memref<1x1536xf32, #tpu.memory_space<vmem>>, %arg11: memref<1536x384xbf16, #tpu.memory_space<vmem>>, %arg12: memref<1x384xf32, #tpu.memory_space<vmem>>, %arg13: memref<2x16x384xf32, #tpu.memory_space<vmem>>) attributes {dimension_semantics = [#tpu.dimension_semantics<parallel>], iteration_bounds = array<i64: 1>, scalar_prefetch = 0 : i64, scratch_operands = 0 : i64, tpu.core_type = #tpu.core_type<tc>, window_params = [{transform_indices = @transform_0, window_bounds = array<i64: 2, 16, 384>}, {pipeline_mode = #tpu.pipeline_mode<synchronous>, transform_indices = @transform_1, window_bounds = array<i64: 384, 1152>}, {pipeline_mode = #tpu.pipeline_mode<synchronous>, transform_indices = @transform_2, window_bounds = array<i64: 384, 384>}, {pipeline_mode = #tpu.pipeline_mode<synchronous>, transform_indices = @transform_3, window_bounds = array<i64: 1, 384>}, {pipeline_mode = #tpu.pipeline_mode<synchronous>, transform_indices = @transform_4, window_bounds = array<i64: 1, 384>}, {pipeline_mode = #tpu.pipeline_mode<synchronous>, transform_indices = @transform_5, window_bounds = array<i64: 1, 384>}, {pipeline_mode = #tpu.pipeline_mode<synchronous>, transform_indices = @transform_6, window_bounds = array<i64: 1, 384>}, {pipeline_mode = #tpu.pipeline_mode<synchronous>, transform_indices = @transform_7, window_bounds = array<i64: 1, 384>}, {pipeline_mode = #tpu.pipeline_mode<synchronous>, transform_indices = @transform_8, window_bounds = array<i64: 384, 1536>}, {pipeline_mode = #tpu.pipeline_mode<synchronous>, transform_indices = @transform_9, window_bounds = array<i64: 1, 1536>}, {pipeline_mode = #tpu.pipeline_mode<synchronous>, transform_indices = @transform_10, window_bounds = array<i64: 1536, 384>}, {pipeline_mode = #tpu.pipeline_mode<synchronous>, transform_indices = @transform_11, window_bounds = array<i64: 1, 384>}, {transform_indices = @transform_12, window_bounds = array<i64: 2, 16, 384>}]} {
    %c0 = arith.constant 0 : index
    %c0_0 = arith.constant 0 : index
    %c0_1 = arith.constant 0 : index
    %0 = vector.load %arg1[%c0, %c0_0, %c0_1] : memref<2x16x384xf32, #tpu.memory_space<vmem>>, vector<2x16x384xf32>
    %1 = vector.shape_cast %0 : vector<2x16x384xf32> to vector<32x384xf32>
    %c0_2 = arith.constant 0 : index
    %c0_3 = arith.constant 0 : index
    %2 = vector.load %arg5[%c0_2, %c0_3] : memref<1x384xf32, #tpu.memory_space<vmem>>, vector<1x384xf32>
    %c0_4 = arith.constant 0 : index
    %c0_5 = arith.constant 0 : index
    %3 = vector.load %arg6[%c0_4, %c0_5] : memref<1x384xf32, #tpu.memory_space<vmem>>, vector<1x384xf32>
    %cst = arith.constant dense<0.000000e+00> : vector<32xf32>
    %4 = vector.multi_reduction <add>, %1, %cst [1] : vector<32x384xf32> to vector<32xf32>
    %5 = vector.shape_cast %4 : vector<32xf32> to vector<32x1xf32>
    %cst_6 = arith.constant 3.840000e+02 : f32
    %6 = vector.broadcast %cst_6 : f32 to vector<32x1xf32>
    %7 = arith.divf %5, %6 : vector<32x1xf32>
    %8 = vector.broadcast %7 : vector<32x1xf32> to vector<32x384xf32>
    %9 = arith.subf %1, %8 : vector<32x384xf32>
    %10 = arith.mulf %9, %9 : vector<32x384xf32>
    %cst_7 = arith.constant dense<0.000000e+00> : vector<32xf32>
    %11 = vector.multi_reduction <add>, %10, %cst_7 [1] : vector<32x384xf32> to vector<32xf32>
    %12 = vector.shape_cast %11 : vector<32xf32> to vector<32x1xf32>
    %cst_8 = arith.constant 3.840000e+02 : f32
    %13 = vector.broadcast %cst_8 : f32 to vector<32x1xf32>
    %14 = arith.divf %12, %13 : vector<32x1xf32>
    %cst_9 = arith.constant 9.99999974E-6 : f32
    %15 = vector.broadcast %cst_9 : f32 to vector<32x1xf32>
    %16 = arith.addf %14, %15 : vector<32x1xf32>
    %17 = math.rsqrt %16 : vector<32x1xf32>
    %18 = vector.broadcast %17 : vector<32x1xf32> to vector<32x384xf32>
    %19 = arith.mulf %9, %18 : vector<32x384xf32>
    %20 = vector.broadcast %2 : vector<1x384xf32> to vector<32x384xf32>
    %21 = arith.mulf %19, %20 : vector<32x384xf32>
    %22 = vector.broadcast %3 : vector<1x384xf32> to vector<32x384xf32>
    %23 = arith.addf %21, %22 : vector<32x384xf32>
    %24 = arith.truncf %23 : vector<32x384xf32> to vector<32x384xbf16>
    %c0_10 = arith.constant 0 : index
    %c0_11 = arith.constant 0 : index
    %25 = vector.load %arg2[%c0_10, %c0_11] : memref<384x1152xbf16, #tpu.memory_space<vmem>>, vector<384x1152xbf16>
    %cst_12 = arith.constant dense<0.000000e+00> : vector<32x1152xf32>
    %26 = tpu.matmul %24, %25, %cst_12 {dimension_numbers = #tpu.dot_dimension_numbers<[1], [0], [0], [1], [0, 0, 1, 1], [], []>} : vector<32x384xbf16>, vector<384x1152xbf16>, vector<32x1152xf32> -> vector<32x1152xf32>
    %27 = tpu.iota {dimensions = array<i32: 0>} : vector<16x16xi32>
    %28 = tpu.iota {dimensions = array<i32: 1>} : vector<16x16xi32>
    %29 = arith.cmpi sge, %27, %28 : vector<16x16xi32>
    %cst_13 = arith.constant 0.000000e+00 : f32
    %30 = vector.broadcast %cst_13 : f32 to vector<16x384xf32>
    %31 = vector.extract_strided_slice %26 {offsets = [0, 0], sizes = [16, 64], strides = [1, 1]} : vector<32x1152xf32> to vector<16x64xf32>
    %cst_14 = arith.constant 1.250000e-01 : f32
    %32 = vector.broadcast %cst_14 : f32 to vector<16x64xf32>
    %33 = arith.mulf %31, %32 : vector<16x64xf32>
    %34 = arith.truncf %33 : vector<16x64xf32> to vector<16x64xbf16>
    %35 = vector.extract_strided_slice %26 {offsets = [0, 384], sizes = [16, 64], strides = [1, 1]} : vector<32x1152xf32> to vector<16x64xf32>
    %36 = arith.truncf %35 : vector<16x64xf32> to vector<16x64xbf16>
    %37 = vector.extract_strided_slice %26 {offsets = [0, 768], sizes = [16, 64], strides = [1, 1]} : vector<32x1152xf32> to vector<16x64xf32>
    %38 = arith.truncf %37 : vector<16x64xf32> to vector<16x64xbf16>
    %cst_15 = arith.constant dense<0.000000e+00> : vector<16x16xf32>
    %39 = tpu.matmul %34, %36, %cst_15 {dimension_numbers = #tpu.dot_dimension_numbers<[1], [1], [0], [0], [0, 0, 1, 0], [], []>} : vector<16x64xbf16>, vector<16x64xbf16>, vector<16x16xf32> -> vector<16x16xf32>
    %cst_16 = arith.constant -1.000000e+30 : f32
    %40 = vector.broadcast %cst_16 : f32 to vector<16x16xf32>
    %41 = arith.select %29, %39, %40 : vector<16x16xi1>, vector<16x16xf32>
    %cst_17 = arith.constant dense<0xFF800000> : vector<16xf32>
    %42 = vector.multi_reduction <maximumf>, %41, %cst_17 [1] : vector<16x16xf32> to vector<16xf32>
    %43 = vector.shape_cast %42 : vector<16xf32> to vector<16x1xf32>
    %44 = vector.broadcast %43 : vector<16x1xf32> to vector<16x16xf32>
    %45 = arith.subf %41, %44 : vector<16x16xf32>
    %46 = math.exp %45 : vector<16x16xf32>
    %cst_18 = arith.constant dense<0.000000e+00> : vector<16xf32>
    %47 = vector.multi_reduction <add>, %46, %cst_18 [1] : vector<16x16xf32> to vector<16xf32>
    %48 = vector.shape_cast %47 : vector<16xf32> to vector<16x1xf32>
    %49 = tpu.reciprocal %48 {approx = true} : vector<16x1xf32> -> vector<16x1xf32>
    %50 = vector.broadcast %49 : vector<16x1xf32> to vector<16x16xf32>
    %51 = arith.mulf %46, %50 : vector<16x16xf32>
    %52 = arith.truncf %51 : vector<16x16xf32> to vector<16x16xbf16>
    %cst_19 = arith.constant dense<0.000000e+00> : vector<16x64xf32>
    %53 = tpu.matmul %52, %38, %cst_19 {dimension_numbers = #tpu.dot_dimension_numbers<[1], [0], [0], [1], [0, 0, 1, 1], [], []>} : vector<16x16xbf16>, vector<16x64xbf16>, vector<16x64xf32> -> vector<16x64xf32>
    %54 = arith.truncf %53 : vector<16x64xf32> to vector<16x64xbf16>
    %c0_20 = arith.constant 0 : index
    %c0_21 = arith.constant 0 : index
    %55 = vector.load %arg3[%c0_20, %c0_21] : memref<384x384xbf16, #tpu.memory_space<vmem>>, vector<64x384xbf16>
    %cst_22 = arith.constant dense<0.000000e+00> : vector<16x384xf32>
    %56 = tpu.matmul %54, %55, %cst_22 {dimension_numbers = #tpu.dot_dimension_numbers<[1], [0], [0], [1], [0, 0, 1, 1], [], []>} : vector<16x64xbf16>, vector<64x384xbf16>, vector<16x384xf32> -> vector<16x384xf32>
    %57 = arith.addf %30, %56 : vector<16x384xf32>
    %58 = vector.extract_strided_slice %26 {offsets = [0, 64], sizes = [16, 64], strides = [1, 1]} : vector<32x1152xf32> to vector<16x64xf32>
    %cst_23 = arith.constant 1.250000e-01 : f32
    %59 = vector.broadcast %cst_23 : f32 to vector<16x64xf32>
    %60 = arith.mulf %58, %59 : vector<16x64xf32>
    %61 = arith.truncf %60 : vector<16x64xf32> to vector<16x64xbf16>
    %62 = vector.extract_strided_slice %26 {offsets = [0, 448], sizes = [16, 64], strides = [1, 1]} : vector<32x1152xf32> to vector<16x64xf32>
    %63 = arith.truncf %62 : vector<16x64xf32> to vector<16x64xbf16>
    %64 = vector.extract_strided_slice %26 {offsets = [0, 832], sizes = [16, 64], strides = [1, 1]} : vector<32x1152xf32> to vector<16x64xf32>
    %65 = arith.truncf %64 : vector<16x64xf32> to vector<16x64xbf16>
    %cst_24 = arith.constant dense<0.000000e+00> : vector<16x16xf32>
    %66 = tpu.matmul %61, %63, %cst_24 {dimension_numbers = #tpu.dot_dimension_numbers<[1], [1], [0], [0], [0, 0, 1, 0], [], []>} : vector<16x64xbf16>, vector<16x64xbf16>, vector<16x16xf32> -> vector<16x16xf32>
    %cst_25 = arith.constant -1.000000e+30 : f32
    %67 = vector.broadcast %cst_25 : f32 to vector<16x16xf32>
    %68 = arith.select %29, %66, %67 : vector<16x16xi1>, vector<16x16xf32>
    %cst_26 = arith.constant dense<0xFF800000> : vector<16xf32>
    %69 = vector.multi_reduction <maximumf>, %68, %cst_26 [1] : vector<16x16xf32> to vector<16xf32>
    %70 = vector.shape_cast %69 : vector<16xf32> to vector<16x1xf32>
    %71 = vector.broadcast %70 : vector<16x1xf32> to vector<16x16xf32>
    %72 = arith.subf %68, %71 : vector<16x16xf32>
    %73 = math.exp %72 : vector<16x16xf32>
    %cst_27 = arith.constant dense<0.000000e+00> : vector<16xf32>
    %74 = vector.multi_reduction <add>, %73, %cst_27 [1] : vector<16x16xf32> to vector<16xf32>
    %75 = vector.shape_cast %74 : vector<16xf32> to vector<16x1xf32>
    %76 = tpu.reciprocal %75 {approx = true} : vector<16x1xf32> -> vector<16x1xf32>
    %77 = vector.broadcast %76 : vector<16x1xf32> to vector<16x16xf32>
    %78 = arith.mulf %73, %77 : vector<16x16xf32>
    %79 = arith.truncf %78 : vector<16x16xf32> to vector<16x16xbf16>
    %cst_28 = arith.constant dense<0.000000e+00> : vector<16x64xf32>
    %80 = tpu.matmul %79, %65, %cst_28 {dimension_numbers = #tpu.dot_dimension_numbers<[1], [0], [0], [1], [0, 0, 1, 1], [], []>} : vector<16x16xbf16>, vector<16x64xbf16>, vector<16x64xf32> -> vector<16x64xf32>
    %81 = arith.truncf %80 : vector<16x64xf32> to vector<16x64xbf16>
    %c64 = arith.constant 64 : index
    %c0_29 = arith.constant 0 : index
    %82 = vector.load %arg3[%c64, %c0_29] : memref<384x384xbf16, #tpu.memory_space<vmem>>, vector<64x384xbf16>
    %cst_30 = arith.constant dense<0.000000e+00> : vector<16x384xf32>
    %83 = tpu.matmul %81, %82, %cst_30 {dimension_numbers = #tpu.dot_dimension_numbers<[1], [0], [0], [1], [0, 0, 1, 1], [], []>} : vector<16x64xbf16>, vector<64x384xbf16>, vector<16x384xf32> -> vector<16x384xf32>
    %84 = arith.addf %57, %83 : vector<16x384xf32>
    %85 = vector.extract_strided_slice %26 {offsets = [0, 128], sizes = [16, 64], strides = [1, 1]} : vector<32x1152xf32> to vector<16x64xf32>
    %cst_31 = arith.constant 1.250000e-01 : f32
    %86 = vector.broadcast %cst_31 : f32 to vector<16x64xf32>
    %87 = arith.mulf %85, %86 : vector<16x64xf32>
    %88 = arith.truncf %87 : vector<16x64xf32> to vector<16x64xbf16>
    %89 = vector.extract_strided_slice %26 {offsets = [0, 512], sizes = [16, 64], strides = [1, 1]} : vector<32x1152xf32> to vector<16x64xf32>
    %90 = arith.truncf %89 : vector<16x64xf32> to vector<16x64xbf16>
    %91 = vector.extract_strided_slice %26 {offsets = [0, 896], sizes = [16, 64], strides = [1, 1]} : vector<32x1152xf32> to vector<16x64xf32>
    %92 = arith.truncf %91 : vector<16x64xf32> to vector<16x64xbf16>
    %cst_32 = arith.constant dense<0.000000e+00> : vector<16x16xf32>
    %93 = tpu.matmul %88, %90, %cst_32 {dimension_numbers = #tpu.dot_dimension_numbers<[1], [1], [0], [0], [0, 0, 1, 0], [], []>} : vector<16x64xbf16>, vector<16x64xbf16>, vector<16x16xf32> -> vector<16x16xf32>
    %cst_33 = arith.constant -1.000000e+30 : f32
    %94 = vector.broadcast %cst_33 : f32 to vector<16x16xf32>
    %95 = arith.select %29, %93, %94 : vector<16x16xi1>, vector<16x16xf32>
    %cst_34 = arith.constant dense<0xFF800000> : vector<16xf32>
    %96 = vector.multi_reduction <maximumf>, %95, %cst_34 [1] : vector<16x16xf32> to vector<16xf32>
    %97 = vector.shape_cast %96 : vector<16xf32> to vector<16x1xf32>
    %98 = vector.broadcast %97 : vector<16x1xf32> to vector<16x16xf32>
    %99 = arith.subf %95, %98 : vector<16x16xf32>
    %100 = math.exp %99 : vector<16x16xf32>
    %cst_35 = arith.constant dense<0.000000e+00> : vector<16xf32>
    %101 = vector.multi_reduction <add>, %100, %cst_35 [1] : vector<16x16xf32> to vector<16xf32>
    %102 = vector.shape_cast %101 : vector<16xf32> to vector<16x1xf32>
    %103 = tpu.reciprocal %102 {approx = true} : vector<16x1xf32> -> vector<16x1xf32>
    %104 = vector.broadcast %103 : vector<16x1xf32> to vector<16x16xf32>
    %105 = arith.mulf %100, %104 : vector<16x16xf32>
    %106 = arith.truncf %105 : vector<16x16xf32> to vector<16x16xbf16>
    %cst_36 = arith.constant dense<0.000000e+00> : vector<16x64xf32>
    %107 = tpu.matmul %106, %92, %cst_36 {dimension_numbers = #tpu.dot_dimension_numbers<[1], [0], [0], [1], [0, 0, 1, 1], [], []>} : vector<16x16xbf16>, vector<16x64xbf16>, vector<16x64xf32> -> vector<16x64xf32>
    %108 = arith.truncf %107 : vector<16x64xf32> to vector<16x64xbf16>
    %c128 = arith.constant 128 : index
    %c0_37 = arith.constant 0 : index
    %109 = vector.load %arg3[%c128, %c0_37] : memref<384x384xbf16, #tpu.memory_space<vmem>>, vector<64x384xbf16>
    %cst_38 = arith.constant dense<0.000000e+00> : vector<16x384xf32>
    %110 = tpu.matmul %108, %109, %cst_38 {dimension_numbers = #tpu.dot_dimension_numbers<[1], [0], [0], [1], [0, 0, 1, 1], [], []>} : vector<16x64xbf16>, vector<64x384xbf16>, vector<16x384xf32> -> vector<16x384xf32>
    %111 = arith.addf %84, %110 : vector<16x384xf32>
    %112 = vector.extract_strided_slice %26 {offsets = [0, 192], sizes = [16, 64], strides = [1, 1]} : vector<32x1152xf32> to vector<16x64xf32>
    %cst_39 = arith.constant 1.250000e-01 : f32
    %113 = vector.broadcast %cst_39 : f32 to vector<16x64xf32>
    %114 = arith.mulf %112, %113 : vector<16x64xf32>
    %115 = arith.truncf %114 : vector<16x64xf32> to vector<16x64xbf16>
    %116 = vector.extract_strided_slice %26 {offsets = [0, 576], sizes = [16, 64], strides = [1, 1]} : vector<32x1152xf32> to vector<16x64xf32>
    %117 = arith.truncf %116 : vector<16x64xf32> to vector<16x64xbf16>
    %118 = vector.extract_strided_slice %26 {offsets = [0, 960], sizes = [16, 64], strides = [1, 1]} : vector<32x1152xf32> to vector<16x64xf32>
    %119 = arith.truncf %118 : vector<16x64xf32> to vector<16x64xbf16>
    %cst_40 = arith.constant dense<0.000000e+00> : vector<16x16xf32>
    %120 = tpu.matmul %115, %117, %cst_40 {dimension_numbers = #tpu.dot_dimension_numbers<[1], [1], [0], [0], [0, 0, 1, 0], [], []>} : vector<16x64xbf16>, vector<16x64xbf16>, vector<16x16xf32> -> vector<16x16xf32>
    %cst_41 = arith.constant -1.000000e+30 : f32
    %121 = vector.broadcast %cst_41 : f32 to vector<16x16xf32>
    %122 = arith.select %29, %120, %121 : vector<16x16xi1>, vector<16x16xf32>
    %cst_42 = arith.constant dense<0xFF800000> : vector<16xf32>
    %123 = vector.multi_reduction <maximumf>, %122, %cst_42 [1] : vector<16x16xf32> to vector<16xf32>
    %124 = vector.shape_cast %123 : vector<16xf32> to vector<16x1xf32>
    %125 = vector.broadcast %124 : vector<16x1xf32> to vector<16x16xf32>
    %126 = arith.subf %122, %125 : vector<16x16xf32>
    %127 = math.exp %126 : vector<16x16xf32>
    %cst_43 = arith.constant dense<0.000000e+00> : vector<16xf32>
    %128 = vector.multi_reduction <add>, %127, %cst_43 [1] : vector<16x16xf32> to vector<16xf32>
    %129 = vector.shape_cast %128 : vector<16xf32> to vector<16x1xf32>
    %130 = tpu.reciprocal %129 {approx = true} : vector<16x1xf32> -> vector<16x1xf32>
    %131 = vector.broadcast %130 : vector<16x1xf32> to vector<16x16xf32>
    %132 = arith.mulf %127, %131 : vector<16x16xf32>
    %133 = arith.truncf %132 : vector<16x16xf32> to vector<16x16xbf16>
    %cst_44 = arith.constant dense<0.000000e+00> : vector<16x64xf32>
    %134 = tpu.matmul %133, %119, %cst_44 {dimension_numbers = #tpu.dot_dimension_numbers<[1], [0], [0], [1], [0, 0, 1, 1], [], []>} : vector<16x16xbf16>, vector<16x64xbf16>, vector<16x64xf32> -> vector<16x64xf32>
    %135 = arith.truncf %134 : vector<16x64xf32> to vector<16x64xbf16>
    %c192 = arith.constant 192 : index
    %c0_45 = arith.constant 0 : index
    %136 = vector.load %arg3[%c192, %c0_45] : memref<384x384xbf16, #tpu.memory_space<vmem>>, vector<64x384xbf16>
    %cst_46 = arith.constant dense<0.000000e+00> : vector<16x384xf32>
    %137 = tpu.matmul %135, %136, %cst_46 {dimension_numbers = #tpu.dot_dimension_numbers<[1], [0], [0], [1], [0, 0, 1, 1], [], []>} : vector<16x64xbf16>, vector<64x384xbf16>, vector<16x384xf32> -> vector<16x384xf32>
    %138 = arith.addf %111, %137 : vector<16x384xf32>
    %139 = vector.extract_strided_slice %26 {offsets = [0, 256], sizes = [16, 64], strides = [1, 1]} : vector<32x1152xf32> to vector<16x64xf32>
    %cst_47 = arith.constant 1.250000e-01 : f32
    %140 = vector.broadcast %cst_47 : f32 to vector<16x64xf32>
    %141 = arith.mulf %139, %140 : vector<16x64xf32>
    %142 = arith.truncf %141 : vector<16x64xf32> to vector<16x64xbf16>
    %143 = vector.extract_strided_slice %26 {offsets = [0, 640], sizes = [16, 64], strides = [1, 1]} : vector<32x1152xf32> to vector<16x64xf32>
    %144 = arith.truncf %143 : vector<16x64xf32> to vector<16x64xbf16>
    %145 = vector.extract_strided_slice %26 {offsets = [0, 1024], sizes = [16, 64], strides = [1, 1]} : vector<32x1152xf32> to vector<16x64xf32>
    %146 = arith.truncf %145 : vector<16x64xf32> to vector<16x64xbf16>
    %cst_48 = arith.constant dense<0.000000e+00> : vector<16x16xf32>
    %147 = tpu.matmul %142, %144, %cst_48 {dimension_numbers = #tpu.dot_dimension_numbers<[1], [1], [0], [0], [0, 0, 1, 0], [], []>} : vector<16x64xbf16>, vector<16x64xbf16>, vector<16x16xf32> -> vector<16x16xf32>
    %cst_49 = arith.constant -1.000000e+30 : f32
    %148 = vector.broadcast %cst_49 : f32 to vector<16x16xf32>
    %149 = arith.select %29, %147, %148 : vector<16x16xi1>, vector<16x16xf32>
    %cst_50 = arith.constant dense<0xFF800000> : vector<16xf32>
    %150 = vector.multi_reduction <maximumf>, %149, %cst_50 [1] : vector<16x16xf32> to vector<16xf32>
    %151 = vector.shape_cast %150 : vector<16xf32> to vector<16x1xf32>
    %152 = vector.broadcast %151 : vector<16x1xf32> to vector<16x16xf32>
    %153 = arith.subf %149, %152 : vector<16x16xf32>
    %154 = math.exp %153 : vector<16x16xf32>
    %cst_51 = arith.constant dense<0.000000e+00> : vector<16xf32>
    %155 = vector.multi_reduction <add>, %154, %cst_51 [1] : vector<16x16xf32> to vector<16xf32>
    %156 = vector.shape_cast %155 : vector<16xf32> to vector<16x1xf32>
    %157 = tpu.reciprocal %156 {approx = true} : vector<16x1xf32> -> vector<16x1xf32>
    %158 = vector.broadcast %157 : vector<16x1xf32> to vector<16x16xf32>
    %159 = arith.mulf %154, %158 : vector<16x16xf32>
    %160 = arith.truncf %159 : vector<16x16xf32> to vector<16x16xbf16>
    %cst_52 = arith.constant dense<0.000000e+00> : vector<16x64xf32>
    %161 = tpu.matmul %160, %146, %cst_52 {dimension_numbers = #tpu.dot_dimension_numbers<[1], [0], [0], [1], [0, 0, 1, 1], [], []>} : vector<16x16xbf16>, vector<16x64xbf16>, vector<16x64xf32> -> vector<16x64xf32>
    %162 = arith.truncf %161 : vector<16x64xf32> to vector<16x64xbf16>
    %c256 = arith.constant 256 : index
    %c0_53 = arith.constant 0 : index
    %163 = vector.load %arg3[%c256, %c0_53] : memref<384x384xbf16, #tpu.memory_space<vmem>>, vector<64x384xbf16>
    %cst_54 = arith.constant dense<0.000000e+00> : vector<16x384xf32>
    %164 = tpu.matmul %162, %163, %cst_54 {dimension_numbers = #tpu.dot_dimension_numbers<[1], [0], [0], [1], [0, 0, 1, 1], [], []>} : vector<16x64xbf16>, vector<64x384xbf16>, vector<16x384xf32> -> vector<16x384xf32>
    %165 = arith.addf %138, %164 : vector<16x384xf32>
    %166 = vector.extract_strided_slice %26 {offsets = [0, 320], sizes = [16, 64], strides = [1, 1]} : vector<32x1152xf32> to vector<16x64xf32>
    %cst_55 = arith.constant 1.250000e-01 : f32
    %167 = vector.broadcast %cst_55 : f32 to vector<16x64xf32>
    %168 = arith.mulf %166, %167 : vector<16x64xf32>
    %169 = arith.truncf %168 : vector<16x64xf32> to vector<16x64xbf16>
    %170 = vector.extract_strided_slice %26 {offsets = [0, 704], sizes = [16, 64], strides = [1, 1]} : vector<32x1152xf32> to vector<16x64xf32>
    %171 = arith.truncf %170 : vector<16x64xf32> to vector<16x64xbf16>
    %172 = vector.extract_strided_slice %26 {offsets = [0, 1088], sizes = [16, 64], strides = [1, 1]} : vector<32x1152xf32> to vector<16x64xf32>
    %173 = arith.truncf %172 : vector<16x64xf32> to vector<16x64xbf16>
    %cst_56 = arith.constant dense<0.000000e+00> : vector<16x16xf32>
    %174 = tpu.matmul %169, %171, %cst_56 {dimension_numbers = #tpu.dot_dimension_numbers<[1], [1], [0], [0], [0, 0, 1, 0], [], []>} : vector<16x64xbf16>, vector<16x64xbf16>, vector<16x16xf32> -> vector<16x16xf32>
    %cst_57 = arith.constant -1.000000e+30 : f32
    %175 = vector.broadcast %cst_57 : f32 to vector<16x16xf32>
    %176 = arith.select %29, %174, %175 : vector<16x16xi1>, vector<16x16xf32>
    %cst_58 = arith.constant dense<0xFF800000> : vector<16xf32>
    %177 = vector.multi_reduction <maximumf>, %176, %cst_58 [1] : vector<16x16xf32> to vector<16xf32>
    %178 = vector.shape_cast %177 : vector<16xf32> to vector<16x1xf32>
    %179 = vector.broadcast %178 : vector<16x1xf32> to vector<16x16xf32>
    %180 = arith.subf %176, %179 : vector<16x16xf32>
    %181 = math.exp %180 : vector<16x16xf32>
    %cst_59 = arith.constant dense<0.000000e+00> : vector<16xf32>
    %182 = vector.multi_reduction <add>, %181, %cst_59 [1] : vector<16x16xf32> to vector<16xf32>
    %183 = vector.shape_cast %182 : vector<16xf32> to vector<16x1xf32>
    %184 = tpu.reciprocal %183 {approx = true} : vector<16x1xf32> -> vector<16x1xf32>
    %185 = vector.broadcast %184 : vector<16x1xf32> to vector<16x16xf32>
    %186 = arith.mulf %181, %185 : vector<16x16xf32>
    %187 = arith.truncf %186 : vector<16x16xf32> to vector<16x16xbf16>
    %cst_60 = arith.constant dense<0.000000e+00> : vector<16x64xf32>
    %188 = tpu.matmul %187, %173, %cst_60 {dimension_numbers = #tpu.dot_dimension_numbers<[1], [0], [0], [1], [0, 0, 1, 1], [], []>} : vector<16x16xbf16>, vector<16x64xbf16>, vector<16x64xf32> -> vector<16x64xf32>
    %189 = arith.truncf %188 : vector<16x64xf32> to vector<16x64xbf16>
    %c320 = arith.constant 320 : index
    %c0_61 = arith.constant 0 : index
    %190 = vector.load %arg3[%c320, %c0_61] : memref<384x384xbf16, #tpu.memory_space<vmem>>, vector<64x384xbf16>
    %cst_62 = arith.constant dense<0.000000e+00> : vector<16x384xf32>
    %191 = tpu.matmul %189, %190, %cst_62 {dimension_numbers = #tpu.dot_dimension_numbers<[1], [0], [0], [1], [0, 0, 1, 1], [], []>} : vector<16x64xbf16>, vector<64x384xbf16>, vector<16x384xf32> -> vector<16x384xf32>
    %192 = arith.addf %165, %191 : vector<16x384xf32>
    %cst_63 = arith.constant 0.000000e+00 : f32
    %193 = vector.broadcast %cst_63 : f32 to vector<16x384xf32>
    %194 = vector.extract_strided_slice %26 {offsets = [16, 0], sizes = [16, 64], strides = [1, 1]} : vector<32x1152xf32> to vector<16x64xf32>
    %cst_64 = arith.constant 1.250000e-01 : f32
    %195 = vector.broadcast %cst_64 : f32 to vector<16x64xf32>
    %196 = arith.mulf %194, %195 : vector<16x64xf32>
    %197 = arith.truncf %196 : vector<16x64xf32> to vector<16x64xbf16>
    %198 = vector.extract_strided_slice %26 {offsets = [16, 384], sizes = [16, 64], strides = [1, 1]} : vector<32x1152xf32> to vector<16x64xf32>
    %199 = arith.truncf %198 : vector<16x64xf32> to vector<16x64xbf16>
    %200 = vector.extract_strided_slice %26 {offsets = [16, 768], sizes = [16, 64], strides = [1, 1]} : vector<32x1152xf32> to vector<16x64xf32>
    %201 = arith.truncf %200 : vector<16x64xf32> to vector<16x64xbf16>
    %cst_65 = arith.constant dense<0.000000e+00> : vector<16x16xf32>
    %202 = tpu.matmul %197, %199, %cst_65 {dimension_numbers = #tpu.dot_dimension_numbers<[1], [1], [0], [0], [0, 0, 1, 0], [], []>} : vector<16x64xbf16>, vector<16x64xbf16>, vector<16x16xf32> -> vector<16x16xf32>
    %cst_66 = arith.constant -1.000000e+30 : f32
    %203 = vector.broadcast %cst_66 : f32 to vector<16x16xf32>
    %204 = arith.select %29, %202, %203 : vector<16x16xi1>, vector<16x16xf32>
    %cst_67 = arith.constant dense<0xFF800000> : vector<16xf32>
    %205 = vector.multi_reduction <maximumf>, %204, %cst_67 [1] : vector<16x16xf32> to vector<16xf32>
    %206 = vector.shape_cast %205 : vector<16xf32> to vector<16x1xf32>
    %207 = vector.broadcast %206 : vector<16x1xf32> to vector<16x16xf32>
    %208 = arith.subf %204, %207 : vector<16x16xf32>
    %209 = math.exp %208 : vector<16x16xf32>
    %cst_68 = arith.constant dense<0.000000e+00> : vector<16xf32>
    %210 = vector.multi_reduction <add>, %209, %cst_68 [1] : vector<16x16xf32> to vector<16xf32>
    %211 = vector.shape_cast %210 : vector<16xf32> to vector<16x1xf32>
    %212 = tpu.reciprocal %211 {approx = true} : vector<16x1xf32> -> vector<16x1xf32>
    %213 = vector.broadcast %212 : vector<16x1xf32> to vector<16x16xf32>
    %214 = arith.mulf %209, %213 : vector<16x16xf32>
    %215 = arith.truncf %214 : vector<16x16xf32> to vector<16x16xbf16>
    %cst_69 = arith.constant dense<0.000000e+00> : vector<16x64xf32>
    %216 = tpu.matmul %215, %201, %cst_69 {dimension_numbers = #tpu.dot_dimension_numbers<[1], [0], [0], [1], [0, 0, 1, 1], [], []>} : vector<16x16xbf16>, vector<16x64xbf16>, vector<16x64xf32> -> vector<16x64xf32>
    %217 = arith.truncf %216 : vector<16x64xf32> to vector<16x64xbf16>
    %c0_70 = arith.constant 0 : index
    %c0_71 = arith.constant 0 : index
    %218 = vector.load %arg3[%c0_70, %c0_71] : memref<384x384xbf16, #tpu.memory_space<vmem>>, vector<64x384xbf16>
    %cst_72 = arith.constant dense<0.000000e+00> : vector<16x384xf32>
    %219 = tpu.matmul %217, %218, %cst_72 {dimension_numbers = #tpu.dot_dimension_numbers<[1], [0], [0], [1], [0, 0, 1, 1], [], []>} : vector<16x64xbf16>, vector<64x384xbf16>, vector<16x384xf32> -> vector<16x384xf32>
    %220 = arith.addf %193, %219 : vector<16x384xf32>
    %221 = vector.extract_strided_slice %26 {offsets = [16, 64], sizes = [16, 64], strides = [1, 1]} : vector<32x1152xf32> to vector<16x64xf32>
    %cst_73 = arith.constant 1.250000e-01 : f32
    %222 = vector.broadcast %cst_73 : f32 to vector<16x64xf32>
    %223 = arith.mulf %221, %222 : vector<16x64xf32>
    %224 = arith.truncf %223 : vector<16x64xf32> to vector<16x64xbf16>
    %225 = vector.extract_strided_slice %26 {offsets = [16, 448], sizes = [16, 64], strides = [1, 1]} : vector<32x1152xf32> to vector<16x64xf32>
    %226 = arith.truncf %225 : vector<16x64xf32> to vector<16x64xbf16>
    %227 = vector.extract_strided_slice %26 {offsets = [16, 832], sizes = [16, 64], strides = [1, 1]} : vector<32x1152xf32> to vector<16x64xf32>
    %228 = arith.truncf %227 : vector<16x64xf32> to vector<16x64xbf16>
    %cst_74 = arith.constant dense<0.000000e+00> : vector<16x16xf32>
    %229 = tpu.matmul %224, %226, %cst_74 {dimension_numbers = #tpu.dot_dimension_numbers<[1], [1], [0], [0], [0, 0, 1, 0], [], []>} : vector<16x64xbf16>, vector<16x64xbf16>, vector<16x16xf32> -> vector<16x16xf32>
    %cst_75 = arith.constant -1.000000e+30 : f32
    %230 = vector.broadcast %cst_75 : f32 to vector<16x16xf32>
    %231 = arith.select %29, %229, %230 : vector<16x16xi1>, vector<16x16xf32>
    %cst_76 = arith.constant dense<0xFF800000> : vector<16xf32>
    %232 = vector.multi_reduction <maximumf>, %231, %cst_76 [1] : vector<16x16xf32> to vector<16xf32>
    %233 = vector.shape_cast %232 : vector<16xf32> to vector<16x1xf32>
    %234 = vector.broadcast %233 : vector<16x1xf32> to vector<16x16xf32>
    %235 = arith.subf %231, %234 : vector<16x16xf32>
    %236 = math.exp %235 : vector<16x16xf32>
    %cst_77 = arith.constant dense<0.000000e+00> : vector<16xf32>
    %237 = vector.multi_reduction <add>, %236, %cst_77 [1] : vector<16x16xf32> to vector<16xf32>
    %238 = vector.shape_cast %237 : vector<16xf32> to vector<16x1xf32>
    %239 = tpu.reciprocal %238 {approx = true} : vector<16x1xf32> -> vector<16x1xf32>
    %240 = vector.broadcast %239 : vector<16x1xf32> to vector<16x16xf32>
    %241 = arith.mulf %236, %240 : vector<16x16xf32>
    %242 = arith.truncf %241 : vector<16x16xf32> to vector<16x16xbf16>
    %cst_78 = arith.constant dense<0.000000e+00> : vector<16x64xf32>
    %243 = tpu.matmul %242, %228, %cst_78 {dimension_numbers = #tpu.dot_dimension_numbers<[1], [0], [0], [1], [0, 0, 1, 1], [], []>} : vector<16x16xbf16>, vector<16x64xbf16>, vector<16x64xf32> -> vector<16x64xf32>
    %244 = arith.truncf %243 : vector<16x64xf32> to vector<16x64xbf16>
    %c64_79 = arith.constant 64 : index
    %c0_80 = arith.constant 0 : index
    %245 = vector.load %arg3[%c64_79, %c0_80] : memref<384x384xbf16, #tpu.memory_space<vmem>>, vector<64x384xbf16>
    %cst_81 = arith.constant dense<0.000000e+00> : vector<16x384xf32>
    %246 = tpu.matmul %244, %245, %cst_81 {dimension_numbers = #tpu.dot_dimension_numbers<[1], [0], [0], [1], [0, 0, 1, 1], [], []>} : vector<16x64xbf16>, vector<64x384xbf16>, vector<16x384xf32> -> vector<16x384xf32>
    %247 = arith.addf %220, %246 : vector<16x384xf32>
    %248 = vector.extract_strided_slice %26 {offsets = [16, 128], sizes = [16, 64], strides = [1, 1]} : vector<32x1152xf32> to vector<16x64xf32>
    %cst_82 = arith.constant 1.250000e-01 : f32
    %249 = vector.broadcast %cst_82 : f32 to vector<16x64xf32>
    %250 = arith.mulf %248, %249 : vector<16x64xf32>
    %251 = arith.truncf %250 : vector<16x64xf32> to vector<16x64xbf16>
    %252 = vector.extract_strided_slice %26 {offsets = [16, 512], sizes = [16, 64], strides = [1, 1]} : vector<32x1152xf32> to vector<16x64xf32>
    %253 = arith.truncf %252 : vector<16x64xf32> to vector<16x64xbf16>
    %254 = vector.extract_strided_slice %26 {offsets = [16, 896], sizes = [16, 64], strides = [1, 1]} : vector<32x1152xf32> to vector<16x64xf32>
    %255 = arith.truncf %254 : vector<16x64xf32> to vector<16x64xbf16>
    %cst_83 = arith.constant dense<0.000000e+00> : vector<16x16xf32>
    %256 = tpu.matmul %251, %253, %cst_83 {dimension_numbers = #tpu.dot_dimension_numbers<[1], [1], [0], [0], [0, 0, 1, 0], [], []>} : vector<16x64xbf16>, vector<16x64xbf16>, vector<16x16xf32> -> vector<16x16xf32>
    %cst_84 = arith.constant -1.000000e+30 : f32
    %257 = vector.broadcast %cst_84 : f32 to vector<16x16xf32>
    %258 = arith.select %29, %256, %257 : vector<16x16xi1>, vector<16x16xf32>
    %cst_85 = arith.constant dense<0xFF800000> : vector<16xf32>
    %259 = vector.multi_reduction <maximumf>, %258, %cst_85 [1] : vector<16x16xf32> to vector<16xf32>
    %260 = vector.shape_cast %259 : vector<16xf32> to vector<16x1xf32>
    %261 = vector.broadcast %260 : vector<16x1xf32> to vector<16x16xf32>
    %262 = arith.subf %258, %261 : vector<16x16xf32>
    %263 = math.exp %262 : vector<16x16xf32>
    %cst_86 = arith.constant dense<0.000000e+00> : vector<16xf32>
    %264 = vector.multi_reduction <add>, %263, %cst_86 [1] : vector<16x16xf32> to vector<16xf32>
    %265 = vector.shape_cast %264 : vector<16xf32> to vector<16x1xf32>
    %266 = tpu.reciprocal %265 {approx = true} : vector<16x1xf32> -> vector<16x1xf32>
    %267 = vector.broadcast %266 : vector<16x1xf32> to vector<16x16xf32>
    %268 = arith.mulf %263, %267 : vector<16x16xf32>
    %269 = arith.truncf %268 : vector<16x16xf32> to vector<16x16xbf16>
    %cst_87 = arith.constant dense<0.000000e+00> : vector<16x64xf32>
    %270 = tpu.matmul %269, %255, %cst_87 {dimension_numbers = #tpu.dot_dimension_numbers<[1], [0], [0], [1], [0, 0, 1, 1], [], []>} : vector<16x16xbf16>, vector<16x64xbf16>, vector<16x64xf32> -> vector<16x64xf32>
    %271 = arith.truncf %270 : vector<16x64xf32> to vector<16x64xbf16>
    %c128_88 = arith.constant 128 : index
    %c0_89 = arith.constant 0 : index
    %272 = vector.load %arg3[%c128_88, %c0_89] : memref<384x384xbf16, #tpu.memory_space<vmem>>, vector<64x384xbf16>
    %cst_90 = arith.constant dense<0.000000e+00> : vector<16x384xf32>
    %273 = tpu.matmul %271, %272, %cst_90 {dimension_numbers = #tpu.dot_dimension_numbers<[1], [0], [0], [1], [0, 0, 1, 1], [], []>} : vector<16x64xbf16>, vector<64x384xbf16>, vector<16x384xf32> -> vector<16x384xf32>
    %274 = arith.addf %247, %273 : vector<16x384xf32>
    %275 = vector.extract_strided_slice %26 {offsets = [16, 192], sizes = [16, 64], strides = [1, 1]} : vector<32x1152xf32> to vector<16x64xf32>
    %cst_91 = arith.constant 1.250000e-01 : f32
    %276 = vector.broadcast %cst_91 : f32 to vector<16x64xf32>
    %277 = arith.mulf %275, %276 : vector<16x64xf32>
    %278 = arith.truncf %277 : vector<16x64xf32> to vector<16x64xbf16>
    %279 = vector.extract_strided_slice %26 {offsets = [16, 576], sizes = [16, 64], strides = [1, 1]} : vector<32x1152xf32> to vector<16x64xf32>
    %280 = arith.truncf %279 : vector<16x64xf32> to vector<16x64xbf16>
    %281 = vector.extract_strided_slice %26 {offsets = [16, 960], sizes = [16, 64], strides = [1, 1]} : vector<32x1152xf32> to vector<16x64xf32>
    %282 = arith.truncf %281 : vector<16x64xf32> to vector<16x64xbf16>
    %cst_92 = arith.constant dense<0.000000e+00> : vector<16x16xf32>
    %283 = tpu.matmul %278, %280, %cst_92 {dimension_numbers = #tpu.dot_dimension_numbers<[1], [1], [0], [0], [0, 0, 1, 0], [], []>} : vector<16x64xbf16>, vector<16x64xbf16>, vector<16x16xf32> -> vector<16x16xf32>
    %cst_93 = arith.constant -1.000000e+30 : f32
    %284 = vector.broadcast %cst_93 : f32 to vector<16x16xf32>
    %285 = arith.select %29, %283, %284 : vector<16x16xi1>, vector<16x16xf32>
    %cst_94 = arith.constant dense<0xFF800000> : vector<16xf32>
    %286 = vector.multi_reduction <maximumf>, %285, %cst_94 [1] : vector<16x16xf32> to vector<16xf32>
    %287 = vector.shape_cast %286 : vector<16xf32> to vector<16x1xf32>
    %288 = vector.broadcast %287 : vector<16x1xf32> to vector<16x16xf32>
    %289 = arith.subf %285, %288 : vector<16x16xf32>
    %290 = math.exp %289 : vector<16x16xf32>
    %cst_95 = arith.constant dense<0.000000e+00> : vector<16xf32>
    %291 = vector.multi_reduction <add>, %290, %cst_95 [1] : vector<16x16xf32> to vector<16xf32>
    %292 = vector.shape_cast %291 : vector<16xf32> to vector<16x1xf32>
    %293 = tpu.reciprocal %292 {approx = true} : vector<16x1xf32> -> vector<16x1xf32>
    %294 = vector.broadcast %293 : vector<16x1xf32> to vector<16x16xf32>
    %295 = arith.mulf %290, %294 : vector<16x16xf32>
    %296 = arith.truncf %295 : vector<16x16xf32> to vector<16x16xbf16>
    %cst_96 = arith.constant dense<0.000000e+00> : vector<16x64xf32>
    %297 = tpu.matmul %296, %282, %cst_96 {dimension_numbers = #tpu.dot_dimension_numbers<[1], [0], [0], [1], [0, 0, 1, 1], [], []>} : vector<16x16xbf16>, vector<16x64xbf16>, vector<16x64xf32> -> vector<16x64xf32>
    %298 = arith.truncf %297 : vector<16x64xf32> to vector<16x64xbf16>
    %c192_97 = arith.constant 192 : index
    %c0_98 = arith.constant 0 : index
    %299 = vector.load %arg3[%c192_97, %c0_98] : memref<384x384xbf16, #tpu.memory_space<vmem>>, vector<64x384xbf16>
    %cst_99 = arith.constant dense<0.000000e+00> : vector<16x384xf32>
    %300 = tpu.matmul %298, %299, %cst_99 {dimension_numbers = #tpu.dot_dimension_numbers<[1], [0], [0], [1], [0, 0, 1, 1], [], []>} : vector<16x64xbf16>, vector<64x384xbf16>, vector<16x384xf32> -> vector<16x384xf32>
    %301 = arith.addf %274, %300 : vector<16x384xf32>
    %302 = vector.extract_strided_slice %26 {offsets = [16, 256], sizes = [16, 64], strides = [1, 1]} : vector<32x1152xf32> to vector<16x64xf32>
    %cst_100 = arith.constant 1.250000e-01 : f32
    %303 = vector.broadcast %cst_100 : f32 to vector<16x64xf32>
    %304 = arith.mulf %302, %303 : vector<16x64xf32>
    %305 = arith.truncf %304 : vector<16x64xf32> to vector<16x64xbf16>
    %306 = vector.extract_strided_slice %26 {offsets = [16, 640], sizes = [16, 64], strides = [1, 1]} : vector<32x1152xf32> to vector<16x64xf32>
    %307 = arith.truncf %306 : vector<16x64xf32> to vector<16x64xbf16>
    %308 = vector.extract_strided_slice %26 {offsets = [16, 1024], sizes = [16, 64], strides = [1, 1]} : vector<32x1152xf32> to vector<16x64xf32>
    %309 = arith.truncf %308 : vector<16x64xf32> to vector<16x64xbf16>
    %cst_101 = arith.constant dense<0.000000e+00> : vector<16x16xf32>
    %310 = tpu.matmul %305, %307, %cst_101 {dimension_numbers = #tpu.dot_dimension_numbers<[1], [1], [0], [0], [0, 0, 1, 0], [], []>} : vector<16x64xbf16>, vector<16x64xbf16>, vector<16x16xf32> -> vector<16x16xf32>
    %cst_102 = arith.constant -1.000000e+30 : f32
    %311 = vector.broadcast %cst_102 : f32 to vector<16x16xf32>
    %312 = arith.select %29, %310, %311 : vector<16x16xi1>, vector<16x16xf32>
    %cst_103 = arith.constant dense<0xFF800000> : vector<16xf32>
    %313 = vector.multi_reduction <maximumf>, %312, %cst_103 [1] : vector<16x16xf32> to vector<16xf32>
    %314 = vector.shape_cast %313 : vector<16xf32> to vector<16x1xf32>
    %315 = vector.broadcast %314 : vector<16x1xf32> to vector<16x16xf32>
    %316 = arith.subf %312, %315 : vector<16x16xf32>
    %317 = math.exp %316 : vector<16x16xf32>
    %cst_104 = arith.constant dense<0.000000e+00> : vector<16xf32>
    %318 = vector.multi_reduction <add>, %317, %cst_104 [1] : vector<16x16xf32> to vector<16xf32>
    %319 = vector.shape_cast %318 : vector<16xf32> to vector<16x1xf32>
    %320 = tpu.reciprocal %319 {approx = true} : vector<16x1xf32> -> vector<16x1xf32>
    %321 = vector.broadcast %320 : vector<16x1xf32> to vector<16x16xf32>
    %322 = arith.mulf %317, %321 : vector<16x16xf32>
    %323 = arith.truncf %322 : vector<16x16xf32> to vector<16x16xbf16>
    %cst_105 = arith.constant dense<0.000000e+00> : vector<16x64xf32>
    %324 = tpu.matmul %323, %309, %cst_105 {dimension_numbers = #tpu.dot_dimension_numbers<[1], [0], [0], [1], [0, 0, 1, 1], [], []>} : vector<16x16xbf16>, vector<16x64xbf16>, vector<16x64xf32> -> vector<16x64xf32>
    %325 = arith.truncf %324 : vector<16x64xf32> to vector<16x64xbf16>
    %c256_106 = arith.constant 256 : index
    %c0_107 = arith.constant 0 : index
    %326 = vector.load %arg3[%c256_106, %c0_107] : memref<384x384xbf16, #tpu.memory_space<vmem>>, vector<64x384xbf16>
    %cst_108 = arith.constant dense<0.000000e+00> : vector<16x384xf32>
    %327 = tpu.matmul %325, %326, %cst_108 {dimension_numbers = #tpu.dot_dimension_numbers<[1], [0], [0], [1], [0, 0, 1, 1], [], []>} : vector<16x64xbf16>, vector<64x384xbf16>, vector<16x384xf32> -> vector<16x384xf32>
    %328 = arith.addf %301, %327 : vector<16x384xf32>
    %329 = vector.extract_strided_slice %26 {offsets = [16, 320], sizes = [16, 64], strides = [1, 1]} : vector<32x1152xf32> to vector<16x64xf32>
    %cst_109 = arith.constant 1.250000e-01 : f32
    %330 = vector.broadcast %cst_109 : f32 to vector<16x64xf32>
    %331 = arith.mulf %329, %330 : vector<16x64xf32>
    %332 = arith.truncf %331 : vector<16x64xf32> to vector<16x64xbf16>
    %333 = vector.extract_strided_slice %26 {offsets = [16, 704], sizes = [16, 64], strides = [1, 1]} : vector<32x1152xf32> to vector<16x64xf32>
    %334 = arith.truncf %333 : vector<16x64xf32> to vector<16x64xbf16>
    %335 = vector.extract_strided_slice %26 {offsets = [16, 1088], sizes = [16, 64], strides = [1, 1]} : vector<32x1152xf32> to vector<16x64xf32>
    %336 = arith.truncf %335 : vector<16x64xf32> to vector<16x64xbf16>
    %cst_110 = arith.constant dense<0.000000e+00> : vector<16x16xf32>
    %337 = tpu.matmul %332, %334, %cst_110 {dimension_numbers = #tpu.dot_dimension_numbers<[1], [1], [0], [0], [0, 0, 1, 0], [], []>} : vector<16x64xbf16>, vector<16x64xbf16>, vector<16x16xf32> -> vector<16x16xf32>
    %cst_111 = arith.constant -1.000000e+30 : f32
    %338 = vector.broadcast %cst_111 : f32 to vector<16x16xf32>
    %339 = arith.select %29, %337, %338 : vector<16x16xi1>, vector<16x16xf32>
    %cst_112 = arith.constant dense<0xFF800000> : vector<16xf32>
    %340 = vector.multi_reduction <maximumf>, %339, %cst_112 [1] : vector<16x16xf32> to vector<16xf32>
    %341 = vector.shape_cast %340 : vector<16xf32> to vector<16x1xf32>
    %342 = vector.broadcast %341 : vector<16x1xf32> to vector<16x16xf32>
    %343 = arith.subf %339, %342 : vector<16x16xf32>
    %344 = math.exp %343 : vector<16x16xf32>
    %cst_113 = arith.constant dense<0.000000e+00> : vector<16xf32>
    %345 = vector.multi_reduction <add>, %344, %cst_113 [1] : vector<16x16xf32> to vector<16xf32>
    %346 = vector.shape_cast %345 : vector<16xf32> to vector<16x1xf32>
    %347 = tpu.reciprocal %346 {approx = true} : vector<16x1xf32> -> vector<16x1xf32>
    %348 = vector.broadcast %347 : vector<16x1xf32> to vector<16x16xf32>
    %349 = arith.mulf %344, %348 : vector<16x16xf32>
    %350 = arith.truncf %349 : vector<16x16xf32> to vector<16x16xbf16>
    %cst_114 = arith.constant dense<0.000000e+00> : vector<16x64xf32>
    %351 = tpu.matmul %350, %336, %cst_114 {dimension_numbers = #tpu.dot_dimension_numbers<[1], [0], [0], [1], [0, 0, 1, 1], [], []>} : vector<16x16xbf16>, vector<16x64xbf16>, vector<16x64xf32> -> vector<16x64xf32>
    %352 = arith.truncf %351 : vector<16x64xf32> to vector<16x64xbf16>
    %c320_115 = arith.constant 320 : index
    %c0_116 = arith.constant 0 : index
    %353 = vector.load %arg3[%c320_115, %c0_116] : memref<384x384xbf16, #tpu.memory_space<vmem>>, vector<64x384xbf16>
    %cst_117 = arith.constant dense<0.000000e+00> : vector<16x384xf32>
    %354 = tpu.matmul %352, %353, %cst_117 {dimension_numbers = #tpu.dot_dimension_numbers<[1], [0], [0], [1], [0, 0, 1, 1], [], []>} : vector<16x64xbf16>, vector<64x384xbf16>, vector<16x384xf32> -> vector<16x384xf32>
    %355 = arith.addf %328, %354 : vector<16x384xf32>
    %356 = tpu.concatenate %192, %355 in 0 : vector<16x384xf32>, vector<16x384xf32> -> vector<32x384xf32>
    %357 = arith.addf %1, %356 : vector<32x384xf32>
    %c0_118 = arith.constant 0 : index
    %c0_119 = arith.constant 0 : index
    %358 = vector.load %arg4[%c0_118, %c0_119] : memref<1x384xf32, #tpu.memory_space<vmem>>, vector<1x384xf32>
    %359 = vector.broadcast %358 : vector<1x384xf32> to vector<32x384xf32>
    %360 = arith.addf %357, %359 : vector<32x384xf32>
    %c0_120 = arith.constant 0 : index
    %c0_121 = arith.constant 0 : index
    %361 = vector.load %arg7[%c0_120, %c0_121] : memref<1x384xf32, #tpu.memory_space<vmem>>, vector<1x384xf32>
    %c0_122 = arith.constant 0 : index
    %c0_123 = arith.constant 0 : index
    %362 = vector.load %arg8[%c0_122, %c0_123] : memref<1x384xf32, #tpu.memory_space<vmem>>, vector<1x384xf32>
    %cst_124 = arith.constant dense<0.000000e+00> : vector<32xf32>
    %363 = vector.multi_reduction <add>, %360, %cst_124 [1] : vector<32x384xf32> to vector<32xf32>
    %364 = vector.shape_cast %363 : vector<32xf32> to vector<32x1xf32>
    %cst_125 = arith.constant 3.840000e+02 : f32
    %365 = vector.broadcast %cst_125 : f32 to vector<32x1xf32>
    %366 = arith.divf %364, %365 : vector<32x1xf32>
    %367 = vector.broadcast %366 : vector<32x1xf32> to vector<32x384xf32>
    %368 = arith.subf %360, %367 : vector<32x384xf32>
    %369 = arith.mulf %368, %368 : vector<32x384xf32>
    %cst_126 = arith.constant dense<0.000000e+00> : vector<32xf32>
    %370 = vector.multi_reduction <add>, %369, %cst_126 [1] : vector<32x384xf32> to vector<32xf32>
    %371 = vector.shape_cast %370 : vector<32xf32> to vector<32x1xf32>
    %cst_127 = arith.constant 3.840000e+02 : f32
    %372 = vector.broadcast %cst_127 : f32 to vector<32x1xf32>
    %373 = arith.divf %371, %372 : vector<32x1xf32>
    %cst_128 = arith.constant 9.99999974E-6 : f32
    %374 = vector.broadcast %cst_128 : f32 to vector<32x1xf32>
    %375 = arith.addf %373, %374 : vector<32x1xf32>
    %376 = math.rsqrt %375 : vector<32x1xf32>
    %377 = vector.broadcast %376 : vector<32x1xf32> to vector<32x384xf32>
    %378 = arith.mulf %368, %377 : vector<32x384xf32>
    %379 = vector.broadcast %361 : vector<1x384xf32> to vector<32x384xf32>
    %380 = arith.mulf %378, %379 : vector<32x384xf32>
    %381 = vector.broadcast %362 : vector<1x384xf32> to vector<32x384xf32>
    %382 = arith.addf %380, %381 : vector<32x384xf32>
    %383 = arith.truncf %382 : vector<32x384xf32> to vector<32x384xbf16>
    %c0_129 = arith.constant 0 : index
    %c0_130 = arith.constant 0 : index
    %384 = vector.load %arg9[%c0_129, %c0_130] : memref<384x1536xbf16, #tpu.memory_space<vmem>>, vector<384x1536xbf16>
    %cst_131 = arith.constant dense<0.000000e+00> : vector<32x1536xf32>
    %385 = tpu.matmul %383, %384, %cst_131 {dimension_numbers = #tpu.dot_dimension_numbers<[1], [0], [0], [1], [0, 0, 1, 1], [], []>} : vector<32x384xbf16>, vector<384x1536xbf16>, vector<32x1536xf32> -> vector<32x1536xf32>
    %c0_132 = arith.constant 0 : index
    %c0_133 = arith.constant 0 : index
    %386 = vector.load %arg10[%c0_132, %c0_133] : memref<1x1536xf32, #tpu.memory_space<vmem>>, vector<1x1536xf32>
    %387 = vector.broadcast %386 : vector<1x1536xf32> to vector<32x1536xf32>
    %388 = arith.addf %385, %387 : vector<32x1536xf32>
    %cst_134 = arith.constant 0.000000e+00 : f32
    %389 = vector.broadcast %cst_134 : f32 to vector<32x1536xf32>
    %390 = arith.maximumf %388, %389 : vector<32x1536xf32>
    %391 = arith.truncf %390 : vector<32x1536xf32> to vector<32x1536xbf16>
    %c0_135 = arith.constant 0 : index
    %c0_136 = arith.constant 0 : index
    %392 = vector.load %arg11[%c0_135, %c0_136] : memref<1536x384xbf16, #tpu.memory_space<vmem>>, vector<1536x384xbf16>
    %cst_137 = arith.constant dense<0.000000e+00> : vector<32x384xf32>
    %393 = tpu.matmul %391, %392, %cst_137 {dimension_numbers = #tpu.dot_dimension_numbers<[1], [0], [0], [1], [0, 0, 1, 1], [], []>} : vector<32x1536xbf16>, vector<1536x384xbf16>, vector<32x384xf32> -> vector<32x384xf32>
    %c0_138 = arith.constant 0 : index
    %c0_139 = arith.constant 0 : index
    %394 = vector.load %arg12[%c0_138, %c0_139] : memref<1x384xf32, #tpu.memory_space<vmem>>, vector<1x384xf32>
    %395 = vector.broadcast %394 : vector<1x384xf32> to vector<32x384xf32>
    %396 = arith.addf %393, %395 : vector<32x384xf32>
    %397 = arith.addf %360, %396 : vector<32x384xf32>
    %398 = vector.shape_cast %397 : vector<32x384xf32> to vector<2x16x384xf32>
    %c0_140 = arith.constant 0 : index
    %c0_141 = arith.constant 0 : index
    %c0_142 = arith.constant 0 : index
    %399 = vector.load %arg13[%c0_140, %c0_141, %c0_142] : memref<2x16x384xf32, #tpu.memory_space<vmem>>, vector<2x16x384xf32>
    tpu.vector_store %arg13[%c0_140, %c0_141, %c0_142], %398 {strides = array<i32>} : memref<2x16x384xf32, #tpu.memory_space<vmem>>, vector<2x16x384xf32>,
    return
  }
  func.func @transform_0(%arg0: i32) -> (i32, i32, i32) {
    %c0_i32 = arith.constant 0 : i32
    %c0_i32_0 = arith.constant 0 : i32
    %c0_i32_1 = arith.constant 0 : i32
    return %arg0, %c0_i32, %c0_i32_0 : i32, i32, i32
  }
  func.func @transform_1(%arg0: i32) -> (i32, i32) {
    %c0_i32 = arith.constant 0 : i32
    %c0_i32_0 = arith.constant 0 : i32
    %c0_i32_1 = arith.constant 0 : i32
    return %c0_i32, %c0_i32_0 : i32, i32
  }
  func.func @transform_2(%arg0: i32) -> (i32, i32) {
    %c0_i32 = arith.constant 0 : i32
    %c0_i32_0 = arith.constant 0 : i32
    %c0_i32_1 = arith.constant 0 : i32
    return %c0_i32, %c0_i32_0 : i32, i32
  }
  func.func @transform_3(%arg0: i32) -> (i32, i32) {
    %c0_i32 = arith.constant 0 : i32
    %c0_i32_0 = arith.constant 0 : i32
    %c0_i32_1 = arith.constant 0 : i32
    return %c0_i32, %c0_i32_0 : i32, i32
  }
  func.func @transform_4(%arg0: i32) -> (i32, i32) {
    %c0_i32 = arith.constant 0 : i32
    %c0_i32_0 = arith.constant 0 : i32
    %c0_i32_1 = arith.constant 0 : i32
    return %c0_i32, %c0_i32_0 : i32, i32
  }
  func.func @transform_5(%arg0: i32) -> (i32, i32) {
    %c0_i32 = arith.constant 0 : i32
    %c0_i32_0 = arith.constant 0 : i32
    %c0_i32_1 = arith.constant 0 : i32
    return %c0_i32, %c0_i32_0 : i32, i32
  }
  func.func @transform_6(%arg0: i32) -> (i32, i32) {
    %c0_i32 = arith.constant 0 : i32
    %c0_i32_0 = arith.constant 0 : i32
    %c0_i32_1 = arith.constant 0 : i32
    return %c0_i32, %c0_i32_0 : i32, i32
  }
  func.func @transform_7(%arg0: i32) -> (i32, i32) {
    %c0_i32 = arith.constant 0 : i32
    %c0_i32_0 = arith.constant 0 : i32
    %c0_i32_1 = arith.constant 0 : i32
    return %c0_i32, %c0_i32_0 : i32, i32
  }
  func.func @transform_8(%arg0: i32) -> (i32, i32) {
    %c0_i32 = arith.constant 0 : i32
    %c0_i32_0 = arith.constant 0 : i32
    %c0_i32_1 = arith.constant 0 : i32
    return %c0_i32, %c0_i32_0 : i32, i32
  }
  func.func @transform_9(%arg0: i32) -> (i32, i32) {
    %c0_i32 = arith.constant 0 : i32
    %c0_i32_0 = arith.constant 0 : i32
    %c0_i32_1 = arith.constant 0 : i32
    return %c0_i32, %c0_i32_0 : i32, i32
  }
  func.func @transform_10(%arg0: i32) -> (i32, i32) {
    %c0_i32 = arith.constant 0 : i32
    %c0_i32_0 = arith.constant 0 : i32
    %c0_i32_1 = arith.constant 0 : i32
    return %c0_i32, %c0_i32_0 : i32, i32
  }
  func.func @transform_11(%arg0: i32) -> (i32, i32) {
    %c0_i32 = arith.constant 0 : i32
    %c0_i32_0 = arith.constant 0 : i32
    %c0_i32_1 = arith.constant 0 : i32
    return %c0_i32, %c0_i32_0 : i32, i32
  }
  func.func @transform_12(%arg0: i32) -> (i32, i32, i32) {
    %c0_i32 = arith.constant 0 : i32
    %c0_i32_0 = arith.constant 0 : i32
    %c0_i32_1 = arith.constant 0 : i32
    return %arg0, %c0_i32, %c0_i32_0 : i32, i32, i32
  }
}

</mosaic_0001>

<bundles_post_ra>
// kernel: tpu_custom_call.1
= control target key start
LH: loop header
LB: loop body
LE: loop exit
PB: predicated region body
PF: predicated region fallthrough
CT: control target
= control target key end

     0   :  { %17 = vsyncpa [#allocation3], 0  ;;  %s15420_s0 = inlined_call_operand.hbm [shape: f32[2,16,384], index: 0, kind: input, shape index: {}]   ;;  %s15421_s1 = inlined_call_operand.hbm [shape: bf16[384,1152], index: 1, kind: input, shape index: {}]   ;;  %s15422_s2 = inlined_call_operand.hbm [shape: bf16[384,384], index: 2, kind: input, shape index: {}]   ;;  %s15423_s3 = inlined_call_operand.hbm [shape: f32[1,384], index: 3, kind: input, shape index: {}]   ;;  %s15424_s4 = inlined_call_operand.hbm [shape: f32[1,384], index: 4, kind: input, shape index: {}]   ;;  %s15425_s5 = inlined_call_operand.hbm [shape: f32[1,384], index: 5, kind: input, shape index: {}]   ;;  %s15426_s6 = inlined_call_operand.hbm [shape: f32[1,384], index: 6, kind: input, shape index: {}]   ;;  %s15427_s7 = inlined_call_operand.hbm [shape: f32[1,384], index: 7, kind: input, shape index: {}]   ;;  %s15428_s8 = inlined_call_operand.hbm [shape: bf16[384,1536], index: 8, kind: input, shape index: {}]   ;;  %s15429_s9 = inlined_call_operand.hbm [shape: f32[1,1536], index: 9, kind: input, shape index: {}]   ;;  %s15430_s10 = inlined_call_operand.hbm [shape: bf16[1536,384], index: 10, kind: input, shape index: {}]   ;;  %s15431_s11 = inlined_call_operand.hbm [shape: f32[1,384], index: 11, kind: input, shape index: {}]   ;;  %s15432_s12 = inlined_call_operand.hbm [shape: f32[2,16,384], index: 12, kind: output, shape index: {}]  }
   0x1   :  { %18 = vsyncpa [#allocation6], 0 }
   0x2   :  { %19 = vsyncpa [#allocation9], 0 }
   0x3   :  { %20 = vsyncpa [#allocation12], 0 }
   0x4   :  { %21 = vsyncpa [#allocation15], 0 }
   0x5   :  { %22 = vsyncpa [#allocation18], 0 }
   0x6   :  { %23 = vsyncpa [#allocation21], 0 }
   0x7   :  { %24 = vsyncpa [#allocation4], 0  ;;  %s13794_s21 = smov [#allocation5]  }
   0x8   :  { %s42_s22 = sshll.u32 %s13794_s21, 4  ;;  %s43_s22 = int_to_ptr.vmem [resolvable:$true] %s42_s22 }
   0x9   :  { %s13526_s23 = scalar_lea.vmem %s43_s22, 27648  ;;  %p13531_p1 = scmp.lt.s32.totalorder %s43_s22, %s43_s22 }
   0xa   :  { %p13527_p0 = scmp.ne.s32.totalorder %s43_s22, %s13526_s23  ;;  %p13532_p2 = scmp.lt.s32.totalorder %s13526_s23, %s13526_s23 }
   0xc   :  { %p13533_p3 = por %p13532_p2, %p13531_p1 }
   0xe   :  { %p13534_p4 = pnand %p13533_p3, %p13527_p0 }
  0x10   :  { %13537 = shalt.err (!%p13534_p4)
}
  0x11   :  { %s13795_s24 = smov 576   ;;  %s13796_s25 = smov 36  }
  0x12   :  { %48 = dma.hbm_to_vmem [thread:$0]  %s15421_s1, 27648, %s43_s22, [#allocation6], %s13795_s24, %s13795_s24, %s13796_s25  }
  0x13   :  { %s13797_s28 = smov [#allocation8]   ;;  %s13798_s30 = smov [#allocation11]  }
  0x14   :  { %s67_s29 = sshll.u32 %s13797_s28, 4  ;;  %s87_s13 = sshll.u32 %s13798_s30, 4  ;;  %s68_s29 = int_to_ptr.vmem [resolvable:$true] %s67_s29  ;;  %s88_s13 = int_to_ptr.vmem [resolvable:$true] %s87_s13 }
  0x15   :  { %s13546_s14 = scalar_lea.vmem %s68_s29, 48  ;;  %s13550_s15 = scalar_lea.vmem %s68_s29, 64 }
  0x16   :  { %p13547_p5 = scmp.ne.s32.totalorder %s68_s29, %s13546_s14  ;;  %p13551_p6 = scmp.lt.s32.totalorder %s68_s29, %s68_s29 }
  0x17   :  { %p13552_p7 = scmp.lt.s32.totalorder %s13550_s15, %s13546_s14 }
  0x19   :  { %p13553_p8 = por %p13552_p7, %p13551_p6 }
  0x1b   :  { %p13554_p9 = pnand %p13553_p8, %p13547_p5 }
  0x1d   :  { %13557 = shalt.err (!%p13554_p9)
}
  0x1e   :  { %70 = dma.hbm_to_vmem [thread:$0]  %s15423_s3, 48, %s68_s29, [#allocation9]  }
  0x1f   :  { %s13566_s18 = scalar_lea.vmem %s88_s13, 48  ;;  %s13570_s1 = scalar_lea.vmem %s88_s13, 64 }
  0x20   :  { %p13567_p10 = scmp.ne.s32.totalorder %s88_s13, %s13566_s18  ;;  %p13571_p11 = scmp.lt.s32.totalorder %s88_s13, %s88_s13 }
  0x21   :  { %p13572_p12 = scmp.lt.s32.totalorder %s13570_s1, %s13566_s18 }
  0x23   :  { %p13573_p13 = por %p13572_p12, %p13571_p11 }
  0x25   :  { %p13574_p0 = pnand %p13573_p13, %p13567_p10 }
  0x27   :  { %13577 = shalt.err (!%p13574_p0)
}
  0x28   :  { %90 = dma.hbm_to_vmem [thread:$0]  %s15425_s5, 48, %s88_s13, [#allocation12]  }
  0x29   :  { %s13799_s21 = smov [#allocation14]   ;;  %s13800_s23 = smov [#allocation17]  }
  0x2a   :  { %s107_s22 = sshll.u32 %s13799_s21, 4  ;;  %s129_s24 = sshll.u32 %s13800_s23, 4  ;;  %s108_s22 = int_to_ptr.vmem [resolvable:$true] %s107_s22  ;;  %s130_s24 = int_to_ptr.vmem [resolvable:$true] %s129_s24 }
  0x2b   :  { %s13586_s25 = scalar_lea.vmem %s108_s22, 48  ;;  %s13590_s3 = scalar_lea.vmem %s108_s22, 64 }
  0x2c   :  { %p13587_p1 = scmp.ne.s32.totalorder %s108_s22, %s13586_s25  ;;  %p13591_p2 = scmp.lt.s32.totalorder %s108_s22, %s108_s22 }
  0x2d   :  { %p13592_p3 = scmp.lt.s32.totalorder %s13590_s3, %s13586_s25 }
  0x2f   :  { %p13593_p4 = por %p13592_p3, %p13591_p2 }
  0x31   :  { %p13594_p5 = pnand %p13593_p4, %p13587_p1 }
  0x33   :  { %13597 = shalt.err (!%p13594_p5)
}
  0x34   :  { %110 = dma.hbm_to_vmem [thread:$0]  %s15427_s7, 48, %s108_s22, [#allocation15]  }
  0x35   :  { %s13606_s28 = scalar_lea.vmem %s130_s24, 192  ;;  %p13611_p7 = scmp.lt.s32.totalorder %s130_s24, %s130_s24 }
  0x36   :  { %p13607_p6 = scmp.ne.s32.totalorder %s130_s24, %s13606_s28  ;;  %p13612_p8 = scmp.lt.s32.totalorder %s13606_s28, %s13606_s28 }
  0x38   :  { %p13613_p9 = por %p13612_p8, %p13611_p7 }
  0x3a   :  { %p13614_p10 = pnand %p13613_p9, %p13607_p6 }
  0x3c   :  { %13617 = shalt.err (!%p13614_p10)
}
  0x3d   :  { %132 = dma.hbm_to_vmem [thread:$0]  %s15429_s9, 192, %s130_s24, [#allocation18]  }
  0x3e   :  { %s13801_s30 = smov [#allocation2]  }
  0x3f   :  { %s30_s13 = sshll.u32 %s13801_s30, 4  ;;  %s31_s13 = int_to_ptr.vmem [resolvable:$true] %s30_s13 }
  0x40   :  { %s13626_s14 = scalar_lea.vmem %s31_s13, 1536  ;;  %p13631_p12 = scmp.lt.s32.totalorder %s31_s13, %s31_s13 }
  0x41   :  { %p13627_p11 = scmp.ne.s32.totalorder %s31_s13, %s13626_s14  ;;  %p13632_p13 = scmp.lt.s32.totalorder %s13626_s14, %s13626_s14 }
  0x43   :  { %p13633_p0 = por %p13632_p13, %p13631_p12 }
  0x45   :  { %p13634_p1 = pnand %p13633_p0, %p13627_p11 }
  0x47   :  { %13637 = shalt.err (!%p13634_p1)
}
  0x48   :  { %s13802_s7 = smov 384   ;;  %s13803_s15 = smov 24  }
  0x49   :  { %36 = dma.hbm_to_vmem [thread:$0]  %s15420_s0, 1536, %s31_s13, [#allocation3], %s13802_s7, %s13802_s7, %s13803_s15  }
  0x4a   :  { %s13804_s9 = smov [#allocation7]  }
  0x4b   :  { %s54_s18 = sshll.u32 %s13804_s9, 4  ;;  %s55_s18 = int_to_ptr.vmem [resolvable:$true] %s54_s18 }
  0x4c   :  { %s13646_s1 = scalar_lea.vmem %s55_s18, 9216  ;;  %p13651_p3 = scmp.lt.s32.totalorder %s55_s18, %s55_s18 }
  0x4d   :  { %p13647_p2 = scmp.ne.s32.totalorder %s55_s18, %s13646_s1  ;;  %p13652_p4 = scmp.lt.s32.totalorder %s13646_s1, %s13646_s1 }
  0x4f   :  { %p13653_p5 = por %p13652_p4, %p13651_p3 }
  0x51   :  { %p13654_p6 = pnand %p13653_p5, %p13647_p2 }
  0x53   :  { %13657 = shalt.err (!%p13654_p6)
}
  0x54   :  { %s13805_s19 = smov 192   ;;  %s13806_s20 = smov 12  }
  0x55   :  { %60 = dma.hbm_to_vmem [thread:$0]  %s15422_s2, 9216, %s55_s18, [#allocation6], %s13805_s19, %s13805_s19, %s13806_s20  }
  0x56   :  { %s13807_s0 = smov [#allocation10]   ;;  %s13808_s24 = smov [#allocation13]  }
  0x57   :  { %s77_s23 = sshll.u32 %s13807_s0, 4  ;;  %s97_s25 = sshll.u32 %s13808_s24, 4  ;;  %s78_s23 = int_to_ptr.vmem [resolvable:$true] %s77_s23  ;;  %s98_s25 = int_to_ptr.vmem [resolvable:$true] %s97_s25 }
  0x58   :  { %s13666_s3 = scalar_lea.vmem %s78_s23, 48  ;;  %s13670_s26 = scalar_lea.vmem %s78_s23, 64 }
  0x59   :  { %p13667_p7 = scmp.ne.s32.totalorder %s78_s23, %s13666_s3  ;;  %p13671_p8 = scmp.lt.s32.totalorder %s78_s23, %s78_s23 }
  0x5a   :  { %p13672_p9 = scmp.lt.s32.totalorder %s13670_s26, %s13666_s3 }
  0x5c   :  { %p13673_p10 = por %p13672_p9, %p13671_p8 }
  0x5e   :  { %p13674_p11 = pnand %p13673_p10, %p13667_p7 }
  0x60   :  { %13677 = shalt.err (!%p13674_p11)
}
  0x61   :  { %80 = dma.hbm_to_vmem [thread:$0]  %s15424_s4, 48, %s78_s23, [#allocation9]  }
  0x62   :  { %s13686_s5 = scalar_lea.vmem %s98_s25, 48  ;;  %s13690_s2 = scalar_lea.vmem %s98_s25, 64 }
  0x63   :  { %p13687_p12 = scmp.ne.s32.totalorder %s98_s25, %s13686_s5  ;;  %p13691_p13 = scmp.lt.s32.totalorder %s98_s25, %s98_s25 }
  0x64   :  { %p13692_p0 = scmp.lt.s32.totalorder %s13690_s2, %s13686_s5 }
  0x66   :  { %p13693_p1 = por %p13692_p0, %p13691_p13 }
  0x68   :  { %p13694_p2 = pnand %p13693_p1, %p13687_p12 }
  0x6a   :  { %13697 = shalt.err (!%p13694_p2)
}
  0x6b   :  { %100 = dma.hbm_to_vmem [thread:$0]  %s15426_s6, 48, %s98_s25, [#allocation12]  }
  0x6c   :  { %s13809_s13 = smov [#allocation16]  }
  0x6d   :  { %s116_s14 = sshll.u32 %s13809_s13, 4  ;;  %s117_s14 = int_to_ptr.vmem [resolvable:$true] %s116_s14 }
  0x6e   :  { %s13706_s16 = scalar_lea.vmem %s117_s14, 36864  ;;  %p13711_p4 = scmp.lt.s32.totalorder %s117_s14, %s117_s14 }
  0x6f   :  { %p13707_p3 = scmp.ne.s32.totalorder %s117_s14, %s13706_s16  ;;  %p13712_p5 = scmp.lt.s32.totalorder %s13706_s16, %s13706_s16 }
  0x71   :  { %p13713_p6 = por %p13712_p5, %p13711_p4 }
  0x73   :  { %p13714_p7 = pnand %p13713_p6, %p13707_p3 }
  0x75   :  { %13717 = shalt.err (!%p13714_p7)
}
  0x76   :  { %s13810_s4 = smov 768   ;;  %s13811_s17 = smov 48  }
  0x77   :  { %122 = dma.hbm_to_vmem [thread:$0]  %s15428_s8, 36864, %s117_s14, [#allocation15], %s13810_s4, %s13810_s4, %s13811_s17  }
  0x78   :  { %s13812_s1 = smov [#allocation19]   ;;  %s13813_s22 = smov [#allocation20]  }
  0x79   :  { %s138_s21 = sshll.u32 %s13812_s1, 4  ;;  %s151_s6 = sshll.u32 %s13813_s22, 4  ;;  %s139_s21 = int_to_ptr.vmem [resolvable:$true] %s138_s21  ;;  %s152_s6 = int_to_ptr.vmem [resolvable:$true] %s151_s6 }
  0x7a   :  { %s13726_s0 = scalar_lea.vmem %s139_s21, 36864  ;;  %p13731_p9 = scmp.lt.s32.totalorder %s139_s21, %s139_s21 }
  0x7b   :  { %p13727_p8 = scmp.ne.s32.totalorder %s139_s21, %s13726_s0  ;;  %p13732_p10 = scmp.lt.s32.totalorder %s13726_s0, %s13726_s0 }
  0x7d   :  { %p13733_p11 = por %p13732_p10, %p13731_p9 }
  0x7f   :  { %p13734_p12 = pnand %p13733_p11, %p13727_p8 }
  0x81   :  { %13737 = shalt.err (!%p13734_p12)
}
  0x82   :  { %144 = dma.hbm_to_vmem [thread:$0]  %s15430_s10, 36864, %s139_s21, [#allocation18], %s13805_s19, %s13805_s19, %s13806_s20  }
  0x83   :  { %s13746_s8 = scalar_lea.vmem %s152_s6, 48  ;;  %s13750_s25 = scalar_lea.vmem %s152_s6, 64 }
  0x84   :  { %p13747_p13 = scmp.ne.s32.totalorder %s152_s6, %s13746_s8  ;;  %p13751_p0 = scmp.lt.s32.totalorder %s152_s6, %s152_s6 }
  0x85   :  { %p13752_p1 = scmp.lt.s32.totalorder %s13750_s25, %s13746_s8 }
  0x87   :  { %p13753_p2 = por %p13752_p1, %p13751_p0 }
  0x89   :  { %p13754_p3 = pnand %p13753_p2, %p13747_p13 }
  0x8b   :  { %13757 = shalt.err (!%p13754_p3)
}
  0x8c   :  { %154 = dma.hbm_to_vmem [thread:$0]  %s15431_s11, 48, %s152_s6, [#allocation21]  }
  0x8d   :  { %13778 = dma.done.wait [#allocation3], 1536  }
  0x8e   :  { %13779 = vsyncadd [#allocation3], 4294965760 }
  0x8f   :  { %13780 = dma.done.wait [#allocation6], 36864  }
  0x90   :  { %13781 = vsyncadd [#allocation6], 4294930432 }
  0x91   :  { %13782 = dma.done.wait [#allocation9], 96  }
  0x92   :  { %13783 = vsyncadd [#allocation9], 4294967200 }
  0x93   :  { %13784 = dma.done.wait [#allocation12], 96  }
  0x94   :  { %13785 = vsyncadd [#allocation12], 4294967200 }
  0x95   :  { %13786 = dma.done.wait [#allocation15], 36912  }
  0x96   :  { %13787 = vsyncadd [#allocation15], 4294930384 }
  0x97   :  { %13788 = dma.done.wait [#allocation18], 37056  }
  0x98   :  { %13789 = vsyncadd [#allocation18], 4294930240 }
  0x99   :  { %13790 = dma.done.wait [#allocation21], 48  }
  0x9a   :  { %13791 = vsyncadd [#allocation21], 4294967248  ;;  %v13929_v0 = vld [vmem:[#allocation2] sm:$0xff]  ;;  %v13931_v1 = vld [vmem:[#allocation2 + $0x8] sm:$0xff]  ;;  %vm13816_vm0 = vmmov 0   ;;  %s13817_s10 = smov 64  }
  0x9b   :  { %v13933_v2 = vld [vmem:[#allocation2 + $0x10] sm:$0xff]  ;;  %v206_v3 = vadd.f32 %v13931_v1, %v13929_v0  ;;  %v13939_v5 = vld [vmem:[#allocation2 + $0x38] sm:$0xff]  ;;  %v13941_v6 = vld [vmem:[#allocation2 + $0x40] sm:$0xff]  ;;  %vm2231_vm1 = vcmask 523264   ;;  %vm2281_vm3 = vcmask 130048   ;;  %s13818_s11 = smov [#allocation22]  }
  0x9c   :  { %v13937_v4 = vld [vmem:[#allocation2 + $0x30] sm:$0xff]  ;;  %v13945_v8 = vld [vmem:[#allocation2 + $0x18] sm:$0xff]  ;;  %v13947_v9 = vld [vmem:[#allocation2 + $0x20] sm:$0xff]  ;;  %s10561_s19 = sshll.u32 %s13818_s11, 4  ;;  %s10562_s19 = int_to_ptr.vmem [resolvable:$true] %s10561_s19 }
  0x9d   :  { %v214_v7 = vadd.f32 %v13939_v5, %v13937_v4  ;;  %v13949_v10 = vld [vmem:[#allocation2 + $0x28] sm:$0xff]  ;;  %v207_v11 = vadd.f32 %v206_v3, %v13933_v2  ;;  %v210_v12 = vadd.f32 %v13947_v9, %v13945_v8  ;;  %v13956_v14 = vld [vmem:[#allocation2 + $0x50] sm:$0xff]  ;;  %v13958_v15 = vld [vmem:[#allocation2 + $0x58] sm:$0xff]  ;;  %s13758_s20 = scalar_lea.vmem %s10562_s19, 1536  ;;  %p13763_p5 = scmp.lt.s32.totalorder %s10562_s19, %s10562_s19 }
  0x9e   :  { %v13954_v13 = vld [vmem:[#allocation2 + $0x48] sm:$0xff]  ;;  %v12138_v20 = vld [vmem:[#allocation5 + $0x1fc] ss:$36 sps:$4 sm:$0xff]   ;;  %v12141_v22 = vld [vmem:[#allocation5 + $0x1b4] ss:$36 sps:$4 sm:$0xff]   ;;  %p13759_p4 = scmp.ne.s32.totalorder %s10562_s19, %s13758_s20  ;;  %p13764_p6 = scmp.lt.s32.totalorder %s13758_s20, %s13758_s20 }
  0x9f   :  { %v215_v16 = vadd.f32 %v214_v7, %v13941_v6  ;;  %v218_v17 = vadd.f32 %v13956_v14, %v13954_v13  ;;  %208 = vadd.xlane.f32.xlu0 %v207_v11  ;;  %v211_v18 = vadd.f32 %v210_v12, %v13949_v10  ;;  %v12140_v21 = vld [vmem:[#allocation5 + $0x1f8] ss:$36 sps:$4 sm:$0xff]   ;;  %1697 = vmatprep.subr.bf16.mxu0 %v12138_v20  ;;  %v12143_v23 = vld [vmem:[#allocation5 + $0x1b0] ss:$36 sps:$4 sm:$0xff]   ;;  %v12146_v25 = vld [vmem:[#allocation5 + $0x168] ss:$36 sps:$4 sm:$0xff]  }
  0xa0   :  { %1698 = vmatpush1.bf16.msra.mxu0 %v12140_v21  ;;  %v12144_v24 = vld [vmem:[#allocation5 + $0x16c] ss:$36 sps:$4 sm:$0xff]   ;;  %v12162_v26 = vld [vmem:[#allocation5 + $0x67c] ss:$36 sps:$4 sm:$0xff]   ;;  %v12147_v27 = vld [vmem:[#allocation5 + $0x124] ss:$36 sps:$4 sm:$0xff]   ;;  %p13765_p7 = por %p13764_p6, %p13763_p5 }
  0xa1   :  { %216 = vadd.xlane.f32.xlu1 %v215_v16  ;;  %v219_v19 = vadd.f32 %v218_v17, %v13958_v15  ;;  %1699 = vmatprep.subr.bf16.mxu0 %v12141_v22  ;;  %v12166_v28 = vld [vmem:[#allocation5 + $0x678] ss:$36 sps:$4 sm:$0xff]   ;;  %v12149_v29 = vld [vmem:[#allocation5 + $0x120] ss:$36 sps:$4 sm:$0xff]   ;;  %v12155_v33 = vld [vmem:[#allocation5 + $0x90] ss:$36 sps:$4 sm:$0xff]  }
  0xa2   :  { %1750 = vmatprep.subr.bf16.mxu1 %v12162_v26  ;;  %v12150_v30 = vld [vmem:[#allocation5 + $0xdc] ss:$36 sps:$4 sm:$0xff]   ;;  %v12153_v32 = vld [vmem:[#allocation5 + $0x94] ss:$36 sps:$4 sm:$0xff]   ;;  %v12156_v34 = vld [vmem:[#allocation5 + $0x4c] ss:$36 sps:$4 sm:$0xff]   ;;  %p13766_p8 = pnand %p13765_p7, %p13759_p4 }
  0xa3   :  { %212 = vadd.xlane.f32.xlu0 %v211_v18  ;;  %1751 = vmatpush1.bf16.msra.mxu1 %v12166_v28  ;;  %v12152_v31 = vld [vmem:[#allocation5 + $0xd8] ss:$36 sps:$4 sm:$0xff]   ;;  %v12158_v35 = vld [vmem:[#allocation5 + $0x48] ss:$36 sps:$4 sm:$0xff]   ;;  %v12161_v37 = vld [vmem:[#allocation5] ss:$36 sps:$4 sm:$0xff]  }
  0xa4   :  { %1700 = vmatpush1.bf16.msra.mxu0 %v12143_v23  ;;  %v12159_v36 = vld [vmem:[#allocation5 + $0x4] ss:$36 sps:$4 sm:$0xff]   ;;  %v12164_v38 = vld [vmem:[#allocation5 + $0x43c] ss:$36 sps:$4 sm:$0xff]   ;;  %v12168_v16 = vld [vmem:[#allocation5 + $0x634] ss:$36 sps:$4 sm:$0xff]  }
  0xa5   :  { %220 = vadd.xlane.f32.xlu1 %v219_v19  ;;  %1701 = vmatprep.subr.bf16.mxu0 %v12144_v24  ;;  %v12167_v39 = vld [vmem:[#allocation5 + $0x438] ss:$36 sps:$4 sm:$0xff]   ;;  %v12172_v18 = vld [vmem:[#allocation5 + $0x630] ss:$36 sps:$4 sm:$0xff]   ;;  %v12178_v22 = vld [vmem:[#allocation5 + $0x5e8] ss:$36 sps:$4 sm:$0xff]  }
  0xa6   :  { %v12170_v17 = vld [vmem:[#allocation5 + $0x3f4] ss:$36 sps:$4 sm:$0xff]   ;;  %1752 = vmatprep.subr.bf16.mxu1 %v12168_v16  ;;  %v12174_v20 = vld [vmem:[#allocation5 + $0x5ec] ss:$36 sps:$4 sm:$0xff]   ;;  %v12180_v24 = vld [vmem:[#allocation5 + $0x5a4] ss:$36 sps:$4 sm:$0xff]  }
  0xa7   :  { %v12173_v19 = vld [vmem:[#allocation5 + $0x3f0] ss:$36 sps:$4 sm:$0xff]   ;;  %1753 = vmatpush1.bf16.msra.mxu1 %v12172_v18  ;;  %v12179_v23 = vld [vmem:[#allocation5 + $0x3a8] ss:$36 sps:$4 sm:$0xff]   ;;  %v12184_v26 = vld [vmem:[#allocation5 + $0x5a0] ss:$36 sps:$4 sm:$0xff]  }
  0xa8   :  { %1702 = vmatpush1.bf16.msra.mxu0 %v12146_v25  ;;  %v12176_v21 = vld [vmem:[#allocation5 + $0x3ac] ss:$36 sps:$4 sm:$0xff]   ;;  %1754 = vmatprep.subr.bf16.mxu1 %v12174_v20  ;;  %v12182_v25 = vld [vmem:[#allocation5 + $0x364] ss:$36 sps:$4 sm:$0xff]   ;;  %v12186_v28 = vld [vmem:[#allocation5 + $0x55c] ss:$36 sps:$4 sm:$0xff]  }
  0xa9   :  { %1703 = vmatprep.subr.bf16.mxu0 %v12147_v27  ;;  %v12185_v27 = vld [vmem:[#allocation5 + $0x360] ss:$36 sps:$4 sm:$0xff]  }
  0xab   :  { %1755 = vmatpush1.bf16.msra.mxu1 %v12178_v22 }
  0xac   :  { %1704 = vmatpush1.bf16.msra.mxu0 %v12149_v29  ;;  %1756 = vmatprep.subr.bf16.mxu1 %v12180_v24  ;;  %v12188_v29 = vld [vmem:[#allocation5 + $0x31c] ss:$36 sps:$4 sm:$0xff]  }
  0xad   :  { %1705 = vmatprep.subr.bf16.mxu0 %v12150_v30  ;;  %v12190_v30 = vld [vmem:[#allocation5 + $0x558] ss:$36 sps:$4 sm:$0xff]  }
  0xaf   :  { %1757 = vmatpush1.bf16.msra.mxu1 %v12184_v26 }
  0xb0   :  { %1706 = vmatpush1.bf16.msra.mxu0 %v12152_v31  ;;  %v12191_v31 = vld [vmem:[#allocation5 + $0x318] ss:$36 sps:$4 sm:$0xff]   ;;  %1758 = vmatprep.subr.bf16.mxu1 %v12186_v28 }
  0xb1   :  { %1707 = vmatprep.subr.bf16.mxu0 %v12153_v32  ;;  %v12192_v32 = vld [vmem:[#allocation5 + $0x514] ss:$36 sps:$4 sm:$0xff]  }
  0xb3   :  { %1759 = vmatpush1.bf16.msra.mxu1 %v12190_v30 }
  0xb4   :  { %1708 = vmatpush1.bf16.msra.mxu0 %v12155_v33  ;;  %v12194_v33 = vld [vmem:[#allocation5 + $0x2d4] ss:$36 sps:$4 sm:$0xff]   ;;  %1760 = vmatprep.subr.bf16.mxu1 %v12192_v32 }
  0xb5   :  { %1709 = vmatprep.subr.bf16.mxu0 %v12156_v34  ;;  %v12196_v34 = vld [vmem:[#allocation5 + $0x510] ss:$36 sps:$4 sm:$0xff]  }
  0xb7   :  { %1761 = vmatpush1.bf16.msra.mxu1 %v12196_v34 }
  0xb8   :  { %1710 = vmatpush1.bf16.msra.mxu0 %v12158_v35  ;;  %v12197_v35 = vld [vmem:[#allocation5 + $0x2d0] ss:$36 sps:$4 sm:$0xff]  }
  0xb9   :  { %1711 = vmatprep.subr.bf16.mxu0 %v12159_v36  ;;  %v12198_v36 = vld [vmem:[#allocation5 + $0x4cc] ss:$36 sps:$4 sm:$0xff]  }
  0xba   :  { %1762 = vmatprep.subr.bf16.mxu1 %v12198_v36 }
  0xbc   :  { %1712 = vmatpush1.bf16.msra.mxu0 %v12161_v37  ;;  %v12200_v37 = vld [vmem:[#allocation5 + $0x28c] ss:$36 sps:$4 sm:$0xff]  }
  0xbd   :  { %1713 = vmatprep.subr.bf16.mxu0 %v12164_v38  ;;  %v12202_v38 = vld [vmem:[#allocation5 + $0x4c8] ss:$36 sps:$4 sm:$0xff]  }
  0xbe   :  { %1763 = vmatpush1.bf16.msra.mxu1 %v12202_v38 }
  0xc0   :  { %1714 = vmatpush2.bf16.msra.mxu0 %v12167_v39  ;;  %v12203_v39 = vld [vmem:[#allocation5 + $0x288] ss:$36 sps:$4 sm:$0xff]  }
  0xc1   :  { %1715 = vmatprep.subr.bf16.mxu0 %v12170_v17 }
  0xc4   :  { %1716 = vmatpush2.bf16.msra.mxu0 %v12173_v19 }
  0xc5   :  { %1717 = vmatprep.subr.bf16.mxu0 %v12176_v21 }
  0xc8   :  { %1718 = vmatpush2.bf16.msra.mxu0 %v12179_v23 }
  0xc9   :  { %1719 = vmatprep.subr.bf16.mxu0 %v12182_v25 }
  0xcc   :  { %1720 = vmatpush2.bf16.msra.mxu0 %v12185_v27 }
  0xcd   :  { %1721 = vmatprep.subr.bf16.mxu0 %v12188_v29 }
  0xd0   :  { %1722 = vmatpush2.bf16.msra.mxu0 %v12191_v31 }
  0xd1   :  { %1723 = vmatprep.subr.bf16.mxu0 %v12194_v33 }
  0xd4   :  { %1724 = vmatpush2.bf16.msra.mxu0 %v12197_v35 }
  0xd5   :  { %1725 = vmatprep.subr.bf16.mxu0 %v12200_v37 }
  0xd8   :  { %1726 = vmatpush2.bf16.msra.mxu0 %v12203_v39  ;;  %v12210_v39 = vld [vmem:[#allocation5 + $0x200] ss:$36 sps:$4 sm:$0xff]  }
 0x128   :  { %v209_v40 = vpop.xlane.xlu0 %208 }
 0x129   :  { %v223_v41 = vmul.f32 0.0026041667, %v209_v40  ;;  %v12204_v40 = vld [vmem:[#allocation5 + $0x484] ss:$36 sps:$4 sm:$0xff]  }
 0x12a   :  { %v217_v42 = vpop.xlane.xlu1 %216  ;;  %1764 = vmatprep.subr.bf16.mxu1 %v12204_v40  ;;  %v12213_v40 = vld [vmem:[#allocation5 + $0x680] ss:$36 sps:$4 sm:$0xff]  }
 0x12b   :  { %v225_v43 = vmul.f32 0.0026041667, %v217_v42  ;;  %v13966_v44 = vsub.f32 %v13929_v0, %v223_v41  ;;  %v13969_v45 = vsub.f32 %v13931_v1, %v223_v41  ;;  %v13972_v46 = vsub.f32 %v13933_v2, %v223_v41  ;;  %v12206_v42 = vld [vmem:[#allocation5 + $0x244] ss:$36 sps:$4 sm:$0xff]  }
 0x12c   :  { %v213_v50 = vpop.xlane.xlu0 %212  ;;  %v15437_v41 = vmov 0   ;;  %1727 = vmatprep.subr.bf16.mxu0 %v12206_v42 }
 0x12d   :  { %v13975_v47 = vsub.f32 %v13937_v4, %v225_v43  ;;  %v13978_v48 = vsub.f32 %v13939_v5, %v225_v43  ;;  %v13981_v49 = vsub.f32 %v13941_v6, %v225_v43  ;;  %v224_v51 = vmul.f32 0.0026041667, %v213_v50  ;;  %1782 = vmatprep.mubr.bf16.mxu1 %v15437_v41  ;;  %v12208_v43 = vld [vmem:[#allocation5 + $0x480] ss:$36 sps:$4 sm:$0xff]  }
 0x12e   :  { %v221_v52 = vpop.xlane.xlu1 %220  ;;  %v239_v53 = vmul.f32 %v13966_v44, %v13966_v44  ;;  %v240_v54 = vmul.f32 %v13969_v45, %v13969_v45  ;;  %v241_v55 = vmul.f32 %v13972_v46, %v13972_v46  ;;  %v12209_v50 = vld [vmem:[#allocation5 + $0x240] ss:$36 sps:$4 sm:$0xff]   ;;  %1765 = vmatpush1.bf16.msra.mxu1 %v12208_v43 }
 0x12f   :  { %v226_v56 = vmul.f32 0.0026041667, %v221_v52  ;;  %v245_v57 = vmul.f32 %v13975_v47, %v13975_v47  ;;  %v246_v58 = vmul.f32 %v13978_v48, %v13978_v48  ;;  %v247_v59 = vmul.f32 %v13981_v49, %v13981_v49  ;;  %1728 = vmatpush2.bf16.msra.mxu0 %v12209_v50  ;;  %v12215_v52 = vld [vmem:[#allocation5 + $0x684] ss:$36 sps:$4 sm:$0xff]  }
 0x130   :  { %v13996_v60 = vsub.f32 %v13945_v8, %v224_v51  ;;  %v13999_v61 = vsub.f32 %v13947_v9, %v224_v51  ;;  %v14002_v62 = vsub.f32 %v13949_v10, %v224_v51  ;;  %v251_v63 = vadd.f32 %v240_v54, %v239_v53  ;;  %v12212_v51 = vld [vmem:[#allocation5 + $0x204] ss:$36 sps:$4 sm:$0xff]   ;;  %1856 = vmatprep.subr.bf16.mxu0 %v12215_v52 }
 0x131   :  { %v14005_v0 = vsub.f32 %v13954_v13, %v226_v56  ;;  %v14008_v1 = vsub.f32 %v13956_v14, %v226_v56  ;;  %v14011_v2 = vsub.f32 %v13958_v15, %v226_v56  ;;  %v259_v3 = vadd.f32 %v246_v58, %v245_v57  ;;  %1803 = vmatprep.subr.bf16.mxu1 %v12212_v51 }
 0x132   :  { %v252_v4 = vadd.f32 %v251_v63, %v241_v55  ;;  %v242_v5 = vmul.f32 %v13996_v60, %v13996_v60  ;;  %v243_v6 = vmul.f32 %v13999_v61, %v13999_v61  ;;  %v244_v10 = vmul.f32 %v14002_v62, %v14002_v62 }
 0x133   :  { %v248_v7 = vmul.f32 %v14005_v0, %v14005_v0  ;;  %v249_v8 = vmul.f32 %v14008_v1, %v14008_v1  ;;  %v260_v9 = vadd.f32 %v259_v3, %v247_v59  ;;  %v250_v12 = vmul.f32 %v14011_v2, %v14011_v2 }
 0x134   :  { %253 = vadd.xlane.f32.xlu0 %v252_v4  ;;  %v255_v11 = vadd.f32 %v243_v6, %v242_v5  ;;  %v292_v63 = vlaneseq }
 0x135   :  { %v263_v13 = vadd.f32 %v249_v8, %v248_v7 }
 0x136   :  { %v256_v14 = vadd.f32 %v255_v11, %v244_v10  ;;  %v14027_v7 = vshrl.u32 %v292_v63, 7 }
 0x137   :  { %v264_v15 = vadd.f32 %v263_v13, %v250_v12  ;;  %v205_v13 = vld [vmem:[#allocation11] sm:$0x7] }
 0x138   :  { %261 = vadd.xlane.f32.xlu0 %v260_v9  ;;  %257 = vadd.xlane.f32.xlu1 %v256_v14  ;;  %15460 = vst [vmem:[#allocation31_spill] sm:$0xff] %v14027_v7  ;;  %v204_v9 = vld [vmem:[#allocation10] sm:$0x7]  ;;  %v14030_v10 = vsub.s32 1, %v14027_v7  ;;  %v14033_v11 = vsub.s32 2, %v14027_v7  ;;  %v14036_v12 = vsub.s32 0, %v14027_v7 }
 0x13a   :  { %15461 = vst [vmem:[#allocation32_spill] sm:$0xff] %v14030_v10  ;;  %15462 = vst [vmem:[#allocation33_spill] sm:$0xff] %v14033_v11  ;;  %v299_v14 = vrot.slane %v204_v9, %v14030_v10  ;;  %v303_v16 = vrot.slane %v204_v9, %v14033_v11  ;;  %v295_v20 = vrot.slane %v204_v9, %v14036_v12 }
 0x13b   :  { %15463 = vst [vmem:[#allocation34_spill] sm:$0xff] %v14036_v12  ;;  %v327_v22 = vrot.slane %v205_v13, %v14030_v10  ;;  %v331_v25 = vrot.slane %v205_v13, %v14033_v11 }
 0x13c   :  { %265 = vadd.xlane.f32.xlu1 %v264_v15 }
 0x1bd   :  { %v254_v53 = vpop.xlane.xlu0 %253 }
 0x1be   :  { %v267_v54 = vmul.f32 0.0026041667, %v254_v53  ;;  %v12218_v53 = vld [vmem:[#allocation5 + $0x1bc] ss:$36 sps:$4 sm:$0xff]  }
 0x1c0   :  { %v271_v55 = vadd.f32 1e-05, %v267_v54  ;;  %v12221_v54 = vld [vmem:[#allocation5 + $0x63c] ss:$36 sps:$4 sm:$0xff]  }
 0x1c1   :  { %v258_v56 = vpop.xlane.xlu1 %257  ;;  %v262_v57 = vpop.xlane.xlu0 %261 }
 0x1c2   :  { %13362 = vrsqrt.f32 %v271_v55  ;;  %v268_v58 = vmul.f32 0.0026041667, %v258_v56  ;;  %v269_v59 = vmul.f32 0.0026041667, %v262_v57 }
 0x1c4   :  { %v272_v3 = vadd.f32 1e-05, %v268_v58  ;;  %v273_v4 = vadd.f32 1e-05, %v269_v59  ;;  %v12219_v58 = vld [vmem:[#allocation5 + $0x638] ss:$36 sps:$4 sm:$0xff]  }
 0x1c5   :  { %v266_v5 = vpop.xlane.xlu1 %265 }
 0x1c6   :  { %13364 = vrsqrt.f32 %v272_v3  ;;  %v270_v6 = vmul.f32 0.0026041667, %v266_v5 }
 0x1c7   :  { %13366 = vrsqrt.f32 %v273_v4  ;;  %v12224_v4 = vld [vmem:[#allocation5 + $0x174] ss:$36 sps:$4 sm:$0xff]  }
 0x1c8   :  { %v274_v8 = vadd.f32 1e-05, %v270_v6  ;;  %v12227_v6 = vld [vmem:[#allocation5 + $0x5f4] ss:$36 sps:$4 sm:$0xff]  }
 0x1ca   :  { %13368 = vrsqrt.f32 %v274_v8 }
 0x1cf   :  { %v13363_v15 = vpop.eup %13362 }
 0x1d0   :  { %v280_v17 = vmul.f32 %v13363_v15, %v13969_v45  ;;  %v281_v18 = vmul.f32 %v13363_v15, %v13972_v46  ;;  %v279_v19 = vmul.f32 %v13363_v15, %v13966_v44  ;;  %v323_v46 = vrot.slane %v205_v13, %v14036_v12  ;;  %v12222_v13 = vld [vmem:[#allocation5 + $0x170] ss:$36 sps:$4 sm:$0xff]  }
 0x1d2   :  { %v308_v21 = vmul.f32 %v299_v14, %v280_v17  ;;  %v309_v24 = vmul.f32 %v303_v16, %v281_v18  ;;  %v307_v29 = vmul.f32 %v295_v20, %v279_v19  ;;  %v12230_v17 = vld [vmem:[#allocation5 + $0x12c] ss:$36 sps:$4 sm:$0xff]  }
 0x1d3   :  { %v13365_v23 = vpop.eup %13364  ;;  %v12233_v18 = vld [vmem:[#allocation5 + $0x5ac] ss:$36 sps:$4 sm:$0xff]  }
 0x1d4   :  { %v13367_v26 = vpop.eup %13366  ;;  %v283_v27 = vmul.f32 %v13365_v23, %v13999_v61  ;;  %v284_v28 = vmul.f32 %v13365_v23, %v14002_v62  ;;  %v282_v45 = vmul.f32 %v13365_v23, %v13996_v60  ;;  %v336_v31 = vadd.f32 %v327_v22, %v308_v21  ;;  %v12231_v21 = vld [vmem:[#allocation5 + $0x5a8] ss:$36 sps:$4 sm:$0xff]  }
 0x1d5   :  { %v286_v44 = vmul.f32 %v13367_v26, %v13978_v48  ;;  %v337_v34 = vadd.f32 %v331_v25, %v309_v24  ;;  %v287_v37 = vmul.f32 %v13367_v26, %v13981_v49  ;;  %v335_v42 = vadd.f32 %v323_v46, %v307_v29  ;;  %v12239_v23 = vld [vmem:[#allocation5 + $0x564] ss:$36 sps:$4 sm:$0xff]   ;;  %v12248_v29 = vld [vmem:[#allocation5 + $0x54] ss:$36 sps:$4 sm:$0xff]  }
 0x1d6   :  { %v311_v30 = vmul.f32 %v299_v14, %v283_v27  ;;  %v312_v32 = vmul.f32 %v303_v16, %v284_v28  ;;  %v310_v35 = vmul.f32 %v295_v20, %v282_v45  ;;  %v285_v48 = vmul.f32 %v13367_v26, %v13975_v47  ;;  %v12234_v24 = vld [vmem:[#allocation5 + $0xe0] ss:$36 sps:$4 sm:$0xff]   ;;  %v12240_v28 = vld [vmem:[#allocation5 + $0x98] ss:$36 sps:$4 sm:$0xff]  }
 0x1d7   :  { %v13369_v33 = vpop.eup %13368  ;;  %v314_v36 = vmul.f32 %v299_v14, %v286_v44  ;;  %v315_v47 = vmul.f32 %v303_v16, %v287_v37  ;;  %v12242_v26 = vld [vmem:[#allocation5 + $0x9c] ss:$36 sps:$4 sm:$0xff]   ;;  %v12246_v44 = vld [vmem:[#allocation5 + $0x50] ss:$36 sps:$4 sm:$0xff]  }
 0x1d8   :  { %v339_v38 = vadd.f32 %v327_v22, %v311_v30  ;;  %v340_v61 = vadd.f32 %v331_v25, %v312_v32  ;;  %v289_v62 = vmul.f32 %v13369_v33, %v14008_v1  ;;  %v290_v60 = vmul.f32 %v13369_v33, %v14011_v2  ;;  %v12245_v27 = vld [vmem:[#allocation5 + $0x51c] ss:$36 sps:$4 sm:$0xff]   ;;  %v12249_v30 = vld [vmem:[#allocation5 + $0x4d0] ss:$36 sps:$4 sm:$0xff]  }
 0x1d9   :  { %v338_v43 = vadd.f32 %v323_v46, %v310_v35  ;;  %v288_v50 = vmul.f32 %v13369_v33, %v14005_v0  ;;  %v342_v2 = vadd.f32 %v327_v22, %v314_v36  ;;  %v12216_v0 = vld [vmem:[#allocation5 + $0x1b8] ss:$36 sps:$4 sm:$0xff]   ;;  %v313_v59 = vmul.f32 %v295_v20, %v285_v48  ;;  %v12257_v32 = vld [vmem:[#allocation5 + $0x48c] ss:$36 sps:$4 sm:$0xff]   ;;  %v12260_v35 = vld [vmem:[#allocation5 + $0x444] ss:$36 sps:$4 sm:$0xff]  }
 0x1da   :  { %v14056_v51 = vpack.c.bf16 %v339_v38, %v336_v31  ;;  %v14058_v52 = vpack.c.bf16 %v340_v61, %v337_v34  ;;  %v317_v49 = vmul.f32 %v299_v14, %v289_v62  ;;  %v318_v55 = vmul.f32 %v303_v16, %v290_v60  ;;  %v12225_v14 = vld [vmem:[#allocation5 + $0x5f0] ss:$36 sps:$4 sm:$0xff]   ;;  %v12243_v45 = vld [vmem:[#allocation5 + $0x518] ss:$36 sps:$4 sm:$0xff]   ;;  %v12252_v33 = vld [vmem:[#allocation5 + $0x8] ss:$36 sps:$4 sm:$0xff]  }
 0x1db   :  { %v14060_v56 = vpack.c.bf16 %v338_v43, %v335_v42  ;;  %v316_v1 = vmul.f32 %v295_v20, %v288_v50  ;;  %v343_v9 = vadd.f32 %v331_v25, %v315_v47  ;;  %v341_v15 = vadd.f32 %v323_v46, %v313_v59  ;;  %v12228_v20 = vld [vmem:[#allocation5 + $0x128] ss:$36 sps:$4 sm:$0xff]   ;;  %v12258_v37 = vld [vmem:[#allocation5 + $0x440] ss:$36 sps:$4 sm:$0xff]   ;;  %v12264_v60 = vld [vmem:[#allocation5 + $0x3f8] ss:$36 sps:$4 sm:$0xff]  }
 0x1dc   :  { %1729 = vmatprep.mubr.bf16.mxu0 %v14056_v51  ;;  %1783 = vmatmul.mubr.bf16.vlgmr.msra.gmra.mxu1 %v14058_v52  ;;  %v345_v57 = vadd.f32 %v327_v22, %v317_v49  ;;  %v346_v5 = vadd.f32 %v331_v25, %v318_v55  ;;  %v12236_v22 = vld [vmem:[#allocation5 + $0xe4] ss:$36 sps:$4 sm:$0xff]   ;;  %v12254_v31 = vld [vmem:[#allocation5 + $0xc] ss:$36 sps:$4 sm:$0xff]   ;;  %v12266_v61 = vld [vmem:[#allocation5 + $0x3fc] ss:$36 sps:$4 sm:$0xff]  }
 0x1dd   :  { %1804 = vmatpush1.bf16.msra.mxu1 %v12210_v39  ;;  %1730 = vmatmul.mubr.bf16.vlgmr.msra.gmra.mxu0 %v14060_v56  ;;  %v344_v8 = vadd.f32 %v323_v46, %v316_v1  ;;  %v12237_v25 = vld [vmem:[#allocation5 + $0x560] ss:$36 sps:$4 sm:$0xff]   ;;  %v12251_v46 = vld [vmem:[#allocation5 + $0x4d4] ss:$36 sps:$4 sm:$0xff]   ;;  %v12255_v34 = vld [vmem:[#allocation5 + $0x488] ss:$36 sps:$4 sm:$0xff]  }
 0x1de   :  { %1857 = vmatpush1.bf16.msra.mxu0 %v12213_v40  ;;  %1805 = vmatprep.subr.bf16.mxu1 %v12218_v53  ;;  %v14065_v3 = vpack.c.bf16 %v345_v57, %v342_v2  ;;  %v14069_v16 = vpack.c.bf16 %v346_v5, %v343_v9  ;;  %v12263_v36 = vld [vmem:[#allocation5 + $0x20c] ss:$36 sps:$4 sm:$0xff]   ;;  %v12269_v62 = vld [vmem:[#allocation5 + $0x1c4] ss:$36 sps:$4 sm:$0xff]   ;;  %v12272_v40 = vld [vmem:[#allocation5 + $0x3b4] ss:$36 sps:$4 sm:$0xff]  }
 0x1df   :  { %1858 = vmatprep.subr.bf16.mxu0 %v12221_v54  ;;  %1792 = vmatprep.mubr.bf16.mxu1 %v15437_v41  ;;  %v14071_v19 = vpack.c.bf16 %v344_v8, %v341_v15  ;;  %v12261_v38 = vld [vmem:[#allocation5 + $0x208] ss:$36 sps:$4 sm:$0xff]   ;;  %v12267_v39 = vld [vmem:[#allocation5 + $0x1c0] ss:$36 sps:$4 sm:$0xff]   ;;  %v12270_v43 = vld [vmem:[#allocation5 + $0x3b0] ss:$36 sps:$4 sm:$0xff]  }
 0x1e0   :  { %1739 = vmatprep.mubr.bf16.mxu0 %v14065_v3  ;;  %v12275_v42 = vld [vmem:[#allocation5 + $0x17c] ss:$36 sps:$4 sm:$0xff]   ;;  %v12278_v50 = vld [vmem:[#allocation5 + $0x36c] ss:$36 sps:$4 sm:$0xff]   ;;  %v12281_v53 = vld [vmem:[#allocation5 + $0x134] ss:$36 sps:$4 sm:$0xff]  }
 0x1e1   :  { %1806 = vmatpush1.bf16.msra.mxu1 %v12216_v0  ;;  %v12273_v48 = vld [vmem:[#allocation5 + $0x178] ss:$36 sps:$4 sm:$0xff]   ;;  %v12276_v49 = vld [vmem:[#allocation5 + $0x368] ss:$36 sps:$4 sm:$0xff]   ;;  %v12279_v54 = vld [vmem:[#allocation5 + $0x130] ss:$36 sps:$4 sm:$0xff]  }
 0x1e2   :  { %1859 = vmatpush1.bf16.msra.mxu0 %v12219_v58  ;;  %1807 = vmatprep.subr.bf16.mxu1 %v12224_v4  ;;  %v12284_v55 = vld [vmem:[#allocation5 + $0x324] ss:$36 sps:$4 sm:$0xff]   ;;  %v12287_v1 = vld [vmem:[#allocation5 + $0xec] ss:$36 sps:$4 sm:$0xff]   ;;  %v12290_v47 = vld [vmem:[#allocation5 + $0x2dc] ss:$36 sps:$4 sm:$0xff]  }
 0x1e3   :  { %1860 = vmatprep.subr.bf16.mxu0 %v12227_v6  ;;  %v12282_v2 = vld [vmem:[#allocation5 + $0x320] ss:$36 sps:$4 sm:$0xff]   ;;  %v12285_v57 = vld [vmem:[#allocation5 + $0xe8] ss:$36 sps:$4 sm:$0xff]   ;;  %v12288_v58 = vld [vmem:[#allocation5 + $0x2d8] ss:$36 sps:$4 sm:$0xff]  }
 0x1e4   :  { %1793 = vmatmul.mubr.bf16.gmra.mxu1 %v14069_v16  ;;  %v12293_v0 = vld [vmem:[#allocation5 + $0xa4] ss:$36 sps:$4 sm:$0xff]   ;;  %v12296_v4 = vld [vmem:[#allocation5 + $0x294] ss:$36 sps:$4 sm:$0xff]   ;;  %v12299_v5 = vld [vmem:[#allocation5 + $0x5c] ss:$36 sps:$4 sm:$0xff]  }
 0x1e5   :  { %1808 = vmatpush1.bf16.msra.mxu1 %v12222_v13  ;;  %1740 = vmatmul.mubr.bf16.gmra.mxu0 %v14071_v19  ;;  %v12291_v59 = vld [vmem:[#allocation5 + $0xa0] ss:$36 sps:$4 sm:$0xff]   ;;  %v12294_v6 = vld [vmem:[#allocation5 + $0x290] ss:$36 sps:$4 sm:$0xff]   ;;  %v12297_v8 = vld [vmem:[#allocation5 + $0x58] ss:$36 sps:$4 sm:$0xff]  }
 0x1e6   :  { %1835 = vmatprep.mubr.bf16.mxu1 %v14056_v51  ;;  %1861 = vmatpush1.bf16.msra.mxu0 %v12225_v14  ;;  %v12302_v9 = vld [vmem:[#allocation5 + $0x24c] ss:$36 sps:$4 sm:$0xff]   ;;  %v12305_v13 = vld [vmem:[#allocation5 + $0x14] ss:$36 sps:$4 sm:$0xff]  }
 0x1e7   :  { %1809 = vmatprep.subr.bf16.mxu1 %v12230_v17  ;;  %1862 = vmatprep.subr.bf16.mxu0 %v12233_v18  ;;  %v12300_v14 = vld [vmem:[#allocation5 + $0x248] ss:$36 sps:$4 sm:$0xff]   ;;  %v12303_v15 = vld [vmem:[#allocation5 + $0x10] ss:$36 sps:$4 sm:$0xff]  }
 0x1e8   :  { %1888 = vmatprep.mubr.bf16.mxu0 %v15437_v41  ;;  %v12308_v17 = vld [vmem:[#allocation5 + $0x68c] ss:$36 sps:$4 sm:$0xff]  }
 0x1e9   :  { %1810 = vmatpush1.bf16.msra.mxu1 %v12228_v20  ;;  %v12311_v18 = vld [vmem:[#allocation5 + $0x44c] ss:$36 sps:$4 sm:$0xff]  }
 0x1ea   :  { %1863 = vmatpush1.bf16.msra.mxu0 %v12231_v21  ;;  %1811 = vmatprep.subr.bf16.mxu1 %v12236_v22  ;;  %v12306_v20 = vld [vmem:[#allocation5 + $0x688] ss:$36 sps:$4 sm:$0xff]  }
 0x1eb   :  { %1864 = vmatprep.subr.bf16.mxu0 %v12239_v23  ;;  %v12309_v21 = vld [vmem:[#allocation5 + $0x448] ss:$36 sps:$4 sm:$0xff]  }
 0x1ec   :  { %v12314_v22 = vld [vmem:[#allocation5 + $0x644] ss:$36 sps:$4 sm:$0xff]  }
 0x1ed   :  { %1812 = vmatpush1.bf16.msra.mxu1 %v12234_v24  ;;  %v12317_v23 = vld [vmem:[#allocation5 + $0x404] ss:$36 sps:$4 sm:$0xff]  }
 0x1ee   :  { %1865 = vmatpush1.bf16.msra.mxu0 %v12237_v25  ;;  %1813 = vmatprep.subr.bf16.mxu1 %v12242_v26  ;;  %v12312_v24 = vld [vmem:[#allocation5 + $0x640] ss:$36 sps:$4 sm:$0xff]  }
 0x1ef   :  { %1866 = vmatprep.subr.bf16.mxu0 %v12245_v27  ;;  %v12315_v25 = vld [vmem:[#allocation5 + $0x400] ss:$36 sps:$4 sm:$0xff]  }
 0x1f0   :  { %v12320_v26 = vld [vmem:[#allocation5 + $0x5fc] ss:$36 sps:$4 sm:$0xff]  }
 0x1f1   :  { %1814 = vmatpush1.bf16.msra.mxu1 %v12240_v28  ;;  %v12323_v27 = vld [vmem:[#allocation5 + $0x3bc] ss:$36 sps:$4 sm:$0xff]  }
 0x1f2   :  { %1867 = vmatpush1.bf16.msra.mxu0 %v12243_v45  ;;  %1815 = vmatprep.subr.bf16.mxu1 %v12248_v29  ;;  %v12318_v28 = vld [vmem:[#allocation5 + $0x5f8] ss:$36 sps:$4 sm:$0xff]  }
 0x1f3   :  { %1868 = vmatprep.subr.bf16.mxu0 %v12251_v46  ;;  %v12321_v45 = vld [vmem:[#allocation5 + $0x3b8] ss:$36 sps:$4 sm:$0xff]  }
 0x1f4   :  { %v12326_v29 = vld [vmem:[#allocation5 + $0x5b4] ss:$36 sps:$4 sm:$0xff]  }
 0x1f5   :  { %1816 = vmatpush1.bf16.msra.mxu1 %v12246_v44  ;;  %v12329_v46 = vld [vmem:[#allocation5 + $0x374] ss:$36 sps:$4 sm:$0xff]  }
 0x1f6   :  { %1869 = vmatpush1.bf16.msra.mxu0 %v12249_v30  ;;  %1817 = vmatprep.subr.bf16.mxu1 %v12254_v31  ;;  %v12324_v44 = vld [vmem:[#allocation5 + $0x5b0] ss:$36 sps:$4 sm:$0xff]  }
 0x1f7   :  { %1870 = vmatprep.subr.bf16.mxu0 %v12257_v32  ;;  %v12327_v30 = vld [vmem:[#allocation5 + $0x370] ss:$36 sps:$4 sm:$0xff]  }
 0x1f8   :  { %v12332_v31 = vld [vmem:[#allocation5 + $0x56c] ss:$36 sps:$4 sm:$0xff]  }
 0x1f9   :  { %1818 = vmatpush1.bf16.msra.mxu1 %v12252_v33  ;;  %v12335_v32 = vld [vmem:[#allocation5 + $0x32c] ss:$36 sps:$4 sm:$0xff]  }
 0x1fa   :  { %1871 = vmatpush1.bf16.msra.mxu0 %v12255_v34  ;;  %1819 = vmatprep.subr.bf16.mxu1 %v12260_v35  ;;  %v12330_v33 = vld [vmem:[#allocation5 + $0x568] ss:$36 sps:$4 sm:$0xff]  }
 0x1fb   :  { %1909 = vmatprep.subr.bf16.mxu0 %v12263_v36  ;;  %v12333_v34 = vld [vmem:[#allocation5 + $0x328] ss:$36 sps:$4 sm:$0xff]  }
 0x1fc   :  { %v12338_v35 = vld [vmem:[#allocation5 + $0x524] ss:$36 sps:$4 sm:$0xff]  }
 0x1fd   :  { %1820 = vmatpush2.bf16.msra.mxu1 %v12258_v37  ;;  %1889 = vmatmul.mubr.bf16.vlgmr.msra.gmra.mxu0 %v14058_v52  ;;  %v12341_v36 = vld [vmem:[#allocation5 + $0x2e4] ss:$36 sps:$4 sm:$0xff]  }
 0x1fe   :  { %1910 = vmatpush1.bf16.msra.mxu0 %v12261_v38  ;;  %1821 = vmatprep.subr.bf16.mxu1 %v12266_v61  ;;  %v12336_v37 = vld [vmem:[#allocation5 + $0x520] ss:$36 sps:$4 sm:$0xff]  }
 0x1ff   :  { %1911 = vmatprep.subr.bf16.mxu0 %v12269_v62  ;;  %1898 = vmatprep.mubr.bf16.mxu0 %v15437_v41  ;;  %v12339_v38 = vld [vmem:[#allocation5 + $0x2e0] ss:$36 sps:$4 sm:$0xff]  }
 0x200   :  { %v12344_v61 = vld [vmem:[#allocation5 + $0x4dc] ss:$36 sps:$4 sm:$0xff]  }
 0x201   :  { %1822 = vmatpush2.bf16.msra.mxu1 %v12264_v60  ;;  %v12347_v62 = vld [vmem:[#allocation5 + $0x29c] ss:$36 sps:$4 sm:$0xff]  }
 0x202   :  { %1912 = vmatpush1.bf16.msra.mxu0 %v12267_v39  ;;  %1823 = vmatprep.subr.bf16.mxu1 %v12272_v40  ;;  %v12342_v60 = vld [vmem:[#allocation5 + $0x4d8] ss:$36 sps:$4 sm:$0xff]  }
 0x203   :  { %1913 = vmatprep.subr.bf16.mxu0 %v12275_v42  ;;  %v12345_v39 = vld [vmem:[#allocation5 + $0x298] ss:$36 sps:$4 sm:$0xff]  }
 0x204   :  { %v12350_v40 = vld [vmem:[#allocation5 + $0x494] ss:$36 sps:$4 sm:$0xff]  }
 0x205   :  { %1824 = vmatpush2.bf16.msra.mxu1 %v12270_v43  ;;  %1899 = vmatmul.mubr.bf16.gmra.mxu0 %v14069_v16  ;;  %v12353_v42 = vld [vmem:[#allocation5 + $0x254] ss:$36 sps:$4 sm:$0xff]  }
 0x206   :  { %1914 = vmatpush1.bf16.msra.mxu0 %v12273_v48  ;;  %1941 = vmatprep.mubr.bf16.mxu0 %v14056_v51  ;;  %v12348_v43 = vld [vmem:[#allocation5 + $0x490] ss:$36 sps:$4 sm:$0xff]  }
 0x207   :  { %1825 = vmatprep.subr.bf16.mxu1 %v12278_v50  ;;  %1915 = vmatprep.subr.bf16.mxu0 %v12281_v53  ;;  %v12351_v48 = vld [vmem:[#allocation5 + $0x250] ss:$36 sps:$4 sm:$0xff]  }
 0x208   :  { %v12356_v50 = vld [vmem:[#allocation5 + $0x214] ss:$36 sps:$4 sm:$0xff]  }
 0x209   :  { %1826 = vmatpush2.bf16.msra.mxu1 %v12276_v49  ;;  %v12359_v53 = vld [vmem:[#allocation5 + $0x694] ss:$36 sps:$4 sm:$0xff]  }
 0x20a   :  { %1916 = vmatpush1.bf16.msra.mxu0 %v12279_v54  ;;  %1827 = vmatprep.subr.bf16.mxu1 %v12284_v55  ;;  %v12354_v49 = vld [vmem:[#allocation5 + $0x210] ss:$36 sps:$4 sm:$0xff]  }
 0x20b   :  { %1917 = vmatprep.subr.bf16.mxu0 %v12287_v1  ;;  %v12357_v54 = vld [vmem:[#allocation5 + $0x690] ss:$36 sps:$4 sm:$0xff]  }
 0x20c   :  { %v12362_v55 = vld [vmem:[#allocation5 + $0x1cc] ss:$36 sps:$4 sm:$0xff]  }
 0x20d   :  { %1828 = vmatpush2.bf16.msra.mxu1 %v12282_v2  ;;  %v12365_v1 = vld [vmem:[#allocation5 + $0x64c] ss:$36 sps:$4 sm:$0xff]  }
 0x20e   :  { %1918 = vmatpush1.bf16.msra.mxu0 %v12285_v57  ;;  %1829 = vmatprep.subr.bf16.mxu1 %v12290_v47  ;;  %v12360_v2 = vld [vmem:[#allocation5 + $0x1c8] ss:$36 sps:$4 sm:$0xff]  }
 0x20f   :  { %1919 = vmatprep.subr.bf16.mxu0 %v12293_v0  ;;  %v12363_v57 = vld [vmem:[#allocation5 + $0x648] ss:$36 sps:$4 sm:$0xff]  }
 0x210   :  { %v12368_v47 = vld [vmem:[#allocation5 + $0x184] ss:$36 sps:$4 sm:$0xff]  }
 0x211   :  { %1830 = vmatpush2.bf16.msra.mxu1 %v12288_v58  ;;  %v12371_v0 = vld [vmem:[#allocation5 + $0x604] ss:$36 sps:$4 sm:$0xff]  }
 0x212   :  { %1920 = vmatpush1.bf16.msra.mxu0 %v12291_v59  ;;  %1831 = vmatprep.subr.bf16.mxu1 %v12296_v4  ;;  %v12366_v58 = vld [vmem:[#allocation5 + $0x180] ss:$36 sps:$4 sm:$0xff]  }
 0x213   :  { %1921 = vmatprep.subr.bf16.mxu0 %v12299_v5  ;;  %v12369_v59 = vld [vmem:[#allocation5 + $0x600] ss:$36 sps:$4 sm:$0xff]  }
 0x214   :  { %v12374_v4 = vld [vmem:[#allocation5 + $0x13c] ss:$36 sps:$4 sm:$0xff]  }
 0x215   :  { %1832 = vmatpush2.bf16.msra.mxu1 %v12294_v6  ;;  %v12377_v5 = vld [vmem:[#allocation5 + $0x5bc] ss:$36 sps:$4 sm:$0xff]  }
 0x216   :  { %1922 = vmatpush1.bf16.msra.mxu0 %v12297_v8  ;;  %1833 = vmatprep.subr.bf16.mxu1 %v12302_v9  ;;  %v12372_v6 = vld [vmem:[#allocation5 + $0x138] ss:$36 sps:$4 sm:$0xff]  }
 0x217   :  { %1923 = vmatprep.subr.bf16.mxu0 %v12305_v13  ;;  %v12375_v8 = vld [vmem:[#allocation5 + $0x5b8] ss:$36 sps:$4 sm:$0xff]  }
 0x218   :  { %v12380_v9 = vld [vmem:[#allocation5 + $0xf4] ss:$36 sps:$4 sm:$0xff]  }
 0x219   :  { %1834 = vmatpush2.bf16.msra.mxu1 %v12300_v14  ;;  %v12383_v13 = vld [vmem:[#allocation5 + $0x574] ss:$36 sps:$4 sm:$0xff]  }
 0x21a   :  { %1924 = vmatpush1.bf16.msra.mxu0 %v12303_v15  ;;  %1962 = vmatprep.subr.bf16.mxu1 %v12308_v17  ;;  %v12378_v14 = vld [vmem:[#allocation5 + $0xf0] ss:$36 sps:$4 sm:$0xff]  }
 0x21b   :  { %1925 = vmatprep.subr.bf16.mxu0 %v12311_v18  ;;  %v12381_v15 = vld [vmem:[#allocation5 + $0x570] ss:$36 sps:$4 sm:$0xff]  }
 0x21c   :  { %1836 = vmatmul.mubr.bf16.vlgmr.msra.gmra.mxu1 %v14060_v56  ;;  %v12386_v17 = vld [vmem:[#allocation5 + $0xac] ss:$36 sps:$4 sm:$0xff]  }
 0x21d   :  { %1845 = vmatprep.mubr.bf16.mxu1 %v14065_v3  ;;  %1963 = vmatpush1.bf16.msra.mxu1 %v12306_v20  ;;  %v12389_v18 = vld [vmem:[#allocation5 + $0x52c] ss:$36 sps:$4 sm:$0xff]  }
 0x21e   :  { %1926 = vmatpush2.bf16.msra.mxu0 %v12309_v21  ;;  %1964 = vmatprep.subr.bf16.mxu1 %v12314_v22  ;;  %v12384_v20 = vld [vmem:[#allocation5 + $0xa8] ss:$36 sps:$4 sm:$0xff]  }
 0x21f   :  { %1927 = vmatprep.subr.bf16.mxu0 %v12317_v23  ;;  %v12387_v21 = vld [vmem:[#allocation5 + $0x528] ss:$36 sps:$4 sm:$0xff]  }
 0x220   :  { %v12392_v22 = vld [vmem:[#allocation5 + $0x64] ss:$36 sps:$4 sm:$0xff]  }
 0x221   :  { %1965 = vmatpush1.bf16.msra.mxu1 %v12312_v24  ;;  %v12395_v23 = vld [vmem:[#allocation5 + $0x4e4] ss:$36 sps:$4 sm:$0xff]  }
 0x222   :  { %1928 = vmatpush2.bf16.msra.mxu0 %v12315_v25  ;;  %1966 = vmatprep.subr.bf16.mxu1 %v12320_v26  ;;  %v12390_v24 = vld [vmem:[#allocation5 + $0x60] ss:$36 sps:$4 sm:$0xff]  }
 0x223   :  { %1929 = vmatprep.subr.bf16.mxu0 %v12323_v27  ;;  %v12393_v25 = vld [vmem:[#allocation5 + $0x4e0] ss:$36 sps:$4 sm:$0xff]  }
 0x224   :  { %1846 = vmatmul.mubr.bf16.gmra.mxu1 %v14071_v19  ;;  %v12398_v26 = vld [vmem:[#allocation5 + $0x1c] ss:$36 sps:$4 sm:$0xff]  }
 0x225   :  { %1967 = vmatpush1.bf16.msra.mxu1 %v12318_v28  ;;  %1994 = vmatprep.mubr.bf16.mxu1 %v15437_v41  ;;  %v12401_v27 = vld [vmem:[#allocation5 + $0x49c] ss:$36 sps:$4 sm:$0xff]  }
 0x226   :  { %1930 = vmatpush2.bf16.msra.mxu0 %v12321_v45  ;;  %1968 = vmatprep.subr.bf16.mxu1 %v12326_v29  ;;  %v12396_v28 = vld [vmem:[#allocation5 + $0x18] ss:$36 sps:$4 sm:$0xff]  }
 0x227   :  { %1931 = vmatprep.subr.bf16.mxu0 %v12329_v46  ;;  %v12399_v45 = vld [vmem:[#allocation5 + $0x498] ss:$36 sps:$4 sm:$0xff]  }
 0x228   :  { %v12404_v29 = vld [vmem:[#allocation5 + $0x454] ss:$36 sps:$4 sm:$0xff]  }
 0x229   :  { %1969 = vmatpush1.bf16.msra.mxu1 %v12324_v44  ;;  %v12405_v46 = vld [vmem:[#allocation5 + $0x458] ss:$36 sps:$4 sm:$0xff]   ;;  %v12402_v44 = vld [vmem:[#allocation5 + $0x450] ss:$36 sps:$4 sm:$0xff]  }
 0x22a   :  { %1932 = vmatpush2.bf16.msra.mxu0 %v12327_v30  ;;  %1970 = vmatprep.subr.bf16.mxu1 %v12332_v31  ;;  %v12406_v30 = vld [vmem:[#allocation5 + $0x218] ss:$36 sps:$4 sm:$0xff]   ;;  %v12409_v31 = vld [vmem:[#allocation5 + $0x40c] ss:$36 sps:$4 sm:$0xff]  }
 0x22b   :  { %1933 = vmatprep.subr.bf16.mxu0 %v12335_v32  ;;  %v12410_v32 = vld [vmem:[#allocation5 + $0x410] ss:$36 sps:$4 sm:$0xff]  }
 0x22d   :  { %1971 = vmatpush1.bf16.msra.mxu1 %v12330_v33  ;;  %v12407_v33 = vld [vmem:[#allocation5 + $0x408] ss:$36 sps:$4 sm:$0xff]  }
 0x22e   :  { %1934 = vmatpush2.bf16.msra.mxu0 %v12333_v34  ;;  %1972 = vmatprep.subr.bf16.mxu1 %v12338_v35  ;;  %v12411_v34 = vld [vmem:[#allocation5 + $0x1d0] ss:$36 sps:$4 sm:$0xff]   ;;  %v12414_v35 = vld [vmem:[#allocation5 + $0x3c4] ss:$36 sps:$4 sm:$0xff]  }
 0x22f   :  { %1935 = vmatprep.subr.bf16.mxu0 %v12341_v36  ;;  %v12415_v36 = vld [vmem:[#allocation5 + $0x3c8] ss:$36 sps:$4 sm:$0xff]  }
 0x231   :  { %1973 = vmatpush1.bf16.msra.mxu1 %v12336_v37  ;;  %v12412_v37 = vld [vmem:[#allocation5 + $0x3c0] ss:$36 sps:$4 sm:$0xff]  }
 0x232   :  { %1936 = vmatpush2.bf16.msra.mxu0 %v12339_v38  ;;  %1974 = vmatprep.subr.bf16.mxu1 %v12344_v61  ;;  %v12416_v38 = vld [vmem:[#allocation5 + $0x188] ss:$36 sps:$4 sm:$0xff]   ;;  %v12419_v61 = vld [vmem:[#allocation5 + $0x37c] ss:$36 sps:$4 sm:$0xff]  }
 0x233   :  { %1937 = vmatprep.subr.bf16.mxu0 %v12347_v62  ;;  %v12420_v62 = vld [vmem:[#allocation5 + $0x380] ss:$36 sps:$4 sm:$0xff]  }
 0x235   :  { %1975 = vmatpush1.bf16.msra.mxu1 %v12342_v60  ;;  %v12417_v60 = vld [vmem:[#allocation5 + $0x378] ss:$36 sps:$4 sm:$0xff]  }
 0x236   :  { %1938 = vmatpush2.bf16.msra.mxu0 %v12345_v39  ;;  %1976 = vmatprep.subr.bf16.mxu1 %v12350_v40  ;;  %v12421_v39 = vld [vmem:[#allocation5 + $0x140] ss:$36 sps:$4 sm:$0xff]   ;;  %v12424_v40 = vld [vmem:[#allocation5 + $0x334] ss:$36 sps:$4 sm:$0xff]  }
 0x237   :  { %1939 = vmatprep.subr.bf16.mxu0 %v12353_v42  ;;  %v12425_v42 = vld [vmem:[#allocation5 + $0x338] ss:$36 sps:$4 sm:$0xff]  }
 0x239   :  { %1977 = vmatpush1.bf16.msra.mxu1 %v12348_v43  ;;  %v12422_v43 = vld [vmem:[#allocation5 + $0x330] ss:$36 sps:$4 sm:$0xff]  }
 0x23a   :  { %1940 = vmatpush2.bf16.msra.mxu0 %v12351_v48  ;;  %2015 = vmatprep.subr.bf16.mxu1 %v12356_v50  ;;  %v12426_v48 = vld [vmem:[#allocation5 + $0xf8] ss:$36 sps:$4 sm:$0xff]   ;;  %v12429_v50 = vld [vmem:[#allocation5 + $0x2ec] ss:$36 sps:$4 sm:$0xff]  }
 0x23b   :  { %2068 = vmatprep.subr.bf16.mxu0 %v12359_v53  ;;  %v12430_v53 = vld [vmem:[#allocation5 + $0x2f0] ss:$36 sps:$4 sm:$0xff]  }
 0x23c   :  { %1995 = vmatmul.mubr.bf16.vlgmr.msra.gmra.mxu1 %v14058_v52 }
 0x23d   :  { %1942 = vmatmul.mubr.bf16.vlgmr.msra.gmra.mxu0 %v14060_v56  ;;  %2016 = vmatpush1.bf16.msra.mxu1 %v12354_v49  ;;  %v12427_v49 = vld [vmem:[#allocation5 + $0x2e8] ss:$36 sps:$4 sm:$0xff]  }
 0x23e   :  { %1951 = vmatprep.mubr.bf16.mxu0 %v14065_v3  ;;  %2069 = vmatpush1.bf16.msra.mxu0 %v12357_v54  ;;  %v12431_v54 = vld [vmem:[#allocation5 + $0xb0] ss:$36 sps:$4 sm:$0xff]  }
 0x23f   :  { %2017 = vmatprep.subr.bf16.mxu1 %v12362_v55  ;;  %2070 = vmatprep.subr.bf16.mxu0 %v12365_v1  ;;  %v12434_v55 = vld [vmem:[#allocation5 + $0x2a4] ss:$36 sps:$4 sm:$0xff]  }
 0x240   :  { %2004 = vmatprep.mubr.bf16.mxu1 %v15437_v41  ;;  %v12432_v1 = vld [vmem:[#allocation5 + $0x2a0] ss:$36 sps:$4 sm:$0xff]  }
 0x241   :  { %2018 = vmatpush1.bf16.msra.mxu1 %v12360_v2  ;;  %v12436_v2 = vld [vmem:[#allocation5 + $0x68] ss:$36 sps:$4 sm:$0xff]  }
 0x242   :  { %2071 = vmatpush1.bf16.msra.mxu0 %v12363_v57  ;;  %2019 = vmatprep.subr.bf16.mxu1 %v12368_v47  ;;  %v12439_v57 = vld [vmem:[#allocation5 + $0x25c] ss:$36 sps:$4 sm:$0xff]  }
 0x243   :  { %2072 = vmatprep.subr.bf16.mxu0 %v12371_v0  ;;  %v12440_v47 = vld [vmem:[#allocation5 + $0x260] ss:$36 sps:$4 sm:$0xff]   ;;  %v12437_v0 = vld [vmem:[#allocation5 + $0x258] ss:$36 sps:$4 sm:$0xff]  }
 0x244   :  { %2005 = vmatmul.mubr.bf16.gmra.mxu1 %v14069_v16 }
 0x245   :  { %1952 = vmatmul.mubr.bf16.gmra.mxu0 %v14071_v19  ;;  %2020 = vmatpush1.bf16.msra.mxu1 %v12366_v58  ;;  %v12441_v58 = vld [vmem:[#allocation5 + $0x20] ss:$36 sps:$4 sm:$0xff]  }
 0x246   :  { %2047 = vmatprep.mubr.bf16.mxu1 %v14056_v51  ;;  %2073 = vmatpush1.bf16.msra.mxu0 %v12369_v59  ;;  %v12442_v59 = vld [vmem:[#allocation5 + $0x698] ss:$36 sps:$4 sm:$0xff]  }
 0x247   :  { %2021 = vmatprep.subr.bf16.mxu1 %v12374_v4  ;;  %2074 = vmatprep.subr.bf16.mxu0 %v12377_v5  ;;  %v12443_v4 = vld [vmem:[#allocation5 + $0x650] ss:$36 sps:$4 sm:$0xff]   ;;  %v15433_v5 = vmov 0.0  }
 0x248   :  { %2100 = vmatprep.mubr.bf16.mxu0 %v15437_v41 }
 0x249   :  { %2022 = vmatpush1.bf16.msra.mxu1 %v12372_v6  ;;  %v12444_v6 = vld [vmem:[#allocation5 + $0x608] ss:$36 sps:$4 sm:$0xff]  }
 0x24a   :  { %2075 = vmatpush1.bf16.msra.mxu0 %v12375_v8  ;;  %2023 = vmatprep.subr.bf16.mxu1 %v12380_v9  ;;  %v12445_v8 = vld [vmem:[#allocation5 + $0x5c0] ss:$36 sps:$4 sm:$0xff]   ;;  %v12448_v9 = vld [vmem:[#allocation5 + $0x4e8] ss:$36 sps:$4 sm:$0xff]  }
 0x24b   :  { %2076 = vmatprep.subr.bf16.mxu0 %v12383_v13  ;;  %v12449_v13 = vld [vmem:[#allocation5 + $0x4a0] ss:$36 sps:$4 sm:$0xff]  }
 0x24d   :  { %2024 = vmatpush1.bf16.msra.mxu1 %v12378_v14 }
 0x24e   :  { %2077 = vmatpush1.bf16.msra.mxu0 %v12381_v15  ;;  %2025 = vmatprep.subr.bf16.mxu1 %v12386_v17 }
 0x24f   :  { %2078 = vmatprep.subr.bf16.mxu0 %v12389_v18 }
 0x251   :  { %2026 = vmatpush1.bf16.msra.mxu1 %v12384_v20 }
 0x252   :  { %2079 = vmatpush1.bf16.msra.mxu0 %v12387_v21  ;;  %2027 = vmatprep.subr.bf16.mxu1 %v12392_v22 }
 0x253   :  { %2080 = vmatprep.subr.bf16.mxu0 %v12395_v23 }
 0x255   :  { %2028 = vmatpush1.bf16.msra.mxu1 %v12390_v24 }
 0x256   :  { %2081 = vmatpush1.bf16.msra.mxu0 %v12393_v25  ;;  %2029 = vmatprep.subr.bf16.mxu1 %v12398_v26 }
 0x257   :  { %2082 = vmatprep.subr.bf16.mxu0 %v12401_v27 }
 0x259   :  { %2030 = vmatpush1.bf16.msra.mxu1 %v12396_v28 }
 0x25a   :  { %2083 = vmatpush1.bf16.msra.mxu0 %v12399_v45  ;;  %2031 = vmatprep.subr.bf16.mxu1 %v12404_v29 }
 0x25b   :  { %11491 = vmatprep.subr.bf16.mxu0 %v12405_v46 }
 0x25d   :  { %2032 = vmatpush2.bf16.msra.mxu1 %v12402_v44  ;;  %2101 = vmatmul.mubr.bf16.vlgmr.msra.gmra.mxu0 %v14058_v52 }
 0x25e   :  { %11492 = vmatpush3.bf16.msra.mxu0 %v12406_v30  ;;  %2033 = vmatprep.subr.bf16.mxu1 %v12409_v31 }
 0x25f   :  { %11493 = vmatprep.subr.bf16.mxu0 %v12410_v32  ;;  %2110 = vmatprep.mubr.bf16.mxu0 %v15437_v41 }
 0x261   :  { %2034 = vmatpush2.bf16.msra.mxu1 %v12407_v33 }
 0x262   :  { %11494 = vmatpush3.bf16.msra.mxu0 %v12411_v34  ;;  %2035 = vmatprep.subr.bf16.mxu1 %v12414_v35 }
 0x263   :  { %11495 = vmatprep.subr.bf16.mxu0 %v12415_v36 }
 0x265   :  { %2036 = vmatpush2.bf16.msra.mxu1 %v12412_v37  ;;  %2111 = vmatmul.mubr.bf16.gmra.mxu0 %v14069_v16 }
 0x266   :  { %11496 = vmatpush3.bf16.msra.mxu0 %v12416_v38  ;;  %2153 = vmatprep.mubr.bf16.mxu0 %v14056_v51  ;;  %v12435_v51 = vld [vmem:[#allocation5 + $0x2a8] ss:$36 sps:$4 sm:$0xff]  }
 0x267   :  { %2037 = vmatprep.subr.bf16.mxu1 %v12419_v61  ;;  %11497 = vmatprep.subr.bf16.mxu0 %v12420_v62 }
 0x269   :  { %2038 = vmatpush2.bf16.msra.mxu1 %v12417_v60 }
 0x26a   :  { %11498 = vmatpush3.bf16.msra.mxu0 %v12421_v39  ;;  %2039 = vmatprep.subr.bf16.mxu1 %v12424_v40 }
 0x26b   :  { %11499 = vmatprep.subr.bf16.mxu0 %v12425_v42 }
 0x26d   :  { %2040 = vmatpush2.bf16.msra.mxu1 %v12422_v43 }
 0x26e   :  { %11500 = vmatpush3.bf16.msra.mxu0 %v12426_v48  ;;  %2041 = vmatprep.subr.bf16.mxu1 %v12429_v50 }
 0x26f   :  { %11501 = vmatprep.subr.bf16.mxu0 %v12430_v53 }
 0x271   :  { %2042 = vmatpush2.bf16.msra.mxu1 %v12427_v49 }
 0x272   :  { %11502 = vmatpush3.bf16.msra.mxu0 %v12431_v54  ;;  %2043 = vmatprep.subr.bf16.mxu1 %v12434_v55 }
 0x273   :  { %11503 = vmatprep.subr.bf16.mxu0 %v12435_v51 }
 0x275   :  { %2044 = vmatpush2.bf16.msra.mxu1 %v12432_v1 }
 0x276   :  { %11504 = vmatpush3.bf16.msra.mxu0 %v12436_v2  ;;  %2045 = vmatprep.subr.bf16.mxu1 %v12439_v57 }
 0x277   :  { %11505 = vmatprep.subr.bf16.mxu0 %v12440_v47 }
 0x279   :  { %2046 = vmatpush2.bf16.msra.mxu1 %v12437_v0 }
 0x27a   :  { %11506 = vmatpush3.bf16.msra.mxu0 %v12441_v58  ;;  %11805 = vmatprep.subr.bf16.mxu1 %v12442_v59 }
 0x27b   :  { %11831 = vmatprep.subr.bf16.mxu0 %v15433_v5 }
 0x27c   :  { %2048 = vmatmul.mubr.bf16.vlgmr.msra.gmra.mxu1 %v14060_v56 }
 0x27d   :  { %2057 = vmatprep.mubr.bf16.mxu1 %v14065_v3  ;;  %2154 = vmatmul.mubr.bf16.vlgmr.msra.gmra.mxu0 %v14060_v56  ;;  %v12446_v56 = vld [vmem:[#allocation5 + $0x578] ss:$36 sps:$4 sm:$0xff]  }
 0x27e   :  { %11806 = vmatpush3.bf16.msra.mxu1 %v12442_v59  ;;  %2161 = vmatprep.mubr.bf16.mxu0 %v14065_v3  ;;  %v12447_v3 = vld [vmem:[#allocation5 + $0x530] ss:$36 sps:$4 sm:$0xff]  }
 0x27f   :  { %11807 = vmatprep.subr.bf16.mxu1 %v12443_v4 }
 0x282   :  { %11808 = vmatpush3.bf16.msra.mxu1 %v12443_v4 }
 0x283   :  { %11809 = vmatprep.subr.bf16.mxu1 %v12444_v6 }
 0x284   :  { %2058 = vmatmul.mubr.bf16.gmra.mxu1 %v14071_v19 }
 0x285   :  { %2162 = vmatmul.mubr.bf16.gmra.mxu0 %v14071_v19  ;;  %11821 = vmatprep.mubr.bf16.mxu1 %v14058_v52 }
 0x286   :  { %11810 = vmatpush3.bf16.msra.mxu1 %v12444_v6  ;;  %11833 = vmatprep.mubr.msk.bf16.mxu0 %vm13816_vm0, %v15433_v5 }
 0x287   :  { %11811 = vmatprep.subr.bf16.mxu1 %v12445_v8 }
 0x28a   :  { %11812 = vmatpush3.bf16.msra.mxu1 %v12445_v8 }
 0x28b   :  { %11813 = vmatprep.subr.bf16.mxu1 %v12446_v56 }
 0x28e   :  { %11814 = vmatpush3.bf16.msra.mxu1 %v12446_v56 }
 0x28f   :  { %11815 = vmatprep.subr.bf16.mxu1 %v12447_v3 }
 0x292   :  { %11816 = vmatpush3.bf16.msra.mxu1 %v12447_v3 }
 0x293   :  { %11817 = vmatprep.subr.bf16.mxu1 %v12448_v9 }
 0x296   :  { %11818 = vmatpush3.bf16.msra.mxu1 %v12448_v9 }
 0x297   :  { %11819 = vmatprep.subr.bf16.mxu1 %v12449_v13 }
 0x29a   :  { %11820 = vmatpush3.bf16.msra.mxu1 %v12449_v13 }
 0x29b   :  { %11825 = vmatprep.subr.bf16.mxu1 %v15433_v5 }
 0x29c   :  { %v1784_v52 = vpop.f32.mrf.mxu1 }
 0x29d   :  { %11822 = vmatmul.mubr.bf16.vlgmr.msra.gmra.mxu1 %v14069_v16  ;;  %v1731_v19 = vpop.f32.mrf.mxu0 }
 0x29e   :  { %v1786_v14 = vpop.f32.mrf.mxu1  ;;  %11827 = vmatprep.mubr.msk.bf16.mxu1 %vm13816_vm0, %v15433_v5  ;;  %v1785_v17 = vadd.f32 %v1784_v52, %v1731_v19 }
 0x29f   :  { %v1733_v15 = vpop.f32.mrf.mxu0 }
 0x2a0   :  { %v14111_v18 = vadd.f32 %v1786_v14, %v1733_v15  ;;  %v1788_v20 = vpop.f32.mrf.mxu1  ;;  %v2226_v25 = vmul.f32 0.125, %v1785_v17 }
 0x2a1   :  { %v1735_v21 = vpop.f32.mrf.mxu0 }
 0x2a2   :  { %v1789_v22 = vadd.f32 %v1788_v20, %v1735_v21  ;;  %v14113_v23 = vpop.f32.mrf.mxu1 }
 0x2a3   :  { %v14115_v24 = vpop.f32.mrf.mxu0 }
 0x2a4   :  { %v2227_v26 = vmul.f32 0.125, %v1789_v22  ;;  %v1794_v27 = vpop.f32.mrf.mxu1 }
 0x2a5   :  { %v1741_v16 = vpop.f32.mrf.mxu0 }
 0x2a6   :  { %v2228_v28 = vpack.c.bf16 %v2227_v26, %v2226_v25  ;;  %v1795_v45 = vadd.f32 %v1794_v27, %v1741_v16  ;;  %v1796_v29 = vpop.f32.mrf.mxu1 }
 0x2a7   :  { %v1743_v46 = vpop.f32.mrf.mxu0 }
 0x2a8   :  { %v14117_v44 = vadd.f32 %v1796_v29, %v1743_v46  ;;  %2367 = vrot.lane.b32.xlu1 %v2228_v28, %s13817_s10  ;;  %v1798_v30 = vpop.f32.mrf.mxu1  ;;  %v4001_v33 = vmul.f32 0.125, %v1795_v45 }
 0x2a9   :  { %v1745_v31 = vpop.f32.mrf.mxu0 }
 0x2aa   :  { %v1799_v32 = vadd.f32 %v1798_v30, %v1745_v31  ;;  %v14124_v62 = vpop.f32.mrf.mxu1 }
 0x2ab   :  { %v14122_v36 = vpop.f32.mrf.mxu0 }
 0x2ac   :  { %v4002_v34 = vmul.f32 0.125, %v1799_v32 }
 0x2ae   :  { %v14120_v35 = vpack.c.bf16 %v4002_v34, %v4001_v33 }
 0x2bd   :  { %v1890_v37 = vpop.f32.mrf.mxu0 }
 0x2bf   :  { %v1892_v38 = vpop.f32.mrf.mxu0 }
 0x2c1   :  { %v1894_v61 = vpop.f32.mrf.mxu0 }
 0x2c3   :  { %v1896_v60 = vpop.f32.mrf.mxu0 }
 0x2c5   :  { %v1900_v43 = vpop.f32.mrf.mxu0 }
 0x2c7   :  { %v1902_v1 = vpop.f32.mrf.mxu0 }
 0x2c9   :  { %v1904_v6 = vpop.f32.mrf.mxu0 }
 0x2cb   :  { %v14140_v19 = vpop.f32.mrf.mxu0 }
 0x2dc   :  { %v1837_v39 = vpop.f32.mrf.mxu1 }
 0x2dd   :  { %v1891_v40 = vadd.f32 %v1890_v37, %v1837_v39 }
 0x2de   :  { %v1839_v42 = vpop.f32.mrf.mxu1 }
 0x2df   :  { %v3406_v49 = vmul.f32 0.125, %v1891_v40  ;;  %v1893_v54 = vadd.f32 %v1892_v38, %v1839_v42 }
 0x2e0   :  { %v1841_v48 = vpop.f32.mrf.mxu1 }
 0x2e1   :  { %v1895_v50 = vadd.f32 %v1894_v61, %v1841_v48 }
 0x2e2   :  { %v1843_v53 = vpop.f32.mrf.mxu1 }
 0x2e3   :  { %v3407_v55 = vmul.f32 0.125, %v1895_v50  ;;  %v1897_v51 = vadd.f32 %v1896_v60, %v1843_v53 }
 0x2e4   :  { %v1847_v2 = vpop.f32.mrf.mxu1 }
 0x2e5   :  { %v14126_v57 = vpack.c.bf16 %v3407_v55, %v3406_v49  ;;  %v2229_v47 = vpack.c.bf16 %v1897_v51, %v1893_v54  ;;  %v1901_v0 = vadd.f32 %v1900_v43, %v1847_v2 }
 0x2e6   :  { %v1849_v58 = vpop.f32.mrf.mxu1 }
 0x2e7   :  { %v14128_v59 = vadd.f32 %v1902_v1, %v1849_v58  ;;  %2370 = vrot.lane.b32.xlu0 %v2229_v47, %s13817_s10  ;;  %v2236_v4 = vsel %vm2231_vm1, %v2229_v47, 0  ;;  %v4859_v3 = vmul.f32 0.125, %v1901_v0 }
 0x2e8   :  { %v1851_v8 = vpop.f32.mrf.mxu1  ;;  %11826 = vmatpush3.bf16.xpose.msra.mxu1 %v2236_v4 }
 0x2e9   :  { %v1905_v56 = vadd.f32 %v1904_v6, %v1851_v8  ;;  %11837 = vmatprep.subr.bf16.mxu1 %v15433_v5 }
 0x2ea   :  { %v14138_v52 = vpop.f32.mrf.mxu1 }
 0x2eb   :  { %v4860_v9 = vmul.f32 0.125, %v1905_v56 }
 0x2ed   :  { %v14133_v13 = vpack.c.bf16 %v4860_v9, %v4859_v3 }
 0x2ef   :  { %15464 = vst [vmem:[#allocation35_spill] sm:$0xff] %v14133_v13  ;;  %11828 = vmatmul.mubr.msk.bf16.vlgmr.msra.gmra.mxu1 %vm2231_vm1, %v2228_v28  ;;  %v12505_v13 = vld [vmem:[#allocation7 + $0x158] ss:$12 sps:$4 sm:$0xff]  }
 0x2f0   :  { %11839 = vmatprep.mubr.msk.bf16.mxu1 %vm13816_vm0, %v15433_v5 }
 0x2fc   :  { %v1996_v14 = vpop.f32.mrf.mxu1 }
 0x2fd   :  { %v1943_v15 = vpop.f32.mrf.mxu0 }
 0x2fe   :  { %v1997_v17 = vadd.f32 %v1996_v14, %v1943_v15  ;;  %v1998_v20 = vpop.f32.mrf.mxu1 }
 0x2ff   :  { %v1945_v21 = vpop.f32.mrf.mxu0 }
 0x300   :  { %v14142_v22 = vadd.f32 %v1998_v20, %v1945_v21  ;;  %v2000_v25 = vpop.f32.mrf.mxu1 }
 0x301   :  { %v1947_v26 = vpop.f32.mrf.mxu0 }
 0x302   :  { %v2001_v27 = vadd.f32 %v2000_v25, %v1947_v26  ;;  %v14144_v16 = vpop.f32.mrf.mxu1 }
 0x303   :  { %v14146_v28 = vpop.f32.mrf.mxu0 }
 0x304   :  { %v14148_v45 = vpack.c.bf16 %v2001_v27, %v1997_v17  ;;  %v2006_v29 = vpop.f32.mrf.mxu1 }
 0x305   :  { %v1953_v46 = vpop.f32.mrf.mxu0 }
 0x306   :  { %v2007_v30 = vadd.f32 %v2006_v29, %v1953_v46  ;;  %v2008_v31 = vpop.f32.mrf.mxu1 }
 0x307   :  { %v1955_v32 = vpop.f32.mrf.mxu0 }
 0x308   :  { %v14150_v33 = vadd.f32 %v2008_v31, %v1955_v32  ;;  %v2010_v34 = vpop.f32.mrf.mxu1 }
 0x309   :  { %v1957_v37 = vpop.f32.mrf.mxu0 }
 0x30a   :  { %15465 = vst [vmem:[#allocation36_spill] sm:$0xff] %v14150_v33  ;;  %v2011_v38 = vadd.f32 %v2010_v34, %v1957_v37  ;;  %v14158_v49 = vpop.f32.mrf.mxu1 }
 0x30b   :  { %v14154_v60 = vpop.f32.mrf.mxu0  ;;  %15466 = vst [vmem:[#allocation37_spill] sm:$0xff] %v14158_v49 }
 0x30c   :  { %v14152_v61 = vpack.c.bf16 %v2011_v38, %v2007_v30 }
 0x31d   :  { %v2102_v39 = vpop.f32.mrf.mxu0 }
 0x31f   :  { %v2104_v40 = vpop.f32.mrf.mxu0 }
 0x321   :  { %v2106_v42 = vpop.f32.mrf.mxu0 }
 0x323   :  { %v14156_v43 = vpop.f32.mrf.mxu0 }
 0x325   :  { %v2112_v48 = vpop.f32.mrf.mxu0 }
 0x327   :  { %v2114_v50 = vpop.f32.mrf.mxu0 }
 0x329   :  { %v2116_v53 = vpop.f32.mrf.mxu0 }
 0x32b   :  { %v14160_v54 = vpop.f32.mrf.mxu0 }
 0x33c   :  { %v2049_v55 = vpop.f32.mrf.mxu1 }
 0x33d   :  { %v11507_v51 = vpop.f32.mrf.mxu0  ;;  %v2103_v4 = vadd.f32 %v2102_v39, %v2049_v55 }
 0x33e   :  { %v2051_v1 = vpop.f32.mrf.mxu1 }
 0x33f   :  { %v14162_v2 = vadd.f32 %v2104_v40, %v2051_v1  ;;  %v11508_v47 = vpop.f32.mrf.mxu0 }
 0x340   :  { %v11509_v0 = vadd.f32 %v11508_v47, %v11507_v51  ;;  %v2053_v58 = vpop.f32.mrf.mxu1 }
 0x341   :  { %v2107_v6 = vadd.f32 %v2106_v42, %v2053_v58  ;;  %v11510_v8 = vpop.f32.mrf.mxu0 }
 0x342   :  { %v14164_v56 = vpop.f32.mrf.mxu1 }
 0x343   :  { %v14166_v3 = vpack.c.bf16 %v2107_v6, %v2103_v4  ;;  %v11511_v9 = vpop.f32.mrf.mxu0  ;;  %v2223_v6 = vand.u32 127, %v292_v63 }
 0x344   :  { %v2059_v14 = vpop.f32.mrf.mxu1  ;;  %v11512_v51 = vadd.f32 %v11511_v9, %v11510_v8 }
 0x345   :  { %v2113_v15 = vadd.f32 %v2112_v48, %v2059_v14  ;;  %v11513_v17 = vpop.f32.mrf.mxu0  ;;  %11832 = vmatpush3.bf16.msra.mxu0 %v14166_v3  ;;  %vm14185_vm2 = vcmp.ge.s32.totalorder %v14027_v7, %v2223_v6 }
 0x346   :  { %v2061_v20 = vpop.f32.mrf.mxu1  ;;  %11843 = vmatprep.subr.bf16.mxu0 %v15433_v5 }
 0x347   :  { %v14170_v21 = vadd.f32 %v2114_v50, %v2061_v20  ;;  %v11514_v25 = vpop.f32.mrf.mxu0  ;;  %v2368_v50 = vpop.permute.xlu1 %2367 }
 0x348   :  { %v11515_v26 = vadd.f32 %v11514_v25, %v11513_v17  ;;  %v2063_v27 = vpop.f32.mrf.mxu1 }
 0x349   :  { %v2117_v29 = vadd.f32 %v2116_v53, %v2063_v27  ;;  %v11516_v30 = vpop.f32.mrf.mxu0 }
 0x34a   :  { %v14175_v34 = vpop.f32.mrf.mxu1 }
 0x34b   :  { %v14172_v46 = vpack.c.bf16 %v2117_v29, %v2113_v15  ;;  %v11517_v37 = vpop.f32.mrf.mxu0 }
 0x34c   :  { %v11518_v42 = vadd.f32 %v11517_v37, %v11516_v30 }
 0x359   :  { %v2371_v31 = vpop.permute.xlu0 %2370 }
 0x35a   :  { %v2376_v32 = vsel %vm2231_vm1, %v2371_v31, 0 }
 0x35b   :  { %11838 = vmatpush3.bf16.xpose.msra.mxu1 %v2376_v32 }
 0x35d   :  { %v11823_v38 = vpop.f32.mrf.mxu1 }
 0x35e   :  { %v2213_v39 = vadd.f32 %v11823_v38, %v11515_v26 }
 0x35f   :  { %v2204_v40 = vpop.f32.mrf.mxu1 }
 0x360   :  { %v2205_v48 = vadd.f32 %v11509_v0, %v2204_v40  ;;  %v2221_v0 = vadd.s32 8, %v14027_v7 }
 0x361   :  { %v11824_v55 = vpop.f32.mrf.mxu1 }
 0x362   :  { %v2216_v1 = vadd.f32 %v11824_v55, %v11518_v42  ;;  %11840 = vmatmul.mubr.msk.bf16.vlgmr.msra.gmra.mxu1 %vm2231_vm1, %v2368_v50  ;;  %vm14193_vm4 = vcmp.ge.s32.totalorder %v2221_v0, %v2223_v6 }
 0x363   :  { %v2207_v53 = vpop.f32.mrf.mxu1  ;;  %2608 = vmatprep.mubr.bf16.mxu1 %v15437_v41 }
 0x364   :  { %v14179_v47 = vpack.c.bf16 %v2216_v1, %v2213_v39  ;;  %v2208_v58 = vadd.f32 %v11512_v51, %v2207_v53 }
 0x366   :  { %15467 = vst [vmem:[#allocation38_spill] sm:$0xff] %v14179_v47  ;;  %v14181_v4 = vpack.c.bf16 %v2208_v58, %v2205_v48 }
 0x3af   :  { %v2272_v8 = vpop.f32.mrf.mxu1 }
 0x3b0   :  { %v2279_v9 = vsel %vm14185_vm2, %v2272_v8, -1e+30 }
 0x3b1   :  { %v11829_v15 = vpop.f32.mrf.mxu1  ;;  %v2282_v17 = vsel %vm2281_vm3, %v2279_v9, -inf }
 0x3b2   :  { %2283 = vmax.xlane.f32.xlu1 %v2282_v17 }
 0x3b3   :  { %v2275_v63 = vpop.f32.mrf.mxu1 }
 0x3b4   :  { %v2280_v25 = vsel %vm14193_vm4, %v2275_v63, -1e+30 }
 0x3b5   :  { %v11830_v26 = vpop.f32.mrf.mxu1  ;;  %v2285_v27 = vsel %vm2281_vm3, %v2280_v25, -inf }
 0x3b6   :  { %2286 = vmax.xlane.f32.xlu0 %v2285_v27 }
 0x422   :  { %v2412_v29 = vpop.f32.mrf.mxu1 }
 0x423   :  { %v2419_v30 = vsel %vm14185_vm2, %v2412_v29, -1e+30 }
 0x424   :  { %v11841_v31 = vpop.f32.mrf.mxu1  ;;  %v2421_v32 = vsel %vm2281_vm3, %v2419_v30, -inf }
 0x425   :  { %2422 = vmax.xlane.f32.xlu0 %v2421_v32  ;;  %v1791_v32 = vadd.f32 %v14113_v23, %v14115_v24  ;;  %v14224_v24 = vld [vmem:[#allocation7 + $0xac] ss:$12 sps:$4 sm:$0xff]  }
 0x426   :  { %v2415_v37 = vpop.f32.mrf.mxu1  ;;  %2584 = vmatprep.subr.bf16.mxu1 %v14224_v24 }
 0x427   :  { %v2420_v38 = vsel %vm14193_vm4, %v2415_v37, -1e+30  ;;  %v2812_v37 = vmul.f32 0.125, %v1791_v32  ;;  %v12465_v32 = vld [vmem:[#allocation7 + $0x68] ss:$12 sps:$4 sm:$0xff]  }
 0x428   :  { %v11842_v39 = vpop.f32.mrf.mxu1  ;;  %v2424_v40 = vsel %vm2281_vm3, %v2420_v38, -inf }
 0x429   :  { %2425 = vmax.xlane.f32.xlu1 %v2424_v40 }
 0x43b   :  { %v2284_v42 = vpop.xlane.xlu1 %2283 }
 0x43c   :  { %v2288_v48 = vsub.f32 %v2279_v9, %v2284_v42 }
 0x43e   :  { %v2290_v50 = vmul.f32 1.442695, %v2288_v48 }
 0x43f   :  { %v2287_v55 = vpop.xlane.xlu0 %2286 }
 0x440   :  { %13370 = vpow2.f32 %v2290_v50  ;;  %v2289_v51 = vsub.f32 %v2280_v25, %v2287_v55 }
 0x442   :  { %v2292_v1 = vmul.f32 1.442695, %v2289_v51  ;;  %v14230_v51 = vld [vmem:[#allocation7 + $0x90] ss:$12 sps:$4 sm:$0xff]  }
 0x444   :  { %13372 = vpow2.f32 %v2292_v1  ;;  %v14233_v1 = vld [vmem:[#allocation7 + $0x7c] ss:$12 sps:$4 sm:$0xff]  }
 0x44d   :  { %v13371_v53 = vpop.eup %13370 }
 0x44e   :  { %v2294_v58 = vsel %vm2281_vm3, %v13371_v53, 0.0 }
 0x44f   :  { %2295 = vadd.xlane.f32.xlu0 %v2294_v58 }
 0x451   :  { %v13373_v6 = vpop.eup %13372 }
 0x452   :  { %v2297_v0 = vsel %vm2281_vm3, %v13373_v6, 0.0 }
 0x453   :  { %2298 = vadd.xlane.f32.xlu1 %v2297_v0 }
 0x4ae   :  { %v2423_v8 = vpop.xlane.xlu0 %2422 }
 0x4af   :  { %v2427_v15 = vsub.f32 %v2419_v30, %v2423_v8  ;;  %v2811_v30 = vmul.f32 0.125, %v14111_v18  ;;  %v14222_v18 = vld [vmem:[#allocation7 + $0xa8] ss:$12 sps:$4 sm:$0xff]  }
 0x4b0   :  { %2585 = vmatpush1.bf16.msra.mxu1 %v14222_v18 }
 0x4b1   :  { %v2429_v17 = vmul.f32 1.442695, %v2427_v15  ;;  %v14215_v39 = vpack.c.bf16 %v2812_v37, %v2811_v30  ;;  %v14254_v37 = vld [vmem:[#allocation7 + $0x4c] ss:$12 sps:$4 sm:$0xff]  }
 0x4b2   :  { %v2426_v63 = vpop.xlane.xlu1 %2425 }
 0x4b3   :  { %13374 = vpow2.f32 %v2429_v17  ;;  %v2428_v9 = vsub.f32 %v2420_v38, %v2426_v63 }
 0x4b5   :  { %v2431_v26 = vmul.f32 1.442695, %v2428_v9  ;;  %v12453_v9 = vld [vmem:[#allocation7 + $0xb0] ss:$12 sps:$4 sm:$0xff]  }
 0x4b7   :  { %13376 = vpow2.f32 %v2431_v26 }
 0x4c0   :  { %v13375_v27 = vpop.eup %13374 }
 0x4c1   :  { %v2433_v25 = vsel %vm2281_vm3, %v13375_v27, 0.0 }
 0x4c2   :  { %2434 = vadd.xlane.f32.xlu0 %v2433_v25  ;;  %v12457_v25 = vld [vmem:[#allocation7 + $0x98] ss:$12 sps:$4 sm:$0xff]  }
 0x4c4   :  { %v13377_v29 = vpop.eup %13376 }
 0x4c5   :  { %v2436_v31 = vsel %vm2281_vm3, %v13377_v29, 0.0 }
 0x4c6   :  { %2437 = vadd.xlane.f32.xlu1 %v2436_v31  ;;  %v12461_v31 = vld [vmem:[#allocation7 + $0x80] ss:$12 sps:$4 sm:$0xff]  }
 0x4d8   :  { %2445 = vrot.lane.b32.xlu0 %v14166_v3, %s13817_s10  ;;  %v2296_v38 = vpop.xlane.xlu0 %2295  ;;  %v14226_v3 = vld [vmem:[#allocation7 + $0x94] ss:$12 sps:$4 sm:$0xff]  }
 0x4d9   :  { %13378 = vrcp.f32 %v2296_v38  ;;  %2586 = vmatprep.subr.bf16.mxu1 %v14226_v3 }
 0x4da   :  { %2587 = vmatpush1.bf16.msra.mxu1 %v14230_v51 }
 0x4db   :  { %2588 = vmatprep.subr.bf16.mxu1 %v14233_v1 }
 0x4dc   :  { %3107 = vrot.lane.b32.xlu0 %v14215_v39, %s13817_s10  ;;  %v2299_v40 = vpop.xlane.xlu1 %2298 }
 0x4dd   :  { %13380 = vrcp.f32 %v2299_v40 }
 0x4e6   :  { %v13379_v42 = vpop.eup %13378 }
 0x4e7   :  { %v2302_v50 = vmul.f32 %v13379_v42, %v13371_v53  ;;  %v14236_v53 = vld [vmem:[#allocation7 + $0x78] ss:$12 sps:$4 sm:$0xff]  }
 0x4e8   :  { %2589 = vmatpush1.bf16.msra.mxu1 %v14236_v53 }
 0x4ea   :  { %v13381_v48 = vpop.eup %13380 }
 0x4eb   :  { %v2303_v55 = vmul.f32 %v13381_v48, %v13373_v6 }
 0x4ed   :  { %v2304_v23 = vpack.c.bf16 %v2303_v55, %v2302_v50 }
 0x4ef   :  { %11834 = vmatmul.mubr.msk.bf16.vlgmr.msra.gmra.mxu0 %vm2281_vm3, %v2304_v23 }
 0x4f0   :  { %11845 = vmatprep.mubr.msk.bf16.mxu0 %vm13816_vm0, %v15433_v5 }
 0x54b   :  { %v2435_v58 = vpop.xlane.xlu0 %2434 }
 0x54c   :  { %13382 = vrcp.f32 %v2435_v58  ;;  %v12466_v58 = vld [vmem:[#allocation7 + $0x48] ss:$12 sps:$4 sm:$0xff]  }
 0x54f   :  { %v2446_v6 = vpop.permute.xlu0 %2445  ;;  %v2438_v0 = vpop.xlane.xlu1 %2437 }
 0x550   :  { %13384 = vrcp.f32 %v2438_v0  ;;  %11844 = vmatpush3.bf16.msra.mxu0 %v2446_v6  ;;  %v12469_v6 = vld [vmem:[#allocation7 + $0x50] ss:$12 sps:$4 sm:$0xff]  }
 0x551   :  { %11849 = vmatprep.subr.bf16.mxu0 %v15433_v5 }
 0x559   :  { %v13383_v8 = vpop.eup %13382 }
 0x55a   :  { %v2441_v17 = vmul.f32 %v13383_v8, %v13375_v27  ;;  %v14247_v27 = vld [vmem:[#allocation7 + $0x60] ss:$12 sps:$4 sm:$0xff]  }
 0x55b   :  { %v12472_v8 = vld [vmem:[#allocation7 + $0x34] ss:$12 sps:$4 sm:$0xff]  }
 0x55d   :  { %v13385_v15 = vpop.eup %13384 }
 0x55e   :  { %v2442_v63 = vmul.f32 %v13385_v15, %v13377_v29  ;;  %v14249_v29 = vld [vmem:[#allocation7 + $0x64] ss:$12 sps:$4 sm:$0xff]  }
 0x55f   :  { %2590 = vmatprep.subr.bf16.mxu1 %v14249_v29 }
 0x560   :  { %v2443_v26 = vpack.c.bf16 %v2442_v63, %v2441_v17  ;;  %2591 = vmatpush1.bf16.msra.mxu1 %v14247_v27  ;;  %v12470_v17 = vld [vmem:[#allocation7 + $0x30] ss:$12 sps:$4 sm:$0xff]   ;;  %v12473_v63 = vld [vmem:[#allocation7 + $0x38] ss:$12 sps:$4 sm:$0xff]  }
 0x561   :  { %2735 = vmatprep.subr.bf16.mxu1 %v14254_v37 }
 0x562   :  { %11846 = vmatmul.mubr.msk.bf16.vlgmr.msra.gmra.mxu0 %vm2281_vm3, %v2443_v26  ;;  %v12474_v26 = vld [vmem:[#allocation7 + $0x18] ss:$12 sps:$4 sm:$0xff]  }
 0x563   :  { %11850 = vmatpush3.bf16.msra.mxu0 %v12453_v9  ;;  %11857 = vmatprep.mubr.msk.bf16.mxu0 %vm13816_vm0, %v15433_v5  ;;  %v12476_v9 = vld [vmem:[#allocation7 + $0x1c] ss:$12 sps:$4 sm:$0xff]  }
 0x564   :  { %11851 = vmatprep.subr.bf16.mxu0 %v15433_v5 }
 0x567   :  { %11852 = vmatpush3.bf16.msra.mxu0 %v12457_v25  ;;  %v12477_v25 = vld [vmem:[#allocation7 + $0x20] ss:$12 sps:$4 sm:$0xff]  }
 0x568   :  { %11853 = vmatprep.subr.bf16.mxu0 %v15433_v5 }
 0x56b   :  { %11854 = vmatpush3.bf16.msra.mxu0 %v12461_v31  ;;  %v12480_v31 = vld [vmem:[#allocation7 + $0x4] ss:$12 sps:$4 sm:$0xff]  }
 0x56c   :  { %11855 = vmatprep.subr.bf16.mxu0 %v15433_v5 }
 0x56f   :  { %11856 = vmatpush3.bf16.msra.mxu0 %v12465_v32  ;;  %v12478_v32 = vld [vmem:[#allocation7] ss:$12 sps:$4 sm:$0xff]  }
 0x570   :  { %11861 = vmatprep.subr.bf16.mxu0 %v15433_v5 }
 0x5af   :  { %v2342_v30 = vpop.f32.mrf.mxu0 }
 0x5b1   :  { %v11835_v38 = vpop.f32.mrf.mxu0 }
 0x5b2   :  { %v2109_v38 = vadd.f32 %v14156_v43, %v14164_v56 }
 0x5b3   :  { %v2345_v40 = vpop.f32.mrf.mxu0 }
 0x5b4   :  { %v2349_v42 = vpack.c.bf16 %v2345_v40, %v2342_v30  ;;  %v12481_v30 = vld [vmem:[#allocation7 + $0x8] ss:$12 sps:$4 sm:$0xff]   ;;  %v14270_v40 = vpack.c.bf16 %v2109_v38, %v14162_v2 }
 0x5b5   :  { %v11836_v48 = vpop.f32.mrf.mxu0 }
 0x5b6   :  { %v2820_v48 = vsel %vm2231_vm1, %v14148_v45, 0 }
 0x622   :  { %v2485_v50 = vpop.f32.mrf.mxu0 }
 0x624   :  { %v11847_v55 = vpop.f32.mrf.mxu0 }
 0x626   :  { %v2488_v23 = vpop.f32.mrf.mxu0 }
 0x627   :  { %v2492_v0 = vpack.c.bf16 %v2488_v23, %v2485_v50 }
 0x628   :  { %v11848_v15 = vpop.f32.mrf.mxu0 }
 0x629   :  { %10811 = vmatmul.mubr.msk.bf16.vlgmr.msra.gmra.mxu1 %vm2231_vm1, %v2492_v0  ;;  %11858 = vmatmul.mubr.msk.bf16.vlgmr.msra.gmra.mxu0 %vm2231_vm1, %v2492_v0 }
 0x62a   :  { %2736 = vmatpush1.bf16.msra.mxu1 %v12466_v58  ;;  %11862 = vmatpush3.bf16.msra.mxu0 %v12469_v6 }
 0x62b   :  { %2737 = vmatprep.subr.bf16.mxu1 %v12472_v8  ;;  %11863 = vmatprep.subr.bf16.mxu0 %v15433_v5 }
 0x62c   :  { %2759 = vmatprep.mubr.bf16.mxu1 %v15437_v41  ;;  %11869 = vmatprep.mubr.msk.bf16.mxu0 %vm13816_vm0, %v15433_v5 }
 0x62e   :  { %2738 = vmatpush1.bf16.msra.mxu1 %v12470_v17  ;;  %11864 = vmatpush3.bf16.msra.mxu0 %v12473_v63 }
 0x62f   :  { %2739 = vmatprep.subr.bf16.mxu1 %v12476_v9  ;;  %11865 = vmatprep.subr.bf16.mxu0 %v15433_v5 }
 0x632   :  { %2740 = vmatpush1.bf16.msra.mxu1 %v12474_v26  ;;  %11866 = vmatpush3.bf16.msra.mxu0 %v12477_v25 }
 0x633   :  { %2741 = vmatprep.subr.bf16.mxu1 %v12480_v31  ;;  %11867 = vmatprep.subr.bf16.mxu0 %v15433_v5 }
 0x636   :  { %2742 = vmatpush1.bf16.msra.mxu1 %v12478_v32  ;;  %11868 = vmatpush3.bf16.msra.mxu0 %v12481_v30 }
 0x637   :  { %11873 = vmatprep.subr.bf16.mxu1 %v15433_v5  ;;  %11879 = vmatprep.subr.bf16.mxu0 %v15433_v5 }
 0x639   :  { %10825 = vmatmul.mubr.msk.bf16.vlgmr.msra.gmra.mxu1 %vm2231_vm1, %v2349_v42  ;;  %11870 = vmatmul.mubr.msk.bf16.vlgmr.msra.gmra.mxu0 %vm2231_vm1, %v2349_v42 }
 0x63a   :  { %11874 = vmatpush3.bf16.xpose.msra.mxu1 %v2820_v48  ;;  %11880 = vmatpush3.bf16.msra.mxu0 %v14270_v40 }
 0x63b   :  { %11875 = vmatprep.mubr.msk.bf16.mxu1 %vm13816_vm0, %v15433_v5  ;;  %11881 = vmatprep.mubr.msk.bf16.mxu0 %vm13816_vm0, %v15433_v5 }
 0x63c   :  { %11885 = vmatprep.subr.bf16.mxu0 %v15433_v5 }
 0x641   :  { %11876 = vmatmul.mubr.msk.bf16.vlgmr.msra.gmra.mxu1 %vm2231_vm1, %v14215_v39 }
 0x642   :  { %3048 = vmatprep.mubr.bf16.mxu1 %v15437_v41 }
 0x6e9   :  { %v2653_v43 = vpop.f32.mrf.mxu0  ;;  %v2610_v2 = vpop.f32.mrf.mxu1 }
 0x6eb   :  { %v11859_v56 = vpop.f32.mrf.mxu0  ;;  %v2612_v50 = vpop.f32.mrf.mxu1 }
 0x6ed   :  { %v2656_v42 = vpop.f32.mrf.mxu0  ;;  %v2614_v23 = vpop.f32.mrf.mxu1 }
 0x6ef   :  { %v11860_v55 = vpop.f32.mrf.mxu0  ;;  %v14285_v58 = vpop.f32.mrf.mxu1 }
 0x6f0   :  { %15472 = vst [vmem:[#allocation39_spill] sm:$0xff] %v14285_v58 }
 0x6f9   :  { %v2761_v6 = vpop.f32.mrf.mxu1  ;;  %v2804_v0 = vpop.f32.mrf.mxu0 }
 0x6fa   :  { %v14287_v8 = vadd.f32 %v2761_v6, %v2610_v2  ;;  %v14289_v15 = vadd.f32 %v2804_v0, %v2653_v43 }
 0x6fb   :  { %v2763_v17 = vpop.f32.mrf.mxu1  ;;  %v11871_v63 = vpop.f32.mrf.mxu0 }
 0x6fc   :  { %v14291_v39 = vadd.f32 %v2763_v17, %v2612_v50 }
 0x6fd   :  { %v2765_v9 = vpop.f32.mrf.mxu1  ;;  %v2807_v26 = vpop.f32.mrf.mxu0 }
 0x6fe   :  { %v14293_v25 = vadd.f32 %v2765_v9, %v2614_v23  ;;  %v14295_v31 = vadd.f32 %v2807_v26, %v2656_v42 }
 0x6ff   :  { %v14297_v32 = vpop.f32.mrf.mxu1  ;;  %v11872_v30 = vpop.f32.mrf.mxu0 }
 0x700   :  { %15473 = vst [vmem:[#allocation40_spill] sm:$0xff] %v14297_v32  ;;  %v12501_v32 = vld [vmem:[#allocation7 + $0x170] ss:$12 sps:$4 sm:$0xff]  }
 0x701   :  { %v2856_v38 = vpop.f32.mrf.mxu1 }
 0x702   :  { %v2863_v48 = vsel %vm14185_vm2, %v2856_v38, -1e+30 }
 0x703   :  { %v11877_v2 = vpop.f32.mrf.mxu1  ;;  %v2865_v43 = vsel %vm2281_vm3, %v2863_v48, -inf }
 0x704   :  { %2866 = vmax.xlane.f32.xlu1 %v2865_v43  ;;  %v14309_v43 = vld [vmem:[#allocation7 + $0x108] ss:$12 sps:$4 sm:$0xff]  }
 0x705   :  { %v2859_v56 = vpop.f32.mrf.mxu1 }
 0x706   :  { %v2864_v50 = vsel %vm14193_vm4, %v2859_v56, -1e+30  ;;  %v14313_v56 = vld [vmem:[#allocation7 + $0xf4] ss:$12 sps:$4 sm:$0xff]  }
 0x707   :  { %v11878_v55 = vpop.f32.mrf.mxu1  ;;  %v2868_v23 = vsel %vm2281_vm3, %v2864_v50, -inf }
 0x708   :  { %2869 = vmax.xlane.f32.xlu1 %v2868_v23  ;;  %v14320_v55 = vld [vmem:[#allocation7 + $0xdc] ss:$12 sps:$4 sm:$0xff]   ;;  %v14323_v23 = vld [vmem:[#allocation7 + $0xd8] ss:$12 sps:$4 sm:$0xff]  }
 0x78d   :  { %v2867_v42 = vpop.xlane.xlu1 %2866 }
 0x78e   :  { %v2871_v6 = vsub.f32 %v2863_v48, %v2867_v42  ;;  %v14311_v48 = vld [vmem:[#allocation7 + $0x10c] ss:$12 sps:$4 sm:$0xff]  }
 0x78f   :  { %3024 = vmatprep.subr.bf16.mxu1 %v14311_v48 }
 0x790   :  { %v2873_v0 = vmul.f32 1.442695, %v2871_v6  ;;  %3025 = vmatpush1.bf16.msra.mxu1 %v14309_v43 }
 0x791   :  { %v2870_v17 = vpop.xlane.xlu1 %2869  ;;  %3026 = vmatprep.subr.bf16.mxu1 %v14313_v56 }
 0x792   :  { %13386 = vpow2.f32 %v2873_v0  ;;  %v2872_v63 = vsub.f32 %v2864_v50, %v2870_v17  ;;  %v14317_v50 = vld [vmem:[#allocation7 + $0xf0] ss:$12 sps:$4 sm:$0xff]  }
 0x794   :  { %v2875_v9 = vmul.f32 1.442695, %v2872_v63  ;;  %3027 = vmatpush1.bf16.msra.mxu1 %v14317_v50 }
 0x795   :  { %3028 = vmatprep.subr.bf16.mxu1 %v14320_v55 }
 0x796   :  { %13388 = vpow2.f32 %v2875_v9  ;;  %v12485_v9 = vld [vmem:[#allocation7 + $0x110] ss:$12 sps:$4 sm:$0xff]  }
 0x798   :  { %3029 = vmatpush1.bf16.msra.mxu1 %v14323_v23 }
 0x79f   :  { %v13387_v26 = vpop.eup %13386 }
 0x7a0   :  { %v2877_v30 = vsel %vm2281_vm3, %v13387_v26, 0.0 }
 0x7a1   :  { %2878 = vadd.xlane.f32.xlu1 %v2877_v30 }
 0x7a3   :  { %v13389_v38 = vpop.eup %13388 }
 0x7a4   :  { %v2880_v2 = vsel %vm2281_vm3, %v13389_v38, 0.0 }
 0x7a5   :  { %2881 = vadd.xlane.f32.xlu1 %v2880_v2  ;;  %v12489_v2 = vld [vmem:[#allocation7 + $0xf8] ss:$12 sps:$4 sm:$0xff]  }
 0x7b6   :  { %3110 = vrot.lane.b32.xlu1 %v14148_v45, %s13817_s10 }
 0x82a   :  { %v2879_v45 = vpop.xlane.xlu1 %2878 }
 0x82b   :  { %13390 = vrcp.f32 %v2879_v45  ;;  %v12493_v45 = vld [vmem:[#allocation7 + $0xe0] ss:$12 sps:$4 sm:$0xff]  }
 0x82e   :  { %v2882_v42 = vpop.xlane.xlu1 %2881 }
 0x82f   :  { %13392 = vrcp.f32 %v2882_v42  ;;  %v14332_v42 = vld [vmem:[#allocation7 + $0xc0] ss:$12 sps:$4 sm:$0xff]  }
 0x838   :  { %v13391_v6 = vpop.eup %13390 }
 0x839   :  { %v2885_v17 = vmul.f32 %v13391_v6, %v13387_v26  ;;  %v14334_v26 = vld [vmem:[#allocation7 + $0xc4] ss:$12 sps:$4 sm:$0xff]  }
 0x83a   :  { %3030 = vmatprep.subr.bf16.mxu1 %v14334_v26 }
 0x83b   :  { %3031 = vmatpush1.bf16.msra.mxu1 %v14332_v42 }
 0x83c   :  { %v13393_v0 = vpop.eup %13392  ;;  %11897 = vmatprep.subr.bf16.mxu1 %v15433_v5 }
 0x83d   :  { %v2886_v63 = vmul.f32 %v13393_v0, %v13389_v38  ;;  %v12497_v38 = vld [vmem:[#allocation7 + $0xc8] ss:$12 sps:$4 sm:$0xff]  }
 0x83f   :  { %v2887_v30 = vpack.c.bf16 %v2886_v63, %v2885_v17  ;;  %v3111_v17 = vpop.permute.xlu1 %3110 }
 0x841   :  { %11882 = vmatmul.mubr.msk.bf16.vlgmr.msra.gmra.mxu0 %vm2281_vm3, %v2887_v30 }
 0x842   :  { %11886 = vmatpush3.bf16.msra.mxu0 %v12485_v9  ;;  %11893 = vmatprep.mubr.msk.bf16.mxu0 %vm13816_vm0, %v15433_v5 }
 0x843   :  { %11887 = vmatprep.subr.bf16.mxu0 %v15433_v5 }
 0x846   :  { %11888 = vmatpush3.bf16.msra.mxu0 %v12489_v2  ;;  %v3116_v2 = vsel %vm2231_vm1, %v3111_v17, 0 }
 0x847   :  { %11889 = vmatprep.subr.bf16.mxu0 %v15433_v5 }
 0x84a   :  { %11890 = vmatpush3.bf16.msra.mxu0 %v12493_v45  ;;  %v3108_v45 = vpop.permute.xlu0 %3107 }
 0x84b   :  { %11891 = vmatprep.subr.bf16.mxu0 %v15433_v5 }
 0x84e   :  { %11892 = vmatpush3.bf16.msra.mxu0 %v12497_v38 }
 0x84f   :  { %11903 = vmatprep.subr.bf16.mxu0 %v15433_v5 }
 0x901   :  { %v2925_v6 = vpop.f32.mrf.mxu0 }
 0x903   :  { %v11883_v0 = vpop.f32.mrf.mxu0 }
 0x905   :  { %v2928_v63 = vpop.f32.mrf.mxu0 }
 0x906   :  { %v2932_v9 = vpack.c.bf16 %v2928_v63, %v2925_v6 }
 0x907   :  { %v11884_v30 = vpop.f32.mrf.mxu0 }
 0x908   :  { %10841 = vmatmul.mubr.msk.bf16.vlgmr.msra.gmra.mxu1 %vm2231_vm1, %v2932_v9  ;;  %11894 = vmatmul.mubr.msk.bf16.vlgmr.msra.gmra.mxu0 %vm2231_vm1, %v2932_v9 }
 0x909   :  { %11898 = vmatpush3.bf16.xpose.msra.mxu1 %v3116_v2  ;;  %11899 = vmatprep.mubr.msk.bf16.mxu1 %vm13816_vm0, %v15433_v5 }
 0x90a   :  { %11905 = vmatprep.mubr.msk.bf16.mxu0 %vm13816_vm0, %v15433_v5 }
 0x910   :  { %11900 = vmatmul.mubr.msk.bf16.vlgmr.msra.gmra.mxu1 %vm2231_vm1, %v3108_v45 }
 0x911   :  { %3348 = vmatprep.mubr.bf16.mxu1 %v15437_v41 }
 0x9c8   :  { %v3050_v38 = vpop.f32.mrf.mxu1  ;;  %v3093_v6 = vpop.f32.mrf.mxu0 }
 0x9c9   :  { %v14351_v0 = vadd.f32 %v3050_v38, %v14287_v8  ;;  %v14354_v17 = vadd.f32 %v3093_v6, %v14289_v15 }
 0x9ca   :  { %v3052_v63 = vpop.f32.mrf.mxu1  ;;  %v11895_v9 = vpop.f32.mrf.mxu0 }
 0x9cb   :  { %v14357_v30 = vadd.f32 %v3052_v63, %v14291_v39 }
 0x9cc   :  { %v3054_v2 = vpop.f32.mrf.mxu1  ;;  %v3096_v5 = vpop.f32.mrf.mxu0 }
 0x9cd   :  { %v14360_v7 = vadd.f32 %v3054_v2, %v14293_v25  ;;  %v14363_v45 = vadd.f32 %v3096_v5, %v14295_v31 }
 0x9ce   :  { %v14365_v41 = vpop.f32.mrf.mxu1  ;;  %v11896_v8 = vpop.f32.mrf.mxu0 }
 0x9cf   :  { %15474 = vst [vmem:[#allocation41_spill] sm:$0xff] %v14365_v41 }
 0x9d0   :  { %v3152_v38 = vpop.f32.mrf.mxu1 }
 0x9d1   :  { %v3159_v15 = vsel %vm14185_vm2, %v3152_v38, -1e+30 }
 0x9d2   :  { %v11901_v6 = vpop.f32.mrf.mxu1  ;;  %v3161_v9 = vsel %vm2281_vm3, %v3159_v15, -inf }
 0x9d3   :  { %3162 = vmax.xlane.f32.xlu0 %v3161_v9 }
 0x9d4   :  { %v3155_v39 = vpop.f32.mrf.mxu1 }
 0x9d5   :  { %v3160_v63 = vsel %vm14193_vm4, %v3155_v39, -1e+30 }
 0x9d6   :  { %v11902_v25 = vpop.f32.mrf.mxu1  ;;  %v3164_v2 = vsel %vm2281_vm3, %v3160_v63, -inf }
 0x9d7   :  { %3165 = vmax.xlane.f32.xlu1 %v3164_v2  ;;  %v15475_v2 = vmov 0.0  }
 0xa5c   :  { %v3163_v5 = vpop.xlane.xlu0 %3162 }
 0xa5d   :  { %v3167_v31 = vsub.f32 %v3159_v15, %v3163_v5  ;;  %v14379_v15 = vld [vmem:[#allocation7 + $0x168] ss:$12 sps:$4 sm:$0xff]  }
 0xa5f   :  { %v3169_v11 = vmul.f32 1.442695, %v3167_v31 }
 0xa60   :  { %v3166_v8 = vpop.xlane.xlu1 %3165 }
 0xa61   :  { %13394 = vpow2.f32 %v3169_v11  ;;  %v3168_v12 = vsub.f32 %v3160_v63, %v3166_v8  ;;  %v14381_v11 = vld [vmem:[#allocation7 + $0x16c] ss:$12 sps:$4 sm:$0xff]  }
 0xa62   :  { %3324 = vmatprep.subr.bf16.mxu1 %v14381_v11 }
 0xa63   :  { %v3171_v10 = vmul.f32 1.442695, %v3168_v12  ;;  %v14383_v12 = vld [vmem:[#allocation7 + $0x154] ss:$12 sps:$4 sm:$0xff]   ;;  %3325 = vmatpush1.bf16.msra.mxu1 %v14379_v15 }
 0xa64   :  { %3326 = vmatprep.subr.bf16.mxu1 %v14383_v12 }
 0xa65   :  { %13396 = vpow2.f32 %v3171_v10  ;;  %v14387_v10 = vld [vmem:[#allocation7 + $0x150] ss:$12 sps:$4 sm:$0xff]  }
 0xa67   :  { %3327 = vmatpush1.bf16.msra.mxu1 %v14387_v10 }
 0xa6e   :  { %v13395_v38 = vpop.eup %13394 }
 0xa6f   :  { %v3173_v6 = vsel %vm2281_vm3, %v13395_v38, 0.0 }
 0xa70   :  { %3174 = vadd.xlane.f32.xlu0 %v3173_v6 }
 0xa72   :  { %v13397_v9 = vpop.eup %13396 }
 0xa73   :  { %v3176_v41 = vsel %vm2281_vm3, %v13397_v9, 0.0 }
 0xa74   :  { %3177 = vadd.xlane.f32.xlu0 %v3176_v41  ;;  %v14390_v41 = vld [vmem:[#allocation7 + $0x13c] ss:$12 sps:$4 sm:$0xff]  }
 0xa75   :  { %3328 = vmatprep.subr.bf16.mxu1 %v14390_v41 }
 0xa8a   :  { %3185 = vrot.lane.b32.xlu0 %v14270_v40, %s13817_s10  ;;  %v14393_v40 = vld [vmem:[#allocation7 + $0x138] ss:$12 sps:$4 sm:$0xff]  }
 0xa8b   :  { %3329 = vmatpush1.bf16.msra.mxu1 %v14393_v40 }
 0xa8e   :  { %3702 = vrot.lane.b32.xlu0 %v14126_v57, %s13817_s10 }
 0xaf9   :  { %v3175_v39 = vpop.xlane.xlu0 %3174 }
 0xafa   :  { %13398 = vrcp.f32 %v3175_v39  ;;  %v12509_v39 = vld [vmem:[#allocation7 + $0x140] ss:$12 sps:$4 sm:$0xff]  }
 0xafd   :  { %v3178_v63 = vpop.xlane.xlu0 %3177 }
 0xafe   :  { %13400 = vrcp.f32 %v3178_v63  ;;  %v12513_v63 = vld [vmem:[#allocation7 + $0x128] ss:$12 sps:$4 sm:$0xff]  }
 0xb01   :  { %v3186_v25 = vpop.permute.xlu0 %3185 }
 0xb02   :  { %11904 = vmatpush3.bf16.msra.mxu0 %v3186_v25 }
 0xb03   :  { %11909 = vmatprep.subr.bf16.mxu0 %v15475_v2 }
 0xb07   :  { %v13399_v5 = vpop.eup %13398 }
 0xb08   :  { %v3181_v8 = vmul.f32 %v13399_v5, %v13395_v38  ;;  %v14404_v38 = vld [vmem:[#allocation7 + $0x120] ss:$12 sps:$4 sm:$0xff]  }
 0xb0b   :  { %v13401_v31 = vpop.eup %13400 }
 0xb0c   :  { %v3182_v6 = vmul.f32 %v13401_v31, %v13397_v9  ;;  %v14406_v9 = vld [vmem:[#allocation7 + $0x124] ss:$12 sps:$4 sm:$0xff]  }
 0xb0d   :  { %3330 = vmatprep.subr.bf16.mxu1 %v14406_v9 }
 0xb0e   :  { %v3183_v58 = vpack.c.bf16 %v3182_v6, %v3181_v8  ;;  %3331 = vmatpush1.bf16.msra.mxu1 %v14404_v38 }
 0xb0f   :  { %11921 = vmatprep.subr.bf16.mxu1 %v15475_v2 }
 0xb10   :  { %11906 = vmatmul.mubr.msk.bf16.vlgmr.msra.gmra.mxu0 %vm2281_vm3, %v3183_v58 }
 0xb11   :  { %11910 = vmatpush3.bf16.msra.mxu0 %v12501_v32  ;;  %11917 = vmatprep.mubr.msk.bf16.mxu0 %vm13816_vm0, %v15475_v2 }
 0xb12   :  { %11911 = vmatprep.subr.bf16.mxu0 %v15475_v2 }
 0xb15   :  { %11912 = vmatpush3.bf16.msra.mxu0 %v12505_v13  ;;  %v2003_v13 = vadd.f32 %v14144_v16, %v14146_v28 }
 0xb16   :  { %11913 = vmatprep.subr.bf16.mxu0 %v15475_v2 }
 0xb17   :  { %v3409_v25 = vpack.c.bf16 %v2003_v13, %v14142_v22  ;;  %v15476_v22 = vmov 0  }
 0xb19   :  { %11914 = vmatpush3.bf16.msra.mxu0 %v12509_v39  ;;  %v3415_v6 = vsel %vm2231_vm1, %v3409_v25, 0 }
 0xb1a   :  { %11915 = vmatprep.subr.bf16.mxu0 %v15475_v2 }
 0xb1d   :  { %11916 = vmatpush3.bf16.msra.mxu0 %v12513_v63 }
 0xb1e   :  { %11927 = vmatprep.subr.bf16.mxu0 %v15475_v2 }
 0xbd0   :  { %v3225_v58 = vpop.f32.mrf.mxu0 }
 0xbd2   :  { %v11907_v32 = vpop.f32.mrf.mxu0 }
 0xbd4   :  { %v3228_v5 = vpop.f32.mrf.mxu0 }
 0xbd5   :  { %v3232_v31 = vpack.c.bf16 %v3228_v5, %v3225_v58 }
 0xbd6   :  { %v11908_v8 = vpop.f32.mrf.mxu0 }
 0xbd7   :  { %10857 = vmatmul.mubr.msk.bf16.vlgmr.msra.gmra.mxu1 %vm2231_vm1, %v3232_v31  ;;  %11918 = vmatmul.mubr.msk.bf16.vlgmr.msra.gmra.mxu0 %vm2231_vm1, %v3232_v31 }
 0xbd8   :  { %11922 = vmatpush3.bf16.xpose.msra.mxu1 %v3415_v6  ;;  %11928 = vmatpush3.bf16.msra.mxu0 %v14181_v4 }
 0xbd9   :  { %11923 = vmatprep.mubr.msk.bf16.mxu1 %vm13816_vm0, %v15475_v2  ;;  %11929 = vmatprep.mubr.msk.bf16.mxu0 %vm13816_vm0, %v15475_v2 }
 0xbda   :  { %11933 = vmatprep.subr.bf16.mxu0 %v15475_v2 }
 0xbdf   :  { %11924 = vmatmul.mubr.msk.bf16.vlgmr.msra.gmra.mxu1 %vm2231_vm1, %v14126_v57 }
 0xbe0   :  { %3643 = vmatprep.mubr.bf16.mxu1 %v15476_v22 }
 0xc97   :  { %v3350_v16 = vpop.f32.mrf.mxu1  ;;  %v3393_v28 = vpop.f32.mrf.mxu0 }
 0xc98   :  { %v14428_v39 = vadd.f32 %v3350_v16, %v14351_v0  ;;  %v14431_v63 = vadd.f32 %v3393_v28, %v14354_v17 }
 0xc99   :  { %v3352_v13 = vpop.f32.mrf.mxu1  ;;  %v11919_v58 = vpop.f32.mrf.mxu0 }
 0xc9a   :  { %v14434_v32 = vadd.f32 %v3352_v13, %v14357_v30 }
 0xc9b   :  { %v3354_v5 = vpop.f32.mrf.mxu1  ;;  %v3396_v31 = vpop.f32.mrf.mxu0 }
 0xc9c   :  { %v14437_v8 = vadd.f32 %v3354_v5, %v14360_v7  ;;  %v14440_v57 = vadd.f32 %v3396_v31, %v14363_v45 }
 0xc9d   :  { %v14442_v6 = vpop.f32.mrf.mxu1  ;;  %v11920_v0 = vpop.f32.mrf.mxu0 }
 0xc9e   :  { %15477 = vst [vmem:[#allocation42_spill] sm:$0xff] %v14442_v6 }
 0xc9f   :  { %v3451_v16 = vpop.f32.mrf.mxu1 }
 0xca0   :  { %v3458_v17 = vsel %vm14185_vm2, %v3451_v16, -1e+30 }
 0xca1   :  { %v11925_v28 = vpop.f32.mrf.mxu1  ;;  %v3460_v58 = vsel %vm2281_vm3, %v3458_v17, -inf }
 0xca2   :  { %3461 = vmax.xlane.f32.xlu1 %v3460_v58 }
 0xca3   :  { %v3454_v30 = vpop.f32.mrf.mxu1 }
 0xca4   :  { %v3459_v13 = vsel %vm14193_vm4, %v3454_v30, -1e+30  ;;  %v14453_v30 = vld [vmem:[#allocation7 + $0x1c8] ss:$12 sps:$4 sm:$0xff]  }
 0xca5   :  { %v11926_v7 = vpop.f32.mrf.mxu1  ;;  %v3463_v5 = vsel %vm2281_vm3, %v3459_v13, -inf }
 0xca6   :  { %3464 = vmax.xlane.f32.xlu1 %v3463_v5  ;;  %v14455_v7 = vld [vmem:[#allocation7 + $0x1cc] ss:$12 sps:$4 sm:$0xff]  }
 0xca7   :  { %3619 = vmatprep.subr.bf16.mxu1 %v14455_v7 }
 0xca8   :  { %3620 = vmatpush1.bf16.msra.mxu1 %v14453_v30 }
 0xd2b   :  { %v3462_v45 = vpop.xlane.xlu1 %3461 }
 0xd2c   :  { %v3466_v31 = vsub.f32 %v3458_v17, %v3462_v45  ;;  %v14457_v17 = vld [vmem:[#allocation7 + $0x1b4] ss:$12 sps:$4 sm:$0xff]  }
 0xd2d   :  { %3621 = vmatprep.subr.bf16.mxu1 %v14457_v17 }
 0xd2e   :  { %v3468_v6 = vmul.f32 1.442695, %v3466_v31 }
 0xd2f   :  { %v3465_v0 = vpop.xlane.xlu1 %3464 }
 0xd30   :  { %13402 = vpow2.f32 %v3468_v6  ;;  %v3467_v47 = vsub.f32 %v3459_v13, %v3465_v0  ;;  %v12517_v0 = vld [vmem:[#allocation7 + $0x1d0] ss:$12 sps:$4 sm:$0xff]  }
 0xd32   :  { %v3470_v33 = vmul.f32 1.442695, %v3467_v47  ;;  %v14464_v47 = vld [vmem:[#allocation7 + $0x19c] ss:$12 sps:$4 sm:$0xff]  }
 0xd33   :  { %15479 = vst [vmem:[#allocation44_spill] sm:$0xff] %v14464_v47 }
 0xd34   :  { %13404 = vpow2.f32 %v3470_v33  ;;  %v14461_v33 = vld [vmem:[#allocation7 + $0x1b0] ss:$12 sps:$4 sm:$0xff]  }
 0xd35   :  { %15478 = vst [vmem:[#allocation43_spill] sm:$0xff] %v14461_v33  ;;  %3622 = vmatpush1.bf16.msra.mxu1 %v14461_v33  ;;  %v12521_v33 = vld [vmem:[#allocation7 + $0x1b8] ss:$12 sps:$4 sm:$0xff]  }
 0xd36   :  { %3623 = vmatprep.subr.bf16.mxu1 %v14464_v47 }
 0xd3d   :  { %v13403_v16 = vpop.eup %13402 }
 0xd3e   :  { %v3472_v28 = vsel %vm2281_vm3, %v13403_v16, 0.0 }
 0xd3f   :  { %3473 = vadd.xlane.f32.xlu1 %v3472_v28 }
 0xd41   :  { %v13405_v58 = vpop.eup %13404 }
 0xd42   :  { %v3475_v49 = vsel %vm2281_vm3, %v13405_v58, 0.0 }
 0xd43   :  { %3476 = vadd.xlane.f32.xlu1 %v3475_v49  ;;  %v14467_v49 = vld [vmem:[#allocation7 + $0x198] ss:$12 sps:$4 sm:$0xff]  }
 0xd44   :  { %15480 = vst [vmem:[#allocation45_spill] sm:$0xff] %v14467_v49  ;;  %3624 = vmatpush1.bf16.msra.mxu1 %v14467_v49 }
 0xd54   :  { %3705 = vrot.lane.b32.xlu1 %v3409_v25, %s13817_s10 }
 0xdc8   :  { %v3474_v25 = vpop.xlane.xlu1 %3473 }
 0xdc9   :  { %13406 = vrcp.f32 %v3474_v25  ;;  %v12525_v25 = vld [vmem:[#allocation7 + $0x1a0] ss:$12 sps:$4 sm:$0xff]  }
 0xdcc   :  { %v3477_v6 = vpop.xlane.xlu1 %3476 }
 0xdcd   :  { %13408 = vrcp.f32 %v3477_v6  ;;  %v14476_v6 = vld [vmem:[#allocation7 + $0x180] ss:$12 sps:$4 sm:$0xff]  }
 0xdce   :  { %15481 = vst [vmem:[#allocation46_spill] sm:$0xff] %v14476_v6 }
 0xdd6   :  { %v13407_v13 = vpop.eup %13406 }
 0xdd7   :  { %v3480_v45 = vmul.f32 %v13407_v13, %v13403_v16  ;;  %v14478_v16 = vld [vmem:[#allocation7 + $0x184] ss:$12 sps:$4 sm:$0xff]  }
 0xdd8   :  { %15482 = vst [vmem:[#allocation47_spill] sm:$0xff] %v14478_v16  ;;  %3625 = vmatprep.subr.bf16.mxu1 %v14478_v16 }
 0xdd9   :  { %3626 = vmatpush1.bf16.msra.mxu1 %v14476_v6 }
 0xdda   :  { %v13409_v5 = vpop.eup %13408  ;;  %11945 = vmatprep.subr.bf16.mxu1 %v15475_v2 }
 0xddb   :  { %v3481_v31 = vmul.f32 %v13409_v5, %v13405_v58  ;;  %v12529_v58 = vld [vmem:[#allocation7 + $0x188] ss:$12 sps:$4 sm:$0xff]   ;;  %v3706_v5 = vpop.permute.xlu1 %3705 }
 0xddd   :  { %v3482_v28 = vpack.c.bf16 %v3481_v31, %v3480_v45 }
 0xddf   :  { %11930 = vmatmul.mubr.msk.bf16.vlgmr.msra.gmra.mxu0 %vm2281_vm3, %v3482_v28  ;;  %v3711_v28 = vsel %vm2231_vm1, %v3706_v5, 0 }
 0xde0   :  { %11934 = vmatpush3.bf16.msra.mxu0 %v12517_v0  ;;  %11941 = vmatprep.mubr.msk.bf16.mxu0 %vm13816_vm0, %v15475_v2 }
 0xde1   :  { %11935 = vmatprep.subr.bf16.mxu0 %v15475_v2 }
 0xde4   :  { %11936 = vmatpush3.bf16.msra.mxu0 %v12521_v33 }
 0xde5   :  { %11937 = vmatprep.subr.bf16.mxu0 %v15475_v2 }
 0xde8   :  { %11938 = vmatpush3.bf16.msra.mxu0 %v12525_v25  ;;  %v3703_v25 = vpop.permute.xlu0 %3702 }
 0xde9   :  { %11939 = vmatprep.subr.bf16.mxu0 %v15475_v2 }
 0xdec   :  { %11940 = vmatpush3.bf16.msra.mxu0 %v12529_v58 }
 0xded   :  { %11951 = vmatprep.subr.bf16.mxu0 %v15475_v2 }
 0xe9f   :  { %v3520_v33 = vpop.f32.mrf.mxu0 }
 0xea1   :  { %v11931_v13 = vpop.f32.mrf.mxu0 }
 0xea3   :  { %v3523_v45 = vpop.f32.mrf.mxu0 }
 0xea4   :  { %v3527_v31 = vpack.c.bf16 %v3523_v45, %v3520_v33 }
 0xea5   :  { %v11932_v0 = vpop.f32.mrf.mxu0 }
 0xea6   :  { %10873 = vmatmul.mubr.msk.bf16.vlgmr.msra.gmra.mxu1 %vm2231_vm1, %v3527_v31  ;;  %11942 = vmatmul.mubr.msk.bf16.vlgmr.msra.gmra.mxu0 %vm2231_vm1, %v3527_v31 }
 0xea7   :  { %11946 = vmatpush3.bf16.xpose.msra.mxu1 %v3711_v28  ;;  %11947 = vmatprep.mubr.msk.bf16.mxu1 %vm13816_vm0, %v15475_v2 }
 0xea8   :  { %11953 = vmatprep.mubr.msk.bf16.mxu0 %vm13816_vm0, %v15475_v2 }
 0xeae   :  { %11948 = vmatmul.mubr.msk.bf16.vlgmr.msra.gmra.mxu1 %vm2231_vm1, %v3703_v25 }
 0xeaf   :  { %3943 = vmatprep.mubr.bf16.mxu1 %v15476_v22 }
 0xf66   :  { %v3645_v58 = vpop.f32.mrf.mxu1  ;;  %v3688_v33 = vpop.f32.mrf.mxu0 }
 0xf67   :  { %v14495_v13 = vadd.f32 %v3645_v58, %v14428_v39  ;;  %v14498_v5 = vadd.f32 %v3688_v33, %v14431_v63 }
 0xf68   :  { %v3647_v45 = vpop.f32.mrf.mxu1  ;;  %v11943_v31 = vpop.f32.mrf.mxu0 }
 0xf69   :  { %v14501_v0 = vadd.f32 %v3647_v45, %v14434_v32 }
 0xf6a   :  { %v3649_v28 = vpop.f32.mrf.mxu1  ;;  %v3691_v6 = vpop.f32.mrf.mxu0 }
 0xf6b   :  { %v14504_v16 = vadd.f32 %v3649_v28, %v14437_v8  ;;  %v14507_v25 = vadd.f32 %v3691_v6, %v14440_v57  ;;  %v1907_v57 = vadd.f32 %v14140_v19, %v14138_v52  ;;  %v14532_v19 = vld [vmem:[#allocation7 + $0x22c] ss:$12 sps:$4 sm:$0xff]  }
 0xf6c   :  { %v14509_v49 = vpop.f32.mrf.mxu1  ;;  %v11944_v39 = vpop.f32.mrf.mxu0  ;;  %3919 = vmatprep.subr.bf16.mxu1 %v14532_v19 }
 0xf6d   :  { %15483 = vst [vmem:[#allocation48_spill] sm:$0xff] %v14509_v49  ;;  %v14520_v6 = vpack.c.bf16 %v1907_v57, %v14128_v59  ;;  %v14530_v59 = vld [vmem:[#allocation7 + $0x228] ss:$12 sps:$4 sm:$0xff]  }
 0xf6e   :  { %v3747_v58 = vpop.f32.mrf.mxu1  ;;  %3920 = vmatpush1.bf16.msra.mxu1 %v14530_v59 }
 0xf6f   :  { %v3754_v63 = vsel %vm14185_vm2, %v3747_v58, -1e+30 }
 0xf70   :  { %v11949_v33 = vpop.f32.mrf.mxu1  ;;  %v3756_v31 = vsel %vm2281_vm3, %v3754_v63, -inf }
 0xf71   :  { %3757 = vmax.xlane.f32.xlu0 %v3756_v31 }
 0xf72   :  { %v3750_v32 = vpop.f32.mrf.mxu1 }
 0xf73   :  { %v3755_v45 = vsel %vm14193_vm4, %v3750_v32, -1e+30 }
 0xf74   :  { %v11950_v8 = vpop.f32.mrf.mxu1  ;;  %v3759_v28 = vsel %vm2281_vm3, %v3755_v45, -inf }
 0xf75   :  { %3760 = vmax.xlane.f32.xlu1 %v3759_v28 }
 0xf86   :  { %4127 = vrot.lane.b32.xlu1 %v14520_v6, %s13817_s10 }
 0xffa   :  { %v3758_v39 = vpop.xlane.xlu0 %3757 }
 0xffb   :  { %v3762_v58 = vsub.f32 %v3754_v63, %v3758_v39  ;;  %v14538_v63 = vld [vmem:[#allocation7 + $0x210] ss:$12 sps:$4 sm:$0xff]  }
 0xffc   :  { %15484 = vst [vmem:[#allocation49_spill] sm:$0xff] %v14538_v63 }
 0xffd   :  { %v3764_v33 = vmul.f32 1.442695, %v3762_v58 }
 0xffe   :  { %v3761_v31 = vpop.xlane.xlu1 %3760 }
 0xfff   :  { %13410 = vpow2.f32 %v3764_v33  ;;  %v3763_v49 = vsub.f32 %v3755_v45, %v3761_v31  ;;  %v14541_v45 = vld [vmem:[#allocation7 + $0x1fc] ss:$12 sps:$4 sm:$0xff]  }
0x1000   :  { %15485 = vst [vmem:[#allocation50_spill] sm:$0xff] %v14541_v45 }
0x1001   :  { %v3766_v32 = vmul.f32 1.442695, %v3763_v49  ;;  %v14534_v49 = vld [vmem:[#allocation7 + $0x214] ss:$12 sps:$4 sm:$0xff]  }
0x1002   :  { %3921 = vmatprep.subr.bf16.mxu1 %v14534_v49 }
0x1003   :  { %13412 = vpow2.f32 %v3766_v32  ;;  %3922 = vmatpush1.bf16.msra.mxu1 %v14538_v63 }
0x1004   :  { %3923 = vmatprep.subr.bf16.mxu1 %v14541_v45  ;;  %v12537_v45 = vld [vmem:[#allocation7 + $0x218] ss:$12 sps:$4 sm:$0xff]  }
0x100c   :  { %v13411_v8 = vpop.eup %13410 }
0x100d   :  { %v3768_v28 = vsel %vm2281_vm3, %v13411_v8, 0.0 }
0x100e   :  { %3769 = vadd.xlane.f32.xlu0 %v3768_v28 }
0x1010   :  { %v13413_v47 = vpop.eup %13412 }
0x1011   :  { %v3771_v52 = vsel %vm2281_vm3, %v13413_v47, 0.0 }
0x1012   :  { %3772 = vadd.xlane.f32.xlu0 %v3771_v52  ;;  %v12533_v52 = vld [vmem:[#allocation7 + $0x230] ss:$12 sps:$4 sm:$0xff]  }
0x1028   :  { %3780 = vrot.lane.b32.xlu0 %v14181_v4, %s13817_s10  ;;  %v14544_v4 = vld [vmem:[#allocation7 + $0x1f8] ss:$12 sps:$4 sm:$0xff]  }
0x1029   :  { %3924 = vmatpush1.bf16.msra.mxu1 %v14544_v4 }
0x102c   :  { %4124 = vrot.lane.b32.xlu0 %v14120_v35, %s13817_s10 }
0x1097   :  { %v3770_v57 = vpop.xlane.xlu0 %3769 }
0x1098   :  { %13414 = vrcp.f32 %v3770_v57  ;;  %v12541_v57 = vld [vmem:[#allocation7 + $0x200] ss:$12 sps:$4 sm:$0xff]  }
0x109b   :  { %v3773_v39 = vpop.xlane.xlu0 %3772 }
0x109c   :  { %13416 = vrcp.f32 %v3773_v39  ;;  %v12545_v39 = vld [vmem:[#allocation7 + $0x1e8] ss:$12 sps:$4 sm:$0xff]  }
0x109f   :  { %v3781_v58 = vpop.permute.xlu0 %3780 }
0x10a0   :  { %11952 = vmatpush3.bf16.msra.mxu0 %v3781_v58 }
0x10a1   :  { %11957 = vmatprep.subr.bf16.mxu0 %v15475_v2 }
0x10a5   :  { %v13415_v33 = vpop.eup %13414 }
0x10a6   :  { %v3776_v32 = vmul.f32 %v13415_v33, %v13411_v8  ;;  %v14555_v8 = vld [vmem:[#allocation7 + $0x1e0] ss:$12 sps:$4 sm:$0xff]  }
0x10a9   :  { %v13417_v31 = vpop.eup %13416 }
0x10aa   :  { %v3777_v28 = vmul.f32 %v13417_v31, %v13413_v47  ;;  %v14557_v47 = vld [vmem:[#allocation7 + $0x1e4] ss:$12 sps:$4 sm:$0xff]  }
0x10ab   :  { %3925 = vmatprep.subr.bf16.mxu1 %v14557_v47 }
0x10ac   :  { %v3778_v63 = vpack.c.bf16 %v3777_v28, %v3776_v32  ;;  %3926 = vmatpush1.bf16.msra.mxu1 %v14555_v8  ;;  %v4010_v32 = vsel %vm2231_vm1, %v14520_v6, 0  ;;  %v4128_v28 = vpop.permute.xlu1 %4127  ;;  %v4125_v6 = vpop.permute.xlu0 %4124 }
0x10ad   :  { %11969 = vmatprep.subr.bf16.mxu1 %v15475_v2 }
0x10ae   :  { %11954 = vmatmul.mubr.msk.bf16.vlgmr.msra.gmra.mxu0 %vm2281_vm3, %v3778_v63 }
0x10af   :  { %11958 = vmatpush3.bf16.msra.mxu0 %v12533_v52  ;;  %11965 = vmatprep.mubr.msk.bf16.mxu0 %vm13816_vm0, %v15475_v2  ;;  %v4133_v52 = vsel %vm2231_vm1, %v4128_v28, 0 }
0x10b0   :  { %11959 = vmatprep.subr.bf16.mxu0 %v15475_v2 }
0x10b3   :  { %11960 = vmatpush3.bf16.msra.mxu0 %v12537_v45 }
0x10b4   :  { %11961 = vmatprep.subr.bf16.mxu0 %v15475_v2 }
0x10b7   :  { %11962 = vmatpush3.bf16.msra.mxu0 %v12541_v57 }
0x10b8   :  { %11963 = vmatprep.subr.bf16.mxu0 %v15475_v2 }
0x10bb   :  { %11964 = vmatpush3.bf16.msra.mxu0 %v12545_v39 }
0x10bc   :  { %11975 = vmatprep.subr.bf16.mxu0 %v15475_v2 }
0x116e   :  { %v3820_v63 = vpop.f32.mrf.mxu0 }
0x1170   :  { %v11955_v45 = vpop.f32.mrf.mxu0 }
0x1172   :  { %v3823_v58 = vpop.f32.mrf.mxu0 }
0x1173   :  { %v3827_v33 = vpack.c.bf16 %v3823_v58, %v3820_v63 }
0x1174   :  { %v11956_v31 = vpop.f32.mrf.mxu0 }
0x1175   :  { %10889 = vmatmul.mubr.msk.bf16.vlgmr.msra.gmra.mxu1 %vm2231_vm1, %v3827_v33  ;;  %11966 = vmatmul.mubr.msk.bf16.vlgmr.msra.gmra.mxu0 %vm2231_vm1, %v3827_v33 }
0x1176   :  { %11970 = vmatpush3.bf16.xpose.msra.mxu1 %v4010_v32  ;;  %11976 = vmatpush3.bf16.msra.mxu0 %v14172_v46 }
0x1177   :  { %11971 = vmatprep.mubr.msk.bf16.mxu1 %vm13816_vm0, %v15475_v2  ;;  %11981 = vmatprep.subr.bf16.mxu1 %v15475_v2 }
0x1178   :  { %11977 = vmatprep.mubr.msk.bf16.mxu0 %vm13816_vm0, %v15475_v2  ;;  %11987 = vmatprep.subr.bf16.mxu0 %v15475_v2 }
0x117d   :  { %11972 = vmatmul.mubr.msk.bf16.vlgmr.msra.gmra.mxu1 %vm2231_vm1, %v14120_v35 }
0x117e   :  { %11982 = vmatpush3.bf16.xpose.msra.mxu1 %v4133_v52  ;;  %11983 = vmatprep.mubr.msk.bf16.mxu1 %vm13816_vm0, %v15475_v2 }
0x117f   :  { %4261 = vmatprep.subr.bf16.mxu1 %v14224_v24 }
0x1185   :  { %11984 = vmatmul.mubr.msk.bf16.vlgmr.msra.gmra.mxu1 %vm2231_vm1, %v4125_v6 }
0x1186   :  { %4262 = vmatpush1.bf16.msra.mxu1 %v14222_v18  ;;  %4285 = vmatprep.mubr.bf16.mxu1 %v15476_v22 }
0x1187   :  { %4263 = vmatprep.subr.bf16.mxu1 %v14226_v3 }
0x118a   :  { %4264 = vmatpush1.bf16.msra.mxu1 %v14230_v51 }
0x118b   :  { %4265 = vmatprep.subr.bf16.mxu1 %v14233_v1 }
0x118e   :  { %4266 = vmatpush1.bf16.msra.mxu1 %v14236_v53 }
0x118f   :  { %4267 = vmatprep.subr.bf16.mxu1 %v14249_v29 }
0x1192   :  { %4268 = vmatpush1.bf16.msra.mxu1 %v14247_v27 }
0x1193   :  { %4348 = vmatprep.subr.bf16.mxu1 %v14254_v37 }
0x1235   :  { %v3945_v35 = vpop.f32.mrf.mxu1  ;;  %v3988_v24 = vpop.f32.mrf.mxu0 }
0x1236   :  { %v14591_v18 = vadd.f32 %v3945_v35, %v14495_v13  ;;  %v14594_v57 = vadd.f32 %v3988_v24, %v14498_v5 }
0x1237   :  { %v3947_v3 = vpop.f32.mrf.mxu1  ;;  %v11967_v51 = vpop.f32.mrf.mxu0 }
0x1238   :  { %v14597_v1 = vadd.f32 %v3947_v3, %v14501_v0 }
0x1239   :  { %v3949_v53 = vpop.f32.mrf.mxu1  ;;  %v3991_v39 = vpop.f32.mrf.mxu0 }
0x123a   :  { %v14600_v29 = vadd.f32 %v3949_v53, %v14504_v16  ;;  %v14603_v27 = vadd.f32 %v3991_v39, %v14507_v25 }
0x123b   :  { %v14605_v37 = vpop.f32.mrf.mxu1  ;;  %v11968_v13 = vpop.f32.mrf.mxu0 }
0x123d   :  { %v4046_v63 = vpop.f32.mrf.mxu1 }
0x123e   :  { %v4053_v5 = vsel %vm14185_vm2, %v4046_v63, -1e+30 }
0x123f   :  { %v11973_v45 = vpop.f32.mrf.mxu1  ;;  %v4055_v58 = vsel %vm2281_vm3, %v4053_v5, -inf }
0x1240   :  { %4056 = vmax.xlane.f32.xlu1 %v4055_v58 }
0x1241   :  { %v4049_v0 = vpop.f32.mrf.mxu1 }
0x1242   :  { %v4054_v33 = vsel %vm14193_vm4, %v4049_v0, -1e+30 }
0x1243   :  { %v11974_v16 = vpop.f32.mrf.mxu1  ;;  %v4058_v31 = vsel %vm2281_vm3, %v4054_v33, -inf }
0x1244   :  { %4059 = vmax.xlane.f32.xlu0 %v4058_v31 }
0x1245   :  { %v4169_v25 = vpop.f32.mrf.mxu1 }
0x1246   :  { %v4176_v32 = vsel %vm14185_vm2, %v4169_v25, -1e+30 }
0x1247   :  { %v11985_v28 = vpop.f32.mrf.mxu1  ;;  %v4178_v52 = vsel %vm2281_vm3, %v4176_v32, -inf }
0x1248   :  { %4179 = vmax.xlane.f32.xlu0 %v4178_v52 }
0x1249   :  { %v4172_v6 = vpop.f32.mrf.mxu1 }
0x124a   :  { %v4177_v35 = vsel %vm14193_vm4, %v4172_v6, -1e+30 }
0x124b   :  { %v11986_v24 = vpop.f32.mrf.mxu1  ;;  %v4181_v3 = vsel %vm2281_vm3, %v4177_v35, -inf }
0x124c   :  { %4182 = vmax.xlane.f32.xlu0 %v4181_v3 }
0x12c9   :  { %v4057_v51 = vpop.xlane.xlu1 %4056 }
0x12ca   :  { %v4061_v53 = vsub.f32 %v4053_v5, %v4057_v51 }
0x12cc   :  { %v4063_v39 = vmul.f32 1.442695, %v4061_v53 }
0x12cd   :  { %v4060_v13 = vpop.xlane.xlu0 %4059 }
0x12ce   :  { %13418 = vpow2.f32 %v4063_v39  ;;  %v4062_v63 = vsub.f32 %v4054_v33, %v4060_v13 }
0x12d0   :  { %v4065_v45 = vmul.f32 1.442695, %v4062_v63 }
0x12d1   :  { %v4180_v58 = vpop.xlane.xlu0 %4179 }
0x12d2   :  { %13420 = vpow2.f32 %v4065_v45  ;;  %v4184_v0 = vsub.f32 %v4176_v32, %v4180_v58 }
0x12d4   :  { %v4186_v16 = vmul.f32 1.442695, %v4184_v0 }
0x12d5   :  { %v4183_v31 = vpop.xlane.xlu0 %4182 }
0x12d6   :  { %13422 = vpow2.f32 %v4186_v16  ;;  %v4185_v25 = vsub.f32 %v4177_v35, %v4183_v31 }
0x12d8   :  { %v4188_v28 = vmul.f32 1.442695, %v4185_v25 }
0x12da   :  { %13424 = vpow2.f32 %v4188_v28 }
0x12db   :  { %v13419_v52 = vpop.eup %13418 }
0x12dc   :  { %v4067_v6 = vsel %vm2281_vm3, %v13419_v52, 0.0 }
0x12dd   :  { %4068 = vadd.xlane.f32.xlu1 %v4067_v6 }
0x12df   :  { %v13421_v24 = vpop.eup %13420 }
0x12e0   :  { %v4070_v5 = vsel %vm2281_vm3, %v13421_v24, 0.0 }
0x12e1   :  { %4071 = vadd.xlane.f32.xlu0 %v4070_v5 }
0x12e3   :  { %v13423_v3 = vpop.eup %13422 }
0x12e4   :  { %v4190_v33 = vsel %vm2281_vm3, %v13423_v3, 0.0 }
0x12e5   :  { %4191 = vadd.xlane.f32.xlu1 %v4190_v33  ;;  %v13474_v33 = vld [vmem:[#allocation7 + $0xb0] ss:$12 sps:$4 sm:$0xff]  }
0x12e7   :  { %v13425_v51 = vpop.eup %13424 }
0x12e8   :  { %v4193_v32 = vsel %vm2281_vm3, %v13425_v51, 0.0 }
0x12e9   :  { %4194 = vadd.xlane.f32.xlu0 %v4193_v32 }
0x12f6   :  { %4202 = vrot.lane.b32.xlu1 %v14172_v46, %s13817_s10 }
0x12fa   :  { %4643 = vrot.lane.b32.xlu1 %v14152_v61, %s13817_s10 }
0x1366   :  { %v4069_v35 = vpop.xlane.xlu1 %4068 }
0x1367   :  { %13426 = vrcp.f32 %v4069_v35 }
0x136a   :  { %v4072_v53 = vpop.xlane.xlu0 %4071 }
0x136b   :  { %13428 = vrcp.f32 %v4072_v53 }
0x136e   :  { %v4192_v39 = vpop.xlane.xlu1 %4191 }
0x136f   :  { %13430 = vrcp.f32 %v4192_v39 }
0x1372   :  { %v4195_v13 = vpop.xlane.xlu0 %4194  ;;  %v4203_v31 = vpop.permute.xlu1 %4202 }
0x1373   :  { %13432 = vrcp.f32 %v4195_v13 }
0x1374   :  { %v13427_v63 = vpop.eup %13426 }
0x1375   :  { %v4075_v58 = vmul.f32 %v13427_v63, %v13419_v52  ;;  %v13475_v52 = vld [vmem:[#allocation7 + $0x98] ss:$12 sps:$4 sm:$0xff]  }
0x1378   :  { %v13429_v45 = vpop.eup %13428 }
0x1379   :  { %v4076_v0 = vmul.f32 %v13429_v45, %v13421_v24  ;;  %v13476_v24 = vld [vmem:[#allocation7 + $0x80] ss:$12 sps:$4 sm:$0xff]  }
0x137b   :  { %v4077_v16 = vpack.c.bf16 %v4076_v0, %v4075_v58  ;;  %v13478_v0 = vld [vmem:[#allocation7 + $0x48] ss:$12 sps:$4 sm:$0xff]  }
0x137c   :  { %v13431_v46 = vpop.eup %13430 }
0x137d   :  { %11978 = vmatmul.mubr.msk.bf16.vlgmr.msra.gmra.mxu0 %vm2281_vm3, %v4077_v16  ;;  %v4198_v28 = vmul.f32 %v13431_v46, %v13423_v3  ;;  %v13477_v3 = vld [vmem:[#allocation7 + $0x68] ss:$12 sps:$4 sm:$0xff]   ;;  %v13479_v16 = vld [vmem:[#allocation7 + $0x50] ss:$12 sps:$4 sm:$0xff]  }
0x137e   :  { %11988 = vmatpush3.bf16.msra.mxu0 %v4203_v31  ;;  %11989 = vmatprep.mubr.msk.bf16.mxu0 %vm13816_vm0, %v15475_v2  ;;  %v13480_v31 = vld [vmem:[#allocation7 + $0x34] ss:$12 sps:$4 sm:$0xff]   ;;  %v13481_v46 = vld [vmem:[#allocation7 + $0x30] ss:$12 sps:$4 sm:$0xff]  }
0x137f   :  { %11993 = vmatprep.subr.bf16.mxu0 %v15475_v2 }
0x1380   :  { %v13433_v25 = vpop.eup %13432 }
0x1381   :  { %v4199_v6 = vmul.f32 %v13433_v25, %v13425_v51  ;;  %v13482_v25 = vld [vmem:[#allocation7 + $0x38] ss:$12 sps:$4 sm:$0xff]  }
0x1383   :  { %v4200_v5 = vpack.c.bf16 %v4199_v6, %v4198_v28  ;;  %v13483_v28 = vld [vmem:[#allocation7 + $0x1c] ss:$12 sps:$4 sm:$0xff]   ;;  %v13484_v6 = vld [vmem:[#allocation7 + $0x18] ss:$12 sps:$4 sm:$0xff]  }
0x1385   :  { %11990 = vmatmul.mubr.msk.bf16.vlgmr.msra.gmra.mxu0 %vm2281_vm3, %v4200_v5  ;;  %v13485_v5 = vld [vmem:[#allocation7 + $0x20] ss:$12 sps:$4 sm:$0xff]  }
0x1386   :  { %11994 = vmatpush3.bf16.msra.mxu0 %v13474_v33  ;;  %12001 = vmatprep.mubr.msk.bf16.mxu0 %vm13816_vm0, %v15475_v2  ;;  %v13486_v33 = vld [vmem:[#allocation7 + $0x4] ss:$12 sps:$4 sm:$0xff]  }
0x1387   :  { %11995 = vmatprep.subr.bf16.mxu0 %v15475_v2 }
0x138a   :  { %11996 = vmatpush3.bf16.msra.mxu0 %v13475_v52  ;;  %v2119_v52 = vadd.f32 %v14160_v54, %v14175_v34  ;;  %v4433_v54 = vsel %vm2231_vm1, %v14152_v61, 0 }
0x138b   :  { %11997 = vmatprep.subr.bf16.mxu0 %v15475_v2 }
0x138e   :  { %11998 = vmatpush3.bf16.msra.mxu0 %v13476_v24  ;;  %v13487_v24 = vld [vmem:[#allocation7] ss:$12 sps:$4 sm:$0xff]  }
0x138f   :  { %11999 = vmatprep.subr.bf16.mxu0 %v15475_v2 }
0x1392   :  { %12000 = vmatpush3.bf16.msra.mxu0 %v13477_v3  ;;  %v13488_v3 = vld [vmem:[#allocation7 + $0x8] ss:$12 sps:$4 sm:$0xff]  }
0x1393   :  { %12005 = vmatprep.subr.bf16.mxu0 %v15475_v2 }
0x143d   :  { %v4115_v51 = vpop.f32.mrf.mxu0 }
0x143f   :  { %v11979_v32 = vpop.f32.mrf.mxu0 }
0x1440   :  { %v1801_v32 = vadd.f32 %v14124_v62, %v14122_v36  ;;  %v4424_v36 = vmul.f32 0.125, %v14117_v44 }
0x1441   :  { %v4118_v35 = vpop.f32.mrf.mxu0 }
0x1442   :  { %v4425_v34 = vmul.f32 0.125, %v1801_v32 }
0x1443   :  { %v11980_v53 = vpop.f32.mrf.mxu0 }
0x1444   :  { %v4122_v53 = vpack.c.bf16 %v4118_v35, %v4115_v51  ;;  %v4426_v62 = vpack.c.bf16 %v4425_v34, %v4424_v36 }
0x1445   :  { %v4242_v39 = vpop.f32.mrf.mxu0 }
0x1447   :  { %v11991_v13 = vpop.f32.mrf.mxu0 }
0x1449   :  { %v4245_v63 = vpop.f32.mrf.mxu0 }
0x144a   :  { %v4249_v45 = vpack.c.bf16 %v4245_v63, %v4242_v39  ;;  %v14653_v39 = vpack.c.bf16 %v2119_v52, %v14170_v21 }
0x144b   :  { %v11992_v58 = vpop.f32.mrf.mxu0 }
0x144c   :  { %10895 = vmatmul.mubr.msk.bf16.vlgmr.msra.gmra.mxu1 %vm2231_vm1, %v4249_v45  ;;  %12002 = vmatmul.mubr.msk.bf16.vlgmr.msra.gmra.mxu0 %vm2231_vm1, %v4249_v45 }
0x144d   :  { %4349 = vmatpush1.bf16.msra.mxu1 %v13478_v0  ;;  %12006 = vmatpush3.bf16.msra.mxu0 %v13479_v16 }
0x144e   :  { %4350 = vmatprep.subr.bf16.mxu1 %v13480_v31  ;;  %12007 = vmatprep.subr.bf16.mxu0 %v15475_v2 }
0x144f   :  { %4372 = vmatprep.mubr.bf16.mxu1 %v15476_v22  ;;  %12013 = vmatprep.mubr.msk.bf16.mxu0 %vm13816_vm0, %v15475_v2 }
0x1451   :  { %4351 = vmatpush1.bf16.msra.mxu1 %v13481_v46  ;;  %12008 = vmatpush3.bf16.msra.mxu0 %v13482_v25 }
0x1452   :  { %4352 = vmatprep.subr.bf16.mxu1 %v13483_v28  ;;  %12009 = vmatprep.subr.bf16.mxu0 %v15475_v2 }
0x1455   :  { %4353 = vmatpush1.bf16.msra.mxu1 %v13484_v6  ;;  %12010 = vmatpush3.bf16.msra.mxu0 %v13485_v5 }
0x1456   :  { %4354 = vmatprep.subr.bf16.mxu1 %v13486_v33  ;;  %12011 = vmatprep.subr.bf16.mxu0 %v15475_v2 }
0x1459   :  { %4355 = vmatpush1.bf16.msra.mxu1 %v13487_v24  ;;  %12012 = vmatpush3.bf16.msra.mxu0 %v13488_v3 }
0x145a   :  { %12017 = vmatprep.subr.bf16.mxu1 %v15475_v2  ;;  %12023 = vmatprep.subr.bf16.mxu0 %v15475_v2 }
0x145c   :  { %10897 = vmatmul.mubr.msk.bf16.vlgmr.msra.gmra.mxu1 %vm2231_vm1, %v4122_v53  ;;  %12014 = vmatmul.mubr.msk.bf16.vlgmr.msra.gmra.mxu0 %vm2231_vm1, %v4122_v53 }
0x145d   :  { %12018 = vmatpush3.bf16.xpose.msra.mxu1 %v4433_v54  ;;  %12024 = vmatpush3.bf16.msra.mxu0 %v14653_v39 }
0x145e   :  { %12019 = vmatprep.mubr.msk.bf16.mxu1 %vm13816_vm0, %v15475_v2  ;;  %12025 = vmatprep.mubr.msk.bf16.mxu0 %vm13816_vm0, %v15475_v2 }
0x145f   :  { %4557 = vmatprep.subr.bf16.mxu1 %v14311_v48  ;;  %12029 = vmatprep.subr.bf16.mxu0 %v15475_v2 }
0x1464   :  { %12020 = vmatmul.mubr.msk.bf16.vlgmr.msra.gmra.mxu1 %vm2231_vm1, %v4426_v62 }
0x1465   :  { %4558 = vmatpush1.bf16.msra.mxu1 %v14309_v43  ;;  %4581 = vmatprep.mubr.bf16.mxu1 %v15476_v22 }
0x1466   :  { %4559 = vmatprep.subr.bf16.mxu1 %v14313_v56 }
0x1469   :  { %4560 = vmatpush1.bf16.msra.mxu1 %v14317_v50 }
0x146a   :  { %4561 = vmatprep.subr.bf16.mxu1 %v14320_v55 }
0x146d   :  { %4562 = vmatpush1.bf16.msra.mxu1 %v14323_v23 }
0x146e   :  { %4563 = vmatprep.subr.bf16.mxu1 %v14334_v26 }
0x1471   :  { %4564 = vmatpush1.bf16.msra.mxu1 %v14332_v42 }
0x1472   :  { %12041 = vmatprep.subr.bf16.mxu1 %v15475_v2 }
0x150c   :  { %v4330_v44 = vpop.f32.mrf.mxu0  ;;  %v4287_v61 = vpop.f32.mrf.mxu1 }
0x150e   :  { %v12003_v21 = vpop.f32.mrf.mxu0  ;;  %v4289_v48 = vpop.f32.mrf.mxu1 }
0x1510   :  { %v4333_v43 = vpop.f32.mrf.mxu0  ;;  %v4291_v35 = vpop.f32.mrf.mxu1 }
0x1512   :  { %v12004_v51 = vpop.f32.mrf.mxu0  ;;  %v14677_v56 = vpop.f32.mrf.mxu1 }
0x151c   :  { %v4374_v50 = vpop.f32.mrf.mxu1  ;;  %v4417_v13 = vpop.f32.mrf.mxu0 }
0x151d   :  { %v14679_v55 = vadd.f32 %v4374_v50, %v4287_v61  ;;  %v14681_v23 = vadd.f32 %v4417_v13, %v4330_v44 }
0x151e   :  { %v4376_v26 = vpop.f32.mrf.mxu1  ;;  %v12015_v63 = vpop.f32.mrf.mxu0 }
0x151f   :  { %v14683_v42 = vadd.f32 %v4376_v26, %v4289_v48 }
0x1520   :  { %v4378_v45 = vpop.f32.mrf.mxu1  ;;  %v4420_v58 = vpop.f32.mrf.mxu0 }
0x1521   :  { %v14685_v0 = vadd.f32 %v4378_v45, %v4291_v35  ;;  %v14687_v16 = vadd.f32 %v4420_v58, %v4333_v43  ;;  %v13489_v58 = vld [vmem:[#allocation7 + $0x110] ss:$12 sps:$4 sm:$0xff]  }
0x1522   :  { %v14689_v31 = vpop.f32.mrf.mxu1  ;;  %v12016_v46 = vpop.f32.mrf.mxu0 }
0x1523   :  { %v13490_v46 = vld [vmem:[#allocation7 + $0xf8] ss:$12 sps:$4 sm:$0xff]  }
0x1524   :  { %v4469_v25 = vpop.f32.mrf.mxu1 }
0x1525   :  { %v4476_v28 = vsel %vm14185_vm2, %v4469_v25, -1e+30  ;;  %v13492_v25 = vld [vmem:[#allocation7 + $0xc8] ss:$12 sps:$4 sm:$0xff]  }
0x1526   :  { %v12021_v6 = vpop.f32.mrf.mxu1  ;;  %v4478_v5 = vsel %vm2281_vm3, %v4476_v28, -inf }
0x1527   :  { %4479 = vmax.xlane.f32.xlu0 %v4478_v5  ;;  %v4644_v5 = vpop.permute.xlu1 %4643 }
0x1528   :  { %v4472_v33 = vpop.f32.mrf.mxu1 }
0x1529   :  { %v4477_v52 = vsel %vm14193_vm4, %v4472_v33, -1e+30 }
0x152a   :  { %v12022_v24 = vpop.f32.mrf.mxu1  ;;  %v4481_v3 = vsel %vm2281_vm3, %v4477_v52, -inf }
0x152b   :  { %4482 = vmax.xlane.f32.xlu0 %v4481_v3  ;;  %v4649_v3 = vsel %vm2231_vm1, %v4644_v5, 0 }
0x15b0   :  { %v4480_v32 = vpop.xlane.xlu0 %4479 }
0x15b1   :  { %v4484_v53 = vsub.f32 %v4476_v28, %v4480_v32 }
0x15b3   :  { %v4486_v54 = vmul.f32 1.442695, %v4484_v53 }
0x15b4   :  { %v4483_v34 = vpop.xlane.xlu0 %4482 }
0x15b5   :  { %13434 = vpow2.f32 %v4486_v54  ;;  %v4485_v36 = vsub.f32 %v4477_v52, %v4483_v34 }
0x15b7   :  { %v4488_v44 = vmul.f32 1.442695, %v4485_v36 }
0x15b9   :  { %13436 = vpow2.f32 %v4488_v44 }
0x15c2   :  { %v13435_v61 = vpop.eup %13434 }
0x15c3   :  { %v4490_v21 = vsel %vm2281_vm3, %v13435_v61, 0.0 }
0x15c4   :  { %4491 = vadd.xlane.f32.xlu0 %v4490_v21 }
0x15c6   :  { %v13437_v43 = vpop.eup %13436 }
0x15c7   :  { %v4493_v48 = vsel %vm2281_vm3, %v13437_v43, 0.0 }
0x15c8   :  { %4494 = vadd.xlane.f32.xlu0 %v4493_v48 }
0x15de   :  { %4640 = vrot.lane.b32.xlu0 %v4426_v62, %s13817_s10  ;;  %v13491_v62 = vld [vmem:[#allocation7 + $0xe0] ss:$12 sps:$4 sm:$0xff]  }
0x164d   :  { %v4492_v51 = vpop.xlane.xlu0 %4491 }
0x164e   :  { %13438 = vrcp.f32 %v4492_v51 }
0x1651   :  { %v4495_v35 = vpop.xlane.xlu0 %4494 }
0x1652   :  { %13440 = vrcp.f32 %v4495_v35 }
0x1655   :  { %v4641_v32 = vpop.permute.xlu0 %4640 }
0x165b   :  { %v13439_v50 = vpop.eup %13438 }
0x165c   :  { %v4498_v26 = vmul.f32 %v13439_v50, %v13435_v61 }
0x165f   :  { %v13441_v13 = vpop.eup %13440 }
0x1660   :  { %v4499_v63 = vmul.f32 %v13441_v13, %v13437_v43 }
0x1662   :  { %v4500_v45 = vpack.c.bf16 %v4499_v63, %v4498_v26 }
0x1664   :  { %12026 = vmatmul.mubr.msk.bf16.vlgmr.msra.gmra.mxu0 %vm2281_vm3, %v4500_v45 }
0x1665   :  { %12030 = vmatpush3.bf16.msra.mxu0 %v13489_v58  ;;  %12037 = vmatprep.mubr.msk.bf16.mxu0 %vm13816_vm0, %v15475_v2 }
0x1666   :  { %12031 = vmatprep.subr.bf16.mxu0 %v15475_v2 }
0x1669   :  { %12032 = vmatpush3.bf16.msra.mxu0 %v13490_v46 }
0x166a   :  { %12033 = vmatprep.subr.bf16.mxu0 %v15475_v2 }
0x166d   :  { %12034 = vmatpush3.bf16.msra.mxu0 %v13491_v62 }
0x166e   :  { %12035 = vmatprep.subr.bf16.mxu0 %v15475_v2 }
0x1671   :  { %12036 = vmatpush3.bf16.msra.mxu0 %v13492_v25 }
0x1672   :  { %12047 = vmatprep.subr.bf16.mxu0 %v15475_v2 }
0x1724   :  { %v4538_v28 = vpop.f32.mrf.mxu0 }
0x1726   :  { %v12027_v6 = vpop.f32.mrf.mxu0 }
0x1728   :  { %v4541_v33 = vpop.f32.mrf.mxu0 }
0x1729   :  { %v4545_v52 = vpack.c.bf16 %v4541_v33, %v4538_v28 }
0x172a   :  { %v12028_v24 = vpop.f32.mrf.mxu0 }
0x172b   :  { %10901 = vmatmul.mubr.msk.bf16.vlgmr.msra.gmra.mxu1 %vm2231_vm1, %v4545_v52  ;;  %12038 = vmatmul.mubr.msk.bf16.vlgmr.msra.gmra.mxu0 %vm2231_vm1, %v4545_v52 }
0x172c   :  { %12042 = vmatpush3.bf16.xpose.msra.mxu1 %v4649_v3  ;;  %12043 = vmatprep.mubr.msk.bf16.mxu1 %vm13816_vm0, %v15475_v2  ;;  %v13493_v3 = vld [vmem:[#allocation7 + $0x170] ss:$12 sps:$4 sm:$0xff]  }
0x172d   :  { %12049 = vmatprep.mubr.msk.bf16.mxu0 %vm13816_vm0, %v15475_v2  ;;  %4777 = vmatprep.subr.bf16.mxu1 %v14381_v11 }
0x1733   :  { %12044 = vmatmul.mubr.msk.bf16.vlgmr.msra.gmra.mxu1 %vm2231_vm1, %v4641_v32  ;;  %v13495_v32 = vld [vmem:[#allocation7 + $0x140] ss:$12 sps:$4 sm:$0xff]  }
0x1734   :  { %4778 = vmatpush1.bf16.msra.mxu1 %v14379_v15  ;;  %4801 = vmatprep.mubr.bf16.mxu1 %v15476_v22 }
0x1735   :  { %4779 = vmatprep.subr.bf16.mxu1 %v14383_v12 }
0x1738   :  { %4780 = vmatpush1.bf16.msra.mxu1 %v14387_v10 }
0x1739   :  { %4781 = vmatprep.subr.bf16.mxu1 %v14390_v41 }
0x173c   :  { %4782 = vmatpush1.bf16.msra.mxu1 %v14393_v40 }
0x173d   :  { %4783 = vmatprep.subr.bf16.mxu1 %v14406_v9 }
0x1740   :  { %4784 = vmatpush1.bf16.msra.mxu1 %v14404_v38 }
0x1741   :  { %12065 = vmatprep.subr.bf16.mxu1 %v15475_v2 }
0x17eb   :  { %v4583_v11 = vpop.f32.mrf.mxu1  ;;  %v4626_v53 = vpop.f32.mrf.mxu0 }
0x17ec   :  { %v14726_v15 = vadd.f32 %v4583_v11, %v14679_v55  ;;  %v14729_v54 = vadd.f32 %v4626_v53, %v14681_v23  ;;  %v13496_v11 = vld [vmem:[#allocation7 + $0x128] ss:$12 sps:$4 sm:$0xff]  }
0x17ed   :  { %v4585_v12 = vpop.f32.mrf.mxu1  ;;  %v12039_v10 = vpop.f32.mrf.mxu0  ;;  %v15486_v53 = vld [vmem:[#allocation37_spill] sm:$0xff] }
0x17ee   :  { %v14732_v41 = vadd.f32 %v4585_v12, %v14683_v42  ;;  %v2013_v12 = vadd.f32 %v15486_v53, %v14154_v60  ;;  %v15489_v60 = vld [vmem:[#allocation35_spill] sm:$0xff] }
0x17ef   :  { %v4587_v40 = vpop.f32.mrf.mxu1  ;;  %v4629_v34 = vpop.f32.mrf.mxu0 }
0x17f0   :  { %v14735_v9 = vadd.f32 %v4587_v40, %v14685_v0  ;;  %v14738_v38 = vadd.f32 %v4629_v34, %v14687_v16  ;;  %v15487_v34 = vld [vmem:[#allocation36_spill] sm:$0xff] }
0x17f1   :  { %v14740_v36 = vpop.f32.mrf.mxu1  ;;  %v12040_v55 = vpop.f32.mrf.mxu0 }
0x17f2   :  { %v4862_v55 = vpack.c.bf16 %v2013_v12, %v15487_v34 }
0x17f3   :  { %v4685_v44 = vpop.f32.mrf.mxu1 }
0x17f4   :  { %v4692_v23 = vsel %vm14185_vm2, %v4685_v44, -1e+30 }
0x17f5   :  { %v12045_v61 = vpop.f32.mrf.mxu1  ;;  %v4694_v21 = vsel %vm2281_vm3, %v4692_v23, -inf }
0x17f6   :  { %4695 = vmax.xlane.f32.xlu1 %v4694_v21  ;;  %v4868_v21 = vsel %vm2231_vm1, %v4862_v55, 0 }
0x17f7   :  { %v4688_v42 = vpop.f32.mrf.mxu1 }
0x17f8   :  { %v4693_v43 = vsel %vm14193_vm4, %v4688_v42, -1e+30  ;;  %v15488_v42 = vld [vmem:[#allocation38_spill] sm:$0xff] }
0x17f9   :  { %v12046_v0 = vpop.f32.mrf.mxu1  ;;  %v4697_v48 = vsel %vm2281_vm3, %v4693_v43, -inf }
0x17fa   :  { %4698 = vmax.xlane.f32.xlu0 %v4697_v48  ;;  %v15491_v0 = vld [vmem:[#allocation44_spill] sm:$0xff]  ;;  %v15492_v48 = vld [vmem:[#allocation45_spill] sm:$0xff] }
0x187f   :  { %v4696_v16 = vpop.xlane.xlu1 %4695 }
0x1880   :  { %v4700_v51 = vsub.f32 %v4692_v23, %v4696_v16  ;;  %v15493_v16 = vld [vmem:[#allocation47_spill] sm:$0xff] }
0x1882   :  { %v4702_v35 = vmul.f32 1.442695, %v4700_v51 }
0x1883   :  { %v4699_v50 = vpop.xlane.xlu0 %4698 }
0x1884   :  { %13442 = vpow2.f32 %v4702_v35  ;;  %v4701_v13 = vsub.f32 %v4693_v43, %v4699_v50  ;;  %v15490_v43 = vld [vmem:[#allocation43_spill] sm:$0xff] }
0x1886   :  { %v4704_v26 = vmul.f32 1.442695, %v4701_v13 }
0x1888   :  { %13444 = vpow2.f32 %v4704_v26 }
0x1891   :  { %v13443_v63 = vpop.eup %13442 }
0x1892   :  { %v4706_v45 = vsel %vm2281_vm3, %v13443_v63, 0.0 }
0x1893   :  { %4707 = vadd.xlane.f32.xlu1 %v4706_v45 }
0x1895   :  { %v13445_v58 = vpop.eup %13444 }
0x1896   :  { %v4709_v46 = vsel %vm2281_vm3, %v13445_v58, 0.0 }
0x1897   :  { %4710 = vadd.xlane.f32.xlu1 %v4709_v46 }
0x18a8   :  { %4718 = vrot.lane.b32.xlu1 %v14653_v39, %s13817_s10  ;;  %v13494_v39 = vld [vmem:[#allocation7 + $0x158] ss:$12 sps:$4 sm:$0xff]  }
0x191c   :  { %v4708_v62 = vpop.xlane.xlu1 %4707 }
0x191d   :  { %13446 = vrcp.f32 %v4708_v62 }
0x1920   :  { %v4711_v25 = vpop.xlane.xlu1 %4710 }
0x1921   :  { %13448 = vrcp.f32 %v4711_v25 }
0x1924   :  { %v4719_v28 = vpop.permute.xlu1 %4718 }
0x1925   :  { %12048 = vmatpush3.bf16.msra.mxu0 %v4719_v28 }
0x1926   :  { %12053 = vmatprep.subr.bf16.mxu0 %v15475_v2 }
0x192a   :  { %v13447_v6 = vpop.eup %13446 }
0x192b   :  { %v4714_v33 = vmul.f32 %v13447_v6, %v13443_v63 }
0x192e   :  { %v13449_v5 = vpop.eup %13448 }
0x192f   :  { %v4715_v52 = vmul.f32 %v13449_v5, %v13445_v58 }
0x1931   :  { %v4716_v24 = vpack.c.bf16 %v4715_v52, %v4714_v33 }
0x1933   :  { %12050 = vmatmul.mubr.msk.bf16.vlgmr.msra.gmra.mxu0 %vm2281_vm3, %v4716_v24 }
0x1934   :  { %12054 = vmatpush3.bf16.msra.mxu0 %v13493_v3  ;;  %12061 = vmatprep.mubr.msk.bf16.mxu0 %vm13816_vm0, %v15475_v2 }
0x1935   :  { %12055 = vmatprep.subr.bf16.mxu0 %v15475_v2 }
0x1938   :  { %12056 = vmatpush3.bf16.msra.mxu0 %v13494_v39 }
0x1939   :  { %12057 = vmatprep.subr.bf16.mxu0 %v15475_v2 }
0x193c   :  { %12058 = vmatpush3.bf16.msra.mxu0 %v13495_v32 }
0x193d   :  { %12059 = vmatprep.subr.bf16.mxu0 %v15475_v2 }
0x1940   :  { %12060 = vmatpush3.bf16.msra.mxu0 %v13496_v11 }
0x1941   :  { %12071 = vmatprep.subr.bf16.mxu0 %v15475_v2 }
0x19f3   :  { %v4758_v10 = vpop.f32.mrf.mxu0 }
0x19f5   :  { %v12051_v40 = vpop.f32.mrf.mxu0 }
0x19f7   :  { %v4761_v44 = vpop.f32.mrf.mxu0 }
0x19f8   :  { %v4765_v23 = vpack.c.bf16 %v4761_v44, %v4758_v10 }
0x19f9   :  { %v12052_v61 = vpop.f32.mrf.mxu0 }
0x19fa   :  { %10905 = vmatmul.mubr.msk.bf16.vlgmr.msra.gmra.mxu1 %vm2231_vm1, %v4765_v23  ;;  %12062 = vmatmul.mubr.msk.bf16.vlgmr.msra.gmra.mxu0 %vm2231_vm1, %v4765_v23 }
0x19fb   :  { %12066 = vmatpush3.bf16.xpose.msra.mxu1 %v4868_v21  ;;  %12072 = vmatpush3.bf16.msra.mxu0 %v15488_v42 }
0x19fc   :  { %12067 = vmatprep.mubr.msk.bf16.mxu1 %vm13816_vm0, %v15475_v2  ;;  %12073 = vmatprep.mubr.msk.bf16.mxu0 %vm13816_vm0, %v15475_v2 }
0x19fd   :  { %4992 = vmatprep.subr.bf16.mxu1 %v14455_v7  ;;  %12077 = vmatprep.subr.bf16.mxu0 %v15475_v2  ;;  %v15494_v7 = vld [vmem:[#allocation46_spill] sm:$0xff] }
0x1a02   :  { %12068 = vmatmul.mubr.msk.bf16.vlgmr.msra.gmra.mxu1 %vm2231_vm1, %v15489_v60 }
0x1a03   :  { %4993 = vmatpush1.bf16.msra.mxu1 %v14453_v30  ;;  %5016 = vmatprep.mubr.bf16.mxu1 %v15476_v22 }
0x1a04   :  { %4994 = vmatprep.subr.bf16.mxu1 %v14457_v17 }
0x1a07   :  { %4995 = vmatpush1.bf16.msra.mxu1 %v15490_v43 }
0x1a08   :  { %4996 = vmatprep.subr.bf16.mxu1 %v15491_v0  ;;  %v13497_v0 = vld [vmem:[#allocation7 + $0x1d0] ss:$12 sps:$4 sm:$0xff]  }
0x1a0b   :  { %4997 = vmatpush1.bf16.msra.mxu1 %v15492_v48  ;;  %v13500_v48 = vld [vmem:[#allocation7 + $0x188] ss:$12 sps:$4 sm:$0xff]  }
0x1a0c   :  { %4998 = vmatprep.subr.bf16.mxu1 %v15493_v16 }
0x1a0f   :  { %4999 = vmatpush1.bf16.msra.mxu1 %v15494_v7 }
0x1a10   :  { %12089 = vmatprep.subr.bf16.mxu1 %v15475_v2 }
0x1aba   :  { %v4803_v51 = vpop.f32.mrf.mxu1  ;;  %v4846_v35 = vpop.f32.mrf.mxu0 }
0x1abb   :  { %v14785_v30 = vadd.f32 %v4803_v51, %v14726_v15  ;;  %v14788_v50 = vadd.f32 %v4846_v35, %v14729_v54 }
0x1abc   :  { %v4805_v17 = vpop.f32.mrf.mxu1  ;;  %v12063_v13 = vpop.f32.mrf.mxu0 }
0x1abd   :  { %v14791_v26 = vadd.f32 %v4805_v17, %v14732_v41 }
0x1abe   :  { %v4807_v63 = vpop.f32.mrf.mxu1  ;;  %v4849_v45 = vpop.f32.mrf.mxu0 }
0x1abf   :  { %v14794_v58 = vadd.f32 %v4807_v63, %v14735_v9  ;;  %v14797_v46 = vadd.f32 %v4849_v45, %v14738_v38 }
0x1ac0   :  { %v14799_v62 = vpop.f32.mrf.mxu1  ;;  %v12064_v15 = vpop.f32.mrf.mxu0 }
0x1ac1   :  { %v15495_v15 = vld [vmem:[#allocation49_spill] sm:$0xff] }
0x1ac2   :  { %v4904_v25 = vpop.f32.mrf.mxu1 }
0x1ac3   :  { %v4911_v54 = vsel %vm14185_vm2, %v4904_v25, -1e+30  ;;  %v15496_v25 = vld [vmem:[#allocation50_spill] sm:$0xff] }
0x1ac4   :  { %v12069_v28 = vpop.f32.mrf.mxu1  ;;  %v4913_v6 = vsel %vm2281_vm3, %v4911_v54, -inf }
0x1ac5   :  { %4914 = vmax.xlane.f32.xlu0 %v4913_v6  ;;  %v15499_v6 = vld [vmem:[#allocation41_spill] sm:$0xff] }
0x1ac6   :  { %v4907_v41 = vpop.f32.mrf.mxu1 }
0x1ac7   :  { %v4912_v5 = vsel %vm14193_vm4, %v4907_v41, -1e+30 }
0x1ac8   :  { %v12070_v9 = vpop.f32.mrf.mxu1  ;;  %v4916_v33 = vsel %vm2281_vm3, %v4912_v5, -inf }
0x1ac9   :  { %4917 = vmax.xlane.f32.xlu0 %v4916_v33  ;;  %v15501_v9 = vld [vmem:[#allocation48_spill] sm:$0xff] }
0x1b4e   :  { %v4915_v38 = vpop.xlane.xlu0 %4914 }
0x1b4f   :  { %v4919_v52 = vsub.f32 %v4911_v54, %v4915_v38  ;;  %v15498_v54 = vld [vmem:[#allocation40_spill] sm:$0xff] }
0x1b50   :  { %v15502_v38 = vld [vmem:[#allocation32_spill] sm:$0xff] }
0x1b51   :  { %v4921_v24 = vmul.f32 1.442695, %v4919_v52 }
0x1b52   :  { %v4918_v3 = vpop.xlane.xlu0 %4917 }
0x1b53   :  { %13450 = vpow2.f32 %v4921_v24  ;;  %v4920_v39 = vsub.f32 %v4912_v5, %v4918_v3 }
0x1b55   :  { %v4923_v32 = vmul.f32 1.442695, %v4920_v39 }
0x1b57   :  { %13452 = vpow2.f32 %v4923_v32 }
0x1b60   :  { %v13451_v11 = vpop.eup %13450 }
0x1b61   :  { %v4925_v53 = vsel %vm2281_vm3, %v13451_v11, 0.0 }
0x1b62   :  { %4926 = vadd.xlane.f32.xlu0 %v4925_v53 }
0x1b64   :  { %v13453_v12 = vpop.eup %13452 }
0x1b65   :  { %v4928_v10 = vsel %vm2281_vm3, %v13453_v12, 0.0 }
0x1b66   :  { %4929 = vadd.xlane.f32.xlu1 %v4928_v10 }
0x1b78   :  { %5078 = vrot.lane.b32.xlu0 %v4862_v55, %s13817_s10  ;;  %v13498_v55 = vld [vmem:[#allocation7 + $0x1b8] ss:$12 sps:$4 sm:$0xff]  }
0x1b7c   :  { %5075 = vrot.lane.b32.xlu0 %v15489_v60, %s13817_s10  ;;  %v13499_v60 = vld [vmem:[#allocation7 + $0x1a0] ss:$12 sps:$4 sm:$0xff]  }
0x1beb   :  { %v4927_v40 = vpop.xlane.xlu0 %4926 }
0x1bec   :  { %13454 = vrcp.f32 %v4927_v40  ;;  %v15503_v40 = vld [vmem:[#allocation34_spill] sm:$0xff] }
0x1bef   :  { %v4930_v34 = vpop.xlane.xlu1 %4929  ;;  %v5079_v51 = vpop.permute.xlu0 %5078 }
0x1bf0   :  { %13456 = vrcp.f32 %v4930_v34  ;;  %v5084_v63 = vsel %vm2231_vm1, %v5079_v51, 0 }
0x1bf3   :  { %v5076_v45 = vpop.permute.xlu0 %5075 }
0x1bf9   :  { %v13455_v44 = vpop.eup %13454 }
0x1bfa   :  { %v4933_v61 = vmul.f32 %v13455_v44, %v13451_v11 }
0x1bfd   :  { %v13457_v23 = vpop.eup %13456 }
0x1bfe   :  { %v4934_v21 = vmul.f32 %v13457_v23, %v13453_v12  ;;  %v13502_v12 = vld [vmem:[#allocation2] sm:$0xff] }
0x1bff   :  { %v5294_v10 = vadd.f32 %v13502_v12, %v14591_v18 }
0x1c00   :  { %v4935_v43 = vpack.c.bf16 %v4934_v21, %v4933_v61 }
0x1c02   :  { %12074 = vmatmul.mubr.msk.bf16.vlgmr.msra.gmra.mxu0 %vm2281_vm3, %v4935_v43 }
0x1c03   :  { %12078 = vmatpush3.bf16.msra.mxu0 %v13497_v0  ;;  %12085 = vmatprep.mubr.msk.bf16.mxu0 %vm13816_vm0, %v15475_v2 }
0x1c04   :  { %12079 = vmatprep.subr.bf16.mxu0 %v15475_v2 }
0x1c07   :  { %12080 = vmatpush3.bf16.msra.mxu0 %v13498_v55 }
0x1c08   :  { %12081 = vmatprep.subr.bf16.mxu0 %v15475_v2 }
0x1c0b   :  { %12082 = vmatpush3.bf16.msra.mxu0 %v13499_v60  ;;  %v15504_v60 = vld [vmem:[#allocation33_spill] sm:$0xff] }
0x1c0c   :  { %12083 = vmatprep.subr.bf16.mxu0 %v15475_v2 }
0x1c0f   :  { %12084 = vmatpush3.bf16.msra.mxu0 %v13500_v48 }
0x1c10   :  { %12095 = vmatprep.subr.bf16.mxu0 %v15475_v2 }
0x1cc2   :  { %v4973_v16 = vpop.f32.mrf.mxu0 }
0x1cc4   :  { %v12075_v7 = vpop.f32.mrf.mxu0 }
0x1cc6   :  { %v4976_v35 = vpop.f32.mrf.mxu0 }
0x1cc7   :  { %v4980_v17 = vpack.c.bf16 %v4976_v35, %v4973_v16  ;;  %v13505_v16 = vld [vmem:[#allocation2 + $0x18] sm:$0xff] }
0x1cc8   :  { %v12076_v13 = vpop.f32.mrf.mxu0  ;;  %v5297_v7 = vadd.f32 %v13505_v16, %v14600_v29  ;;  %v13506_v29 = vld [vmem:[#allocation2 + $0x28] sm:$0xff] }
0x1cc9   :  { %10909 = vmatmul.mubr.msk.bf16.vlgmr.msra.gmra.mxu1 %vm2231_vm1, %v4980_v17  ;;  %12086 = vmatmul.mubr.msk.bf16.vlgmr.msra.gmra.mxu0 %vm2231_vm1, %v4980_v17 }
0x1cca   :  { %12090 = vmatpush3.bf16.xpose.msra.mxu1 %v5084_v63  ;;  %12091 = vmatprep.mubr.msk.bf16.mxu1 %vm13816_vm0, %v15475_v2 }
0x1ccb   :  { %12097 = vmatprep.mubr.msk.bf16.mxu0 %vm13816_vm0, %v15475_v2  ;;  %5212 = vmatprep.subr.bf16.mxu1 %v14532_v19  ;;  %v15497_v19 = vld [vmem:[#allocation39_spill] sm:$0xff] }
0x1ccc   :  { %v2768_v28 = vadd.f32 %v15498_v54, %v15497_v19 }
0x1cce   :  { %v3104_v41 = vadd.f32 %v15499_v6, %v2768_v28 }
0x1cd1   :  { %12092 = vmatmul.mubr.msk.bf16.vlgmr.msra.gmra.mxu1 %vm2231_vm1, %v5076_v45  ;;  %v5299_v45 = vadd.f32 %v13506_v29, %v14603_v27  ;;  %v12552_v29 = vld [vmem:[#allocation16 + $0x1e0] ss:$48 sps:$4 sm:$0xff]  }
0x1cd2   :  { %5213 = vmatpush1.bf16.msra.mxu1 %v14530_v59  ;;  %5236 = vmatprep.mubr.bf16.mxu1 %v15476_v22  ;;  %v15500_v59 = vld [vmem:[#allocation42_spill] sm:$0xff] }
0x1cd3   :  { %5214 = vmatprep.subr.bf16.mxu1 %v14534_v49  ;;  %v3404_v5 = vadd.f32 %v15500_v59, %v3104_v41  ;;  %v5306_v49 = vld [vmem:[#allocation8] sm:$0x7] }
0x1cd4   :  { %v14842_v52 = vrot.slane %v5306_v49, %v15502_v38  ;;  %v14854_v34 = vrot.slane %v5306_v49, %v15503_v40  ;;  %v14875_v48 = vrot.slane %v5306_v49, %v15504_v60 }
0x1cd5   :  { %v3699_v33 = vadd.f32 %v15501_v9, %v3404_v5 }
0x1cd6   :  { %5215 = vmatpush1.bf16.msra.mxu1 %v15495_v15  ;;  %v14871_v0 = vadd.f32 %v14854_v34, %v5294_v10  ;;  %v14890_v63 = vadd.f32 %v14854_v34, %v5297_v7  ;;  %v14900_v6 = vadd.f32 %v14875_v48, %v5299_v45  ;;  %v12557_v45 = vld [vmem:[#allocation16 + $0x184] ss:$48 sps:$4 sm:$0xff]  }
0x1cd7   :  { %5216 = vmatprep.subr.bf16.mxu1 %v15496_v25 }
0x1cd8   :  { %15506 = vst [vmem:[#allocation36_spill] sm:$0xff] %v14900_v6 }
0x1cda   :  { %5217 = vmatpush1.bf16.msra.mxu1 %v14544_v4  ;;  %v13501_v4 = vld [vmem:[#allocation2 + $0x8] sm:$0xff] }
0x1cdb   :  { %5218 = vmatprep.subr.bf16.mxu1 %v14557_v47  ;;  %v5295_v47 = vadd.f32 %v13501_v4, %v14597_v1 }
0x1cde   :  { %5219 = vmatpush1.bf16.msra.mxu1 %v14555_v8  ;;  %v3999_v8 = vadd.f32 %v14605_v37, %v3699_v33  ;;  %v14860_v37 = vadd.f32 %v14842_v52, %v5295_v47 }
0x1ce0   :  { %v5337_v35 = vadd.f32 %v14860_v37, %v14871_v0 }
0x1d89   :  { %v5018_v24 = vpop.f32.mrf.mxu1  ;;  %v5061_v3 = vpop.f32.mrf.mxu0 }
0x1d8a   :  { %v14847_v39 = vadd.f32 %v5018_v24, %v14785_v30  ;;  %v14850_v32 = vadd.f32 %v5061_v3, %v14788_v50  ;;  %v13503_v30 = vld [vmem:[#allocation2 + $0x20] sm:$0xff] }
0x1d8b   :  { %v5020_v11 = vpop.f32.mrf.mxu1  ;;  %v12087_v53 = vpop.f32.mrf.mxu0  ;;  %v5298_v61 = vadd.f32 %v13503_v30, %v3999_v8  ;;  %v13507_v30 = vld [vmem:[#allocation7 + $0x230] ss:$12 sps:$4 sm:$0xff]  }
0x1d8c   :  { %v14857_v44 = vadd.f32 %v5020_v11, %v14791_v26  ;;  %v13504_v26 = vld [vmem:[#allocation2 + $0x10] sm:$0xff] }
0x1d8d   :  { %v5022_v1 = vpop.f32.mrf.mxu1  ;;  %v5064_v23 = vpop.f32.mrf.mxu0  ;;  %v5296_v55 = vadd.f32 %v13504_v26, %v14594_v57  ;;  %v14879_v51 = vadd.f32 %v14842_v52, %v5298_v61  ;;  %v13509_v61 = vld [vmem:[#allocation7 + $0x200] ss:$12 sps:$4 sm:$0xff]  }
0x1d8e   :  { %v14863_v50 = vadd.f32 %v5022_v1, %v14794_v58  ;;  %v14866_v21 = vadd.f32 %v5064_v23, %v14797_v46 }
0x1d8f   :  { %v14868_v18 = vpop.f32.mrf.mxu1  ;;  %v12088_v43 = vpop.f32.mrf.mxu0  ;;  %v14887_v57 = vadd.f32 %v14875_v48, %v5296_v55  ;;  %v5341_v19 = vadd.f32 %v14879_v51, %v14890_v63 }
0x1d90   :  { %v13510_v43 = vld [vmem:[#allocation7 + $0x1e8] ss:$12 sps:$4 sm:$0xff]  }
0x1d91   :  { %v5120_v58 = vpop.f32.mrf.mxu1  ;;  %15505 = vst [vmem:[#allocation37_spill] sm:$0xff] %v14887_v57  ;;  %v5338_v25 = vadd.f32 %v5337_v35, %v14887_v57  ;;  %v5342_v27 = vadd.f32 %v5341_v19, %v14900_v6  ;;  %v12548_v35 = vld [vmem:[#allocation16 + $0x2a4] ss:$48 sps:$4 sm:$0xff]  }
0x1d92   :  { %v5127_v46 = vsel %vm14185_vm2, %v5120_v58, -1e+30  ;;  %7275 = vmatprep.subr.bf16.mxu1 %v12548_v35  ;;  %v12563_v19 = vld [vmem:[#allocation16 + $0xc4] ss:$48 sps:$4 sm:$0xff]   ;;  %v13516_v35 = vld [vmem:[#allocation2 + $0x50] sm:$0xff] }
0x1d93   :  { %v12093_v17 = vpop.f32.mrf.mxu1  ;;  %v5129_v13 = vsel %vm2281_vm3, %v5127_v46, -inf }
0x1d94   :  { %5130 = vmax.xlane.f32.xlu0 %v5129_v13  ;;  %v12551_v17 = vld [vmem:[#allocation16 + $0x244] ss:$48 sps:$4 sm:$0xff]   ;;  %v12549_v13 = vld [vmem:[#allocation16 + $0x240] ss:$48 sps:$4 sm:$0xff]  }
0x1d95   :  { %v5123_v15 = vpop.f32.mrf.mxu1 }
0x1d96   :  { %v5128_v14 = vsel %vm14193_vm4, %v5123_v15, -1e+30  ;;  %v12555_v15 = vld [vmem:[#allocation16 + $0x180] ss:$48 sps:$4 sm:$0xff]  }
0x1d97   :  { %v12094_v54 = vpop.f32.mrf.mxu1  ;;  %v5132_v28 = vsel %vm2281_vm3, %v5128_v14, -inf }
0x1d98   :  { %5339 = vadd.xlane.f32.xlu0 %v5338_v25  ;;  %5133 = vmax.xlane.f32.xlu1 %v5132_v28  ;;  %v12558_v25 = vld [vmem:[#allocation16 + $0x120] ss:$48 sps:$4 sm:$0xff]   ;;  %v12566_v28 = vld [vmem:[#allocation16 + $0x64] ss:$48 sps:$4 sm:$0xff]  }
0x1d99   :  { %v12561_v54 = vld [vmem:[#allocation16 + $0xc0] ss:$48 sps:$4 sm:$0xff]  }
0x1d9c   :  { %5343 = vadd.xlane.f32.xlu0 %v5342_v27  ;;  %v12564_v27 = vld [vmem:[#allocation16 + $0x60] ss:$48 sps:$4 sm:$0xff]  }
0x1e1d   :  { %v5131_v41 = vpop.xlane.xlu0 %5130 }
0x1e1e   :  { %v5135_v59 = vsub.f32 %v5127_v46, %v5131_v41  ;;  %v12546_v46 = vld [vmem:[#allocation16 + $0x2a0] ss:$48 sps:$4 sm:$0xff]  }
0x1e20   :  { %v5137_v20 = vmul.f32 1.442695, %v5135_v59  ;;  %v4381_v59 = vadd.f32 %v14689_v31, %v14677_v56 }
0x1e21   :  { %v5134_v5 = vpop.xlane.xlu1 %5133  ;;  %v5340_v41 = vpop.xlane.xlu0 %5339 }
0x1e22   :  { %13458 = vpow2.f32 %v5137_v20  ;;  %v5136_v9 = vsub.f32 %v5128_v14, %v5134_v5  ;;  %v12560_v14 = vld [vmem:[#allocation16 + $0x124] ss:$48 sps:$4 sm:$0xff]  }
0x1e24   :  { %v5139_v33 = vmul.f32 1.442695, %v5136_v9  ;;  %v4637_v9 = vadd.f32 %v14740_v36, %v4381_v59 }
0x1e26   :  { %13460 = vpow2.f32 %v5139_v33 }
0x1e2f   :  { %v13459_v49 = vpop.eup %13458 }
0x1e30   :  { %v5141_v24 = vsel %vm2281_vm3, %v13459_v49, 0.0 }
0x1e31   :  { %5142 = vadd.xlane.f32.xlu1 %v5141_v24  ;;  %v5353_v24 = vmul.f32 0.0026041667, %v5340_v41 }
0x1e33   :  { %v13461_v3 = vpop.eup %13460 }
0x1e34   :  { %v5144_v4 = vsel %vm2281_vm3, %v13461_v3, 0.0 }
0x1e35   :  { %5145 = vadd.xlane.f32.xlu1 %v5144_v4 }
0x1e46   :  { %5153 = vrot.lane.b32.xlu1 %v15488_v42, %s13817_s10  ;;  %v13508_v42 = vld [vmem:[#allocation7 + $0x218] ss:$12 sps:$4 sm:$0xff]  }
0x1eba   :  { %v5143_v47 = vpop.xlane.xlu1 %5142 }
0x1ebb   :  { %13462 = vrcp.f32 %v5143_v47  ;;  %v4857_v47 = vadd.f32 %v14799_v62, %v4637_v9  ;;  %v14930_v62 = vsub.f32 %v14860_v37, %v5353_v24 }
0x1ebd   :  { %v5072_v31 = vadd.f32 %v14868_v18, %v4857_v47  ;;  %v12573_v47 = vld [vmem:[#allocation16 + $0x5a0] ss:$48 sps:$4 sm:$0xff]  }
0x1ebe   :  { %v5146_v8 = vpop.xlane.xlu1 %5145 }
0x1ebf   :  { %13464 = vrcp.f32 %v5146_v8  ;;  %v5344_v8 = vpop.xlane.xlu0 %5343 }
0x1ec2   :  { %v5154_v11 = vpop.permute.xlu1 %5153 }
0x1ec3   :  { %12096 = vmatpush3.bf16.msra.mxu0 %v5154_v11  ;;  %v13511_v11 = vld [vmem:[#allocation2 + $0x30] sm:$0xff] }
0x1ec4   :  { %12101 = vmatprep.subr.bf16.mxu0 %v15475_v2 }
0x1ec8   :  { %v13463_v53 = vpop.eup %13462 }
0x1ec9   :  { %v5149_v10 = vmul.f32 %v13463_v53, %v13459_v49 }
0x1ecc   :  { %v13465_v12 = vpop.eup %13464 }
0x1ecd   :  { %v5150_v1 = vmul.f32 %v13465_v12, %v13461_v3 }
0x1ecf   :  { %v5151_v23 = vpack.c.bf16 %v5150_v1, %v5149_v10  ;;  %v13512_v1 = vld [vmem:[#allocation2 + $0x40] sm:$0xff] }
0x1ed1   :  { %12098 = vmatmul.mubr.msk.bf16.vlgmr.msra.gmra.mxu0 %vm2281_vm3, %v5151_v23  ;;  %v13513_v23 = vld [vmem:[#allocation2 + $0x38] sm:$0xff] }
0x1ed2   :  { %12102 = vmatpush3.bf16.msra.mxu0 %v13507_v30  ;;  %12109 = vmatprep.mubr.msk.bf16.mxu0 %vm13816_vm0, %v15475_v2  ;;  %v14927_v30 = vsub.f32 %v14871_v0, %v5353_v24 }
0x1ed3   :  { %12103 = vmatprep.subr.bf16.mxu0 %v15475_v2 }
0x1ed6   :  { %12104 = vmatpush3.bf16.msra.mxu0 %v13508_v42  ;;  %v5354_v42 = vmul.f32 0.0026041667, %v5344_v8  ;;  %v12575_v8 = vld [vmem:[#allocation16 + $0x5a4] ss:$48 sps:$4 sm:$0xff]  }
0x1ed7   :  { %12105 = vmatprep.subr.bf16.mxu0 %v15475_v2 }
0x1ed8   :  { %v14975_v59 = vsub.f32 %v14900_v6, %v5354_v42 }
0x1eda   :  { %12106 = vmatpush3.bf16.msra.mxu0 %v13509_v61  ;;  %v5374_v9 = vmul.f32 %v14975_v59, %v14975_v59 }
0x1edb   :  { %12107 = vmatprep.subr.bf16.mxu0 %v15475_v2  ;;  %v12554_v2 = vld [vmem:[#allocation16 + $0x1e4] ss:$48 sps:$4 sm:$0xff]  }
0x1ede   :  { %12108 = vmatpush3.bf16.msra.mxu0 %v13510_v43 }
0x1f91   :  { %v5193_v26 = vpop.f32.mrf.mxu0 }
0x1f93   :  { %v12099_v55 = vpop.f32.mrf.mxu0 }
0x1f94   :  { %v13514_v55 = vld [vmem:[#allocation2 + $0x48] sm:$0xff] }
0x1f95   :  { %v5196_v16 = vpop.f32.mrf.mxu0 }
0x1f96   :  { %v5200_v7 = vpack.c.bf16 %v5196_v16, %v5193_v26 }
0x1f97   :  { %v12100_v58 = vpop.f32.mrf.mxu0 }
0x1f98   :  { %10913 = vmatmul.mubr.msk.bf16.vlgmr.msra.gmra.mxu1 %vm2231_vm1, %v5200_v7  ;;  %12110 = vmatmul.mubr.msk.bf16.vlgmr.msra.gmra.mxu0 %vm2231_vm1, %v5200_v7  ;;  %v13515_v58 = vld [vmem:[#allocation2 + $0x58] sm:$0xff] }
0x1f99   :  { %7360 = vmatprep.mubr.bf16.mxu0 %v15476_v22  ;;  %7276 = vmatpush1.bf16.msra.mxu1 %v12546_v46 }
0x1f9a   :  { %7277 = vmatprep.subr.bf16.mxu1 %v12551_v17 }
0x1f9d   :  { %7278 = vmatpush1.bf16.msra.mxu1 %v12549_v13  ;;  %v14945_v13 = vsub.f32 %v14890_v63, %v5354_v42 }
0x1f9e   :  { %7279 = vmatprep.subr.bf16.mxu1 %v12554_v2  ;;  %v5369_v2 = vmul.f32 %v14927_v30, %v14927_v30 }
0x1fa1   :  { %7280 = vmatpush1.bf16.msra.mxu1 %v12552_v29  ;;  %v5370_v29 = vmul.f32 %v14930_v62, %v14930_v62 }
0x1fa2   :  { %7281 = vmatprep.subr.bf16.mxu1 %v12557_v45  ;;  %v14952_v45 = vsub.f32 %v14879_v51, %v5354_v42  ;;  %v12591_v42 = vld [vmem:[#allocation16 + $0x480] ss:$48 sps:$4 sm:$0xff]  }
0x1fa3   :  { %v5381_v41 = vadd.f32 %v5370_v29, %v5369_v2  ;;  %v12609_v2 = vld [vmem:[#allocation16 + $0x360] ss:$48 sps:$4 sm:$0xff]   ;;  %v12614_v29 = vld [vmem:[#allocation16 + $0x604] ss:$48 sps:$4 sm:$0xff]  }
0x1fa5   :  { %7282 = vmatpush1.bf16.msra.mxu1 %v12555_v15 }
0x1fa6   :  { %7283 = vmatprep.subr.bf16.mxu1 %v12560_v14 }
0x1fa9   :  { %7284 = vmatpush1.bf16.msra.mxu1 %v12558_v25 }
0x1faa   :  { %7285 = vmatprep.subr.bf16.mxu1 %v12563_v19  ;;  %v14962_v19 = vsub.f32 %v14887_v57, %v5353_v24  ;;  %v12569_v24 = vld [vmem:[#allocation16 + $0x4] ss:$48 sps:$4 sm:$0xff]  }
0x1fad   :  { %7286 = vmatpush1.bf16.msra.mxu1 %v12561_v54 }
0x1fae   :  { %7287 = vmatprep.subr.bf16.mxu1 %v12566_v28 }
0x1fb1   :  { %7288 = vmatpush1.bf16.msra.mxu1 %v12564_v27 }
0x1fb2   :  { %7289 = vmatprep.subr.bf16.mxu1 %v12569_v24 }
0x2058   :  { %v5238_v20 = vpop.f32.mrf.mxu1  ;;  %v5281_v5 = vpop.f32.mrf.mxu0 }
0x2059   :  { %v5288_v33 = vadd.f32 %v5238_v20, %v14847_v39  ;;  %v5290_v49 = vadd.f32 %v5281_v5, %v14850_v32 }
0x205a   :  { %v5240_v3 = vpop.f32.mrf.mxu1  ;;  %v12111_v4 = vpop.f32.mrf.mxu0 }
0x205b   :  { %v5300_v53 = vadd.f32 %v13511_v11, %v5288_v33  ;;  %v5289_v12 = vadd.f32 %v5240_v3, %v14857_v44  ;;  %v5302_v36 = vadd.f32 %v13512_v1, %v5290_v49  ;;  %v12567_v49 = vld [vmem:[#allocation16] ss:$48 sps:$4 sm:$0xff]   ;;  %v12572_v4 = vld [vmem:[#allocation16 + $0x8a4] ss:$48 sps:$4 sm:$0xff]  }
0x205c   :  { %v5242_v10 = vpop.f32.mrf.mxu1  ;;  %v5284_v56 = vpop.f32.mrf.mxu0  ;;  %7290 = vmatpush1.bf16.msra.mxu1 %v12567_v49  ;;  %v12570_v3 = vld [vmem:[#allocation16 + $0x8a0] ss:$48 sps:$4 sm:$0xff]   ;;  %7328 = vmatprep.subr.bf16.mxu0 %v12572_v4  ;;  %v12578_v11 = vld [vmem:[#allocation16 + $0x844] ss:$48 sps:$4 sm:$0xff]  }
0x205d   :  { %v5301_v39 = vadd.f32 %v13513_v23, %v5289_v12  ;;  %v5291_v32 = vadd.f32 %v5242_v10, %v14863_v50  ;;  %v5293_v61 = vadd.f32 %v5284_v56, %v14866_v21  ;;  %v14934_v26 = vadd.f32 %v14854_v34, %v5300_v53  ;;  %7291 = vmatprep.subr.bf16.mxu1 %v12575_v8  ;;  %v12576_v53 = vld [vmem:[#allocation16 + $0x840] ss:$48 sps:$4 sm:$0xff]   ;;  %v12581_v12 = vld [vmem:[#allocation16 + $0x544] ss:$48 sps:$4 sm:$0xff]  }
0x205e   :  { %v5244_v44 = vpop.f32.mrf.mxu1  ;;  %v12112_v43 = vpop.f32.mrf.mxu0  ;;  %v14940_v7 = vadd.f32 %v14875_v48, %v5302_v36  ;;  %7329 = vmatpush1.bf16.msra.mxu0 %v12570_v3  ;;  %v12579_v10 = vld [vmem:[#allocation16 + $0x540] ss:$48 sps:$4 sm:$0xff]   ;;  %v12584_v56 = vld [vmem:[#allocation16 + $0x7e4] ss:$48 sps:$4 sm:$0xff]  }
0x205f   :  { %v14937_v18 = vadd.f32 %v14842_v52, %v5301_v39  ;;  %v5303_v16 = vadd.f32 %v13514_v55, %v5291_v32  ;;  %v5292_v50 = vadd.f32 %v5244_v44, %v5072_v31  ;;  %v5305_v46 = vadd.f32 %v13515_v58, %v5293_v61  ;;  %7330 = vmatprep.subr.bf16.mxu0 %v12578_v11  ;;  %v12582_v31 = vld [vmem:[#allocation16 + $0x7e0] ss:$48 sps:$4 sm:$0xff]   ;;  %v12587_v1 = vld [vmem:[#allocation16 + $0x4e4] ss:$48 sps:$4 sm:$0xff]  }
0x2060   :  { %15507 = vst [vmem:[#allocation38_spill] sm:$0xff] %v14940_v7  ;;  %7292 = vmatpush2.bf16.msra.mxu1 %v12573_v47  ;;  %v12585_v36 = vld [vmem:[#allocation16 + $0x4e0] ss:$48 sps:$4 sm:$0xff]   ;;  %v12590_v23 = vld [vmem:[#allocation16 + $0x784] ss:$48 sps:$4 sm:$0xff]  }
0x2061   :  { %v5304_v17 = vadd.f32 %v13516_v35, %v5292_v50  ;;  %v5345_v21 = vadd.f32 %v14937_v18, %v14934_v26  ;;  %v14955_v15 = vadd.f32 %v14854_v34, %v5303_v16  ;;  %v14965_v54 = vadd.f32 %v14875_v48, %v5305_v46  ;;  %7293 = vmatprep.subr.bf16.mxu1 %v12581_v12  ;;  %v12588_v39 = vld [vmem:[#allocation16 + $0x780] ss:$48 sps:$4 sm:$0xff]   ;;  %v12593_v32 = vld [vmem:[#allocation16 + $0x484] ss:$48 sps:$4 sm:$0xff]  }
0x2062   :  { %v5372_v34 = vmul.f32 %v14945_v13, %v14945_v13  ;;  %v5371_v48 = vmul.f32 %v14962_v19, %v14962_v19  ;;  %7331 = vmatpush1.bf16.msra.mxu0 %v12576_v53  ;;  %v12596_v61 = vld [vmem:[#allocation16 + $0x724] ss:$48 sps:$4 sm:$0xff]   ;;  %v12594_v43 = vld [vmem:[#allocation16 + $0x720] ss:$48 sps:$4 sm:$0xff]  }
0x2063   :  { %v14958_v14 = vadd.f32 %v14842_v52, %v5304_v17  ;;  %v5346_v25 = vadd.f32 %v5345_v21, %v14940_v7  ;;  %15509 = vst [vmem:[#allocation43_spill] sm:$0xff] %v14965_v54  ;;  %v5373_v52 = vmul.f32 %v14952_v45, %v14952_v45  ;;  %7332 = vmatprep.subr.bf16.mxu0 %v12584_v56  ;;  %v12599_v44 = vld [vmem:[#allocation16 + $0x424] ss:$48 sps:$4 sm:$0xff]   ;;  %v12597_v55 = vld [vmem:[#allocation16 + $0x420] ss:$48 sps:$4 sm:$0xff]  }
0x2064   :  { %v5382_v20 = vadd.f32 %v5381_v41, %v5371_v48  ;;  %7294 = vmatpush2.bf16.msra.mxu1 %v12579_v10  ;;  %v12602_v16 = vld [vmem:[#allocation16 + $0x6c4] ss:$48 sps:$4 sm:$0xff]   ;;  %v12600_v58 = vld [vmem:[#allocation16 + $0x6c0] ss:$48 sps:$4 sm:$0xff]   ;;  %v12620_v41 = vld [vmem:[#allocation16 + $0x2ac] ss:$48 sps:$4 sm:$0xff]  }
0x2065   :  { %15508 = vst [vmem:[#allocation35_spill] sm:$0xff] %v14958_v14  ;;  %5347 = vadd.xlane.f32.xlu1 %v5346_v25  ;;  %v5349_v28 = vadd.f32 %v14958_v14, %v14955_v15  ;;  %v5385_v5 = vadd.f32 %v5373_v52, %v5372_v34  ;;  %7295 = vmatprep.subr.bf16.mxu1 %v12587_v1  ;;  %v12605_v50 = vld [vmem:[#allocation16 + $0x3c4] ss:$48 sps:$4 sm:$0xff]   ;;  %v12603_v46 = vld [vmem:[#allocation16 + $0x3c0] ss:$48 sps:$4 sm:$0xff]  }
0x2066   :  { %7333 = vmatpush1.bf16.msra.mxu0 %v12582_v31  ;;  %v12608_v35 = vld [vmem:[#allocation16 + $0x664] ss:$48 sps:$4 sm:$0xff]   ;;  %v12606_v21 = vld [vmem:[#allocation16 + $0x660] ss:$48 sps:$4 sm:$0xff]  }
0x2067   :  { %v5350_v27 = vadd.f32 %v5349_v28, %v14965_v54  ;;  %v5386_v33 = vadd.f32 %v5385_v5, %v5374_v9  ;;  %7334 = vmatprep.subr.bf16.mxu0 %v12590_v23  ;;  %v12611_v17 = vld [vmem:[#allocation16 + $0x364] ss:$48 sps:$4 sm:$0xff]   ;;  %v12612_v28 = vld [vmem:[#allocation16 + $0x600] ss:$48 sps:$4 sm:$0xff]  }
0x2068   :  { %7296 = vmatpush2.bf16.msra.mxu1 %v12585_v36  ;;  %v12617_v25 = vld [vmem:[#allocation16 + $0x304] ss:$48 sps:$4 sm:$0xff]  }
0x2069   :  { %5351 = vadd.xlane.f32.xlu0 %v5350_v27  ;;  %7297 = vmatprep.subr.bf16.mxu1 %v12593_v32  ;;  %v12615_v27 = vld [vmem:[#allocation16 + $0x300] ss:$48 sps:$4 sm:$0xff]  }
0x206a   :  { %7335 = vmatpush1.bf16.msra.mxu0 %v12588_v39 }
0x206b   :  { %7336 = vmatprep.subr.bf16.mxu0 %v12596_v61 }
0x206c   :  { %7298 = vmatpush2.bf16.msra.mxu1 %v12591_v42 }
0x206d   :  { %5383 = vadd.xlane.f32.xlu0 %v5382_v20  ;;  %7299 = vmatprep.subr.bf16.mxu1 %v12599_v44  ;;  %v5335_v44 = vld [vmem:[#allocation13] sm:$0x7] }
0x206e   :  { %7337 = vmatpush1.bf16.msra.mxu0 %v12594_v43 }
0x206f   :  { %7338 = vmatprep.subr.bf16.mxu0 %v12602_v16 }
0x2070   :  { %7300 = vmatpush2.bf16.msra.mxu1 %v12597_v55  ;;  %v5336_v55 = vld [vmem:[#allocation14] sm:$0x7] }
0x2071   :  { %5387 = vadd.xlane.f32.xlu0 %v5386_v33  ;;  %7301 = vmatprep.subr.bf16.mxu1 %v12605_v50  ;;  %v15013_v50 = vrot.slane %v5335_v44, %v15502_v38 }
0x2072   :  { %7339 = vmatpush1.bf16.msra.mxu0 %v12600_v58 }
0x2073   :  { %7340 = vmatprep.subr.bf16.mxu0 %v12608_v35  ;;  %v12647_v35 = vld [vmem:[#allocation16 + $0x8ac] ss:$48 sps:$4 sm:$0xff]  }
0x2074   :  { %7302 = vmatpush2.bf16.msra.mxu1 %v12603_v46  ;;  %v15017_v46 = vrot.slane %v5335_v44, %v15504_v60 }
0x2075   :  { %7303 = vmatprep.subr.bf16.mxu1 %v12611_v17 }
0x2076   :  { %7341 = vmatpush1.bf16.msra.mxu0 %v12606_v21  ;;  %v15021_v21 = vrot.slane %v5335_v44, %v15503_v40  ;;  %v12657_v44 = vld [vmem:[#allocation16 + $0x7e8] ss:$48 sps:$4 sm:$0xff]  }
0x2077   :  { %7342 = vmatprep.subr.bf16.mxu0 %v12614_v29  ;;  %v15024_v29 = vrot.slane %v5336_v55, %v15502_v38 }
0x2078   :  { %7304 = vmatpush2.bf16.msra.mxu1 %v12609_v2 }
0x2079   :  { %7305 = vmatprep.subr.bf16.mxu1 %v12617_v25 }
0x207a   :  { %7343 = vmatpush1.bf16.msra.mxu0 %v12612_v28 }
0x207b   :  { %7381 = vmatprep.subr.bf16.mxu0 %v12620_v41 }
0x207c   :  { %7306 = vmatpush2.bf16.msra.mxu1 %v12615_v27 }
0x207d   :  { %7434 = vmatprep.subr.bf16.mxu1 %v12647_v35  ;;  %v12671_v35 = vld [vmem:[#allocation16 + $0x72c] ss:$48 sps:$4 sm:$0xff]  }
0x20ee   :  { %v5348_v34 = vpop.xlane.xlu1 %5347 }
0x20ef   :  { %v5355_v52 = vmul.f32 0.0026041667, %v5348_v34  ;;  %v15036_v34 = vrot.slane %v5336_v55, %v15503_v40 }
0x20f1   :  { %v14982_v48 = vsub.f32 %v14934_v26, %v5355_v52  ;;  %v14985_v20 = vsub.f32 %v14937_v18, %v5355_v52  ;;  %v14988_v5 = vsub.f32 %v14940_v7, %v5355_v52  ;;  %v13157_v7 = vld [vmem:[#allocation19 + $0x3f4] ss:$12 sps:$4 sm:$0xff]  }
0x20f2   :  { %v5352_v9 = vpop.xlane.xlu0 %5351 }
0x20f3   :  { %v5356_v33 = vmul.f32 0.0026041667, %v5352_v9  ;;  %v5375_v49 = vmul.f32 %v14982_v48, %v14982_v48  ;;  %v5376_v24 = vmul.f32 %v14985_v20, %v14985_v20  ;;  %v5377_v3 = vmul.f32 %v14988_v5, %v14988_v5 }
0x20f5   :  { %v14997_v4 = vsub.f32 %v14955_v15, %v5356_v33  ;;  %v15000_v47 = vsub.f32 %v14958_v14, %v5356_v33  ;;  %v15003_v8 = vsub.f32 %v14965_v54, %v5356_v33  ;;  %v5389_v11 = vadd.f32 %v5376_v24, %v5375_v49  ;;  %v13151_v54 = vld [vmem:[#allocation19 + $0x40c] ss:$12 sps:$4 sm:$0xff]   ;;  %v13163_v14 = vld [vmem:[#allocation19 + $0x3dc] ss:$12 sps:$4 sm:$0xff]  }
0x20f6   :  { %v5384_v53 = vpop.xlane.xlu0 %5383 }
0x20f7   :  { %v5397_v12 = vmul.f32 0.0026041667, %v5384_v53  ;;  %v5390_v10 = vadd.f32 %v5389_v11, %v5377_v3  ;;  %v5378_v56 = vmul.f32 %v14997_v4, %v14997_v4  ;;  %v5379_v31 = vmul.f32 %v15000_v47, %v15000_v47  ;;  %v12618_v11 = vld [vmem:[#allocation16 + $0x2a8] ss:$48 sps:$4 sm:$0xff]  }
0x20f8   :  { %v5380_v36 = vmul.f32 %v15003_v8, %v15003_v8 }
0x20f9   :  { %v5401_v1 = vadd.f32 1e-05, %v5397_v12  ;;  %5391 = vadd.xlane.f32.xlu0 %v5390_v10  ;;  %v5393_v23 = vadd.f32 %v5379_v31, %v5378_v56  ;;  %v12623_v10 = vld [vmem:[#allocation16 + $0x24c] ss:$48 sps:$4 sm:$0xff]   ;;  %v12645_v56 = vld [vmem:[#allocation16 + $0x8a8] ss:$48 sps:$4 sm:$0xff]  }
0x20fa   :  { %v5388_v39 = vpop.xlane.xlu0 %5387 }
0x20fb   :  { %13466 = vrsqrt.f32 %v5401_v1  ;;  %v5398_v32 = vmul.f32 0.0026041667, %v5388_v39  ;;  %v5394_v42 = vadd.f32 %v5393_v23, %v5380_v36  ;;  %v12653_v1 = vld [vmem:[#allocation16 + $0x84c] ss:$48 sps:$4 sm:$0xff]   ;;  %v12621_v36 = vld [vmem:[#allocation16 + $0x248] ss:$48 sps:$4 sm:$0xff]  }
0x20fc   :  { %v12626_v23 = vld [vmem:[#allocation16 + $0x1ec] ss:$48 sps:$4 sm:$0xff]   ;;  %v12651_v39 = vld [vmem:[#allocation16 + $0x848] ss:$48 sps:$4 sm:$0xff]  }
0x20fd   :  { %v5402_v61 = vadd.f32 1e-05, %v5398_v32  ;;  %5395 = vadd.xlane.f32.xlu0 %v5394_v42  ;;  %v12659_v32 = vld [vmem:[#allocation16 + $0x7ec] ss:$48 sps:$4 sm:$0xff]   ;;  %v12624_v42 = vld [vmem:[#allocation16 + $0x1e8] ss:$48 sps:$4 sm:$0xff]  }
0x20ff   :  { %13468 = vrsqrt.f32 %v5402_v61  ;;  %v12629_v61 = vld [vmem:[#allocation16 + $0x18c] ss:$48 sps:$4 sm:$0xff]  }
0x2108   :  { %v13467_v43 = vpop.eup %13466 }
0x2109   :  { %v5410_v16 = vmul.f32 %v13467_v43, %v14930_v62  ;;  %v5411_v58 = vmul.f32 %v13467_v43, %v14962_v19  ;;  %v5409_v17 = vmul.f32 %v13467_v43, %v14927_v30  ;;  %v15027_v62 = vrot.slane %v5336_v55, %v15504_v60  ;;  %v12665_v43 = vld [vmem:[#allocation16 + $0x78c] ss:$48 sps:$4 sm:$0xff]   ;;  %v12627_v55 = vld [vmem:[#allocation16 + $0x188] ss:$48 sps:$4 sm:$0xff]  }
0x210b   :  { %v5438_v19 = vmul.f32 %v15013_v50, %v5410_v16  ;;  %v5439_v27 = vmul.f32 %v15017_v46, %v5411_v58  ;;  %v5437_v41 = vmul.f32 %v15021_v21, %v5409_v17  ;;  %v12632_v16 = vld [vmem:[#allocation16 + $0x12c] ss:$48 sps:$4 sm:$0xff]   ;;  %v12663_v58 = vld [vmem:[#allocation16 + $0x788] ss:$48 sps:$4 sm:$0xff]  }
0x210c   :  { %v13469_v2 = vpop.eup %13468  ;;  %v12630_v17 = vld [vmem:[#allocation16 + $0x128] ss:$48 sps:$4 sm:$0xff]  }
0x210d   :  { %v5413_v25 = vmul.f32 %v13469_v2, %v14952_v45  ;;  %v5414_v28 = vmul.f32 %v13469_v2, %v14975_v59  ;;  %v5412_v30 = vmul.f32 %v13469_v2, %v14945_v13  ;;  %v5466_v45 = vadd.f32 %v15024_v29, %v5438_v19  ;;  %v12635_v2 = vld [vmem:[#allocation16 + $0xcc] ss:$48 sps:$4 sm:$0xff]  }
0x210e   :  { %v5467_v59 = vadd.f32 %v15027_v62, %v5439_v27  ;;  %v5465_v13 = vadd.f32 %v15036_v34, %v5437_v41  ;;  %v12677_v19 = vld [vmem:[#allocation16 + $0x6cc] ss:$48 sps:$4 sm:$0xff]  }
0x210f   :  { %v5441_v52 = vmul.f32 %v15013_v50, %v5413_v25  ;;  %v5442_v9 = vmul.f32 %v15017_v46, %v5414_v28  ;;  %v5440_v33 = vmul.f32 %v15021_v21, %v5412_v30  ;;  %v12669_v25 = vld [vmem:[#allocation16 + $0x728] ss:$48 sps:$4 sm:$0xff]   ;;  %v12638_v27 = vld [vmem:[#allocation16 + $0x6c] ss:$48 sps:$4 sm:$0xff]  }
0x2110   :  { %v12633_v28 = vld [vmem:[#allocation16 + $0xc8] ss:$48 sps:$4 sm:$0xff]   ;;  %v12683_v41 = vld [vmem:[#allocation16 + $0x66c] ss:$48 sps:$4 sm:$0xff]  }
0x2111   :  { %v5469_v49 = vadd.f32 %v15024_v29, %v5441_v52  ;;  %v5470_v24 = vadd.f32 %v15027_v62, %v5442_v9  ;;  %v5468_v3 = vadd.f32 %v15036_v34, %v5440_v33  ;;  %v12675_v30 = vld [vmem:[#allocation16 + $0x6c8] ss:$48 sps:$4 sm:$0xff]   ;;  %v12641_v9 = vld [vmem:[#allocation16 + $0xc] ss:$48 sps:$4 sm:$0xff]  }
0x2112   :  { %v12636_v52 = vld [vmem:[#allocation16 + $0x68] ss:$48 sps:$4 sm:$0xff]  }
0x2113   :  { %v15047_v53 = vpack.c.bf16 %v5469_v49, %v5466_v45  ;;  %v15049_v12 = vpack.c.bf16 %v5470_v24, %v5467_v59  ;;  %v15051_v31 = vpack.c.bf16 %v5468_v3, %v5465_v13  ;;  %v12681_v33 = vld [vmem:[#allocation16 + $0x668] ss:$48 sps:$4 sm:$0xff]   ;;  %v12689_v45 = vld [vmem:[#allocation16 + $0x60c] ss:$48 sps:$4 sm:$0xff]   ;;  %v12695_v13 = vld [vmem:[#allocation16 + $0x2b4] ss:$48 sps:$4 sm:$0xff]  }
0x2114   :  { %v12639_v49 = vld [vmem:[#allocation16 + $0x8] ss:$48 sps:$4 sm:$0xff]   ;;  %v12644_v59 = vld [vmem:[#allocation16 + $0x5ac] ss:$48 sps:$4 sm:$0xff]  }
0x2115   :  { %7307 = vmatprep.mubr.bf16.mxu1 %v15047_v53  ;;  %7361 = vmatmul.mubr.bf16.vlgmr.msra.gmra.mxu0 %v15049_v12  ;;  %v12687_v24 = vld [vmem:[#allocation16 + $0x608] ss:$48 sps:$4 sm:$0xff]  }
0x2116   :  { %7308 = vmatmul.mubr.bf16.vlgmr.msra.gmra.mxu1 %v15051_v31  ;;  %7382 = vmatpush1.bf16.msra.mxu0 %v12618_v11  ;;  %v12642_v3 = vld [vmem:[#allocation16 + $0x5a8] ss:$48 sps:$4 sm:$0xff]   ;;  %v12650_v11 = vld [vmem:[#allocation16 + $0x54c] ss:$48 sps:$4 sm:$0xff]  }
0x2117   :  { %7383 = vmatprep.subr.bf16.mxu0 %v12623_v10  ;;  %7435 = vmatpush1.bf16.msra.mxu1 %v12645_v56  ;;  %v12648_v10 = vld [vmem:[#allocation16 + $0x548] ss:$48 sps:$4 sm:$0xff]   ;;  %v12656_v56 = vld [vmem:[#allocation16 + $0x4ec] ss:$48 sps:$4 sm:$0xff]  }
0x2118   :  { %7436 = vmatprep.subr.bf16.mxu1 %v12653_v1  ;;  %7370 = vmatprep.mubr.bf16.mxu0 %v15476_v22  ;;  %v12654_v1 = vld [vmem:[#allocation16 + $0x4e8] ss:$48 sps:$4 sm:$0xff]  }
0x211a   :  { %7384 = vmatpush1.bf16.msra.mxu0 %v12621_v36  ;;  %v12662_v36 = vld [vmem:[#allocation16 + $0x48c] ss:$48 sps:$4 sm:$0xff]  }
0x211b   :  { %7385 = vmatprep.subr.bf16.mxu0 %v12626_v23  ;;  %7437 = vmatpush1.bf16.msra.mxu1 %v12651_v39  ;;  %v12660_v23 = vld [vmem:[#allocation16 + $0x488] ss:$48 sps:$4 sm:$0xff]   ;;  %v12668_v39 = vld [vmem:[#allocation16 + $0x42c] ss:$48 sps:$4 sm:$0xff]  }
0x211c   :  { %7438 = vmatprep.subr.bf16.mxu1 %v12659_v32  ;;  %v12666_v32 = vld [vmem:[#allocation16 + $0x428] ss:$48 sps:$4 sm:$0xff]  }
0x211e   :  { %7386 = vmatpush1.bf16.msra.mxu0 %v12624_v42  ;;  %v12674_v42 = vld [vmem:[#allocation16 + $0x3cc] ss:$48 sps:$4 sm:$0xff]  }
0x211f   :  { %7387 = vmatprep.subr.bf16.mxu0 %v12629_v61  ;;  %7439 = vmatpush1.bf16.msra.mxu1 %v12657_v44  ;;  %v12672_v61 = vld [vmem:[#allocation16 + $0x3c8] ss:$48 sps:$4 sm:$0xff]   ;;  %v12680_v44 = vld [vmem:[#allocation16 + $0x36c] ss:$48 sps:$4 sm:$0xff]  }
0x2120   :  { %7440 = vmatprep.subr.bf16.mxu1 %v12665_v43  ;;  %v12678_v43 = vld [vmem:[#allocation16 + $0x368] ss:$48 sps:$4 sm:$0xff]  }
0x2122   :  { %7388 = vmatpush1.bf16.msra.mxu0 %v12627_v55  ;;  %v12686_v55 = vld [vmem:[#allocation16 + $0x30c] ss:$48 sps:$4 sm:$0xff]  }
0x2123   :  { %7389 = vmatprep.subr.bf16.mxu0 %v12632_v16  ;;  %7441 = vmatpush1.bf16.msra.mxu1 %v12663_v58  ;;  %v12684_v16 = vld [vmem:[#allocation16 + $0x308] ss:$48 sps:$4 sm:$0xff]   ;;  %v12692_v58 = vld [vmem:[#allocation16 + $0x8b4] ss:$48 sps:$4 sm:$0xff]  }
0x2124   :  { %7442 = vmatprep.subr.bf16.mxu1 %v12671_v35 }
0x2126   :  { %7390 = vmatpush1.bf16.msra.mxu0 %v12630_v17 }
0x2127   :  { %7391 = vmatprep.subr.bf16.mxu0 %v12635_v2  ;;  %7443 = vmatpush1.bf16.msra.mxu1 %v12669_v25 }
0x2128   :  { %7444 = vmatprep.subr.bf16.mxu1 %v12677_v19 }
0x212a   :  { %7392 = vmatpush1.bf16.msra.mxu0 %v12633_v28 }
0x212b   :  { %7393 = vmatprep.subr.bf16.mxu0 %v12638_v27  ;;  %7445 = vmatpush1.bf16.msra.mxu1 %v12675_v30 }
0x212c   :  { %7446 = vmatprep.subr.bf16.mxu1 %v12683_v41 }
0x212e   :  { %7394 = vmatpush1.bf16.msra.mxu0 %v12636_v52 }
0x212f   :  { %7395 = vmatprep.subr.bf16.mxu0 %v12641_v9  ;;  %7447 = vmatpush1.bf16.msra.mxu1 %v12681_v33 }
0x2130   :  { %7448 = vmatprep.subr.bf16.mxu1 %v12689_v45 }
0x2132   :  { %7396 = vmatpush1.bf16.msra.mxu0 %v12639_v49 }
0x2133   :  { %7397 = vmatprep.subr.bf16.mxu0 %v12644_v59  ;;  %7449 = vmatpush1.bf16.msra.mxu1 %v12687_v24 }
0x2134   :  { %7487 = vmatprep.subr.bf16.mxu1 %v12695_v13 }
0x2136   :  { %7398 = vmatpush2.bf16.msra.mxu0 %v12642_v3 }
0x2137   :  { %7399 = vmatprep.subr.bf16.mxu0 %v12650_v11 }
0x213a   :  { %7400 = vmatpush2.bf16.msra.mxu0 %v12648_v10 }
0x213b   :  { %7401 = vmatprep.subr.bf16.mxu0 %v12656_v56 }
0x213e   :  { %7402 = vmatpush2.bf16.msra.mxu0 %v12654_v1 }
0x213f   :  { %7403 = vmatprep.subr.bf16.mxu0 %v12662_v36  ;;  %v12704_v36 = vld [vmem:[#allocation16 + $0x7f4] ss:$48 sps:$4 sm:$0xff]  }
0x2142   :  { %7404 = vmatpush2.bf16.msra.mxu0 %v12660_v23  ;;  %v12699_v23 = vld [vmem:[#allocation16 + $0x250] ss:$48 sps:$4 sm:$0xff]  }
0x2143   :  { %7405 = vmatprep.subr.bf16.mxu0 %v12668_v39  ;;  %v12707_v39 = vld [vmem:[#allocation16 + $0x1f4] ss:$48 sps:$4 sm:$0xff]  }
0x2146   :  { %7406 = vmatpush2.bf16.msra.mxu0 %v12666_v32  ;;  %v12702_v32 = vld [vmem:[#allocation16 + $0x7f0] ss:$48 sps:$4 sm:$0xff]  }
0x2147   :  { %7407 = vmatprep.subr.bf16.mxu0 %v12674_v42  ;;  %v12710_v42 = vld [vmem:[#allocation16 + $0x794] ss:$48 sps:$4 sm:$0xff]  }
0x214a   :  { %7408 = vmatpush2.bf16.msra.mxu0 %v12672_v61  ;;  %v12705_v61 = vld [vmem:[#allocation16 + $0x1f0] ss:$48 sps:$4 sm:$0xff]  }
0x214b   :  { %7409 = vmatprep.subr.bf16.mxu0 %v12680_v44  ;;  %v12713_v44 = vld [vmem:[#allocation16 + $0x194] ss:$48 sps:$4 sm:$0xff]  }
0x214e   :  { %7410 = vmatpush2.bf16.msra.mxu0 %v12678_v43  ;;  %v12708_v43 = vld [vmem:[#allocation16 + $0x790] ss:$48 sps:$4 sm:$0xff]  }
0x214f   :  { %7411 = vmatprep.subr.bf16.mxu0 %v12686_v55  ;;  %v12716_v55 = vld [vmem:[#allocation16 + $0x734] ss:$48 sps:$4 sm:$0xff]  }
0x2152   :  { %7412 = vmatpush2.bf16.msra.mxu0 %v12684_v16  ;;  %v12711_v16 = vld [vmem:[#allocation16 + $0x190] ss:$48 sps:$4 sm:$0xff]  }
0x2153   :  { %7540 = vmatprep.subr.bf16.mxu0 %v12692_v58  ;;  %v12719_v58 = vld [vmem:[#allocation16 + $0x134] ss:$48 sps:$4 sm:$0xff]  }
0x2182   :  { %v5392_v35 = vpop.xlane.xlu0 %5391 }
0x2183   :  { %v5399_v17 = vmul.f32 0.0026041667, %v5392_v35  ;;  %v12714_v35 = vld [vmem:[#allocation16 + $0x730] ss:$48 sps:$4 sm:$0xff]  }
0x2185   :  { %v5403_v2 = vadd.f32 1e-05, %v5399_v17  ;;  %v12722_v17 = vld [vmem:[#allocation16 + $0x6d4] ss:$48 sps:$4 sm:$0xff]  }
0x2186   :  { %v5396_v25 = vpop.xlane.xlu0 %5395 }
0x2187   :  { %13470 = vrsqrt.f32 %v5403_v2  ;;  %v5400_v19 = vmul.f32 0.0026041667, %v5396_v25  ;;  %v12717_v2 = vld [vmem:[#allocation16 + $0x130] ss:$48 sps:$4 sm:$0xff]   ;;  %v12725_v25 = vld [vmem:[#allocation16 + $0xd4] ss:$48 sps:$4 sm:$0xff]  }
0x2189   :  { %v5404_v28 = vadd.f32 1e-05, %v5400_v19  ;;  %v12720_v19 = vld [vmem:[#allocation16 + $0x6d0] ss:$48 sps:$4 sm:$0xff]  }
0x218b   :  { %13472 = vrsqrt.f32 %v5404_v28  ;;  %v12728_v28 = vld [vmem:[#allocation16 + $0x674] ss:$48 sps:$4 sm:$0xff]  }
0x2194   :  { %v13471_v27 = vpop.eup %13470 }
0x2195   :  { %v5416_v30 = vmul.f32 %v13471_v27, %v14985_v20  ;;  %v5417_v41 = vmul.f32 %v13471_v27, %v14988_v5  ;;  %v5415_v52 = vmul.f32 %v13471_v27, %v14982_v48  ;;  %v12723_v27 = vld [vmem:[#allocation16 + $0xd0] ss:$48 sps:$4 sm:$0xff]  }
0x2197   :  { %v5444_v45 = vmul.f32 %v15013_v50, %v5416_v30  ;;  %v5445_v59 = vmul.f32 %v15017_v46, %v5417_v41  ;;  %v5443_v13 = vmul.f32 %v15021_v21, %v5415_v52  ;;  %v12731_v30 = vld [vmem:[#allocation16 + $0x74] ss:$48 sps:$4 sm:$0xff]   ;;  %v12726_v41 = vld [vmem:[#allocation16 + $0x670] ss:$48 sps:$4 sm:$0xff]  }
0x2198   :  { %v13473_v9 = vpop.eup %13472  ;;  %v12734_v52 = vld [vmem:[#allocation16 + $0x614] ss:$48 sps:$4 sm:$0xff]  }
0x2199   :  { %v5419_v33 = vmul.f32 %v13473_v9, %v15000_v47  ;;  %v5420_v49 = vmul.f32 %v13473_v9, %v15003_v8  ;;  %v5418_v24 = vmul.f32 %v13473_v9, %v14997_v4  ;;  %v5472_v48 = vadd.f32 %v15024_v29, %v5444_v45  ;;  %v12729_v9 = vld [vmem:[#allocation16 + $0x70] ss:$48 sps:$4 sm:$0xff]  }
0x219a   :  { %v5473_v11 = vadd.f32 %v15027_v62, %v5445_v59  ;;  %v5471_v10 = vadd.f32 %v15036_v34, %v5443_v13  ;;  %v12732_v45 = vld [vmem:[#allocation16 + $0x610] ss:$48 sps:$4 sm:$0xff]   ;;  %v12738_v13 = vld [vmem:[#allocation16 + $0x2b8] ss:$48 sps:$4 sm:$0xff]  }
0x219b   :  { %v5447_v3 = vmul.f32 %v15013_v50, %v5419_v33  ;;  %v5448_v20 = vmul.f32 %v15017_v46, %v5420_v49  ;;  %v5446_v5 = vmul.f32 %v15021_v21, %v5418_v24  ;;  %v12690_v46 = vld [vmem:[#allocation16 + $0x8b0] ss:$48 sps:$4 sm:$0xff]   ;;  %v12698_v21 = vld [vmem:[#allocation16 + $0x854] ss:$48 sps:$4 sm:$0xff]   ;;  %v12740_v49 = vld [vmem:[#allocation16 + $0x2bc] ss:$48 sps:$4 sm:$0xff]  }
0x219c   :  { %v12737_v33 = vld [vmem:[#allocation16 + $0x14] ss:$48 sps:$4 sm:$0xff]   ;;  %v12735_v59 = vld [vmem:[#allocation16 + $0x10] ss:$48 sps:$4 sm:$0xff]  }
0x219d   :  { %v5475_v47 = vadd.f32 %v15024_v29, %v5447_v3  ;;  %v5476_v8 = vadd.f32 %v15027_v62, %v5448_v20  ;;  %v5474_v4 = vadd.f32 %v15036_v34, %v5446_v5  ;;  %v12693_v29 = vld [vmem:[#allocation16 + $0x2b0] ss:$48 sps:$4 sm:$0xff]   ;;  %v12701_v62 = vld [vmem:[#allocation16 + $0x254] ss:$48 sps:$4 sm:$0xff]   ;;  %v12746_v3 = vld [vmem:[#allocation16 + $0x25c] ss:$48 sps:$4 sm:$0xff]  }
0x219e   :  { %v12696_v34 = vld [vmem:[#allocation16 + $0x850] ss:$48 sps:$4 sm:$0xff]   ;;  %v12743_v24 = vld [vmem:[#allocation16 + $0x5b4] ss:$48 sps:$4 sm:$0xff]  }
0x219f   :  { %v15075_v56 = vpack.c.bf16 %v5475_v47, %v5472_v48  ;;  %v15077_v1 = vpack.c.bf16 %v5476_v8, %v5473_v11  ;;  %v15079_v50 = vpack.c.bf16 %v5474_v4, %v5471_v10  ;;  %v12741_v20 = vld [vmem:[#allocation16 + $0x5b0] ss:$48 sps:$4 sm:$0xff]   ;;  %v12749_v5 = vld [vmem:[#allocation16 + $0x554] ss:$48 sps:$4 sm:$0xff]   ;;  %v12744_v48 = vld [vmem:[#allocation16 + $0x258] ss:$48 sps:$4 sm:$0xff]  }
0x21a0   :  { %v12752_v47 = vld [vmem:[#allocation16 + $0x1fc] ss:$48 sps:$4 sm:$0xff]   ;;  %v12747_v11 = vld [vmem:[#allocation16 + $0x550] ss:$48 sps:$4 sm:$0xff]   ;;  %v12755_v8 = vld [vmem:[#allocation16 + $0x4f4] ss:$48 sps:$4 sm:$0xff]  }
0x21a1   :  { %7317 = vmatprep.mubr.bf16.mxu1 %v15075_v56  ;;  %7371 = vmatmul.mubr.bf16.gmra.mxu0 %v15077_v1  ;;  %v12750_v10 = vld [vmem:[#allocation16 + $0x1f8] ss:$48 sps:$4 sm:$0xff]   ;;  %v12758_v4 = vld [vmem:[#allocation16 + $0x19c] ss:$48 sps:$4 sm:$0xff]  }
0x21a2   :  { %7318 = vmatmul.mubr.bf16.gmra.mxu1 %v15079_v50  ;;  %7413 = vmatprep.mubr.bf16.mxu0 %v15047_v53 }
0x21a3   :  { %7466 = vmatprep.mubr.bf16.mxu1 %v15476_v22 }
0x21a9   :  { %7414 = vmatmul.mubr.bf16.vlgmr.msra.gmra.mxu0 %v15051_v31 }
0x21aa   :  { %7541 = vmatpush1.bf16.msra.mxu0 %v12690_v46  ;;  %7423 = vmatprep.mubr.bf16.mxu0 %v15075_v56  ;;  %v12753_v46 = vld [vmem:[#allocation16 + $0x4f0] ss:$48 sps:$4 sm:$0xff]  }
0x21ab   :  { %7467 = vmatmul.mubr.bf16.vlgmr.msra.gmra.mxu1 %v15049_v12  ;;  %7542 = vmatprep.subr.bf16.mxu0 %v12698_v21  ;;  %v15096_v21 = vld [vmem:[#allocation17] sm:$0xff] }
0x21ac   :  { %7488 = vmatpush1.bf16.msra.mxu1 %v12693_v29  ;;  %7476 = vmatprep.mubr.bf16.mxu1 %v15476_v22  ;;  %v12761_v29 = vld [vmem:[#allocation16 + $0x494] ss:$48 sps:$4 sm:$0xff]  }
0x21ad   :  { %7489 = vmatprep.subr.bf16.mxu1 %v12701_v62  ;;  %v12756_v62 = vld [vmem:[#allocation16 + $0x198] ss:$48 sps:$4 sm:$0xff]  }
0x21ae   :  { %7543 = vmatpush1.bf16.msra.mxu0 %v12696_v34  ;;  %v15102_v34 = vrot.slane %v15096_v21, %v15503_v40 }
0x21af   :  { %7544 = vmatprep.subr.bf16.mxu0 %v12704_v36  ;;  %v12764_v36 = vld [vmem:[#allocation16 + $0x13c] ss:$48 sps:$4 sm:$0xff]  }
0x21b0   :  { %7490 = vmatpush1.bf16.msra.mxu1 %v12699_v23  ;;  %v12759_v23 = vld [vmem:[#allocation16 + $0x490] ss:$48 sps:$4 sm:$0xff]  }
0x21b1   :  { %7424 = vmatmul.mubr.bf16.gmra.mxu0 %v15079_v50  ;;  %7491 = vmatprep.subr.bf16.mxu1 %v12707_v39 }
0x21b2   :  { %7545 = vmatpush1.bf16.msra.mxu0 %v12702_v32  ;;  %7572 = vmatprep.mubr.bf16.mxu0 %v15476_v22  ;;  %v12767_v32 = vld [vmem:[#allocation16 + $0x434] ss:$48 sps:$4 sm:$0xff]  }
0x21b3   :  { %7477 = vmatmul.mubr.bf16.gmra.mxu1 %v15077_v1  ;;  %7546 = vmatprep.subr.bf16.mxu0 %v12710_v42 }
0x21b4   :  { %7492 = vmatpush1.bf16.msra.mxu1 %v12705_v61  ;;  %7519 = vmatprep.mubr.bf16.mxu1 %v15047_v53  ;;  %v12762_v61 = vld [vmem:[#allocation16 + $0x138] ss:$48 sps:$4 sm:$0xff]  }
0x21b5   :  { %7493 = vmatprep.subr.bf16.mxu1 %v12713_v44 }
0x21b6   :  { %7547 = vmatpush1.bf16.msra.mxu0 %v12708_v43  ;;  %v12770_v43 = vld [vmem:[#allocation16 + $0xdc] ss:$48 sps:$4 sm:$0xff]  }
0x21b7   :  { %7548 = vmatprep.subr.bf16.mxu0 %v12716_v55 }
0x21b8   :  { %7494 = vmatpush1.bf16.msra.mxu1 %v12711_v16 }
0x21b9   :  { %7495 = vmatprep.subr.bf16.mxu1 %v12719_v58  ;;  %v12765_v58 = vld [vmem:[#allocation16 + $0x430] ss:$48 sps:$4 sm:$0xff]  }
0x21ba   :  { %7549 = vmatpush1.bf16.msra.mxu0 %v12714_v35 }
0x21bb   :  { %7550 = vmatprep.subr.bf16.mxu0 %v12722_v17  ;;  %v12773_v17 = vld [vmem:[#allocation16 + $0x3d4] ss:$48 sps:$4 sm:$0xff]  }
0x21bc   :  { %7496 = vmatpush1.bf16.msra.mxu1 %v12717_v2 }
0x21bd   :  { %7497 = vmatprep.subr.bf16.mxu1 %v12725_v25  ;;  %v12768_v25 = vld [vmem:[#allocation16 + $0xd8] ss:$48 sps:$4 sm:$0xff]  }
0x21be   :  { %7551 = vmatpush1.bf16.msra.mxu0 %v12720_v19 }
0x21bf   :  { %7552 = vmatprep.subr.bf16.mxu0 %v12728_v28  ;;  %v12776_v28 = vld [vmem:[#allocation16 + $0x7c] ss:$48 sps:$4 sm:$0xff]  }
0x21c0   :  { %7498 = vmatpush1.bf16.msra.mxu1 %v12723_v27 }
0x21c1   :  { %7499 = vmatprep.subr.bf16.mxu1 %v12731_v30  ;;  %v12771_v30 = vld [vmem:[#allocation16 + $0x3d0] ss:$48 sps:$4 sm:$0xff]  }
0x21c2   :  { %7553 = vmatpush1.bf16.msra.mxu0 %v12726_v41 }
0x21c3   :  { %7554 = vmatprep.subr.bf16.mxu0 %v12734_v52  ;;  %v12779_v52 = vld [vmem:[#allocation16 + $0x374] ss:$48 sps:$4 sm:$0xff]  }
0x21c4   :  { %7500 = vmatpush1.bf16.msra.mxu1 %v12729_v9  ;;  %v12774_v9 = vld [vmem:[#allocation16 + $0x78] ss:$48 sps:$4 sm:$0xff]  }
0x21c5   :  { %7501 = vmatprep.subr.bf16.mxu1 %v12737_v33 }
0x21c6   :  { %7555 = vmatpush1.bf16.msra.mxu0 %v12732_v45 }
0x21c7   :  { %7593 = vmatprep.subr.bf16.mxu0 %v12740_v49  ;;  %v12782_v49 = vld [vmem:[#allocation16 + $0x1c] ss:$48 sps:$4 sm:$0xff]  }
0x21c8   :  { %7502 = vmatpush1.bf16.msra.mxu1 %v12735_v59  ;;  %v12777_v59 = vld [vmem:[#allocation16 + $0x370] ss:$48 sps:$4 sm:$0xff]  }
0x21c9   :  { %7573 = vmatmul.mubr.bf16.vlgmr.msra.gmra.mxu0 %v15049_v12  ;;  %7503 = vmatprep.subr.bf16.mxu1 %v12743_v24 }
0x21ca   :  { %7594 = vmatpush1.bf16.msra.mxu0 %v12738_v13  ;;  %7582 = vmatprep.mubr.bf16.mxu0 %v15476_v22  ;;  %v12785_v13 = vld [vmem:[#allocation16 + $0x314] ss:$48 sps:$4 sm:$0xff]  }
0x21cb   :  { %7595 = vmatprep.subr.bf16.mxu0 %v12746_v3  ;;  %v12780_v3 = vld [vmem:[#allocation16 + $0x18] ss:$48 sps:$4 sm:$0xff]  }
0x21cc   :  { %7504 = vmatpush2.bf16.msra.mxu1 %v12741_v20  ;;  %v12788_v20 = vld [vmem:[#allocation16 + $0x5bc] ss:$48 sps:$4 sm:$0xff]  }
0x21cd   :  { %7505 = vmatprep.subr.bf16.mxu1 %v12749_v5  ;;  %v12783_v5 = vld [vmem:[#allocation16 + $0x310] ss:$48 sps:$4 sm:$0xff]  }
0x21ce   :  { %7596 = vmatpush1.bf16.msra.mxu0 %v12744_v48  ;;  %v12791_v48 = vld [vmem:[#allocation16 + $0x8bc] ss:$48 sps:$4 sm:$0xff]  }
0x21cf   :  { %7597 = vmatprep.subr.bf16.mxu0 %v12752_v47  ;;  %v12786_v47 = vld [vmem:[#allocation16 + $0x5b8] ss:$48 sps:$4 sm:$0xff]  }
0x21d0   :  { %7506 = vmatpush2.bf16.msra.mxu1 %v12747_v11  ;;  %v12794_v11 = vld [vmem:[#allocation16 + $0x55c] ss:$48 sps:$4 sm:$0xff]  }
0x21d1   :  { %7583 = vmatmul.mubr.bf16.gmra.mxu0 %v15077_v1  ;;  %7507 = vmatprep.subr.bf16.mxu1 %v12755_v8  ;;  %v12789_v8 = vld [vmem:[#allocation16 + $0x8b8] ss:$48 sps:$4 sm:$0xff]  }
0x21d2   :  { %7598 = vmatpush1.bf16.msra.mxu0 %v12750_v10  ;;  %7625 = vmatprep.mubr.bf16.mxu0 %v15047_v53  ;;  %v12797_v10 = vld [vmem:[#allocation16 + $0x85c] ss:$48 sps:$4 sm:$0xff]  }
0x21d3   :  { %7599 = vmatprep.subr.bf16.mxu0 %v12758_v4  ;;  %v12792_v4 = vld [vmem:[#allocation16 + $0x558] ss:$48 sps:$4 sm:$0xff]  }
0x21d4   :  { %7508 = vmatpush2.bf16.msra.mxu1 %v12753_v46  ;;  %v12800_v46 = vld [vmem:[#allocation16 + $0x4fc] ss:$48 sps:$4 sm:$0xff]  }
0x21d5   :  { %v7362_v39 = vpop.f32.mrf.mxu0  ;;  %7509 = vmatprep.subr.bf16.mxu1 %v12761_v29  ;;  %v12795_v29 = vld [vmem:[#allocation16 + $0x858] ss:$48 sps:$4 sm:$0xff]  }
0x21d6   :  { %7600 = vmatpush1.bf16.msra.mxu0 %v12756_v62  ;;  %v7309_v42 = vpop.f32.mrf.mxu1  ;;  %v12803_v62 = vld [vmem:[#allocation16 + $0x7fc] ss:$48 sps:$4 sm:$0xff]  }
0x21d7   :  { %v7310_v44 = vadd.f32 %v7309_v42, %v15102_v34  ;;  %7601 = vmatprep.subr.bf16.mxu0 %v12764_v36  ;;  %v15105_v55 = vpop.f32.mrf.mxu0  ;;  %v12798_v36 = vld [vmem:[#allocation16 + $0x4f8] ss:$48 sps:$4 sm:$0xff]  }
0x21d8   :  { %7510 = vmatpush2.bf16.msra.mxu1 %v12759_v23  ;;  %v15107_v16 = vpop.f32.mrf.mxu1  ;;  %v12806_v23 = vld [vmem:[#allocation16 + $0x49c] ss:$48 sps:$4 sm:$0xff]   ;;  %v12804_v42 = vld [vmem:[#allocation16 + $0x498] ss:$48 sps:$4 sm:$0xff]  }
0x21d9   :  { %v7363_v35 = vadd.f32 %v7362_v39, %v7310_v44  ;;  %7511 = vmatprep.subr.bf16.mxu1 %v12767_v32  ;;  %v7366_v27 = vpop.f32.mrf.mxu0  ;;  %v12801_v39 = vld [vmem:[#allocation16 + $0x7f8] ss:$48 sps:$4 sm:$0xff]   ;;  %v12809_v32 = vld [vmem:[#allocation16 + $0x79c] ss:$48 sps:$4 sm:$0xff]  }
0x21da   :  { %7602 = vmatpush1.bf16.msra.mxu0 %v12762_v61  ;;  %v7313_v2 = vpop.f32.mrf.mxu1  ;;  %v12812_v61 = vld [vmem:[#allocation16 + $0x43c] ss:$48 sps:$4 sm:$0xff]   ;;  %v12807_v44 = vld [vmem:[#allocation16 + $0x798] ss:$48 sps:$4 sm:$0xff]  }
0x21db   :  { %v7314_v19 = vadd.f32 %v7313_v2, %v15102_v34  ;;  %7603 = vmatprep.subr.bf16.mxu0 %v12770_v43  ;;  %v7911_v33 = vmax.f32 %v7363_v35, 0.0  ;;  %v12815_v43 = vld [vmem:[#allocation16 + $0x73c] ss:$48 sps:$4 sm:$0xff]  }
0x21dc   :  { %7512 = vmatpush2.bf16.msra.mxu1 %v12765_v58  ;;  %v12810_v58 = vld [vmem:[#allocation16 + $0x438] ss:$48 sps:$4 sm:$0xff]   ;;  %v12818_v35 = vld [vmem:[#allocation16 + $0x3dc] ss:$48 sps:$4 sm:$0xff]  }
0x21dd   :  { %v7367_v41 = vadd.f32 %v7366_v27, %v7314_v19  ;;  %7513 = vmatprep.subr.bf16.mxu1 %v12773_v17  ;;  %v12813_v17 = vld [vmem:[#allocation16 + $0x738] ss:$48 sps:$4 sm:$0xff]   ;;  %v12821_v2 = vld [vmem:[#allocation16 + $0x6dc] ss:$48 sps:$4 sm:$0xff]  }
0x21de   :  { %7604 = vmatpush1.bf16.msra.mxu0 %v12768_v25  ;;  %v12816_v25 = vld [vmem:[#allocation16 + $0x3d8] ss:$48 sps:$4 sm:$0xff]   ;;  %v12824_v19 = vld [vmem:[#allocation16 + $0x37c] ss:$48 sps:$4 sm:$0xff]  }
0x21df   :  { %v7923_v45 = vmax.f32 %v7367_v41, 0.0  ;;  %7605 = vmatprep.subr.bf16.mxu0 %v12776_v28  ;;  %v12819_v28 = vld [vmem:[#allocation16 + $0x6d8] ss:$48 sps:$4 sm:$0xff]   ;;  %v12827_v27 = vld [vmem:[#allocation16 + $0x67c] ss:$48 sps:$4 sm:$0xff]  }
0x21e0   :  { %7514 = vmatpush2.bf16.msra.mxu1 %v12771_v30  ;;  %v12822_v30 = vld [vmem:[#allocation16 + $0x378] ss:$48 sps:$4 sm:$0xff]   ;;  %v12830_v41 = vld [vmem:[#allocation16 + $0x31c] ss:$48 sps:$4 sm:$0xff]  }
0x21e1   :  { %v15110_v24 = vpack.c.bf16 %v7923_v45, %v7911_v33  ;;  %7515 = vmatprep.subr.bf16.mxu1 %v12779_v52  ;;  %v12825_v52 = vld [vmem:[#allocation16 + $0x678] ss:$48 sps:$4 sm:$0xff]   ;;  %v12836_v45 = vld [vmem:[#allocation16 + $0x8c4] ss:$48 sps:$4 sm:$0xff]  }
0x21e2   :  { %7606 = vmatpush1.bf16.msra.mxu0 %v12774_v9  ;;  %v12833_v9 = vld [vmem:[#allocation16 + $0x61c] ss:$48 sps:$4 sm:$0xff]   ;;  %v12828_v33 = vld [vmem:[#allocation16 + $0x318] ss:$48 sps:$4 sm:$0xff]  }
0x21e3   :  { %7607 = vmatprep.subr.bf16.mxu0 %v12782_v49  ;;  %v12831_v49 = vld [vmem:[#allocation16 + $0x618] ss:$48 sps:$4 sm:$0xff]  }
0x21e4   :  { %7516 = vmatpush2.bf16.msra.mxu1 %v12777_v59  ;;  %v12839_v59 = vld [vmem:[#allocation16 + $0x2c4] ss:$48 sps:$4 sm:$0xff]  }
0x21e5   :  { %7517 = vmatprep.subr.bf16.mxu1 %v12785_v13  ;;  %v12834_v13 = vld [vmem:[#allocation16 + $0x8c0] ss:$48 sps:$4 sm:$0xff]  }
0x21e6   :  { %7608 = vmatpush1.bf16.msra.mxu0 %v12780_v3  ;;  %v12842_v3 = vld [vmem:[#allocation16 + $0x864] ss:$48 sps:$4 sm:$0xff]  }
0x21e7   :  { %7609 = vmatprep.subr.bf16.mxu0 %v12788_v20  ;;  %v12837_v20 = vld [vmem:[#allocation16 + $0x2c0] ss:$48 sps:$4 sm:$0xff]  }
0x21e8   :  { %7518 = vmatpush2.bf16.msra.mxu1 %v12783_v5  ;;  %v12845_v5 = vld [vmem:[#allocation16 + $0x264] ss:$48 sps:$4 sm:$0xff]  }
0x21e9   :  { %7646 = vmatprep.subr.bf16.mxu1 %v12791_v48  ;;  %v12840_v48 = vld [vmem:[#allocation16 + $0x860] ss:$48 sps:$4 sm:$0xff]  }
0x21ea   :  { %7610 = vmatpush2.bf16.msra.mxu0 %v12786_v47  ;;  %v12848_v47 = vld [vmem:[#allocation16 + $0x804] ss:$48 sps:$4 sm:$0xff]  }
0x21eb   :  { %7520 = vmatmul.mubr.bf16.vlgmr.msra.gmra.mxu1 %v15051_v31  ;;  %7611 = vmatprep.subr.bf16.mxu0 %v12794_v11  ;;  %v12843_v11 = vld [vmem:[#allocation16 + $0x260] ss:$48 sps:$4 sm:$0xff]  }
0x21ec   :  { %7529 = vmatprep.mubr.bf16.mxu1 %v15075_v56  ;;  %7647 = vmatpush1.bf16.msra.mxu1 %v12789_v8  ;;  %v12851_v8 = vld [vmem:[#allocation16 + $0x204] ss:$48 sps:$4 sm:$0xff]  }
0x21ed   :  { %7648 = vmatprep.subr.bf16.mxu1 %v12797_v10  ;;  %v12846_v10 = vld [vmem:[#allocation16 + $0x800] ss:$48 sps:$4 sm:$0xff]  }
0x21ee   :  { %7612 = vmatpush2.bf16.msra.mxu0 %v12792_v4  ;;  %v12854_v4 = vld [vmem:[#allocation16 + $0x7a4] ss:$48 sps:$4 sm:$0xff]  }
0x21ef   :  { %7613 = vmatprep.subr.bf16.mxu0 %v12800_v46  ;;  %v12849_v46 = vld [vmem:[#allocation16 + $0x200] ss:$48 sps:$4 sm:$0xff]  }
0x21f0   :  { %7649 = vmatpush1.bf16.msra.mxu1 %v12795_v29  ;;  %v12857_v29 = vld [vmem:[#allocation16 + $0x1a4] ss:$48 sps:$4 sm:$0xff]  }
0x21f1   :  { %7650 = vmatprep.subr.bf16.mxu1 %v12803_v62  ;;  %v12852_v62 = vld [vmem:[#allocation16 + $0x7a0] ss:$48 sps:$4 sm:$0xff]  }
0x21f2   :  { %7614 = vmatpush2.bf16.msra.mxu0 %v12798_v36  ;;  %v12860_v36 = vld [vmem:[#allocation16 + $0x744] ss:$48 sps:$4 sm:$0xff]  }
0x21f3   :  { %7530 = vmatmul.mubr.bf16.gmra.mxu1 %v15079_v50  ;;  %7615 = vmatprep.subr.bf16.mxu0 %v12806_v23  ;;  %v12855_v23 = vld [vmem:[#allocation16 + $0x1a0] ss:$48 sps:$4 sm:$0xff]  }
0x21f4   :  { %7651 = vmatpush1.bf16.msra.mxu1 %v12801_v39  ;;  %7678 = vmatprep.mubr.bf16.mxu1 %v15476_v22  ;;  %v12863_v39 = vld [vmem:[#allocation16 + $0x144] ss:$48 sps:$4 sm:$0xff]  }
0x21f5   :  { %7652 = vmatprep.subr.bf16.mxu1 %v12809_v32  ;;  %v12858_v32 = vld [vmem:[#allocation16 + $0x740] ss:$48 sps:$4 sm:$0xff]  }
0x21f6   :  { %7616 = vmatpush2.bf16.msra.mxu0 %v12804_v42  ;;  %v12866_v42 = vld [vmem:[#allocation16 + $0x6e4] ss:$48 sps:$4 sm:$0xff]  }
0x21f7   :  { %7617 = vmatprep.subr.bf16.mxu0 %v12812_v61  ;;  %v12861_v61 = vld [vmem:[#allocation16 + $0x140] ss:$48 sps:$4 sm:$0xff]  }
0x21f8   :  { %7653 = vmatpush1.bf16.msra.mxu1 %v12807_v44  ;;  %v12869_v44 = vld [vmem:[#allocation16 + $0xe4] ss:$48 sps:$4 sm:$0xff]  }
0x21f9   :  { %7654 = vmatprep.subr.bf16.mxu1 %v12815_v43  ;;  %v12864_v43 = vld [vmem:[#allocation16 + $0x6e0] ss:$48 sps:$4 sm:$0xff]  }
0x21fa   :  { %7618 = vmatpush2.bf16.msra.mxu0 %v12810_v58  ;;  %v12872_v58 = vld [vmem:[#allocation16 + $0x684] ss:$48 sps:$4 sm:$0xff]  }
0x21fb   :  { %7619 = vmatprep.subr.bf16.mxu0 %v12818_v35  ;;  %v12867_v35 = vld [vmem:[#allocation16 + $0xe0] ss:$48 sps:$4 sm:$0xff]  }
0x21fc   :  { %7655 = vmatpush1.bf16.msra.mxu1 %v12813_v17  ;;  %v12875_v17 = vld [vmem:[#allocation16 + $0x84] ss:$48 sps:$4 sm:$0xff]  }
0x21fd   :  { %7656 = vmatprep.subr.bf16.mxu1 %v12821_v2  ;;  %v12870_v2 = vld [vmem:[#allocation16 + $0x680] ss:$48 sps:$4 sm:$0xff]  }
0x21fe   :  { %7620 = vmatpush2.bf16.msra.mxu0 %v12816_v25  ;;  %v12878_v25 = vld [vmem:[#allocation16 + $0x624] ss:$48 sps:$4 sm:$0xff]  }
0x21ff   :  { %7621 = vmatprep.subr.bf16.mxu0 %v12824_v19  ;;  %v12873_v19 = vld [vmem:[#allocation16 + $0x80] ss:$48 sps:$4 sm:$0xff]  }
0x2200   :  { %7657 = vmatpush1.bf16.msra.mxu1 %v12819_v28  ;;  %v12881_v28 = vld [vmem:[#allocation16 + $0x24] ss:$48 sps:$4 sm:$0xff]  }
0x2201   :  { %7658 = vmatprep.subr.bf16.mxu1 %v12827_v27  ;;  %v12876_v27 = vld [vmem:[#allocation16 + $0x620] ss:$48 sps:$4 sm:$0xff]  }
0x2202   :  { %7622 = vmatpush2.bf16.msra.mxu0 %v12822_v30  ;;  %v12884_v30 = vld [vmem:[#allocation16 + $0x2cc] ss:$48 sps:$4 sm:$0xff]  }
0x2203   :  { %7623 = vmatprep.subr.bf16.mxu0 %v12830_v41  ;;  %v12879_v41 = vld [vmem:[#allocation16 + $0x20] ss:$48 sps:$4 sm:$0xff]  }
0x2204   :  { %7659 = vmatpush1.bf16.msra.mxu1 %v12825_v52  ;;  %v12887_v52 = vld [vmem:[#allocation16 + $0x5c4] ss:$48 sps:$4 sm:$0xff]  }
0x2205   :  { %7660 = vmatprep.subr.bf16.mxu1 %v12833_v9  ;;  %v12882_v9 = vld [vmem:[#allocation16 + $0x2c8] ss:$48 sps:$4 sm:$0xff]  }
0x2206   :  { %7624 = vmatpush2.bf16.msra.mxu0 %v12828_v33  ;;  %v12890_v33 = vld [vmem:[#allocation16 + $0x26c] ss:$48 sps:$4 sm:$0xff]  }
0x2207   :  { %7752 = vmatprep.subr.bf16.mxu0 %v12836_v45  ;;  %v12885_v45 = vld [vmem:[#allocation16 + $0x5c0] ss:$48 sps:$4 sm:$0xff]  }
0x2208   :  { %7661 = vmatpush1.bf16.msra.mxu1 %v12831_v49  ;;  %v12893_v49 = vld [vmem:[#allocation16 + $0x564] ss:$48 sps:$4 sm:$0xff]  }
0x2209   :  { %7626 = vmatmul.mubr.bf16.vlgmr.msra.gmra.mxu0 %v15051_v31  ;;  %7699 = vmatprep.subr.bf16.mxu1 %v12839_v59  ;;  %v12888_v59 = vld [vmem:[#allocation16 + $0x268] ss:$48 sps:$4 sm:$0xff]  }
0x220a   :  { %7635 = vmatprep.mubr.bf16.mxu0 %v15075_v56  ;;  %7753 = vmatpush1.bf16.msra.mxu0 %v12834_v13  ;;  %v12896_v13 = vld [vmem:[#allocation16 + $0x20c] ss:$48 sps:$4 sm:$0xff]  }
0x220b   :  { %7679 = vmatmul.mubr.bf16.vlgmr.msra.gmra.mxu1 %v15049_v12  ;;  %7754 = vmatprep.subr.bf16.mxu0 %v12842_v3  ;;  %v12891_v3 = vld [vmem:[#allocation16 + $0x560] ss:$48 sps:$4 sm:$0xff]  }
0x220c   :  { %7700 = vmatpush1.bf16.msra.mxu1 %v12837_v20  ;;  %7688 = vmatprep.mubr.bf16.mxu1 %v15476_v22  ;;  %v12899_v20 = vld [vmem:[#allocation16 + $0x504] ss:$48 sps:$4 sm:$0xff]  }
0x220d   :  { %7701 = vmatprep.subr.bf16.mxu1 %v12845_v5  ;;  %v12894_v5 = vld [vmem:[#allocation16 + $0x208] ss:$48 sps:$4 sm:$0xff]  }
0x220e   :  { %7755 = vmatpush1.bf16.msra.mxu0 %v12840_v48  ;;  %v12902_v48 = vld [vmem:[#allocation16 + $0x1ac] ss:$48 sps:$4 sm:$0xff]  }
0x220f   :  { %7756 = vmatprep.subr.bf16.mxu0 %v12848_v47  ;;  %v12897_v47 = vld [vmem:[#allocation16 + $0x500] ss:$48 sps:$4 sm:$0xff]  }
0x2210   :  { %7702 = vmatpush1.bf16.msra.mxu1 %v12843_v11  ;;  %v12905_v11 = vld [vmem:[#allocation16 + $0x4a4] ss:$48 sps:$4 sm:$0xff]  }
0x2211   :  { %7636 = vmatmul.mubr.bf16.gmra.mxu0 %v15079_v50  ;;  %7703 = vmatprep.subr.bf16.mxu1 %v12851_v8  ;;  %v12900_v8 = vld [vmem:[#allocation16 + $0x1a8] ss:$48 sps:$4 sm:$0xff]  }
0x2212   :  { %7757 = vmatpush1.bf16.msra.mxu0 %v12846_v10  ;;  %7784 = vmatprep.mubr.bf16.mxu0 %v15476_v22  ;;  %v12908_v10 = vld [vmem:[#allocation16 + $0x14c] ss:$48 sps:$4 sm:$0xff]  }
0x2213   :  { %7689 = vmatmul.mubr.bf16.gmra.mxu1 %v15077_v1  ;;  %7758 = vmatprep.subr.bf16.mxu0 %v12854_v4  ;;  %v12903_v4 = vld [vmem:[#allocation16 + $0x4a0] ss:$48 sps:$4 sm:$0xff]  }
0x2214   :  { %7704 = vmatpush1.bf16.msra.mxu1 %v12849_v46  ;;  %7731 = vmatprep.mubr.bf16.mxu1 %v15047_v53  ;;  %v12911_v46 = vld [vmem:[#allocation16 + $0x444] ss:$48 sps:$4 sm:$0xff]  }
0x2215   :  { %7705 = vmatprep.subr.bf16.mxu1 %v12857_v29  ;;  %v12906_v29 = vld [vmem:[#allocation16 + $0x148] ss:$48 sps:$4 sm:$0xff]  }
0x2216   :  { %7759 = vmatpush1.bf16.msra.mxu0 %v12852_v62  ;;  %v12914_v62 = vld [vmem:[#allocation16 + $0xec] ss:$48 sps:$4 sm:$0xff]  }
0x2217   :  { %7760 = vmatprep.subr.bf16.mxu0 %v12860_v36  ;;  %v12909_v36 = vld [vmem:[#allocation16 + $0x440] ss:$48 sps:$4 sm:$0xff]  }
0x2218   :  { %7706 = vmatpush1.bf16.msra.mxu1 %v12855_v23  ;;  %v12917_v23 = vld [vmem:[#allocation16 + $0x3e4] ss:$48 sps:$4 sm:$0xff]  }
0x2219   :  { %7707 = vmatprep.subr.bf16.mxu1 %v12863_v39  ;;  %v12912_v39 = vld [vmem:[#allocation16 + $0xe8] ss:$48 sps:$4 sm:$0xff]  }
0x221a   :  { %7761 = vmatpush1.bf16.msra.mxu0 %v12858_v32  ;;  %v12920_v32 = vld [vmem:[#allocation16 + $0x8c] ss:$48 sps:$4 sm:$0xff]  }
0x221b   :  { %7762 = vmatprep.subr.bf16.mxu0 %v12866_v42  ;;  %v12923_v42 = vld [vmem:[#allocation16 + $0x384] ss:$48 sps:$4 sm:$0xff]  }
0x221c   :  { %7708 = vmatpush1.bf16.msra.mxu1 %v12861_v61  ;;  %v12918_v61 = vld [vmem:[#allocation16 + $0x88] ss:$48 sps:$4 sm:$0xff]  }
0x221d   :  { %7709 = vmatprep.subr.bf16.mxu1 %v12869_v44  ;;  %v12926_v44 = vld [vmem:[#allocation16 + $0x2c] ss:$48 sps:$4 sm:$0xff]  }
0x221e   :  { %7763 = vmatpush1.bf16.msra.mxu0 %v12864_v43  ;;  %v12921_v43 = vld [vmem:[#allocation16 + $0x380] ss:$48 sps:$4 sm:$0xff]  }
0x221f   :  { %7764 = vmatprep.subr.bf16.mxu0 %v12872_v58  ;;  %v12929_v58 = vld [vmem:[#allocation16 + $0x324] ss:$48 sps:$4 sm:$0xff]  }
0x2220   :  { %7710 = vmatpush1.bf16.msra.mxu1 %v12867_v35  ;;  %v12924_v35 = vld [vmem:[#allocation16 + $0x28] ss:$48 sps:$4 sm:$0xff]  }
0x2221   :  { %7711 = vmatprep.subr.bf16.mxu1 %v12875_v17  ;;  %v12932_v17 = vld [vmem:[#allocation16 + $0x5cc] ss:$48 sps:$4 sm:$0xff]  }
0x2222   :  { %7765 = vmatpush1.bf16.msra.mxu0 %v12870_v2  ;;  %v12927_v2 = vld [vmem:[#allocation16 + $0x320] ss:$48 sps:$4 sm:$0xff]  }
0x2223   :  { %7766 = vmatprep.subr.bf16.mxu0 %v12878_v25  ;;  %v12935_v25 = vld [vmem:[#allocation16 + $0x8cc] ss:$48 sps:$4 sm:$0xff]  }
0x2224   :  { %7712 = vmatpush1.bf16.msra.mxu1 %v12873_v19  ;;  %v12930_v19 = vld [vmem:[#allocation16 + $0x5c8] ss:$48 sps:$4 sm:$0xff]  }
0x2225   :  { %7713 = vmatprep.subr.bf16.mxu1 %v12881_v28  ;;  %v12938_v28 = vld [vmem:[#allocation16 + $0x56c] ss:$48 sps:$4 sm:$0xff]  }
0x2226   :  { %7767 = vmatpush1.bf16.msra.mxu0 %v12876_v27  ;;  %v12933_v27 = vld [vmem:[#allocation16 + $0x8c8] ss:$48 sps:$4 sm:$0xff]  }
0x2227   :  { %7805 = vmatprep.subr.bf16.mxu0 %v12884_v30  ;;  %v12941_v30 = vld [vmem:[#allocation16 + $0x86c] ss:$48 sps:$4 sm:$0xff]  }
0x2228   :  { %7714 = vmatpush1.bf16.msra.mxu1 %v12879_v41  ;;  %v12936_v41 = vld [vmem:[#allocation16 + $0x568] ss:$48 sps:$4 sm:$0xff]  }
0x2229   :  { %7785 = vmatmul.mubr.bf16.vlgmr.msra.gmra.mxu0 %v15049_v12  ;;  %7715 = vmatprep.subr.bf16.mxu1 %v12887_v52  ;;  %v12944_v52 = vld [vmem:[#allocation16 + $0x50c] ss:$48 sps:$4 sm:$0xff]  }
0x222a   :  { %7806 = vmatpush1.bf16.msra.mxu0 %v12882_v9  ;;  %7794 = vmatprep.mubr.bf16.mxu0 %v15476_v22  ;;  %v12939_v9 = vld [vmem:[#allocation16 + $0x868] ss:$48 sps:$4 sm:$0xff]  }
0x222b   :  { %7807 = vmatprep.subr.bf16.mxu0 %v12890_v33  ;;  %v12947_v33 = vld [vmem:[#allocation16 + $0x80c] ss:$48 sps:$4 sm:$0xff]  }
0x222c   :  { %7716 = vmatpush2.bf16.msra.mxu1 %v12885_v45  ;;  %v12942_v45 = vld [vmem:[#allocation16 + $0x508] ss:$48 sps:$4 sm:$0xff]  }
0x222d   :  { %7717 = vmatprep.subr.bf16.mxu1 %v12893_v49  ;;  %v12950_v49 = vld [vmem:[#allocation16 + $0x4ac] ss:$48 sps:$4 sm:$0xff]  }
0x222e   :  { %7808 = vmatpush1.bf16.msra.mxu0 %v12888_v59  ;;  %v12945_v59 = vld [vmem:[#allocation16 + $0x808] ss:$48 sps:$4 sm:$0xff]  }
0x222f   :  { %7809 = vmatprep.subr.bf16.mxu0 %v12896_v13  ;;  %v12953_v13 = vld [vmem:[#allocation16 + $0x7ac] ss:$48 sps:$4 sm:$0xff]  }
0x2230   :  { %7718 = vmatpush2.bf16.msra.mxu1 %v12891_v3  ;;  %v12948_v3 = vld [vmem:[#allocation16 + $0x4a8] ss:$48 sps:$4 sm:$0xff]  }
0x2231   :  { %7795 = vmatmul.mubr.bf16.gmra.mxu0 %v15077_v1  ;;  %7719 = vmatprep.subr.bf16.mxu1 %v12899_v20  ;;  %v12956_v20 = vld [vmem:[#allocation16 + $0x44c] ss:$48 sps:$4 sm:$0xff]  }
0x2232   :  { %7810 = vmatpush1.bf16.msra.mxu0 %v12894_v5  ;;  %7837 = vmatprep.mubr.bf16.mxu0 %v15047_v53  ;;  %v12915_v53 = vld [vmem:[#allocation16 + $0x3e0] ss:$48 sps:$4 sm:$0xff]   ;;  %v12951_v5 = vld [vmem:[#allocation16 + $0x7a8] ss:$48 sps:$4 sm:$0xff]  }
0x2233   :  { %7811 = vmatprep.subr.bf16.mxu0 %v12902_v48  ;;  %v12959_v48 = vld [vmem:[#allocation16 + $0x74c] ss:$48 sps:$4 sm:$0xff]  }
0x2234   :  { %7720 = vmatpush2.bf16.msra.mxu1 %v12897_v47  ;;  %v12954_v47 = vld [vmem:[#allocation16 + $0x448] ss:$48 sps:$4 sm:$0xff]  }
0x2235   :  { %7721 = vmatprep.subr.bf16.mxu1 %v12905_v11  ;;  %v12962_v11 = vld [vmem:[#allocation16 + $0x3ec] ss:$48 sps:$4 sm:$0xff]  }
0x2236   :  { %7812 = vmatpush1.bf16.msra.mxu0 %v12900_v8  ;;  %v12957_v8 = vld [vmem:[#allocation16 + $0x748] ss:$48 sps:$4 sm:$0xff]  }
0x2237   :  { %7813 = vmatprep.subr.bf16.mxu0 %v12908_v10  ;;  %v12965_v10 = vld [vmem:[#allocation16 + $0x6ec] ss:$48 sps:$4 sm:$0xff]  }
0x2238   :  { %7722 = vmatpush2.bf16.msra.mxu1 %v12903_v4  ;;  %v12960_v4 = vld [vmem:[#allocation16 + $0x3e8] ss:$48 sps:$4 sm:$0xff]  }
0x2239   :  { %7723 = vmatprep.subr.bf16.mxu1 %v12911_v46  ;;  %v12968_v46 = vld [vmem:[#allocation16 + $0x38c] ss:$48 sps:$4 sm:$0xff]  }
0x223a   :  { %7814 = vmatpush1.bf16.msra.mxu0 %v12906_v29  ;;  %v12963_v29 = vld [vmem:[#allocation16 + $0x6e8] ss:$48 sps:$4 sm:$0xff]  }
0x223b   :  { %7815 = vmatprep.subr.bf16.mxu0 %v12914_v62  ;;  %v12971_v62 = vld [vmem:[#allocation16 + $0x68c] ss:$48 sps:$4 sm:$0xff]  }
0x223c   :  { %7724 = vmatpush2.bf16.msra.mxu1 %v12909_v36  ;;  %v12966_v36 = vld [vmem:[#allocation16 + $0x388] ss:$48 sps:$4 sm:$0xff]  }
0x223d   :  { %7725 = vmatprep.subr.bf16.mxu1 %v12917_v23  ;;  %v7368_v23 = vpop.f32.mrf.mxu0 }
0x223e   :  { %7816 = vmatpush1.bf16.msra.mxu0 %v12912_v39  ;;  %v12974_v39 = vld [vmem:[#allocation16 + $0x32c] ss:$48 sps:$4 sm:$0xff]  }
0x223f   :  { %7817 = vmatprep.subr.bf16.mxu0 %v12920_v32  ;;  %v7315_v32 = vpop.f32.mrf.mxu1 }
0x2240   :  { %7726 = vmatpush2.bf16.msra.mxu1 %v12915_v53  ;;  %v12969_v53 = vld [vmem:[#allocation16 + $0x688] ss:$48 sps:$4 sm:$0xff]  }
0x2241   :  { %7727 = vmatprep.subr.bf16.mxu1 %v12923_v42 }
0x2242   :  { %7818 = vmatpush1.bf16.msra.mxu0 %v12918_v61  ;;  %v12977_v61 = vld [vmem:[#allocation16 + $0x62c] ss:$48 sps:$4 sm:$0xff]  }
0x2243   :  { %7819 = vmatprep.subr.bf16.mxu0 %v12926_v44 }
0x2244   :  { %7728 = vmatpush2.bf16.msra.mxu1 %v12921_v43  ;;  %v12972_v43 = vld [vmem:[#allocation16 + $0x328] ss:$48 sps:$4 sm:$0xff]  }
0x2245   :  { %7729 = vmatprep.subr.bf16.mxu1 %v12929_v58 }
0x2246   :  { %7820 = vmatpush1.bf16.msra.mxu0 %v12924_v35 }
0x2247   :  { %7821 = vmatprep.subr.bf16.mxu0 %v12932_v17  ;;  %v12980_v17 = vld [vmem:[#allocation19 + $0x22c] ss:$12 sps:$4 sm:$0xff]  }
0x2248   :  { %7730 = vmatpush2.bf16.msra.mxu1 %v12927_v2  ;;  %v15137_v2 = vrot.slane %v15096_v21, %v15502_v38 }
0x2249   :  { %7858 = vmatprep.subr.bf16.mxu1 %v12935_v25 }
0x224a   :  { %7822 = vmatpush2.bf16.msra.mxu0 %v12930_v19  ;;  %v12975_v19 = vld [vmem:[#allocation16 + $0x628] ss:$48 sps:$4 sm:$0xff]  }
0x224b   :  { %7732 = vmatmul.mubr.bf16.vlgmr.msra.gmra.mxu1 %v15051_v31  ;;  %7823 = vmatprep.subr.bf16.mxu0 %v12938_v28  ;;  %v15510_v28 = vld [vmem:[#allocation31_spill] sm:$0xff] }
0x224c   :  { %7741 = vmatprep.mubr.bf16.mxu1 %v15075_v56  ;;  %7859 = vmatpush1.bf16.msra.mxu1 %v12933_v27  ;;  %v15454_v27 = vsub.s32 3, %v15510_v28 }
0x224d   :  { %7860 = vmatprep.subr.bf16.mxu1 %v12941_v30 }
0x224e   :  { %7824 = vmatpush2.bf16.msra.mxu0 %v12936_v41 }
0x224f   :  { %7825 = vmatprep.subr.bf16.mxu0 %v12944_v52  ;;  %v12983_v52 = vld [vmem:[#allocation19 + $0xac] ss:$12 sps:$4 sm:$0xff]  }
0x2250   :  { %7861 = vmatpush1.bf16.msra.mxu1 %v12939_v9  ;;  %v7316_v9 = vadd.f32 %v7315_v32, %v15137_v2 }
0x2251   :  { %7862 = vmatprep.subr.bf16.mxu1 %v12947_v33 }
0x2252   :  { %7826 = vmatpush2.bf16.msra.mxu0 %v12942_v45  ;;  %v12978_v45 = vld [vmem:[#allocation19 + $0x228] ss:$12 sps:$4 sm:$0xff]  }
0x2253   :  { %7742 = vmatmul.mubr.bf16.gmra.mxu1 %v15079_v50  ;;  %7827 = vmatprep.subr.bf16.mxu0 %v12950_v49 }
0x2254   :  { %7863 = vmatpush1.bf16.msra.mxu1 %v12945_v59  ;;  %7890 = vmatprep.mubr.bf16.mxu1 %v15476_v22 }
0x2255   :  { %7864 = vmatprep.subr.bf16.mxu1 %v12953_v13  ;;  %v12986_v13 = vld [vmem:[#allocation19 + $0x214] ss:$12 sps:$4 sm:$0xff]  }
0x2256   :  { %7828 = vmatpush2.bf16.msra.mxu0 %v12948_v3  ;;  %v7312_v3 = vadd.f32 %v15107_v16, %v15137_v2  ;;  %v12984_v16 = vld [vmem:[#allocation19 + $0x210] ss:$12 sps:$4 sm:$0xff]  }
0x2257   :  { %7829 = vmatprep.subr.bf16.mxu0 %v12956_v20 }
0x2258   :  { %7865 = vmatpush1.bf16.msra.mxu1 %v12951_v5  ;;  %v12981_v5 = vld [vmem:[#allocation19 + $0xa8] ss:$12 sps:$4 sm:$0xff]  }
0x2259   :  { %7866 = vmatprep.subr.bf16.mxu1 %v12959_v48  ;;  %v15153_v48 = vrot.slane %v15096_v21, %v15454_v27 }
0x225a   :  { %7830 = vmatpush2.bf16.msra.mxu0 %v12954_v47 }
0x225b   :  { %7831 = vmatprep.subr.bf16.mxu0 %v12962_v11  ;;  %v12989_v11 = vld [vmem:[#allocation19 + $0x94] ss:$12 sps:$4 sm:$0xff]  }
0x225c   :  { %7867 = vmatpush1.bf16.msra.mxu1 %v12957_v8  ;;  %v7369_v8 = vadd.f32 %v7368_v23, %v7316_v9  ;;  %v12996_v9 = vld [vmem:[#allocation19 + $0x1e0] ss:$12 sps:$4 sm:$0xff]  }
0x225d   :  { %7868 = vmatprep.subr.bf16.mxu1 %v12965_v10 }
0x225e   :  { %7832 = vmatpush2.bf16.msra.mxu0 %v12960_v4 }
0x225f   :  { %7833 = vmatprep.subr.bf16.mxu0 %v12968_v46 }
0x2260   :  { %7869 = vmatpush1.bf16.msra.mxu1 %v12963_v29 }
0x2261   :  { %v7372_v42 = vpop.f32.mrf.mxu0  ;;  %7870 = vmatprep.subr.bf16.mxu1 %v12971_v62  ;;  %v12992_v62 = vld [vmem:[#allocation19 + $0x1fc] ss:$12 sps:$4 sm:$0xff]  }
0x2262   :  { %7834 = vmatpush2.bf16.msra.mxu0 %v12966_v36  ;;  %v7319_v44 = vpop.f32.mrf.mxu1 }
0x2263   :  { %v7320_v58 = vadd.f32 %v7319_v44, %v15102_v34  ;;  %v15133_v35 = vpop.f32.mrf.mxu0  ;;  %7835 = vmatprep.subr.bf16.mxu0 %v12974_v39  ;;  %v12987_v39 = vld [vmem:[#allocation19 + $0x90] ss:$12 sps:$4 sm:$0xff]  }
0x2264   :  { %7871 = vmatpush1.bf16.msra.mxu1 %v12969_v53  ;;  %v15139_v25 = vpop.f32.mrf.mxu1  ;;  %v7924_v53 = vmax.f32 %v7369_v8, 0.0  ;;  %v13008_v8 = vld [vmem:[#allocation19 + $0x1b0] ss:$12 sps:$4 sm:$0xff]  }
0x2265   :  { %v7373_v30 = vadd.f32 %v7372_v42, %v7320_v58  ;;  %v7376_v41 = vpop.f32.mrf.mxu0  ;;  %7872 = vmatprep.subr.bf16.mxu1 %v12977_v61  ;;  %v12990_v42 = vld [vmem:[#allocation19 + $0x1f8] ss:$12 sps:$4 sm:$0xff]  }
0x2266   :  { %7836 = vmatpush2.bf16.msra.mxu0 %v12972_v43  ;;  %v7323_v33 = vpop.f32.mrf.mxu1 }
0x2267   :  { %v7324_v49 = vadd.f32 %v7323_v33, %v15102_v34  ;;  %v15144_v59 = vpop.f32.mrf.mxu0  ;;  %9973 = vmatprep.subr.bf16.mxu0 %v12980_v17  ;;  %v7935_v10 = vmax.f32 %v7373_v30, 0.0  ;;  %v12993_v17 = vld [vmem:[#allocation19 + $0x78] ss:$12 sps:$4 sm:$0xff]  }
0x2268   :  { %7873 = vmatpush1.bf16.msra.mxu1 %v12975_v19  ;;  %v15148_v20 = vpop.f32.mrf.mxu1  ;;  %v13001_v30 = vld [vmem:[#allocation19 + $0x64] ss:$12 sps:$4 sm:$0xff]   ;;  %v13004_v33 = vld [vmem:[#allocation19 + $0x1cc] ss:$12 sps:$4 sm:$0xff]  }
0x2269   :  { %v7377_v47 = vadd.f32 %v7376_v41, %v7324_v49  ;;  %7838 = vmatmul.mubr.bf16.vlgmr.msra.gmra.mxu0 %v15051_v31  ;;  %v15156_v34 = vpop.f32.mrf.mxu0  ;;  %9920 = vmatprep.subr.bf16.mxu1 %v12983_v52  ;;  %v7365_v31 = vadd.f32 %v15105_v55, %v7312_v3  ;;  %v12998_v55 = vld [vmem:[#allocation19 + $0x1e4] ss:$12 sps:$4 sm:$0xff]   ;;  %v13007_v3 = vld [vmem:[#allocation19 + $0x4c] ss:$12 sps:$4 sm:$0xff]  }
0x226a   :  { %7847 = vmatprep.mubr.bf16.mxu0 %v15075_v56  ;;  %9974 = vmatpush1.bf16.msra.mxu0 %v12978_v45 }
0x226b   :  { %v7947_v4 = vmax.f32 %v7377_v47, 0.0  ;;  %7891 = vmatmul.mubr.bf16.vlgmr.msra.gmra.mxu1 %v15049_v12  ;;  %v15160_v46 = vpop.f32.mrf.mxu1  ;;  %v7417_v29 = vpop.f32.mrf.mxu0  ;;  %9975 = vmatprep.subr.bf16.mxu0 %v12986_v13  ;;  %v12995_v12 = vld [vmem:[#allocation19 + $0x7c] ss:$12 sps:$4 sm:$0xff]   ;;  %v7912_v43 = vmax.f32 %v7365_v31, 0.0  ;;  %v12999_v13 = vld [vmem:[#allocation19 + $0x60] ss:$12 sps:$4 sm:$0xff]  }
0x226c   :  { %9921 = vmatpush1.bf16.msra.mxu1 %v12981_v5  ;;  %v7418_v36 = vadd.f32 %v7417_v29, %v15153_v48  ;;  %7900 = vmatprep.mubr.bf16.mxu1 %v15476_v22  ;;  %v13002_v5 = vld [vmem:[#allocation19 + $0x1c8] ss:$12 sps:$4 sm:$0xff]   ;;  %v13014_v29 = vld [vmem:[#allocation19 + $0x198] ss:$12 sps:$4 sm:$0xff]  }
0x226d   :  { %v15165_v56 = vpack.c.bf16 %v7947_v4, %v7935_v10  ;;  %v7470_v23 = vpop.f32.mrf.mxu1  ;;  %v15167_v32 = vpop.f32.mrf.mxu0  ;;  %9922 = vmatprep.subr.bf16.mxu1 %v12989_v11  ;;  %v15173_v52 = vpack.c.bf16 %v7924_v53, %v7912_v43  ;;  %v13010_v47 = vld [vmem:[#allocation19 + $0x1b4] ss:$12 sps:$4 sm:$0xff]   ;;  %v13011_v10 = vld [vmem:[#allocation19 + $0x30] ss:$12 sps:$4 sm:$0xff]   ;;  %v13017_v31 = vld [vmem:[#allocation19 + $0x18] ss:$12 sps:$4 sm:$0xff]  }
0x226e   :  { %9976 = vmatpush1.bf16.msra.mxu0 %v12984_v16  ;;  %v7471_v58 = vadd.f32 %v7470_v23, %v7418_v36  ;;  %v13013_v11 = vld [vmem:[#allocation19 + $0x34] ss:$12 sps:$4 sm:$0xff]   ;;  %v13016_v16 = vld [vmem:[#allocation19 + $0x19c] ss:$12 sps:$4 sm:$0xff]   ;;  %v13025_v36 = vld [vmem:[#allocation19 + $0x4] ss:$12 sps:$4 sm:$0xff]  }
0x226f   :  { %v15169_v61 = vpop.f32.mrf.mxu1  ;;  %v7421_v44 = vpop.f32.mrf.mxu0  ;;  %9977 = vmatprep.subr.bf16.mxu0 %v12992_v62  ;;  %v13019_v4 = vld [vmem:[#allocation19 + $0x1c] ss:$12 sps:$4 sm:$0xff]   ;;  %v13022_v62 = vld [vmem:[#allocation19 + $0x184] ss:$12 sps:$4 sm:$0xff]   ;;  %v13028_v23 = vld [vmem:[#allocation19 + $0x2ec] ss:$12 sps:$4 sm:$0xff]  }
0x2270   :  { %9923 = vmatpush1.bf16.msra.mxu1 %v12987_v39  ;;  %v7422_v22 = vadd.f32 %v7421_v44, %v15153_v48  ;;  %v7914_v45 = vmax.f32 %v7471_v58, 0.0  ;;  %v13020_v39 = vld [vmem:[#allocation19 + $0x180] ss:$12 sps:$4 sm:$0xff]   ;;  %v13032_v58 = vld [vmem:[#allocation19 + $0x2d0] ss:$12 sps:$4 sm:$0xff]  }
0x2271   :  { %v7474_v19 = vpop.f32.mrf.mxu1  ;;  %7848 = vmatmul.mubr.bf16.gmra.mxu0 %v15079_v50  ;;  %9924 = vmatprep.subr.bf16.mxu1 %v12995_v12  ;;  %v13023_v12 = vld [vmem:[#allocation19] ss:$12 sps:$4 sm:$0xff]  }
0x2272   :  { %v7475_v41 = vadd.f32 %v7474_v19, %v7422_v22  ;;  %9978 = vmatpush1.bf16.msra.mxu0 %v12990_v42  ;;  %v13031_v53 = vld [vmem:[#allocation19 + $0x16c] ss:$12 sps:$4 sm:$0xff]   ;;  %v13026_v42 = vld [vmem:[#allocation19 + $0x2e8] ss:$12 sps:$4 sm:$0xff]   ;;  %v15180_v19 = vpop.f32.mrf.mxu0 }
0x2273   :  { %7901 = vmatmul.mubr.bf16.gmra.mxu1 %v15077_v1  ;;  %9979 = vmatprep.subr.bf16.mxu0 %v12998_v55  ;;  %v13005_v1 = vld [vmem:[#allocation19 + $0x48] ss:$12 sps:$4 sm:$0xff]  }
0x2274   :  { %v7926_v49 = vmax.f32 %v7475_v41, 0.0  ;;  %9925 = vmatpush1.bf16.msra.mxu1 %v12993_v17  ;;  %9952 = vmatprep.mubr.bf16.mxu1 %v15173_v52  ;;  %v13034_v44 = vld [vmem:[#allocation19 + $0x2d4] ss:$12 sps:$4 sm:$0xff]   ;;  %v13040_v22 = vld [vmem:[#allocation19 + $0x2bc] ss:$12 sps:$4 sm:$0xff]  }
0x2275   :  { %9926 = vmatprep.subr.bf16.mxu1 %v13001_v30  ;;  %v13029_v55 = vld [vmem:[#allocation19 + $0x168] ss:$12 sps:$4 sm:$0xff]   ;;  %v13035_v17 = vld [vmem:[#allocation19 + $0x150] ss:$12 sps:$4 sm:$0xff]   ;;  %v13038_v41 = vld [vmem:[#allocation19 + $0x2b8] ss:$12 sps:$4 sm:$0xff]  }
0x2276   :  { %v15177_v50 = vpack.c.bf16 %v7926_v49, %v7914_v45  ;;  %9980 = vmatpush1.bf16.msra.mxu0 %v12996_v9  ;;  %v13037_v43 = vld [vmem:[#allocation19 + $0x154] ss:$12 sps:$4 sm:$0xff]   ;;  %v13043_v30 = vld [vmem:[#allocation19 + $0x13c] ss:$12 sps:$4 sm:$0xff]   ;;  %v13046_v9 = vld [vmem:[#allocation19 + $0x2a4] ss:$12 sps:$4 sm:$0xff]   ;;  %v15182_v45 = vpop.f32.mrf.mxu1  ;;  %v7427_v49 = vpop.f32.mrf.mxu0 }
0x2277   :  { %9981 = vmatprep.subr.bf16.mxu0 %v13004_v33  ;;  %v13041_v33 = vld [vmem:[#allocation19 + $0x138] ss:$12 sps:$4 sm:$0xff]  }
0x2278   :  { %9927 = vmatpush1.bf16.msra.mxu1 %v12999_v13  ;;  %10005 = vmatprep.mubr.bf16.mxu0 %v15177_v50  ;;  %v13049_v13 = vld [vmem:[#allocation19 + $0x124] ss:$12 sps:$4 sm:$0xff]  }
0x2279   :  { %9928 = vmatprep.subr.bf16.mxu1 %v13007_v3  ;;  %v13044_v3 = vld [vmem:[#allocation19 + $0x2a0] ss:$12 sps:$4 sm:$0xff]  }
0x227a   :  { %9982 = vmatpush1.bf16.msra.mxu0 %v13002_v5  ;;  %v13052_v5 = vld [vmem:[#allocation19 + $0x28c] ss:$12 sps:$4 sm:$0xff]  }
0x227b   :  { %9983 = vmatprep.subr.bf16.mxu0 %v13010_v47  ;;  %v13047_v47 = vld [vmem:[#allocation19 + $0x120] ss:$12 sps:$4 sm:$0xff]  }
0x227c   :  { %9929 = vmatpush1.bf16.msra.mxu1 %v13005_v1  ;;  %v7480_v1 = vpop.f32.mrf.mxu1 }
0x227d   :  { %9930 = vmatprep.subr.bf16.mxu1 %v13013_v11  ;;  %v7429_v11 = vpop.f32.mrf.mxu0 }
0x227e   :  { %9984 = vmatpush1.bf16.msra.mxu0 %v13008_v8  ;;  %v13055_v8 = vld [vmem:[#allocation19 + $0x10c] ss:$12 sps:$4 sm:$0xff]  }
0x227f   :  { %9985 = vmatprep.subr.bf16.mxu0 %v13016_v16  ;;  %v13050_v16 = vld [vmem:[#allocation19 + $0x288] ss:$12 sps:$4 sm:$0xff]  }
0x2280   :  { %9931 = vmatpush1.bf16.msra.mxu1 %v13011_v10  ;;  %v13058_v10 = vld [vmem:[#allocation19 + $0x274] ss:$12 sps:$4 sm:$0xff]  }
0x2281   :  { %9932 = vmatprep.subr.bf16.mxu1 %v13019_v4  ;;  %v13053_v4 = vld [vmem:[#allocation19 + $0x108] ss:$12 sps:$4 sm:$0xff]  }
0x2282   :  { %9986 = vmatpush1.bf16.msra.mxu0 %v13014_v29  ;;  %v5786_v29 = vrot.slane %v15096_v21, %v15504_v60  ;;  %v7326_v21 = vadd.f32 %v15148_v20, %v15137_v2 }
0x2283   :  { %9987 = vmatprep.subr.bf16.mxu0 %v13022_v62  ;;  %v7482_v62 = vpop.f32.mrf.mxu1 }
0x2284   :  { %9933 = vmatpush1.bf16.msra.mxu1 %v13017_v31  ;;  %v7431_v31 = vpop.f32.mrf.mxu0  ;;  %v7379_v20 = vadd.f32 %v15144_v59, %v7326_v21  ;;  %v13074_v59 = vld [vmem:[#allocation19 + $0x528] ss:$12 sps:$4 sm:$0xff]   ;;  %v13083_v21 = vld [vmem:[#allocation19 + $0x390] ss:$12 sps:$4 sm:$0xff]  }
0x2285   :  { %9934 = vmatprep.subr.bf16.mxu1 %v13025_v36  ;;  %v13061_v36 = vld [vmem:[#allocation19 + $0xf4] ss:$12 sps:$4 sm:$0xff]  }
0x2286   :  { %9988 = vmatpush1.bf16.msra.mxu0 %v13020_v39  ;;  %v13056_v39 = vld [vmem:[#allocation19 + $0x270] ss:$12 sps:$4 sm:$0xff]  }
0x2287   :  { %9989 = vmatprep.subr.bf16.mxu0 %v13028_v23  ;;  %v7420_v23 = vadd.f32 %v15167_v32, %v5786_v29 }
0x2288   :  { %9935 = vmatpush1.bf16.msra.mxu1 %v13023_v12  ;;  %v13064_v12 = vld [vmem:[#allocation19 + $0x25c] ss:$12 sps:$4 sm:$0xff]  }
0x2289   :  { %9936 = vmatprep.subr.bf16.mxu1 %v13031_v53  ;;  %v7432_v53 = vadd.f32 %v7431_v31, %v15153_v48  ;;  %v7473_v32 = vadd.f32 %v15169_v61, %v7420_v23  ;;  %v13076_v61 = vld [vmem:[#allocation19 + $0x52c] ss:$12 sps:$4 sm:$0xff]   ;;  %v15202_v31 = vpop.f32.mrf.mxu0  ;;  %v13085_v23 = vld [vmem:[#allocation19 + $0x394] ss:$12 sps:$4 sm:$0xff]  }
0x228a   :  { %9990 = vmatpush2.bf16.msra.mxu0 %v13026_v42  ;;  %v13059_v42 = vld [vmem:[#allocation19 + $0xf0] ss:$12 sps:$4 sm:$0xff]  }
0x228b   :  { %9991 = vmatprep.subr.bf16.mxu0 %v13034_v44  ;;  %v7416_v44 = vadd.f32 %v15156_v34, %v5786_v29  ;;  %v13065_v34 = vld [vmem:[#allocation19 + $0xd8] ss:$12 sps:$4 sm:$0xff]  }
0x228c   :  { %9937 = vmatpush2.bf16.msra.mxu1 %v13029_v55  ;;  %v7484_v55 = vpop.f32.mrf.mxu1 }
0x228d   :  { %9938 = vmatprep.subr.bf16.mxu1 %v13037_v43  ;;  %v13067_v43 = vld [vmem:[#allocation19 + $0xdc] ss:$12 sps:$4 sm:$0xff]  }
0x228e   :  { %9992 = vmatpush2.bf16.msra.mxu0 %v13032_v58  ;;  %v7428_v58 = vadd.f32 %v7427_v49, %v15153_v48  ;;  %v13068_v48 = vld [vmem:[#allocation19 + $0x240] ss:$12 sps:$4 sm:$0xff]   ;;  %v7925_v49 = vmax.f32 %v7473_v32, 0.0  ;;  %v13091_v32 = vld [vmem:[#allocation19 + $0x37c] ss:$12 sps:$4 sm:$0xff]  }
0x228f   :  { %9993 = vmatprep.subr.bf16.mxu0 %v13040_v22  ;;  %v13062_v22 = vld [vmem:[#allocation19 + $0x258] ss:$12 sps:$4 sm:$0xff]  }
0x2290   :  { %9939 = vmatpush2.bf16.msra.mxu1 %v13035_v17  ;;  %v13070_v17 = vld [vmem:[#allocation19 + $0x244] ss:$12 sps:$4 sm:$0xff]  }
0x2291   :  { %9940 = vmatprep.subr.bf16.mxu1 %v13043_v30  ;;  %v7322_v30 = vadd.f32 %v15139_v25, %v15137_v2  ;;  %v13071_v2 = vld [vmem:[#allocation19 + $0xc0] ss:$12 sps:$4 sm:$0xff]  }
0x2292   :  { %9994 = vmatpush2.bf16.msra.mxu0 %v13038_v41  ;;  %v7485_v41 = vadd.f32 %v7484_v55, %v7432_v53  ;;  %v7576_v55 = vpop.f32.mrf.mxu0 }
0x2293   :  { %9995 = vmatprep.subr.bf16.mxu0 %v13046_v9  ;;  %v7469_v9 = vadd.f32 %v15160_v46, %v7416_v44  ;;  %v13079_v46 = vld [vmem:[#allocation19 + $0x3ac] ss:$12 sps:$4 sm:$0xff]  }
0x2294   :  { %9941 = vmatpush2.bf16.msra.mxu1 %v13041_v33  ;;  %v13073_v33 = vld [vmem:[#allocation19 + $0xc4] ss:$12 sps:$4 sm:$0xff]  }
0x2295   :  { %9942 = vmatprep.subr.bf16.mxu1 %v13049_v13  ;;  %v7481_v13 = vadd.f32 %v7480_v1, %v7428_v58  ;;  %v7913_v25 = vmax.f32 %v7469_v9, 0.0  ;;  %v5797_v1 = vsub.s32 5, %v15510_v28 }
0x2296   :  { %9996 = vmatpush2.bf16.msra.mxu0 %v13044_v3  ;;  %v7430_v3 = vadd.f32 %v7429_v11, %v5786_v29 }
0x2297   :  { %9997 = vmatprep.subr.bf16.mxu0 %v13052_v5  ;;  %v7375_v5 = vadd.f32 %v15133_v35, %v7322_v30  ;;  %v13082_v35 = vld [vmem:[#allocation19 + $0x514] ss:$12 sps:$4 sm:$0xff]   ;;  %v13086_v30 = vld [vmem:[#allocation19 + $0x4f8] ss:$12 sps:$4 sm:$0xff]  }
0x2298   :  { %9943 = vmatpush2.bf16.msra.mxu1 %v13047_v47  ;;  %v7950_v47 = vmax.f32 %v7485_v41, 0.0  ;;  %v7483_v11 = vadd.f32 %v7482_v62, %v7430_v3  ;;  %v15211_v62 = vld [vmem:[#allocation17] sm:$0xff] }
0x2299   :  { %9944 = vmatprep.subr.bf16.mxu1 %v13055_v8  ;;  %v7426_v8 = vadd.f32 %v15180_v19, %v5786_v29  ;;  %v13077_v19 = vld [vmem:[#allocation19 + $0x3a8] ss:$12 sps:$4 sm:$0xff]   ;;  %v15214_v53 = vrot.slane %v15211_v62, %v5797_v1 }
0x229a   :  { %9998 = vmatpush2.bf16.msra.mxu0 %v13050_v16  ;;  %v7948_v16 = vmax.f32 %v7379_v20, 0.0  ;;  %v7949_v44 = vmax.f32 %v7483_v11, 0.0  ;;  %v13089_v20 = vld [vmem:[#allocation19 + $0x378] ss:$12 sps:$4 sm:$0xff]   ;;  %v13101_v11 = vld [vmem:[#allocation19 + $0x348] ss:$12 sps:$4 sm:$0xff]  }
0x229b   :  { %9999 = vmatprep.subr.bf16.mxu0 %v13058_v10  ;;  %v7938_v10 = vmax.f32 %v7481_v13, 0.0  ;;  %v7479_v29 = vadd.f32 %v15182_v45, %v7426_v8  ;;  %v13088_v45 = vld [vmem:[#allocation19 + $0x4fc] ss:$12 sps:$4 sm:$0xff]   ;;  %v13103_v8 = vld [vmem:[#allocation19 + $0x34c] ss:$12 sps:$4 sm:$0xff]  }
0x229c   :  { %9945 = vmatpush2.bf16.msra.mxu1 %v13053_v4  ;;  %v15200_v4 = vpack.c.bf16 %v7925_v49, %v7913_v25  ;;  %v13095_v25 = vld [vmem:[#allocation19 + $0x360] ss:$12 sps:$4 sm:$0xff]  }
0x229d   :  { %9946 = vmatprep.subr.bf16.mxu1 %v13061_v36  ;;  %v7936_v36 = vmax.f32 %v7375_v5, 0.0  ;;  %v7937_v58 = vmax.f32 %v7479_v29, 0.0  ;;  %v13112_v29 = vld [vmem:[#allocation19 + $0x49c] ss:$12 sps:$4 sm:$0xff]  }
0x229e   :  { %10000 = vmatpush2.bf16.msra.mxu0 %v13056_v39  ;;  %v15204_v39 = vpack.c.bf16 %v7950_v47, %v7938_v10  ;;  %v13100_v47 = vld [vmem:[#allocation19 + $0x4cc] ss:$12 sps:$4 sm:$0xff]   ;;  %v13098_v10 = vld [vmem:[#allocation19 + $0x4c8] ss:$12 sps:$4 sm:$0xff]  }
0x229f   :  { %10001 = vmatprep.subr.bf16.mxu0 %v13064_v12  ;;  %v15209_v12 = vpack.c.bf16 %v7948_v16, %v7936_v36  ;;  %v15221_v41 = vpack.c.bf16 %v7949_v44, %v7937_v58  ;;  %v13104_v36 = vld [vmem:[#allocation19 + $0x4b0] ss:$12 sps:$4 sm:$0xff]   ;;  %v13113_v58 = vld [vmem:[#allocation19 + $0x318] ss:$12 sps:$4 sm:$0xff]  }
0x22a0   :  { %9947 = vmatpush2.bf16.msra.mxu1 %v13059_v42  ;;  %v13080_v42 = vld [vmem:[#allocation19 + $0x510] ss:$12 sps:$4 sm:$0xff]  }
0x22a1   :  { %9948 = vmatprep.subr.bf16.mxu1 %v13067_v43  ;;  %v13115_v44 = vld [vmem:[#allocation19 + $0x31c] ss:$12 sps:$4 sm:$0xff]  }
0x22a2   :  { %10002 = vmatpush2.bf16.msra.mxu0 %v13062_v22 }
0x22a3   :  { %10003 = vmatprep.subr.bf16.mxu0 %v13070_v17 }
0x22a4   :  { %9949 = vmatpush2.bf16.msra.mxu1 %v13065_v34  ;;  %v15223_v34 = vpop.f32.mrf.mxu0 }
0x22a5   :  { %9950 = vmatprep.subr.bf16.mxu1 %v13073_v33  ;;  %v13094_v33 = vld [vmem:[#allocation19 + $0x4e4] ss:$12 sps:$4 sm:$0xff]  }
0x22a6   :  { %10004 = vmatpush2.bf16.msra.mxu0 %v13068_v48  ;;  %v13097_v48 = vld [vmem:[#allocation19 + $0x364] ss:$12 sps:$4 sm:$0xff]   ;;  %v7580_v5 = vpop.f32.mrf.mxu0 }
0x22a7   :  { %10079 = vmatprep.subr.bf16.mxu0 %v13076_v61  ;;  %v13092_v61 = vld [vmem:[#allocation19 + $0x4e0] ss:$12 sps:$4 sm:$0xff]  }
0x22a8   :  { %9951 = vmatpush2.bf16.msra.mxu1 %v13071_v2 }
0x22a9   :  { %10006 = vmatmul.mubr.bf16.vlgmr.msra.gmra.mxu0 %v15200_v4  ;;  %10026 = vmatprep.subr.bf16.mxu1 %v13079_v46 }
0x22aa   :  { %10015 = vmatprep.mubr.bf16.mxu0 %v15204_v39  ;;  %10080 = vmatpush1.bf16.msra.mxu0 %v13074_v59  ;;  %v13106_v59 = vld [vmem:[#allocation19 + $0x4b4] ss:$12 sps:$4 sm:$0xff]  }
0x22ab   :  { %v15216_v43 = vpop.f32.mrf.mxu1  ;;  %9953 = vmatmul.mubr.bf16.vlgmr.msra.gmra.mxu1 %v15110_v24  ;;  %10081 = vmatprep.subr.bf16.mxu0 %v13082_v35  ;;  %v13109_v35 = vld [vmem:[#allocation19 + $0x334] ss:$12 sps:$4 sm:$0xff]  }
0x22ac   :  { %9962 = vmatprep.mubr.bf16.mxu1 %v15209_v12  ;;  %10027 = vmatpush1.bf16.msra.mxu1 %v13077_v19  ;;  %v15233_v19 = vpop.f32.mrf.mxu0 }
0x22ad   :  { %v7523_v22 = vpop.f32.mrf.mxu1  ;;  %10028 = vmatprep.subr.bf16.mxu1 %v13085_v23  ;;  %v13107_v23 = vld [vmem:[#allocation19 + $0x330] ss:$12 sps:$4 sm:$0xff]  }
0x22ae   :  { %v7524_v17 = vadd.f32 %v7523_v22, %v15214_v53  ;;  %10082 = vmatpush1.bf16.msra.mxu0 %v13080_v42 }
0x22af   :  { %v15225_v9 = vpop.f32.mrf.mxu1  ;;  %10083 = vmatprep.subr.bf16.mxu0 %v13088_v45  ;;  %v15237_v45 = vpop.f32.mrf.mxu0 }
0x22b0   :  { %10029 = vmatpush1.bf16.msra.mxu1 %v13083_v21  ;;  %v7577_v49 = vadd.f32 %v7576_v55, %v7524_v17  ;;  %v13110_v55 = vld [vmem:[#allocation19 + $0x498] ss:$12 sps:$4 sm:$0xff]   ;;  %v13116_v17 = vld [vmem:[#allocation19 + $0x480] ss:$12 sps:$4 sm:$0xff]  }
0x22b1   :  { %v7527_v13 = vpop.f32.mrf.mxu1  ;;  %10016 = vmatmul.mubr.bf16.gmra.mxu0 %v15221_v41  ;;  %10030 = vmatprep.subr.bf16.mxu1 %v13091_v32  ;;  %v13118_v21 = vld [vmem:[#allocation19 + $0x484] ss:$12 sps:$4 sm:$0xff]  }
0x22b2   :  { %v7528_v3 = vadd.f32 %v7527_v13, %v15214_v53  ;;  %10084 = vmatpush1.bf16.msra.mxu0 %v13086_v30  ;;  %v7916_v46 = vmax.f32 %v7577_v49, 0.0  ;;  %v13121_v32 = vld [vmem:[#allocation19 + $0x304] ss:$12 sps:$4 sm:$0xff]   ;;  %v15241_v30 = vpop.f32.mrf.mxu0  ;;  %v5805_v13 = vsub.s32 7, %v15510_v28  ;;  %v13127_v49 = vld [vmem:[#allocation19 + $0x46c] ss:$12 sps:$4 sm:$0xff]  }
0x22b3   :  { %9963 = vmatmul.mubr.bf16.gmra.mxu1 %v15165_v56  ;;  %10085 = vmatprep.subr.bf16.mxu0 %v13094_v33  ;;  %v15235_v42 = vpop.f32.mrf.mxu1  ;;  %v13124_v33 = vld [vmem:[#allocation19 + $0x5ec] ss:$12 sps:$4 sm:$0xff]  }
0x22b4   :  { %v7581_v2 = vadd.f32 %v7580_v5, %v7528_v3  ;;  %10031 = vmatpush1.bf16.msra.mxu1 %v13089_v20  ;;  %v13119_v20 = vld [vmem:[#allocation19 + $0x300] ss:$12 sps:$4 sm:$0xff]   ;;  %v13122_v3 = vld [vmem:[#allocation19 + $0x5e8] ss:$12 sps:$4 sm:$0xff]  }
0x22b5   :  { %10032 = vmatprep.subr.bf16.mxu1 %v13097_v48  ;;  %v15239_v22 = vpop.f32.mrf.mxu1  ;;  %v13130_v5 = vld [vmem:[#allocation19 + $0x5d4] ss:$12 sps:$4 sm:$0xff]  }
0x22b6   :  { %v7928_v16 = vmax.f32 %v7581_v2, 0.0  ;;  %10086 = vmatpush1.bf16.msra.mxu0 %v13092_v61  ;;  %v15246_v61 = vpop.f32.mrf.mxu0  ;;  %v15249_v2 = vrot.slane %v15211_v62, %v5805_v13 }
0x22b7   :  { %10087 = vmatprep.subr.bf16.mxu0 %v13100_v47  ;;  %v15244_v48 = vpop.f32.mrf.mxu1  ;;  %v13125_v47 = vld [vmem:[#allocation19 + $0x468] ss:$12 sps:$4 sm:$0xff]  }
0x22b8   :  { %10033 = vmatpush1.bf16.msra.mxu1 %v13095_v25  ;;  %v15230_v1 = vpack.c.bf16 %v7928_v16, %v7916_v46  ;;  %v13133_v46 = vld [vmem:[#allocation19 + $0x454] ss:$12 sps:$4 sm:$0xff]   ;;  %v13128_v16 = vld [vmem:[#allocation19 + $0x5d0] ss:$12 sps:$4 sm:$0xff]  }
0x22b9   :  { %10034 = vmatprep.subr.bf16.mxu1 %v13103_v8  ;;  %v15251_v25 = vpop.f32.mrf.mxu1 }
0x22ba   :  { %10058 = vmatprep.mubr.bf16.mxu1 %v15230_v1  ;;  %10088 = vmatpush1.bf16.msra.mxu0 %v13098_v10 }
0x22bb   :  { %10089 = vmatprep.subr.bf16.mxu0 %v13106_v59 }
0x22bc   :  { %10035 = vmatpush1.bf16.msra.mxu1 %v13101_v11  ;;  %v13136_v11 = vld [vmem:[#allocation19 + $0x5bc] ss:$12 sps:$4 sm:$0xff]  }
0x22bd   :  { %10036 = vmatprep.subr.bf16.mxu1 %v13109_v35 }
0x22be   :  { %10090 = vmatpush1.bf16.msra.mxu0 %v13104_v36  ;;  %v13131_v36 = vld [vmem:[#allocation19 + $0x450] ss:$12 sps:$4 sm:$0xff]  }
0x22bf   :  { %10091 = vmatprep.subr.bf16.mxu0 %v13112_v29 }
0x22c0   :  { %10037 = vmatpush1.bf16.msra.mxu1 %v13107_v23 }
0x22c1   :  { %10038 = vmatprep.subr.bf16.mxu1 %v13115_v44  ;;  %v13139_v44 = vld [vmem:[#allocation19 + $0x43c] ss:$12 sps:$4 sm:$0xff]  }
0x22c2   :  { %10092 = vmatpush1.bf16.msra.mxu0 %v13110_v55  ;;  %v13134_v55 = vld [vmem:[#allocation19 + $0x5b8] ss:$12 sps:$4 sm:$0xff]  }
0x22c3   :  { %10093 = vmatprep.subr.bf16.mxu0 %v13118_v21 }
0x22c4   :  { %10039 = vmatpush1.bf16.msra.mxu1 %v13113_v58 }
0x22c5   :  { %10040 = vmatprep.subr.bf16.mxu1 %v13121_v32  ;;  %v13142_v32 = vld [vmem:[#allocation19 + $0x5a4] ss:$12 sps:$4 sm:$0xff]  }
0x22c6   :  { %10094 = vmatpush1.bf16.msra.mxu0 %v13116_v17 }
0x22c7   :  { %10095 = vmatprep.subr.bf16.mxu0 %v13124_v33 }
0x22c8   :  { %10041 = vmatpush1.bf16.msra.mxu1 %v13119_v20  ;;  %v13137_v20 = vld [vmem:[#allocation19 + $0x438] ss:$12 sps:$4 sm:$0xff]  }
0x22c9   :  { %v15253_v8 = vpop.f32.mrf.mxu0  ;;  %10042 = vmatprep.subr.bf16.mxu1 %v13127_v49 }
0x22ca   :  { %10096 = vmatpush2.bf16.msra.mxu0 %v13122_v3  ;;  %v13145_v3 = vld [vmem:[#allocation19 + $0x424] ss:$12 sps:$4 sm:$0xff]  }
0x22cb   :  { %v15255_v10 = vpop.f32.mrf.mxu1  ;;  %v7629_v59 = vpop.f32.mrf.mxu0  ;;  %10097 = vmatprep.subr.bf16.mxu0 %v13130_v5 }
0x22cc   :  { %v7630_v35 = vadd.f32 %v7629_v59, %v15249_v2  ;;  %10043 = vmatpush2.bf16.msra.mxu1 %v13125_v47  ;;  %v13140_v47 = vld [vmem:[#allocation19 + $0x5a0] ss:$12 sps:$4 sm:$0xff]  }
0x22cd   :  { %v7682_v29 = vpop.f32.mrf.mxu1  ;;  %v7631_v23 = vpop.f32.mrf.mxu0  ;;  %10044 = vmatprep.subr.bf16.mxu1 %v13133_v46  ;;  %v13148_v59 = vld [vmem:[#allocation19 + $0x58c] ss:$12 sps:$4 sm:$0xff]  }
0x22ce   :  { %10098 = vmatpush2.bf16.msra.mxu0 %v13128_v16  ;;  %v7683_v17 = vadd.f32 %v7682_v29, %v7630_v35  ;;  %v13143_v35 = vld [vmem:[#allocation19 + $0x420] ss:$12 sps:$4 sm:$0xff]  }
0x22cf   :  { %v7684_v21 = vpop.f32.mrf.mxu1  ;;  %v7633_v58 = vpop.f32.mrf.mxu0  ;;  %10099 = vmatprep.subr.bf16.mxu0 %v13136_v11 }
0x22d0   :  { %v7634_v33 = vadd.f32 %v7633_v58, %v15249_v2  ;;  %10045 = vmatpush2.bf16.msra.mxu1 %v13131_v36  ;;  %v7918_v11 = vmax.f32 %v7683_v17, 0.0  ;;  %v5801_v36 = vsub.s32 6, %v15510_v28 }
0x22d1   :  { %v7686_v13 = vpop.f32.mrf.mxu1  ;;  %v15259_v49 = vpop.f32.mrf.mxu0  ;;  %10046 = vmatprep.subr.bf16.mxu1 %v13139_v44 }
0x22d2   :  { %v7687_v5 = vadd.f32 %v7686_v13, %v7634_v33  ;;  %10100 = vmatpush2.bf16.msra.mxu0 %v13134_v55  ;;  %v13146_v55 = vld [vmem:[#allocation19 + $0x588] ss:$12 sps:$4 sm:$0xff]   ;;  %v5793_v33 = vsub.s32 4, %v15510_v28  ;;  %v5802_v17 = vrot.slane %v15211_v62, %v5801_v36 }
0x22d3   :  { %v15261_v46 = vpop.f32.mrf.mxu1  ;;  %v7639_v16 = vpop.f32.mrf.mxu0  ;;  %10101 = vmatprep.subr.bf16.mxu0 %v13142_v32  ;;  %v13154_v13 = vld [vmem:[#allocation19 + $0x574] ss:$12 sps:$4 sm:$0xff]  }
0x22d4   :  { %v7930_v27 = vmax.f32 %v7687_v5, 0.0  ;;  %10047 = vmatpush2.bf16.msra.mxu1 %v13137_v20  ;;  %v13149_v32 = vld [vmem:[#allocation19 + $0x408] ss:$12 sps:$4 sm:$0xff]   ;;  %v7628_v57 = vadd.f32 %v15253_v8, %v5802_v17  ;;  %v13161_v8 = vld [vmem:[#allocation19 + $0x3d8] ss:$12 sps:$4 sm:$0xff]  }
0x22d5   :  { %v7692_v29 = vpop.f32.mrf.mxu1  ;;  %v7641_v58 = vpop.f32.mrf.mxu0  ;;  %10048 = vmatprep.subr.bf16.mxu1 %v13145_v3  ;;  %v13152_v3 = vld [vmem:[#allocation19 + $0x570] ss:$12 sps:$4 sm:$0xff]  }
0x22d6   :  { %v15264_v44 = vpack.c.bf16 %v7930_v27, %v7918_v11  ;;  %10102 = vmatpush2.bf16.msra.mxu0 %v13140_v47  ;;  %v5794_v27 = vrot.slane %v15211_v62, %v5793_v33  ;;  %v7632_v47 = vadd.f32 %v7631_v23, %v5802_v17  ;;  %v13160_v11 = vld [vmem:[#allocation19 + $0x55c] ss:$12 sps:$4 sm:$0xff]   ;;  %v13158_v62 = vld [vmem:[#allocation19 + $0x558] ss:$12 sps:$4 sm:$0xff]  }
0x22d7   :  { %10103 = vmatprep.subr.bf16.mxu0 %v13148_v59  ;;  %v7694_v20 = vpop.f32.mrf.mxu1  ;;  %v7643_v5 = vpop.f32.mrf.mxu0 }
0x22d8   :  { %10049 = vmatpush2.bf16.msra.mxu1 %v13143_v35  ;;  %10111 = vmatprep.mubr.bf16.mxu0 %v15264_v44  ;;  %v7644_v59 = vadd.f32 %v7643_v5, %v15249_v2  ;;  %v13155_v35 = vld [vmem:[#allocation19 + $0x3f0] ss:$12 sps:$4 sm:$0xff]   ;;  %v7526_v6 = vadd.f32 %v15225_v9, %v5794_v27  ;;  %v7522_v23 = vadd.f32 %v15216_v43, %v5794_v27  ;;  %v13164_v43 = vld [vmem:[#allocation19 + $0x540] ss:$12 sps:$4 sm:$0xff]  }
0x22d9   :  { %10050 = vmatprep.subr.bf16.mxu1 %v13151_v54  ;;  %v7696_v36 = vpop.f32.mrf.mxu1  ;;  %v7538_v54 = vadd.f32 %v15251_v25, %v15214_v53  ;;  %v7685_v33 = vadd.f32 %v7684_v21, %v7632_v47  ;;  %v7534_v9 = vadd.f32 %v15239_v22, %v15214_v53  ;;  %v7681_v5 = vadd.f32 %v15255_v10, %v7628_v57  ;;  %v13169_v25 = vld [vmem:[#allocation19 + $0x3c4] ss:$12 sps:$4 sm:$0xff]   ;;  %v13184_v53 = vld [vmem:[#allocation19 + $0x82c] ss:$12 sps:$4 sm:$0xff]  }
0x22da   :  { %10104 = vmatpush2.bf16.msra.mxu0 %v13146_v55  ;;  %v7640_v55 = vadd.f32 %v7639_v16, %v15249_v2  ;;  %v7575_v21 = vadd.f32 %v15202_v31, %v7522_v23  ;;  %v7642_v47 = vadd.f32 %v7641_v58, %v5802_v17  ;;  %v7536_v57 = vadd.f32 %v15244_v48, %v5794_v27  ;;  %v13172_v10 = vld [vmem:[#allocation19 + $0x6ac] ss:$12 sps:$4 sm:$0xff]   ;;  %v13182_v31 = vld [vmem:[#allocation19 + $0x828] ss:$12 sps:$4 sm:$0xff]  }
0x22db   :  { %10105 = vmatprep.subr.bf16.mxu0 %v13154_v13  ;;  %v13166_v13 = vld [vmem:[#allocation19 + $0x544] ss:$12 sps:$4 sm:$0xff]   ;;  %v7591_v2 = vadd.f32 %v15246_v61, %v7538_v54  ;;  %v7587_v22 = vadd.f32 %v15237_v45, %v7534_v9  ;;  %v7638_v61 = vadd.f32 %v15259_v49, %v5802_v17  ;;  %v13190_v54 = vld [vmem:[#allocation19 + $0x814] ss:$12 sps:$4 sm:$0xff]   ;;  %v13196_v9 = vld [vmem:[#allocation19 + $0x7fc] ss:$12 sps:$4 sm:$0xff]  }
0x22dc   :  { %10051 = vmatpush2.bf16.msra.mxu1 %v13149_v32  ;;  %v7697_v32 = vadd.f32 %v7696_v36, %v7644_v59  ;;  %v7693_v16 = vadd.f32 %v7692_v29, %v7640_v55  ;;  %v7915_v58 = vmax.f32 %v7575_v21, 0.0  ;;  %v7695_v45 = vadd.f32 %v7694_v20, %v7642_v47  ;;  %v13170_v48 = vld [vmem:[#allocation19 + $0x6a8] ss:$12 sps:$4 sm:$0xff]   ;;  %v13200_v21 = vld [vmem:[#allocation19 + $0x7e0] ss:$12 sps:$4 sm:$0xff]  }
0x22dd   :  { %10052 = vmatprep.subr.bf16.mxu1 %v13157_v7  ;;  %v7579_v7 = vadd.f32 %v15223_v34, %v7526_v6  ;;  %v13167_v6 = vld [vmem:[#allocation19 + $0x3c0] ss:$12 sps:$4 sm:$0xff]   ;;  %v7952_v29 = vmax.f32 %v7591_v2, 0.0  ;;  %v7940_v55 = vmax.f32 %v7587_v22, 0.0  ;;  %v7589_v17 = vadd.f32 %v15241_v30, %v7536_v57  ;;  %v13173_v30 = vld [vmem:[#allocation19 + $0x690] ss:$12 sps:$4 sm:$0xff]  }
0x22de   :  { %10106 = vmatpush2.bf16.msra.mxu0 %v13152_v3  ;;  %v7929_v3 = vmax.f32 %v7685_v33, 0.0  ;;  %v7942_v59 = vmax.f32 %v7693_v16, 0.0  ;;  %v7691_v23 = vadd.f32 %v15261_v46, %v7638_v61  ;;  %v13176_v2 = vld [vmem:[#allocation19 + $0x678] ss:$12 sps:$4 sm:$0xff]   ;;  %v13179_v47 = vld [vmem:[#allocation19 + $0x660] ss:$12 sps:$4 sm:$0xff]  }
0x22df   :  { %10107 = vmatprep.subr.bf16.mxu0 %v13160_v11  ;;  %v7954_v11 = vmax.f32 %v7697_v32, 0.0  ;;  %v7927_v34 = vmax.f32 %v7579_v7, 0.0  ;;  %v15297_v20 = vpack.c.bf16 %v7952_v29, %v7940_v55  ;;  %v7951_v46 = vmax.f32 %v7589_v17, 0.0  ;;  %v13194_v7 = vld [vmem:[#allocation19 + $0x7f8] ss:$12 sps:$4 sm:$0xff]  }
0x22e0   :  { %10053 = vmatpush2.bf16.msra.mxu1 %v13155_v35  ;;  %v7532_v35 = vadd.f32 %v15235_v42, %v5794_v27  ;;  %v13175_v42 = vld [vmem:[#allocation19 + $0x694] ss:$12 sps:$4 sm:$0xff]   ;;  %v13188_v27 = vld [vmem:[#allocation19 + $0x810] ss:$12 sps:$4 sm:$0xff]   ;;  %v7941_v32 = vmax.f32 %v7691_v23, 0.0 }
0x22e1   :  { %10054 = vmatprep.subr.bf16.mxu1 %v13163_v14  ;;  %v7917_v14 = vmax.f32 %v7681_v5, 0.0  ;;  %v15291_v49 = vpack.c.bf16 %v7927_v34, %v7915_v58  ;;  %v13206_v22 = vld [vmem:[#allocation19 + $0x7c8] ss:$12 sps:$4 sm:$0xff]   ;;  %v13212_v57 = vld [vmem:[#allocation19 + $0x7b0] ss:$12 sps:$4 sm:$0xff]  }
0x22e2   :  { %10108 = vmatpush2.bf16.msra.mxu0 %v13158_v62  ;;  %v15289_v62 = vpack.c.bf16 %v7954_v11, %v7942_v59  ;;  %v7585_v33 = vadd.f32 %v15233_v19, %v7532_v35  ;;  %v13202_v19 = vld [vmem:[#allocation19 + $0x7e4] ss:$12 sps:$4 sm:$0xff]   ;;  %v13214_v11 = vld [vmem:[#allocation19 + $0x7b4] ss:$12 sps:$4 sm:$0xff]  }
0x22e3   :  { %10109 = vmatprep.subr.bf16.mxu0 %v13166_v13  ;;  %v15287_v36 = vpack.c.bf16 %v7929_v3, %v7917_v14  ;;  %v7953_v13 = vmax.f32 %v7695_v45, 0.0  ;;  %v13208_v3 = vld [vmem:[#allocation19 + $0x7cc] ss:$12 sps:$4 sm:$0xff]   ;;  %v13193_v34 = vld [vmem:[#allocation19 + $0x634] ss:$12 sps:$4 sm:$0xff]  }
0x22e4   :  { %10055 = vmatpush2.bf16.msra.mxu1 %v13161_v8  ;;  %v13178_v8 = vld [vmem:[#allocation19 + $0x67c] ss:$12 sps:$4 sm:$0xff]   ;;  %v7939_v5 = vmax.f32 %v7585_v33, 0.0  ;;  %v13218_v29 = vld [vmem:[#allocation19 + $0x798] ss:$12 sps:$4 sm:$0xff]  }
0x22e5   :  { %10056 = vmatprep.subr.bf16.mxu1 %v13169_v25  ;;  %v15302_v25 = vpack.c.bf16 %v7953_v13, %v7941_v32  ;;  %v13220_v14 = vld [vmem:[#allocation19 + $0x79c] ss:$12 sps:$4 sm:$0xff]   ;;  %v13226_v59 = vld [vmem:[#allocation19 + $0x784] ss:$12 sps:$4 sm:$0xff]   ;;  %v13224_v35 = vld [vmem:[#allocation19 + $0x780] ss:$12 sps:$4 sm:$0xff]  }
0x22e6   :  { %10110 = vmatpush2.bf16.msra.mxu0 %v13164_v43  ;;  %v15304_v16 = vpack.c.bf16 %v7951_v46, %v7939_v5  ;;  %v13181_v43 = vld [vmem:[#allocation19 + $0x664] ss:$12 sps:$4 sm:$0xff]   ;;  %v13232_v45 = vld [vmem:[#allocation19 + $0x8ec] ss:$12 sps:$4 sm:$0xff]   ;;  %v13230_v17 = vld [vmem:[#allocation19 + $0x8e8] ss:$12 sps:$4 sm:$0xff]  }
0x22e7   :  { %10185 = vmatprep.subr.bf16.mxu0 %v13184_v53  ;;  %v13187_v53 = vld [vmem:[#allocation19 + $0x64c] ss:$12 sps:$4 sm:$0xff]   ;;  %v13191_v61 = vld [vmem:[#allocation19 + $0x630] ss:$12 sps:$4 sm:$0xff]   ;;  %v13238_v23 = vld [vmem:[#allocation19 + $0x8d4] ss:$12 sps:$4 sm:$0xff]  }
0x22e8   :  { %10057 = vmatpush2.bf16.msra.mxu1 %v13167_v6  ;;  %v13185_v6 = vld [vmem:[#allocation19 + $0x648] ss:$12 sps:$4 sm:$0xff]   ;;  %v13205_v58 = vld [vmem:[#allocation19 + $0x604] ss:$12 sps:$4 sm:$0xff]   ;;  %v15310_v33 = vld [vmem:[#allocation17 + $0x8] sm:$0xf] }
0x22e9   :  { %10112 = vmatmul.mubr.bf16.vlgmr.msra.gmra.mxu0 %v15287_v36  ;;  %10132 = vmatprep.subr.bf16.mxu1 %v13172_v10  ;;  %v13199_v10 = vld [vmem:[#allocation19 + $0x61c] ss:$12 sps:$4 sm:$0xff]   ;;  %v15308_v55 = vpop.f32.mrf.mxu0  ;;  %v13217_v13 = vld [vmem:[#allocation19 + $0x754] ss:$12 sps:$4 sm:$0xff]  }
0x22ea   :  { %10121 = vmatprep.mubr.bf16.mxu0 %v15289_v62  ;;  %10186 = vmatpush1.bf16.msra.mxu0 %v13182_v31  ;;  %v13197_v31 = vld [vmem:[#allocation19 + $0x618] ss:$12 sps:$4 sm:$0xff]   ;;  %v13244_v32 = vld [vmem:[#allocation19 + $0x8bc] ss:$12 sps:$4 sm:$0xff]  }
0x22eb   :  { %10059 = vmatmul.mubr.bf16.vlgmr.msra.gmra.mxu1 %v15291_v49  ;;  %10187 = vmatprep.subr.bf16.mxu0 %v13190_v54  ;;  %v13203_v54 = vld [vmem:[#allocation19 + $0x600] ss:$12 sps:$4 sm:$0xff]  }
0x22ec   :  { %10068 = vmatprep.mubr.bf16.mxu1 %v15297_v20  ;;  %10133 = vmatpush1.bf16.msra.mxu1 %v13170_v48  ;;  %v13211_v48 = vld [vmem:[#allocation19 + $0x76c] ss:$12 sps:$4 sm:$0xff]  }
0x22ed   :  { %10134 = vmatprep.subr.bf16.mxu1 %v13175_v42  ;;  %v13209_v42 = vld [vmem:[#allocation19 + $0x768] ss:$12 sps:$4 sm:$0xff]  }
0x22ee   :  { %10188 = vmatpush1.bf16.msra.mxu0 %v13188_v27  ;;  %v7788_v27 = vpop.f32.mrf.mxu0 }
0x22ef   :  { %10189 = vmatprep.subr.bf16.mxu0 %v13196_v9  ;;  %v15314_v9 = vrot.slane %v15310_v33, %v15502_v38 }
0x22f0   :  { %10135 = vmatpush1.bf16.msra.mxu1 %v13173_v30  ;;  %v13236_v30 = vld [vmem:[#allocation19 + $0x8d0] ss:$12 sps:$4 sm:$0xff]  }
0x22f1   :  { %10122 = vmatmul.mubr.bf16.gmra.mxu0 %v15302_v25  ;;  %10136 = vmatprep.subr.bf16.mxu1 %v13178_v8  ;;  %v13215_v8 = vld [vmem:[#allocation19 + $0x750] ss:$12 sps:$4 sm:$0xff]  }
0x22f2   :  { %10190 = vmatpush1.bf16.msra.mxu0 %v13194_v7  ;;  %v15318_v7 = vpop.f32.mrf.mxu0 }
0x22f3   :  { %10069 = vmatmul.mubr.bf16.gmra.mxu1 %v15304_v16  ;;  %10191 = vmatprep.subr.bf16.mxu0 %v13202_v19  ;;  %v13223_v19 = vld [vmem:[#allocation19 + $0x73c] ss:$12 sps:$4 sm:$0xff]  }
0x22f4   :  { %10137 = vmatpush1.bf16.msra.mxu1 %v13176_v2 }
0x22f5   :  { %10138 = vmatprep.subr.bf16.mxu1 %v13181_v43  ;;  %v13242_v43 = vld [vmem:[#allocation19 + $0x8b8] ss:$12 sps:$4 sm:$0xff]  }
0x22f6   :  { %10192 = vmatpush1.bf16.msra.mxu0 %v13200_v21 }
0x22f7   :  { %10193 = vmatprep.subr.bf16.mxu0 %v13208_v3  ;;  %v13250_v3 = vld [vmem:[#allocation19 + $0x8a4] ss:$12 sps:$4 sm:$0xff]  }
0x22f8   :  { %10139 = vmatpush1.bf16.msra.mxu1 %v13179_v47  ;;  %v13221_v47 = vld [vmem:[#allocation19 + $0x738] ss:$12 sps:$4 sm:$0xff]  }
0x22f9   :  { %10140 = vmatprep.subr.bf16.mxu1 %v13187_v53  ;;  %v7792_v53 = vpop.f32.mrf.mxu0 }
0x22fa   :  { %10194 = vmatpush1.bf16.msra.mxu0 %v13206_v22 }
0x22fb   :  { %10195 = vmatprep.subr.bf16.mxu0 %v13214_v11  ;;  %v13229_v11 = vld [vmem:[#allocation19 + $0x724] ss:$12 sps:$4 sm:$0xff]  }
0x22fc   :  { %10141 = vmatpush1.bf16.msra.mxu1 %v13185_v6 }
0x22fd   :  { %10142 = vmatprep.subr.bf16.mxu1 %v13193_v34 }
0x22fe   :  { %10196 = vmatpush1.bf16.msra.mxu0 %v13212_v57  ;;  %v13248_v57 = vld [vmem:[#allocation19 + $0x8a0] ss:$12 sps:$4 sm:$0xff]  }
0x22ff   :  { %10197 = vmatprep.subr.bf16.mxu0 %v13220_v14 }
0x2300   :  { %10143 = vmatpush1.bf16.msra.mxu1 %v13191_v61  ;;  %v13256_v61 = vld [vmem:[#allocation19 + $0x88c] ss:$12 sps:$4 sm:$0xff]  }
0x2301   :  { %10144 = vmatprep.subr.bf16.mxu1 %v13199_v10 }
0x2302   :  { %10198 = vmatpush1.bf16.msra.mxu0 %v13218_v29  ;;  %v13227_v29 = vld [vmem:[#allocation19 + $0x720] ss:$12 sps:$4 sm:$0xff]  }
0x2303   :  { %10199 = vmatprep.subr.bf16.mxu0 %v13226_v59  ;;  %v15324_v59 = vpop.f32.mrf.mxu0 }
0x2304   :  { %10145 = vmatpush1.bf16.msra.mxu1 %v13197_v31 }
0x2305   :  { %10146 = vmatprep.subr.bf16.mxu1 %v13205_v58  ;;  %v13235_v58 = vld [vmem:[#allocation19 + $0x70c] ss:$12 sps:$4 sm:$0xff]  }
0x2306   :  { %10200 = vmatpush1.bf16.msra.mxu0 %v13224_v35 }
0x2307   :  { %10201 = vmatprep.subr.bf16.mxu0 %v13232_v45 }
0x2308   :  { %10147 = vmatpush1.bf16.msra.mxu1 %v13203_v54  ;;  %v13254_v54 = vld [vmem:[#allocation19 + $0x888] ss:$12 sps:$4 sm:$0xff]  }
0x2309   :  { %10148 = vmatprep.subr.bf16.mxu1 %v13211_v48 }
0x230a   :  { %10202 = vmatpush2.bf16.msra.mxu0 %v13230_v17  ;;  %v13261_v17 = vld [vmem:[#allocation19 + $0x874] ss:$12 sps:$4 sm:$0xff]  }
0x230b   :  { %v15316_v46 = vpop.f32.mrf.mxu1  ;;  %10203 = vmatprep.subr.bf16.mxu0 %v13238_v23 }
0x230c   :  { %10149 = vmatpush2.bf16.msra.mxu1 %v13209_v42  ;;  %v13233_v42 = vld [vmem:[#allocation19 + $0x708] ss:$12 sps:$4 sm:$0xff]  }
0x230d   :  { %v7735_v5 = vpop.f32.mrf.mxu1  ;;  %10150 = vmatprep.subr.bf16.mxu1 %v13217_v13  ;;  %v13241_v13 = vld [vmem:[#allocation19 + $0x6f4] ss:$12 sps:$4 sm:$0xff]  }
0x230e   :  { %v7736_v2 = vadd.f32 %v7735_v5, %v15314_v9  ;;  %10204 = vmatpush2.bf16.msra.mxu0 %v13236_v30  ;;  %v13259_v30 = vld [vmem:[#allocation19 + $0x870] ss:$12 sps:$4 sm:$0xff]  }
0x230f   :  { %v7737_v21 = vpop.f32.mrf.mxu1  ;;  %10205 = vmatprep.subr.bf16.mxu0 %v13244_v32  ;;  %v5810_v32 = vrot.slane %v15310_v33, %v15503_v40  ;;  %v13266_v5 = vld [vmem:[#allocation19 + $0x85c] ss:$12 sps:$4 sm:$0xff]  }
0x2310   :  { %10151 = vmatpush2.bf16.msra.mxu1 %v13215_v8  ;;  %v7789_v6 = vadd.f32 %v7788_v27, %v7736_v2  ;;  %v7798_v27 = vpop.f32.mrf.mxu0 }
0x2311   :  { %v7739_v22 = vpop.f32.mrf.mxu1  ;;  %10152 = vmatprep.subr.bf16.mxu1 %v13223_v19  ;;  %v13239_v19 = vld [vmem:[#allocation19 + $0x6f0] ss:$12 sps:$4 sm:$0xff]  }
0x2312   :  { %v7740_v34 = vadd.f32 %v7739_v22, %v15314_v9  ;;  %10206 = vmatpush2.bf16.msra.mxu0 %v13242_v43  ;;  %v7920_v35 = vmax.f32 %v7789_v6, 0.0  ;;  %v7800_v2 = vpop.f32.mrf.mxu0  ;;  %v7738_v43 = vadd.f32 %v7737_v21, %v5810_v32  ;;  %v7734_v22 = vadd.f32 %v15316_v46, %v5810_v32  ;;  %v13251_v46 = vld [vmem:[#allocation19 + $0x6c0] ss:$12 sps:$4 sm:$0xff]  }
0x2313   :  { %v15322_v14 = vpop.f32.mrf.mxu1  ;;  %10207 = vmatprep.subr.bf16.mxu0 %v13250_v3  ;;  %v13247_v3 = vld [vmem:[#allocation19 + $0x6dc] ss:$12 sps:$4 sm:$0xff]  }
0x2314   :  { %v7793_v10 = vadd.f32 %v7792_v53, %v7740_v34  ;;  %10153 = vmatpush2.bf16.msra.mxu1 %v13221_v47  ;;  %v13264_v53 = vld [vmem:[#allocation19 + $0x858] ss:$12 sps:$4 sm:$0xff]  }
0x2315   :  { %v7745_v31 = vpop.f32.mrf.mxu1  ;;  %10154 = vmatprep.subr.bf16.mxu1 %v13229_v11  ;;  %v13271_v11 = vld [vmem:[#allocation19 + $0x844] ss:$12 sps:$4 sm:$0xff]  }
0x2316   :  { %v7932_v45 = vmax.f32 %v7793_v10, 0.0  ;;  %10208 = vmatpush2.bf16.msra.mxu0 %v13248_v57  ;;  %v7746_v6 = vadd.f32 %v7745_v31, %v15314_v9  ;;  %v13245_v34 = vld [vmem:[#allocation19 + $0x6d8] ss:$12 sps:$4 sm:$0xff]   ;;  %v7802_v57 = vpop.f32.mrf.mxu0 }
0x2317   :  { %v7747_v48 = vpop.f32.mrf.mxu1  ;;  %10209 = vmatprep.subr.bf16.mxu0 %v13256_v61  ;;  %v7791_v61 = vadd.f32 %v15318_v7, %v7738_v43  ;;  %v13253_v10 = vld [vmem:[#allocation19 + $0x6c4] ss:$12 sps:$4 sm:$0xff]   ;;  %v7744_v7 = vadd.f32 %v15322_v14, %v5810_v32 }
0x2318   :  { %10155 = vmatpush2.bf16.msra.mxu1 %v13227_v29  ;;  %v15326_v23 = vpack.c.bf16 %v7932_v45, %v7920_v35  ;;  %v13269_v29 = vld [vmem:[#allocation19 + $0x840] ss:$12 sps:$4 sm:$0xff]   ;;  %v13274_v35 = vld [vmem:[#allocation19 + $0x2f0] ss:$12 sps:$4 sm:$0xff]   ;;  %v7799_v45 = vadd.f32 %v7798_v27, %v7746_v6  ;;  %v13262_v43 = vld [vmem:[#allocation19 + $0x158] ss:$12 sps:$4 sm:$0xff]  }
0x2319   :  { %10156 = vmatprep.subr.bf16.mxu1 %v13235_v58  ;;  %v7749_v8 = vpop.f32.mrf.mxu1  ;;  %v7787_v58 = vadd.f32 %v15308_v55, %v7734_v22  ;;  %v13258_v27 = vld [vmem:[#allocation19 + $0xb0] ss:$12 sps:$4 sm:$0xff]   ;;  %v7797_v14 = vadd.f32 %v15324_v59, %v7744_v7  ;;  %v13267_v6 = vld [vmem:[#allocation19 + $0x140] ss:$12 sps:$4 sm:$0xff]  }
0x231a   :  { %10164 = vmatprep.mubr.bf16.mxu1 %v15326_v23  ;;  %10210 = vmatpush2.bf16.msra.mxu0 %v13254_v54  ;;  %v7750_v47 = vadd.f32 %v7749_v8, %v15314_v9  ;;  %v7931_v54 = vmax.f32 %v7791_v61, 0.0  ;;  %v13257_v9 = vld [vmem:[#allocation19 + $0x170] ss:$12 sps:$4 sm:$0xff]  }
0x231b   :  { %10211 = vmatprep.subr.bf16.mxu0 %v13261_v17  ;;  %v7748_v17 = vadd.f32 %v7747_v48, %v5810_v32  ;;  %v5818_v48 = vrot.slane %v15310_v33, %v15504_v60 }
0x231c   :  { %10157 = vmatpush2.bf16.msra.mxu1 %v13233_v42  ;;  %v7803_v21 = vadd.f32 %v7802_v57, %v7750_v47  ;;  %v7919_v42 = vmax.f32 %v7787_v58, 0.0  ;;  %v7943_v57 = vmax.f32 %v7797_v14, 0.0  ;;  %v13268_v58 = vld [vmem:[#allocation19 + $0x80] ss:$12 sps:$4 sm:$0xff]  }
0x231d   :  { %10158 = vmatprep.subr.bf16.mxu1 %v13241_v13  ;;  %v7944_v13 = vmax.f32 %v7799_v45, 0.0 }
0x231e   :  { %10212 = vmatpush2.bf16.msra.mxu0 %v13259_v30  ;;  %v7956_v31 = vmax.f32 %v7803_v21, 0.0  ;;  %v15511_v30 = vsub.s32 3, %v15510_v28  ;;  %v15342_v8 = vpack.c.bf16 %v7931_v54, %v7919_v42 }
0x231f   :  { %10213 = vmatprep.subr.bf16.mxu0 %v13266_v5  ;;  %v7801_v5 = vadd.f32 %v7800_v2, %v7748_v17  ;;  %v13263_v2 = vld [vmem:[#allocation19 + $0x98] ss:$12 sps:$4 sm:$0xff]   ;;  %v13272_v17 = vld [vmem:[#allocation19 + $0x128] ss:$12 sps:$4 sm:$0xff]  }
0x2320   :  { %10159 = vmatpush2.bf16.msra.mxu1 %v13239_v19  ;;  %v15340_v55 = vrot.slane %v15310_v33, %v15511_v30 }
0x2321   :  { %10160 = vmatprep.subr.bf16.mxu1 %v13247_v3  ;;  %v15346_v3 = vpack.c.bf16 %v7956_v31, %v7944_v13 }
0x2322   :  { %10214 = vmatpush2.bf16.msra.mxu0 %v13264_v53  ;;  %v7955_v53 = vmax.f32 %v7801_v5, 0.0  ;;  %v13273_v5 = vld [vmem:[#allocation19 + $0x68] ss:$12 sps:$4 sm:$0xff]  }
0x2323   :  { %10215 = vmatprep.subr.bf16.mxu0 %v13271_v11 }
0x2324   :  { %10161 = vmatpush2.bf16.msra.mxu1 %v13245_v34 }
0x2325   :  { %10162 = vmatprep.subr.bf16.mxu1 %v13253_v10 }
0x2326   :  { %10216 = vmatpush2.bf16.msra.mxu0 %v13269_v29 }
0x2327   :  { %11665 = vmatprep.subr.bf16.mxu0 %v13274_v35  ;;  %v15353_v35 = vpack.c.bf16 %v7955_v53, %v7943_v57  ;;  %v13275_v53 = vld [vmem:[#allocation19 + $0x230] ss:$12 sps:$4 sm:$0xff]  }
0x2328   :  { %10163 = vmatpush2.bf16.msra.mxu1 %v13251_v46 }
0x2329   :  { %v7839_v19 = vpop.f32.mrf.mxu0  ;;  %11637 = vmatprep.subr.bf16.mxu1 %v13257_v9 }
0x232a   :  { %v7840_v22 = vadd.f32 %v7839_v19, %v5818_v48 }
0x232b   :  { %v7892_v32 = vpop.f32.mrf.mxu1  ;;  %10165 = vmatmul.mubr.bf16.vlgmr.msra.gmra.mxu1 %v15342_v8  ;;  %v7841_v28 = vpop.f32.mrf.mxu0 }
0x232c   :  { %v7842_v47 = vadd.f32 %v7841_v28, %v15340_v55  ;;  %10174 = vmatprep.mubr.bf16.mxu1 %v15346_v3  ;;  %11638 = vmatpush3.bf16.msra.mxu1 %v13258_v27  ;;  %v7893_v45 = vadd.f32 %v7892_v32, %v7840_v22  ;;  %v13276_v28 = vld [vmem:[#allocation19 + $0x110] ss:$12 sps:$4 sm:$0xff]  }
0x232d   :  { %v7894_v33 = vpop.f32.mrf.mxu1  ;;  %v7843_v11 = vpop.f32.mrf.mxu0  ;;  %11639 = vmatprep.subr.bf16.mxu1 %v13262_v43 }
0x232e   :  { %v7844_v34 = vadd.f32 %v7843_v11, %v5818_v48  ;;  %v7895_v10 = vadd.f32 %v7894_v33, %v7842_v47  ;;  %v7921_v19 = vmax.f32 %v7893_v45, 0.0  ;;  %v13282_v45 = vld [vmem:[#allocation19 + $0x2c0] ss:$12 sps:$4 sm:$0xff]  }
0x232f   :  { %v7896_v61 = vpop.f32.mrf.mxu1  ;;  %v7845_v59 = vpop.f32.mrf.mxu0 }
0x2330   :  { %v7897_v21 = vadd.f32 %v7896_v61, %v7844_v34  ;;  %v7846_v29 = vadd.f32 %v7845_v59, %v15340_v55  ;;  %11640 = vmatpush3.bf16.msra.mxu1 %v13263_v2  ;;  %v7922_v13 = vmax.f32 %v7895_v10, 0.0  ;;  %v13277_v61 = vld [vmem:[#allocation19 + $0x50] ss:$12 sps:$4 sm:$0xff]  }
0x2331   :  { %v7898_v46 = vpop.f32.mrf.mxu1  ;;  %v7849_v54 = vpop.f32.mrf.mxu0  ;;  %11641 = vmatprep.subr.bf16.mxu1 %v13267_v6  ;;  %v13278_v6 = vld [vmem:[#allocation19 + $0x2d8] ss:$12 sps:$4 sm:$0xff]  }
0x2332   :  { %v7899_v9 = vadd.f32 %v7898_v46, %v7846_v29  ;;  %v7933_v31 = vmax.f32 %v7897_v21, 0.0  ;;  %v7850_v43 = vadd.f32 %v7849_v54, %v5818_v48  ;;  %v13279_v29 = vld [vmem:[#allocation19 + $0x218] ss:$12 sps:$4 sm:$0xff]  }
0x2333   :  { %v7902_v42 = vpop.f32.mrf.mxu1  ;;  %10175 = vmatmul.mubr.bf16.gmra.mxu1 %v15353_v35  ;;  %v7851_v7 = vpop.f32.mrf.mxu0 }
0x2334   :  { %v7934_v30 = vmax.f32 %v7899_v9, 0.0  ;;  %v7852_v27 = vadd.f32 %v7851_v7, %v15340_v55  ;;  %11642 = vmatpush3.bf16.msra.mxu1 %v13268_v58  ;;  %10270 = vmatprep.mubr.bf16.mxu1 %v15173_v52  ;;  %v15360_v22 = vpack.c.bf16 %v7933_v31, %v7921_v19  ;;  %v7903_v59 = vadd.f32 %v7902_v42, %v7850_v43  ;;  %v13284_v9 = vld [vmem:[#allocation19 + $0xe0] ss:$12 sps:$4 sm:$0xff]   ;;  %v13290_v19 = vld [vmem:[#allocation19 + $0x290] ss:$12 sps:$4 sm:$0xff]  }
0x2335   :  { %v7904_v14 = vpop.f32.mrf.mxu1  ;;  %v7853_v32 = vpop.f32.mrf.mxu0  ;;  %11643 = vmatprep.subr.bf16.mxu1 %v13272_v17  ;;  %v13283_v42 = vld [vmem:[#allocation19 + $0x200] ss:$12 sps:$4 sm:$0xff]   ;;  %v13289_v43 = vld [vmem:[#allocation19 + $0x8] ss:$12 sps:$4 sm:$0xff]  }
0x2336   :  { %v15358_v47 = vpack.c.bf16 %v7934_v30, %v7922_v13  ;;  %v7854_v2 = vadd.f32 %v7853_v32, %v5818_v48  ;;  %v7905_v34 = vadd.f32 %v7904_v14, %v7852_v27  ;;  %v13280_v48 = vld [vmem:[#allocation19 + $0xf8] ss:$12 sps:$4 sm:$0xff]   ;;  %v7945_v17 = vmax.f32 %v7903_v59, 0.0  ;;  %v13286_v13 = vld [vmem:[#allocation19 + $0x2a8] ss:$12 sps:$4 sm:$0xff]  }
0x2337   :  { %v7906_v33 = vpop.f32.mrf.mxu1  ;;  %v7855_v11 = vpop.f32.mrf.mxu0  ;;  %v13285_v30 = vld [vmem:[#allocation19 + $0x20] ss:$12 sps:$4 sm:$0xff]   ;;  %v13288_v27 = vld [vmem:[#allocation19 + $0xc8] ss:$12 sps:$4 sm:$0xff]   ;;  %v13292_v14 = vld [vmem:[#allocation19 + $0x470] ss:$12 sps:$4 sm:$0xff]  }
0x2338   :  { %v7907_v57 = vadd.f32 %v7906_v33, %v7854_v2  ;;  %v7856_v52 = vadd.f32 %v7855_v11, %v15340_v55  ;;  %11644 = vmatpush3.bf16.msra.mxu1 %v13273_v5  ;;  %10217 = vmatprep.mubr.bf16.mxu0 %v15358_v47  ;;  %v7946_v46 = vmax.f32 %v7905_v34, 0.0  ;;  %v13281_v55 = vld [vmem:[#allocation19 + $0x38] ss:$12 sps:$4 sm:$0xff]   ;;  %v13287_v5 = vld [vmem:[#allocation19 + $0x1e8] ss:$12 sps:$4 sm:$0xff]  }
0x2339   :  { %v7908_v10 = vpop.f32.mrf.mxu1  ;;  %10218 = vmatmul.mubr.bf16.vlgmr.msra.gmra.mxu0 %v15360_v22  ;;  %11645 = vmatprep.subr.bf16.mxu1 %v13276_v28  ;;  %v13291_v32 = vld [vmem:[#allocation19 + $0x1d0] ss:$12 sps:$4 sm:$0xff]   ;;  %v13294_v28 = vld [vmem:[#allocation19 + $0x278] ss:$12 sps:$4 sm:$0xff]   ;;  %v13299_v34 = vld [vmem:[#allocation19 + $0x1a0] ss:$12 sps:$4 sm:$0xff]  }
0x233a   :  { %v7909_v21 = vadd.f32 %v7908_v10, %v7856_v52  ;;  %11666 = vmatpush3.bf16.msra.mxu0 %v13275_v53  ;;  %v7957_v58 = vmax.f32 %v7907_v57, 0.0  ;;  %v13293_v2 = vld [vmem:[#allocation19 + $0x3b0] ss:$12 sps:$4 sm:$0xff]   ;;  %v13296_v53 = vld [vmem:[#allocation19 + $0x458] ss:$12 sps:$4 sm:$0xff]  }
0x233b   :  { %11667 = vmatprep.subr.bf16.mxu0 %v13278_v6  ;;  %v13295_v33 = vld [vmem:[#allocation19 + $0x1b8] ss:$12 sps:$4 sm:$0xff]   ;;  %v13300_v6 = vld [vmem:[#allocation19 + $0x440] ss:$12 sps:$4 sm:$0xff]   ;;  %v13302_v57 = vld [vmem:[#allocation19 + $0x248] ss:$12 sps:$4 sm:$0xff]  }
0x233c   :  { %v7958_v54 = vmax.f32 %v7909_v21, 0.0  ;;  %11646 = vmatpush3.bf16.msra.mxu1 %v13277_v61  ;;  %v15367_v7 = vpack.c.bf16 %v7957_v58, %v7945_v17  ;;  %v13297_v11 = vld [vmem:[#allocation19 + $0x398] ss:$12 sps:$4 sm:$0xff]   ;;  %v13301_v52 = vld [vmem:[#allocation19 + $0x380] ss:$12 sps:$4 sm:$0xff]  }
0x233d   :  { %11647 = vmatprep.subr.bf16.mxu1 %v13280_v48  ;;  %v13304_v61 = vld [vmem:[#allocation19 + $0x428] ss:$12 sps:$4 sm:$0xff]   ;;  %v13308_v10 = vld [vmem:[#allocation19 + $0x410] ss:$12 sps:$4 sm:$0xff]   ;;  %v13310_v21 = vld [vmem:[#allocation19 + $0x5d8] ss:$12 sps:$4 sm:$0xff]  }
0x233e   :  { %v15365_v31 = vpack.c.bf16 %v7958_v54, %v7946_v46  ;;  %11668 = vmatpush3.bf16.msra.mxu0 %v13279_v29  ;;  %v13303_v59 = vld [vmem:[#allocation19 + $0x188] ss:$12 sps:$4 sm:$0xff]   ;;  %v13307_v48 = vld [vmem:[#allocation19 + $0x530] ss:$12 sps:$4 sm:$0xff]   ;;  %v13312_v58 = vld [vmem:[#allocation19 + $0x3f8] ss:$12 sps:$4 sm:$0xff]  }
0x233f   :  { %11669 = vmatprep.subr.bf16.mxu0 %v13282_v45  ;;  %v13309_v29 = vld [vmem:[#allocation19 + $0x350] ss:$12 sps:$4 sm:$0xff]   ;;  %v13314_v45 = vld [vmem:[#allocation19 + $0x5c0] ss:$12 sps:$4 sm:$0xff]  }
0x2340   :  { %11648 = vmatpush3.bf16.msra.mxu1 %v13281_v55  ;;  %10227 = vmatprep.mubr.bf16.mxu0 %v15365_v31  ;;  %v13316_v46 = vld [vmem:[#allocation19 + $0x3e0] ss:$12 sps:$4 sm:$0xff]   ;;  %v13318_v55 = vld [vmem:[#allocation19 + $0x5a8] ss:$12 sps:$4 sm:$0xff]  }
0x2341   :  { %10228 = vmatmul.mubr.bf16.gmra.mxu0 %v15367_v7  ;;  %11649 = vmatprep.subr.bf16.mxu1 %v13284_v9  ;;  %v13315_v54 = vld [vmem:[#allocation19 + $0x500] ss:$12 sps:$4 sm:$0xff]   ;;  %v13322_v9 = vld [vmem:[#allocation19 + $0x590] ss:$12 sps:$4 sm:$0xff]  }
0x2342   :  { %11670 = vmatpush3.bf16.msra.mxu0 %v13283_v42  ;;  %10319 = vmatprep.mubr.bf16.mxu0 %v15177_v50  ;;  %v13298_v50 = vld [vmem:[#allocation19 + $0x260] ss:$12 sps:$4 sm:$0xff]   ;;  %v13321_v42 = vld [vmem:[#allocation19 + $0x308] ss:$12 sps:$4 sm:$0xff]  }
0x2343   :  { %11671 = vmatprep.subr.bf16.mxu0 %v13286_v13  ;;  %v13317_v17 = vld [vmem:[#allocation19 + $0x320] ss:$12 sps:$4 sm:$0xff]   ;;  %v13324_v13 = vld [vmem:[#allocation19 + $0x770] ss:$12 sps:$4 sm:$0xff]  }
0x2344   :  { %11650 = vmatpush3.bf16.msra.mxu1 %v13285_v30  ;;  %v13323_v30 = vld [vmem:[#allocation19 + $0x4d0] ss:$12 sps:$4 sm:$0xff]  }
0x2345   :  { %11651 = vmatprep.subr.bf16.mxu1 %v13288_v27  ;;  %v13326_v27 = vld [vmem:[#allocation19 + $0x578] ss:$12 sps:$4 sm:$0xff]  }
0x2346   :  { %11672 = vmatpush3.bf16.msra.mxu0 %v13287_v5  ;;  %v13325_v5 = vld [vmem:[#allocation19 + $0x6b0] ss:$12 sps:$4 sm:$0xff]  }
0x2347   :  { %11673 = vmatprep.subr.bf16.mxu0 %v13290_v19  ;;  %v13327_v19 = vld [vmem:[#allocation19 + $0x4b8] ss:$12 sps:$4 sm:$0xff]  }
0x2348   :  { %11652 = vmatpush3.bf16.msra.mxu1 %v13289_v43  ;;  %v13329_v43 = vld [vmem:[#allocation19 + $0x698] ss:$12 sps:$4 sm:$0xff]  }
0x2349   :  { %11693 = vmatprep.subr.bf16.mxu1 %v13292_v14  ;;  %v13332_v14 = vld [vmem:[#allocation19 + $0x740] ss:$12 sps:$4 sm:$0xff]  }
0x234a   :  { %11674 = vmatpush3.bf16.msra.mxu0 %v13291_v32  ;;  %v13331_v32 = vld [vmem:[#allocation19 + $0x4a0] ss:$12 sps:$4 sm:$0xff]  }
0x234b   :  { %10271 = vmatmul.mubr.bf16.vlgmr.msra.gmra.mxu1 %v15110_v24  ;;  %11675 = vmatprep.subr.bf16.mxu0 %v13294_v28  ;;  %v13306_v24 = vld [vmem:[#allocation19 + $0x5f0] ss:$12 sps:$4 sm:$0xff]   ;;  %v13334_v28 = vld [vmem:[#allocation19 + $0x548] ss:$12 sps:$4 sm:$0xff]  }
0x234c   :  { %10278 = vmatprep.mubr.bf16.mxu1 %v15209_v12  ;;  %11694 = vmatpush3.bf16.msra.mxu1 %v13293_v2  ;;  %v13305_v12 = vld [vmem:[#allocation19 + $0x368] ss:$12 sps:$4 sm:$0xff]   ;;  %v13333_v2 = vld [vmem:[#allocation19 + $0x680] ss:$12 sps:$4 sm:$0xff]  }
0x234d   :  { %11695 = vmatprep.subr.bf16.mxu1 %v13296_v53  ;;  %v13336_v53 = vld [vmem:[#allocation19 + $0x728] ss:$12 sps:$4 sm:$0xff]  }
0x234e   :  { %11676 = vmatpush3.bf16.msra.mxu0 %v13295_v33  ;;  %v13335_v33 = vld [vmem:[#allocation19 + $0x488] ss:$12 sps:$4 sm:$0xff]  }
0x234f   :  { %11677 = vmatprep.subr.bf16.mxu0 %v13298_v50  ;;  %v13340_v50 = vld [vmem:[#allocation19 + $0x710] ss:$12 sps:$4 sm:$0xff]  }
0x2350   :  { %11696 = vmatpush3.bf16.msra.mxu1 %v13297_v11  ;;  %v13339_v11 = vld [vmem:[#allocation19 + $0x830] ss:$12 sps:$4 sm:$0xff]  }
0x2351   :  { %11697 = vmatprep.subr.bf16.mxu1 %v13300_v6  ;;  %v13342_v6 = vld [vmem:[#allocation19 + $0x8d8] ss:$12 sps:$4 sm:$0xff]  }
0x2352   :  { %11678 = vmatpush3.bf16.msra.mxu0 %v13299_v34  ;;  %v13341_v34 = vld [vmem:[#allocation19 + $0x650] ss:$12 sps:$4 sm:$0xff]  }
0x2353   :  { %10279 = vmatmul.mubr.bf16.gmra.mxu1 %v15165_v56  ;;  %11679 = vmatprep.subr.bf16.mxu0 %v13302_v57  ;;  %v13311_v56 = vld [vmem:[#allocation19 + $0x518] ss:$12 sps:$4 sm:$0xff]  }
0x2354   :  { %11698 = vmatpush3.bf16.msra.mxu1 %v13301_v52  ;;  %10368 = vmatprep.mubr.bf16.mxu1 %v15230_v1  ;;  %v13313_v1 = vld [vmem:[#allocation19 + $0x338] ss:$12 sps:$4 sm:$0xff]   ;;  %v13346_v52 = vld [vmem:[#allocation19 + $0x8c0] ss:$12 sps:$4 sm:$0xff]  }
0x2355   :  { %11699 = vmatprep.subr.bf16.mxu1 %v13304_v61  ;;  %v13344_v57 = vld [vmem:[#allocation19 + $0x6f8] ss:$12 sps:$4 sm:$0xff]   ;;  %v13348_v61 = vld [vmem:[#allocation19 + $0x6e0] ss:$12 sps:$4 sm:$0xff]  }
0x2356   :  { %11680 = vmatpush3.bf16.msra.mxu0 %v13303_v59  ;;  %v13347_v59 = vld [vmem:[#allocation19 + $0x800] ss:$12 sps:$4 sm:$0xff]  }
0x2357   :  { %11721 = vmatprep.subr.bf16.mxu0 %v13306_v24  ;;  %v13350_v24 = vld [vmem:[#allocation19 + $0x8a8] ss:$12 sps:$4 sm:$0xff]  }
0x2358   :  { %11700 = vmatpush3.bf16.msra.mxu1 %v13305_v12  ;;  %v13349_v12 = vld [vmem:[#allocation19 + $0x620] ss:$12 sps:$4 sm:$0xff]  }
0x2359   :  { %10320 = vmatmul.mubr.bf16.vlgmr.msra.gmra.mxu0 %v15200_v4  ;;  %11701 = vmatprep.subr.bf16.mxu1 %v13308_v10  ;;  %v13320_v4 = vld [vmem:[#allocation19 + $0x3c8] ss:$12 sps:$4 sm:$0xff]   ;;  %v13354_v10 = vld [vmem:[#allocation19 + $0x890] ss:$12 sps:$4 sm:$0xff]  }
0x235a   :  { %10327 = vmatprep.mubr.bf16.mxu0 %v15204_v39  ;;  %11722 = vmatpush3.bf16.msra.mxu0 %v13307_v48  ;;  %v13319_v39 = vld [vmem:[#allocation19 + $0x4e8] ss:$12 sps:$4 sm:$0xff]  }
0x235b   :  { %11723 = vmatprep.subr.bf16.mxu0 %v13310_v21  ;;  %v13353_v48 = vld [vmem:[#allocation19 + $0x608] ss:$12 sps:$4 sm:$0xff]   ;;  %v13355_v21 = vld [vmem:[#allocation19 + $0x7d0] ss:$12 sps:$4 sm:$0xff]  }
0x235c   :  { %11702 = vmatpush3.bf16.msra.mxu1 %v13309_v29  ;;  %v13356_v29 = vld [vmem:[#allocation19 + $0x878] ss:$12 sps:$4 sm:$0xff]  }
0x235d   :  { %11703 = vmatprep.subr.bf16.mxu1 %v13312_v58  ;;  %v13357_v58 = vld [vmem:[#allocation19 + $0x7b8] ss:$12 sps:$4 sm:$0xff]  }
0x235e   :  { %11724 = vmatpush3.bf16.msra.mxu0 %v13311_v56  ;;  %v13360_v56 = vld [vmem:[#allocation19 + $0x848] ss:$12 sps:$4 sm:$0xff]  }
0x235f   :  { %11725 = vmatprep.subr.bf16.mxu0 %v13314_v45  ;;  %v13361_v45 = vld [vmem:[#allocation19 + $0x788] ss:$12 sps:$4 sm:$0xff]  }
0x2360   :  { %11704 = vmatpush3.bf16.msra.mxu1 %v13313_v1 }
0x2361   :  { %10328 = vmatmul.mubr.bf16.gmra.mxu0 %v15221_v41  ;;  %11705 = vmatprep.subr.bf16.mxu1 %v13316_v46  ;;  %v13328_v41 = vld [vmem:[#allocation19 + $0x758] ss:$12 sps:$4 sm:$0xff]  }
0x2362   :  { %11726 = vmatpush3.bf16.msra.mxu0 %v13315_v54  ;;  %10417 = vmatprep.mubr.bf16.mxu0 %v15264_v44  ;;  %v13330_v44 = vld [vmem:[#allocation19 + $0x560] ss:$12 sps:$4 sm:$0xff]  }
0x2363   :  { %11727 = vmatprep.subr.bf16.mxu0 %v13318_v55 }
0x2364   :  { %11706 = vmatpush3.bf16.msra.mxu1 %v13317_v17 }
0x2365   :  { %11707 = vmatprep.subr.bf16.mxu1 %v13320_v4 }
0x2366   :  { %11728 = vmatpush3.bf16.msra.mxu0 %v13319_v39 }
0x2367   :  { %11729 = vmatprep.subr.bf16.mxu0 %v13322_v9 }
0x2368   :  { %11708 = vmatpush3.bf16.msra.mxu1 %v13321_v42 }
0x2369   :  { %11749 = vmatprep.subr.bf16.mxu1 %v13324_v13  ;;  %v10007_v54 = vpop.f32.mrf.mxu0 }
0x236a   :  { %11730 = vmatpush3.bf16.msra.mxu0 %v13323_v30 }
0x236b   :  { %10369 = vmatmul.mubr.bf16.vlgmr.msra.gmra.mxu1 %v15291_v49  ;;  %11731 = vmatprep.subr.bf16.mxu0 %v13326_v27  ;;  %v13338_v49 = vld [vmem:[#allocation19 + $0x8f0] ss:$12 sps:$4 sm:$0xff]   ;;  %v10009_v17 = vpop.f32.mrf.mxu0 }
0x236c   :  { %10376 = vmatprep.mubr.bf16.mxu1 %v15297_v20  ;;  %11750 = vmatpush3.bf16.msra.mxu1 %v13325_v5  ;;  %v13337_v20 = vld [vmem:[#allocation19 + $0x668] ss:$12 sps:$4 sm:$0xff]  }
0x236d   :  { %11751 = vmatprep.subr.bf16.mxu1 %v13328_v41  ;;  %v10011_v39 = vpop.f32.mrf.mxu0 }
0x236e   :  { %11732 = vmatpush3.bf16.msra.mxu0 %v13327_v19 }
0x236f   :  { %11733 = vmatprep.subr.bf16.mxu0 %v13330_v44  ;;  %v10013_v42 = vpop.f32.mrf.mxu0 }
0x2370   :  { %11752 = vmatpush3.bf16.msra.mxu1 %v13329_v43 }
0x2371   :  { %11753 = vmatprep.subr.bf16.mxu1 %v13332_v14  ;;  %v10017_v13 = vpop.f32.mrf.mxu0 }
0x2372   :  { %11734 = vmatpush3.bf16.msra.mxu0 %v13331_v32 }
0x2373   :  { %10377 = vmatmul.mubr.bf16.gmra.mxu1 %v15304_v16  ;;  %11735 = vmatprep.subr.bf16.mxu0 %v13334_v28  ;;  %v13343_v16 = vld [vmem:[#allocation19 + $0x818] ss:$12 sps:$4 sm:$0xff]   ;;  %v10019_v27 = vpop.f32.mrf.mxu0  ;;  %v15394_v28 = vld [vmem:[#allocation20] sm:$0x7] }
0x2374   :  { %11754 = vmatpush3.bf16.msra.mxu1 %v13333_v2  ;;  %10466 = vmatprep.mubr.bf16.mxu1 %v15326_v23  ;;  %v13345_v23 = vld [vmem:[#allocation19 + $0x638] ss:$12 sps:$4 sm:$0xff]  }
0x2375   :  { %11755 = vmatprep.subr.bf16.mxu1 %v13336_v53  ;;  %v10021_v5 = vpop.f32.mrf.mxu0 }
0x2376   :  { %11736 = vmatpush3.bf16.msra.mxu0 %v13335_v33  ;;  %v8372_v33 = vrot.slane %v15394_v28, %v15503_v40 }
0x2377   :  { %11777 = vmatprep.subr.bf16.mxu0 %v13338_v49  ;;  %v10023_v41 = vpop.f32.mrf.mxu0 }
0x2378   :  { %11756 = vmatpush3.bf16.msra.mxu1 %v13337_v20  ;;  %v8376_v20 = vrot.slane %v15394_v28, %v15502_v38 }
0x2379   :  { %10418 = vmatmul.mubr.bf16.vlgmr.msra.gmra.mxu0 %v15287_v36  ;;  %11757 = vmatprep.subr.bf16.mxu1 %v13340_v50  ;;  %v13352_v36 = vld [vmem:[#allocation19 + $0x6c8] ss:$12 sps:$4 sm:$0xff]  }
0x237a   :  { %10425 = vmatprep.mubr.bf16.mxu0 %v15289_v62  ;;  %11778 = vmatpush3.bf16.msra.mxu0 %v13339_v11  ;;  %v13351_v62 = vld [vmem:[#allocation19 + $0x7e8] ss:$12 sps:$4 sm:$0xff]  }
0x237b   :  { %11779 = vmatprep.subr.bf16.mxu0 %v13342_v6 }
0x237c   :  { %11758 = vmatpush3.bf16.msra.mxu1 %v13341_v34 }
0x237d   :  { %11759 = vmatprep.subr.bf16.mxu1 %v13344_v57 }
0x237e   :  { %11780 = vmatpush3.bf16.msra.mxu0 %v13343_v16 }
0x237f   :  { %11781 = vmatprep.subr.bf16.mxu0 %v13346_v52 }
0x2380   :  { %11760 = vmatpush3.bf16.msra.mxu1 %v13345_v23 }
0x2381   :  { %10426 = vmatmul.mubr.bf16.gmra.mxu0 %v15302_v25  ;;  %11761 = vmatprep.subr.bf16.mxu1 %v13348_v61  ;;  %v13358_v25 = vld [vmem:[#allocation19 + $0x860] ss:$12 sps:$4 sm:$0xff]  }
0x2382   :  { %11782 = vmatpush3.bf16.msra.mxu0 %v13347_v59  ;;  %10515 = vmatprep.mubr.bf16.mxu0 %v15358_v47  ;;  %v13359_v47 = vld [vmem:[#allocation19 + $0x7a0] ss:$12 sps:$4 sm:$0xff]  }
0x2383   :  { %11783 = vmatprep.subr.bf16.mxu0 %v13350_v24 }
0x2384   :  { %11762 = vmatpush3.bf16.msra.mxu1 %v13349_v12 }
0x2385   :  { %11763 = vmatprep.subr.bf16.mxu1 %v13352_v36 }
0x2386   :  { %11784 = vmatpush3.bf16.msra.mxu0 %v13351_v62 }
0x2387   :  { %11785 = vmatprep.subr.bf16.mxu0 %v13354_v10 }
0x2388   :  { %11764 = vmatpush3.bf16.msra.mxu1 %v13353_v48 }
0x238a   :  { %11786 = vmatpush3.bf16.msra.mxu0 %v13355_v21 }
0x238b   :  { %10467 = vmatmul.mubr.bf16.vlgmr.msra.gmra.mxu1 %v15342_v8  ;;  %11787 = vmatprep.subr.bf16.mxu0 %v13356_v29  ;;  %v9954_v8 = vpop.f32.mrf.mxu1 }
0x238c   :  { %10474 = vmatprep.mubr.bf16.mxu1 %v15346_v3  ;;  %v9955_v6 = vadd.f32 %v9954_v8, %v8372_v33 }
0x238d   :  { %v9956_v1 = vpop.f32.mrf.mxu1 }
0x238e   :  { %11788 = vmatpush3.bf16.msra.mxu0 %v13357_v58  ;;  %v9957_v57 = vadd.f32 %v9956_v1, %v8376_v20  ;;  %v10008_v61 = vadd.f32 %v10007_v54, %v9955_v6 }
0x238f   :  { %11789 = vmatprep.subr.bf16.mxu0 %v13358_v25  ;;  %v9958_v46 = vpop.f32.mrf.mxu1 }
0x2390   :  { %v9959_v23 = vadd.f32 %v9958_v46, %v8372_v33  ;;  %v10010_v12 = vadd.f32 %v10009_v17, %v9957_v57 }
0x2391   :  { %v9960_v3 = vpop.f32.mrf.mxu1 }
0x2392   :  { %11790 = vmatpush3.bf16.msra.mxu0 %v13359_v47  ;;  %v9961_v59 = vadd.f32 %v9960_v3, %v8376_v20  ;;  %v10012_v48 = vadd.f32 %v10011_v39, %v9959_v23 }
0x2393   :  { %10475 = vmatmul.mubr.bf16.gmra.mxu1 %v15353_v35  ;;  %11791 = vmatprep.subr.bf16.mxu0 %v13360_v56  ;;  %v9964_v55 = vpop.f32.mrf.mxu1 }
0x2394   :  { %v9965_v36 = vadd.f32 %v9964_v55, %v8372_v33  ;;  %v10014_v38 = vadd.f32 %v10013_v42, %v9961_v59 }
0x2395   :  { %v9966_v4 = vpop.f32.mrf.mxu1 }
0x2396   :  { %11792 = vmatpush3.bf16.msra.mxu0 %v13361_v45  ;;  %v9967_v21 = vadd.f32 %v9966_v4, %v8376_v20  ;;  %v10018_v47 = vadd.f32 %v10017_v13, %v9965_v36 }
0x2397   :  { %v9968_v9 = vpop.f32.mrf.mxu1 }
0x2398   :  { %v9969_v25 = vadd.f32 %v9968_v9, %v8372_v33 }
0x2399   :  { %10516 = vmatmul.mubr.bf16.vlgmr.msra.gmra.mxu0 %v15360_v22  ;;  %v9970_v35 = vpop.f32.mrf.mxu1 }
0x239a   :  { %10523 = vmatprep.mubr.bf16.mxu0 %v15365_v31  ;;  %v9971_v54 = vadd.f32 %v9970_v35, %v8376_v20  ;;  %v10022_v39 = vadd.f32 %v10021_v5, %v9969_v25 }
0x239c   :  { %v10024_v33 = vadd.f32 %v10023_v41, %v9971_v54 }
0x23a1   :  { %10524 = vmatmul.mubr.bf16.gmra.mxu0 %v15367_v7 }
0x23a9   :  { %v10113_v19 = vpop.f32.mrf.mxu0 }
0x23ab   :  { %v10060_v30 = vpop.f32.mrf.mxu1  ;;  %v10115_v43 = vpop.f32.mrf.mxu0 }
0x23ac   :  { %v10061_v24 = vadd.f32 %v10060_v30, %v10008_v61  ;;  %v10020_v30 = vadd.f32 %v10019_v27, %v9967_v21 }
0x23ad   :  { %v10062_v22 = vpop.f32.mrf.mxu1  ;;  %v10117_v32 = vpop.f32.mrf.mxu0 }
0x23ae   :  { %v10063_v40 = vadd.f32 %v10062_v22, %v10010_v12  ;;  %v10114_v58 = vadd.f32 %v10113_v19, %v10061_v24 }
0x23af   :  { %v10064_v31 = vpop.f32.mrf.mxu1  ;;  %v10119_v53 = vpop.f32.mrf.mxu0 }
0x23b0   :  { %v10065_v29 = vadd.f32 %v10064_v31, %v10012_v48  ;;  %v10116_v46 = vadd.f32 %v10115_v43, %v10063_v40  ;;  %v15512_v48 = vld [vmem:[#allocation35_spill] sm:$0xff] }
0x23b1   :  { %v10066_v7 = vpop.f32.mrf.mxu1  ;;  %v10123_v50 = vpop.f32.mrf.mxu0 }
0x23b2   :  { %v10067_v8 = vadd.f32 %v10066_v7, %v10014_v38  ;;  %v10118_v6 = vadd.f32 %v10117_v32, %v10065_v29 }
0x23b3   :  { %v10070_v44 = vpop.f32.mrf.mxu1  ;;  %v10125_v16 = vpop.f32.mrf.mxu0 }
0x23b4   :  { %v10071_v3 = vadd.f32 %v10070_v44, %v10018_v47  ;;  %v10120_v19 = vadd.f32 %v10119_v53, %v10067_v8 }
0x23b5   :  { %v10072_v14 = vpop.f32.mrf.mxu1  ;;  %v10127_v62 = vpop.f32.mrf.mxu0 }
0x23b6   :  { %v10073_v22 = vadd.f32 %v10072_v14, %v10020_v30  ;;  %v10124_v7 = vadd.f32 %v10123_v50, %v10071_v3 }
0x23b7   :  { %v10074_v2 = vpop.f32.mrf.mxu1  ;;  %v10129_v56 = vpop.f32.mrf.mxu0 }
0x23b8   :  { %v10075_v43 = vadd.f32 %v10074_v2, %v10022_v39  ;;  %v10126_v32 = vadd.f32 %v10125_v16, %v10073_v22 }
0x23b9   :  { %v10076_v49 = vpop.f32.mrf.mxu1 }
0x23ba   :  { %v10077_v5 = vadd.f32 %v10076_v49, %v10024_v33  ;;  %v10128_v41 = vadd.f32 %v10127_v62, %v10075_v43 }
0x23bc   :  { %v10130_v24 = vadd.f32 %v10129_v56, %v10077_v5 }
0x23eb   :  { %v10166_v11 = vpop.f32.mrf.mxu1 }
0x23ec   :  { %v10167_v1 = vadd.f32 %v10166_v11, %v10114_v58 }
0x23ed   :  { %v10168_v34 = vpop.f32.mrf.mxu1 }
0x23ee   :  { %v10169_v55 = vadd.f32 %v10168_v34, %v10116_v46 }
0x23ef   :  { %v10170_v52 = vpop.f32.mrf.mxu1 }
0x23f0   :  { %v10171_v42 = vadd.f32 %v10170_v52, %v10118_v6 }
0x23f1   :  { %v10172_v10 = vpop.f32.mrf.mxu1 }
0x23f2   :  { %v10173_v35 = vadd.f32 %v10172_v10, %v10120_v19 }
0x23f3   :  { %v10176_v45 = vpop.f32.mrf.mxu1 }
0x23f4   :  { %v10177_v34 = vadd.f32 %v10176_v45, %v10124_v7 }
0x23f5   :  { %v10178_v4 = vpop.f32.mrf.mxu1 }
0x23f6   :  { %v10179_v23 = vadd.f32 %v10178_v4, %v10126_v32 }
0x23f7   :  { %v10180_v20 = vpop.f32.mrf.mxu1 }
0x23f9   :  { %v10219_v17 = vpop.f32.mrf.mxu0  ;;  %v10182_v61 = vpop.f32.mrf.mxu1 }
0x23fa   :  { %v10220_v57 = vadd.f32 %v10219_v17, %v10167_v1  ;;  %v10183_v36 = vadd.f32 %v10182_v61, %v10130_v24 }
0x23fb   :  { %v10221_v31 = vpop.f32.mrf.mxu0 }
0x23fc   :  { %v10532_v9 = vadd.f32 %v10220_v57, %v14871_v0  ;;  %v10222_v13 = vadd.f32 %v10221_v31, %v10169_v55 }
0x23fd   :  { %v10223_v11 = vpop.f32.mrf.mxu0 }
0x23fe   :  { %10544 = vst [vmem:[#allocation22] sm:$0xff] %v10532_v9  ;;  %v10533_v27 = vadd.f32 %v10222_v13, %v14860_v37  ;;  %v10224_v44 = vadd.f32 %v10223_v11, %v10171_v42  ;;  %v10181_v37 = vadd.f32 %v10180_v20, %v10128_v41 }
0x23ff   :  { %v10225_v14 = vpop.f32.mrf.mxu0 }
0x2400   :  { %10545 = vst [vmem:[#allocation22 + $0x8] sm:$0xff] %v10533_v27  ;;  %v10535_v53 = vadd.f32 %v10224_v44, %v14890_v63  ;;  %v10226_v52 = vadd.f32 %v10225_v14, %v10173_v35  ;;  %v8380_v27 = vrot.slane %v15394_v28, %v15504_v60 }
0x2401   :  { %v10229_v0 = vpop.f32.mrf.mxu0 }
0x2402   :  { %10547 = vst [vmem:[#allocation22 + $0x18] sm:$0xff] %v10535_v53  ;;  %v10536_v2 = vadd.f32 %v10226_v52, %v14879_v51  ;;  %v10230_v50 = vadd.f32 %v10229_v0, %v10177_v34 }
0x2403   :  { %v10231_v59 = vpop.f32.mrf.mxu0 }
0x2404   :  { %10548 = vst [vmem:[#allocation22 + $0x20] sm:$0xff] %v10536_v2  ;;  %v10538_v16 = vadd.f32 %v10230_v50, %v14934_v26  ;;  %v10232_v49 = vadd.f32 %v10231_v59, %v10179_v23 }
0x2405   :  { %v10233_v12 = vpop.f32.mrf.mxu0 }
0x2406   :  { %10550 = vst [vmem:[#allocation22 + $0x30] sm:$0xff] %v10538_v16  ;;  %v10539_v63 = vadd.f32 %v10232_v49, %v14937_v18  ;;  %v10234_v10 = vadd.f32 %v10233_v12, %v10181_v37 }
0x2407   :  { %v10235_v40 = vpop.f32.mrf.mxu0 }
0x2408   :  { %10551 = vst [vmem:[#allocation22 + $0x38] sm:$0xff] %v10539_v63  ;;  %v10541_v62 = vadd.f32 %v10234_v10, %v14955_v15  ;;  %v10236_v51 = vadd.f32 %v10235_v40, %v10183_v36 }
0x240a   :  { %10553 = vst [vmem:[#allocation22 + $0x48] sm:$0xff] %v10541_v62  ;;  %v10542_v21 = vadd.f32 %v10236_v51, %v15512_v48 }
0x240b   :  { %v11653_v29 = vpop.f32.mrf.mxu1 }
0x240c   :  { %10554 = vst [vmem:[#allocation22 + $0x50] sm:$0xff] %v10542_v21 }
0x240d   :  { %v11654_v38 = vpop.f32.mrf.mxu1 }
0x240e   :  { %v11655_v44 = vadd.f32 %v11654_v38, %v11653_v29 }
0x240f   :  { %v11656_v58 = vpop.f32.mrf.mxu1 }
0x2410   :  { %v10273_v5 = vadd.f32 %v11655_v44, %v8380_v27 }
0x2411   :  { %v11657_v26 = vpop.f32.mrf.mxu1 }
0x2412   :  { %v11658_v34 = vadd.f32 %v11657_v26, %v11656_v58 }
0x2413   :  { %v11659_v47 = vpop.f32.mrf.mxu1 }
0x2414   :  { %v10276_v61 = vadd.f32 %v11658_v34, %v8380_v27  ;;  %v15516_v34 = vld [vmem:[#allocation43_spill] sm:$0xff] }
0x2415   :  { %v11660_v45 = vpop.f32.mrf.mxu1 }
0x2416   :  { %v11661_v2 = vadd.f32 %v11660_v45, %v11659_v47 }
0x2417   :  { %v11662_v18 = vpop.f32.mrf.mxu1 }
0x2418   :  { %v10281_v63 = vadd.f32 %v11661_v2, %v8380_v27 }
0x2419   :  { %v11681_v25 = vpop.f32.mrf.mxu0  ;;  %v11663_v46 = vpop.f32.mrf.mxu1 }
0x241a   :  { %v11664_v10 = vadd.f32 %v11663_v46, %v11662_v18  ;;  %v15513_v18 = vld [vmem:[#allocation37_spill] sm:$0xff] }
0x241b   :  { %v11682_v56 = vpop.f32.mrf.mxu0 }
0x241c   :  { %v11683_v20 = vadd.f32 %v11682_v56, %v11681_v25 }
0x241d   :  { %v11684_v8 = vpop.f32.mrf.mxu0 }
0x241e   :  { %v10322_v0 = vadd.f32 %v11683_v20, %v10273_v5 }
0x241f   :  { %v11685_v1 = vpop.f32.mrf.mxu0 }
0x2420   :  { %v11686_v23 = vadd.f32 %v11685_v1, %v11684_v8  ;;  %v10284_v8 = vadd.f32 %v11664_v10, %v8380_v27 }
0x2421   :  { %v11687_v54 = vpop.f32.mrf.mxu0 }
0x2422   :  { %v10325_v28 = vadd.f32 %v11686_v23, %v10276_v61 }
0x2423   :  { %v11688_v15 = vpop.f32.mrf.mxu0 }
0x2424   :  { %v11689_v16 = vadd.f32 %v11688_v15, %v11687_v54 }
0x2425   :  { %v11690_v17 = vpop.f32.mrf.mxu0 }
0x2426   :  { %v10330_v38 = vadd.f32 %v11689_v16, %v10281_v63 }
0x2427   :  { %v11691_v6 = vpop.f32.mrf.mxu0 }
0x2428   :  { %v11692_v58 = vadd.f32 %v11691_v6, %v11690_v17 }
0x242b   :  { %v11709_v3 = vpop.f32.mrf.mxu1 }
0x242d   :  { %v11710_v30 = vpop.f32.mrf.mxu1 }
0x242e   :  { %v11711_v53 = vadd.f32 %v11710_v30, %v11709_v3 }
0x242f   :  { %v11712_v55 = vpop.f32.mrf.mxu1 }
0x2430   :  { %v10371_v59 = vadd.f32 %v11711_v53, %v10322_v0 }
0x2431   :  { %v11713_v57 = vpop.f32.mrf.mxu1 }
0x2432   :  { %v11714_v37 = vadd.f32 %v11713_v57, %v11712_v55  ;;  %v10333_v57 = vadd.f32 %v11692_v58, %v10284_v8 }
0x2433   :  { %v11715_v39 = vpop.f32.mrf.mxu1 }
0x2434   :  { %v10374_v51 = vadd.f32 %v11714_v37, %v10325_v28 }
0x2435   :  { %v11716_v31 = vpop.f32.mrf.mxu1 }
0x2436   :  { %v11717_v40 = vadd.f32 %v11716_v31, %v11715_v39 }
0x2437   :  { %v11718_v19 = vpop.f32.mrf.mxu1 }
0x2438   :  { %v10379_v1 = vadd.f32 %v11717_v40, %v10330_v38 }
0x2439   :  { %v11737_v22 = vpop.f32.mrf.mxu0  ;;  %v11719_v13 = vpop.f32.mrf.mxu1 }
0x243a   :  { %v11720_v54 = vadd.f32 %v11719_v13, %v11718_v19 }
0x243b   :  { %v11738_v4 = vpop.f32.mrf.mxu0 }
0x243c   :  { %v11739_v41 = vadd.f32 %v11738_v4, %v11737_v22  ;;  %v10382_v6 = vadd.f32 %v11720_v54, %v10333_v57 }
0x243d   :  { %v11740_v42 = vpop.f32.mrf.mxu0 }
0x243e   :  { %v10420_v12 = vadd.f32 %v11739_v41, %v10371_v59 }
0x243f   :  { %v11741_v9 = vpop.f32.mrf.mxu0 }
0x2440   :  { %v11742_v36 = vadd.f32 %v11741_v9, %v11740_v42 }
0x2441   :  { %v11743_v33 = vpop.f32.mrf.mxu0 }
0x2442   :  { %v10423_v47 = vadd.f32 %v11742_v36, %v10374_v51 }
0x2443   :  { %v11744_v43 = vpop.f32.mrf.mxu0 }
0x2444   :  { %v11745_v56 = vadd.f32 %v11744_v43, %v11743_v33 }
0x2445   :  { %v11746_v14 = vpop.f32.mrf.mxu0 }
0x2446   :  { %v10428_v4 = vadd.f32 %v11745_v56, %v10379_v1 }
0x2447   :  { %v11747_v50 = vpop.f32.mrf.mxu0 }
0x2448   :  { %v11748_v31 = vadd.f32 %v11747_v50, %v11746_v14 }
0x244a   :  { %v10431_v43 = vadd.f32 %v11748_v31, %v10382_v6 }
0x244b   :  { %v11765_v7 = vpop.f32.mrf.mxu1 }
0x244d   :  { %v11766_v11 = vpop.f32.mrf.mxu1 }
0x244e   :  { %v11767_v24 = vadd.f32 %v11766_v11, %v11765_v7  ;;  %v15514_v7 = vld [vmem:[#allocation36_spill] sm:$0xff] }
0x244f   :  { %v11768_v35 = vpop.f32.mrf.mxu1 }
0x2450   :  { %v10469_v48 = vadd.f32 %v11767_v24, %v10420_v12 }
0x2451   :  { %v11769_v32 = vpop.f32.mrf.mxu1 }
0x2452   :  { %v11770_v21 = vadd.f32 %v11769_v32, %v11768_v35  ;;  %v15515_v32 = vld [vmem:[#allocation38_spill] sm:$0xff] }
0x2453   :  { %v11771_v52 = vpop.f32.mrf.mxu1 }
0x2454   :  { %v10472_v15 = vadd.f32 %v11770_v21, %v10423_v47 }
0x2455   :  { %v11772_v49 = vpop.f32.mrf.mxu1 }
0x2456   :  { %v11773_v30 = vadd.f32 %v11772_v49, %v11771_v52 }
0x2457   :  { %v11774_v26 = vpop.f32.mrf.mxu1 }
0x2458   :  { %v10477_v9 = vadd.f32 %v11773_v30, %v10428_v4 }
0x2459   :  { %v11793_v60 = vpop.f32.mrf.mxu0  ;;  %v11775_v22 = vpop.f32.mrf.mxu1 }
0x245a   :  { %v11776_v33 = vadd.f32 %v11775_v22, %v11774_v26 }
0x245b   :  { %v11794_v62 = vpop.f32.mrf.mxu0 }
0x245c   :  { %v11795_v29 = vadd.f32 %v11794_v62, %v11793_v60  ;;  %v10480_v44 = vadd.f32 %v11776_v33, %v10431_v43 }
0x245d   :  { %v11796_v25 = vpop.f32.mrf.mxu0 }
0x245e   :  { %v10518_v45 = vadd.f32 %v11795_v29, %v10469_v48 }
0x245f   :  { %v11797_v3 = vpop.f32.mrf.mxu0 }
0x2460   :  { %v10534_v46 = vadd.f32 %v10518_v45, %v15513_v18  ;;  %v11798_v55 = vadd.f32 %v11797_v3, %v11796_v25 }
0x2461   :  { %v11799_v39 = vpop.f32.mrf.mxu0 }
0x2462   :  { %10546 = vst [vmem:[#allocation22 + $0x10] sm:$0xff] %v10534_v46  ;;  %v10521_v17 = vadd.f32 %v11798_v55, %v10472_v15 }
0x2463   :  { %v11800_v42 = vpop.f32.mrf.mxu0 }
0x2464   :  { %v10537_v11 = vadd.f32 %v10521_v17, %v15514_v7  ;;  %v11801_v19 = vadd.f32 %v11800_v42, %v11799_v39 }
0x2465   :  { %v11802_v13 = vpop.f32.mrf.mxu0 }
0x2466   :  { %10549 = vst [vmem:[#allocation22 + $0x28] sm:$0xff] %v10537_v11  ;;  %v10526_v35 = vadd.f32 %v11801_v19, %v10477_v9 }
0x2467   :  { %v11803_v27 = vpop.f32.mrf.mxu0 }
0x2468   :  { %v10540_v20 = vadd.f32 %v10526_v35, %v15515_v32  ;;  %v11804_v5 = vadd.f32 %v11803_v27, %v11802_v13 }
0x246a   :  { %10552 = vst [vmem:[#allocation22 + $0x40] sm:$0xff] %v10540_v20  ;;  %v10529_v14 = vadd.f32 %v11804_v5, %v10480_v44 }
0x246c   :  { %v10543_v53 = vadd.f32 %v10529_v14, %v15516_v34 }
0x246e   :  { %10555 = vst [vmem:[#allocation22 + $0x58] sm:$0xff] %v10543_v53 }
0x246f   :  { %13769 = shalt.err (!%p13766_p8)
}
0x2470   :  { %10567 = dma.vmem_to_hbm [thread:$0]  %s10562_s19, 1536, %s15432_s12, [#allocation4], %s13802_s7, %s13802_s7, %s13803_s15  }
0x2471   :  { %13792 = dma.done.wait [#allocation4], 1536  }
0x2472   :  { %13793 = vsyncadd [#allocation4], 4294965760 }
0x2473   :  { %10571 = vsyncpa [#allocation3], 1 }
0x2474   :  { %10572 = vsyncpa [#allocation6], 1 }
0x2475   :  { %10573 = vsyncpa [#allocation9], 1 }
0x2476   :  { %10574 = vsyncpa [#allocation12], 1 }
0x2477   :  { %10575 = vsyncpa [#allocation15], 1 }
0x2478   :  { %10576 = vsyncpa [#allocation18], 1 }
0x2479   :  { %10577 = vsyncpa [#allocation21], 1 }
0x247a   :  { %10578 = vsyncpa [#allocation4], 1 }

</bundles_post_ra>
